<compile_context>
chip_gen: v6e
topology: v6e:2x2x1
jax: 0.10.0
libtpu: 0.0.40
codegen_flags: <defaults>
</compile_context>

<pallas_src>
import functools

import jax
import jax.numpy as jnp
from jax import lax
from jax.experimental import pallas as pl
from jax.experimental.pallas import tpu as pltpu

EPS = 1e-5        # nn.BatchNorm1d default eps
SLOPE = 0.2       # LeakyReLU negative_slope
LAT_W = 128       # lane-padded width of the packed [mu | scale] output / z carrier

_VMEM = pl.BlockSpec(memory_space=pltpu.MemorySpace.VMEM)

HEAD_DIMS = (55 * 6, 3, 400 * 3, 99)     # dec_pose, dec_trans, dec_ver, dec_dis

# ------------------------- slab row / plane indices -------------------------- #
# vec_h slab rows (each row is a (1, VW) f32 vector: biases, BN gammas/betas)
(V_E1_B1, V_E1_G1, V_E1_BE1, V_E1_B2, V_E1_G2, V_E1_BE2, V_E1_B3,
 V_E2_B1, V_E2_G1, V_E2_BE1, V_E2_B2, V_E2_G2, V_E2_BE2, V_E2_B3,
 V_LAT_B,
 V_DBN_G, V_DBN_B,
 V_D1_B1, V_D1_G1, V_D1_BE1, V_D1_B2, V_D1_G2, V_D1_BE2, V_D1_B3,
 V_D2_B1, V_D2_G1, V_D2_BE1, V_D2_B2, V_D2_G2, V_D2_BE2, V_D2_B3) = range(31)
N_VEC = 31

# w_kx slab planes (kx_pad x H): encoder wide weights
WKX_E1_FC1, WKX_E1_FC3, WKX_E2_FC1, WKX_E2_FC3 = range(4)
# w_h slab planes (H x H)
(WH_E1_FC2, WH_E2_FC1, WH_E2_FC2, WH_E2_FC3,
 WH_D1_FC2, WH_D2_FC1, WH_D2_FC2, WH_D2_FC3) = range(8)
# w_c slab planes (kc_pad x H) and w_z slab planes (LAT_W x H)
WC_D1_FC1, WC_D1_FC3, WC_D2_FC1, WC_D2_FC3 = range(4)


def _round_up(n, m):
    return ((n + m - 1) // m) * m


# ----------------------------- in-kernel helpers ---------------------------- #
def _bn_train(x, gamma, beta):
    """BatchNorm1d with training-mode batch statistics (biased variance)."""
    mean = jnp.mean(x, axis=0, keepdims=True)
    var = jnp.mean((x - mean) ** 2, axis=0, keepdims=True)
    return (x - mean) * lax.rsqrt(var + EPS) * gamma + beta


def _lrelu(x):
    return jnp.where(x >= 0, x, SLOPE * x)


def _softplus(x):
    # numerically stable softplus using only exp/log (EUP-friendly in Mosaic)
    return jnp.maximum(x, 0.0) + jnp.log(1.0 + jnp.exp(-jnp.abs(x)))


# ------------------------------- fused kernel ------------------------------- #
def _gnet_kernel(x_ref, cond_ref, zcarr_ref,
                 w_kx_ref, w_h_ref, w_c_ref, w_z_ref, w_lat_ref, w_head_ref,
                 vec_kx_ref, vec_h_ref, b_head_ref,
                 lat_ref, head_ref,
                 *, latentD):
    H = w_h_ref.shape[-1]
    kc_pad = cond_ref.shape[-1]
    VW = vec_h_ref.shape[-1]

    def row(i, n=H):                      # one (1, n) f32 row of the vec slab
        r = vec_h_ref[pl.ds(i, 1), :]
        return r if n == VW else r[:, :n]

    def dot(x, w):                        # bf16 x bf16 -> f32 MXU accumulate
        return jnp.dot(x.astype(jnp.bfloat16), w,
                       preferred_element_type=jnp.float32)

    # ------------------------------- encoder -------------------------------- #
    x0 = _bn_train(x_ref[...],
                   vec_kx_ref[pl.ds(0, 1), :], vec_kx_ref[pl.ds(1, 1), :])
    x0 = x0.astype(jnp.bfloat16)                       # only feeds matmuls

    # enc_rb1 (Fin != Fout -> fc3 shortcut)
    h = _lrelu(_bn_train(dot(x0, w_kx_ref[WKX_E1_FC1]) + row(V_E1_B1),
                         row(V_E1_G1), row(V_E1_BE1)))
    xout = _bn_train(dot(h, w_h_ref[WH_E1_FC2]) + row(V_E1_B2),
                     row(V_E1_G2), row(V_E1_BE2))
    xin = _lrelu(dot(x0, w_kx_ref[WKX_E1_FC3]) + row(V_E1_B3))
    xe = _lrelu(xin + xout).astype(jnp.bfloat16)

    # enc_rb2 on concat([X0, Xe]) via split-K (no materialized concat)
    h = _lrelu(_bn_train(dot(x0, w_kx_ref[WKX_E2_FC1]) + dot(xe, w_h_ref[WH_E2_FC1])
                         + row(V_E2_B1), row(V_E2_G1), row(V_E2_BE1)))
    xout = _bn_train(dot(h, w_h_ref[WH_E2_FC2]) + row(V_E2_B2),
                     row(V_E2_G2), row(V_E2_BE2))
    xin = _lrelu(dot(x0, w_kx_ref[WKX_E2_FC3]) + dot(xe, w_h_ref[WH_E2_FC3])
                 + row(V_E2_B3))
    xe = _lrelu(xin + xout)

    # latent heads: [mu | var_pre | 0...] in one lane-dense matmul
    latv = dot(xe, w_lat_ref[...]) + row(V_LAT_B, LAT_W)
    lane = lax.broadcasted_iota(jnp.int32, latv.shape, 1)
    is_var = jnp.logical_and(lane >= latentD, lane < 2 * latentD)
    musc = jnp.where(is_var, _softplus(latv), latv)    # [mu | scale | 0...]
    lat_ref[...] = musc                                # single unmasked 128-wide store

    # z carrier: lanes [0:D)=mu*1, [D:2D)=scale*eps, rest 0. The w_z planes have
    # rows duplicated at [0:D) and [D:2D), so  zrep @ w_z == (mu + scale*eps) @ Wz
    # exactly, with no lane shuffles / slices.
    zrep = (musc * zcarr_ref[...]).astype(jnp.bfloat16)

    # ------------------------------- decoder -------------------------------- #
    cond = _bn_train(cond_ref[...], row(V_DBN_G, kc_pad), row(V_DBN_B, kc_pad))
    cond = cond.astype(jnp.bfloat16)

    # dec_rb1 on [z, cond] via split-K
    h = _lrelu(_bn_train(dot(zrep, w_z_ref[WC_D1_FC1]) + dot(cond, w_c_ref[WC_D1_FC1])
                         + row(V_D1_B1), row(V_D1_G1), row(V_D1_BE1)))
    xout = _bn_train(dot(h, w_h_ref[WH_D1_FC2]) + row(V_D1_B2),
                     row(V_D1_G2), row(V_D1_BE2))
    xin = _lrelu(dot(zrep, w_z_ref[WC_D1_FC3]) + dot(cond, w_c_ref[WC_D1_FC3])
                 + row(V_D1_B3))
    xd = _lrelu(xin + xout).astype(jnp.bfloat16)

    # dec_rb2 on [z, cond, Xd] via split-K
    h = _lrelu(_bn_train(dot(zrep, w_z_ref[WC_D2_FC1]) + dot(cond, w_c_ref[WC_D2_FC1])
                         + dot(xd, w_h_ref[WH_D2_FC1]) + row(V_D2_B1),
                         row(V_D2_G1), row(V_D2_BE1)))
    xout = _bn_train(dot(h, w_h_ref[WH_D2_FC2]) + row(V_D2_B2),
                     row(V_D2_G2), row(V_D2_BE2))
    xin = _lrelu(dot(zrep, w_z_ref[WC_D2_FC3]) + dot(cond, w_c_ref[WC_D2_FC3])
                 + dot(xd, w_h_ref[WH_D2_FC3]) + row(V_D2_B3))
    xd = _lrelu(xin + xout)

    # fused output heads: [pose | trans | verts | dists], lane-dense (1664 = 13*128)
    head_ref[...] = dot(xd, w_head_ref[...]) + b_head_ref[...]


# ----------------------------- parameter packing ---------------------------- #
def _pad_cols(a, n_pad, value=0.0):
    n = a.shape[-1]
    if n == n_pad:
        return a
    pad = jnp.full(a.shape[:-1] + (n_pad - n,), value, a.dtype)
    return jnp.concatenate([a, pad], axis=-1)


def _pad_rows(w, k_pad):
    k = w.shape[0]
    if k == k_pad:
        return w
    return jnp.concatenate([w, jnp.zeros((k_pad - k, w.shape[1]), w.dtype)], axis=0)


def pack_params(params, in_condition, in_params, n_neurons, latentD):
    """One-time repack: pad lane/K dims to 128 multiples, split fc1/fc3 weights
    along K for the in-kernel split-K concats, fuse the latent and decoder head
    weights along N, cast all weight slabs to bf16, and stack everything into a
    handful of slabs (few large DMAs instead of ~65 tiny ones)."""
    # TODO(synk): when loading real pretrained GrabNet weights, transpose the torch
    # (Fout, Fin) Linear weights to (Fin, Fout) and verify the torch.cat row order
    # against the splits below before trusting outputs.
    f32, bf16 = jnp.float32, jnp.bfloat16
    kx = in_condition + in_params
    kx_pad = _round_up(kx, 128)
    kc_pad = _round_up(in_condition, 128)
    H = n_neurons
    VW = max(H, kc_pad, LAT_W)

    e1, e2 = params["enc_rb1"], params["enc_rb2"]
    d1, d2 = params["dec_rb1"], params["dec_rb2"]
    s1, s2 = latentD, latentD + in_condition          # [z | cond | Xd] row splits

    def zdup(w):                                      # (latentD,H) -> (LAT_W,H), rows dup'd
        z = jnp.zeros((LAT_W, w.shape[1]), w.dtype)
        return z.at[:latentD].set(w).at[latentD:2 * latentD].set(w)

    w_kx = jnp.stack([
        _pad_rows(e1["fc1"]["w"], kx_pad), _pad_rows(e1["fc3"]["w"], kx_pad),
        _pad_rows(e2["fc1"]["w"][:kx], kx_pad), _pad_rows(e2["fc3"]["w"][:kx], kx_pad),
    ]).astype(bf16)
    w_h = jnp.stack([
        e1["fc2"]["w"], e2["fc1"]["w"][kx:], e2["fc2"]["w"], e2["fc3"]["w"][kx:],
        d1["fc2"]["w"], d2["fc1"]["w"][s2:], d2["fc2"]["w"], d2["fc3"]["w"][s2:],
    ]).astype(bf16)
    w_c = jnp.stack([
        _pad_rows(d1["fc1"]["w"][s1:], kc_pad), _pad_rows(d1["fc3"]["w"][s1:], kc_pad),
        _pad_rows(d2["fc1"]["w"][s1:s2], kc_pad), _pad_rows(d2["fc3"]["w"][s1:s2], kc_pad),
    ]).astype(bf16)
    w_z = jnp.stack([
        zdup(d1["fc1"]["w"][:s1]), zdup(d1["fc3"]["w"][:s1]),
        zdup(d2["fc1"]["w"][:s1]), zdup(d2["fc3"]["w"][:s1]),
    ]).astype(bf16)

    w_lat = jnp.zeros((H, LAT_W), f32)
    w_lat = w_lat.at[:, :latentD].set(params["enc_mu"]["w"])
    w_lat = w_lat.at[:, latentD:2 * latentD].set(params["enc_var"]["w"]).astype(bf16)

    w_head = jnp.concatenate([params["dec_pose"]["w"], params["dec_trans"]["w"],
                              params["dec_ver"]["w"], params["dec_dis"]["w"]], axis=1)
    n_head_pad = _round_up(w_head.shape[1], 128)
    b_head = jnp.concatenate([params["dec_pose"]["b"], params["dec_trans"]["b"],
                              params["dec_ver"]["b"], params["dec_dis"]["b"]], axis=1)
    w_head = _pad_cols(w_head, n_head_pad).astype(bf16)
    b_head = _pad_cols(b_head, n_head_pad).astype(f32)

    vec_kx = jnp.concatenate([
        _pad_cols(params["enc_bn1"]["gamma"], kx_pad, 1.0),
        _pad_cols(params["enc_bn1"]["beta"], kx_pad, 0.0)], axis=0).astype(f32)

    b_lat = jnp.zeros((1, LAT_W), f32)
    b_lat = b_lat.at[:, :latentD].set(params["enc_mu"]["b"])
    b_lat = b_lat.at[:, latentD:2 * latentD].set(params["enc_var"]["b"])

    def V(a, fill=0.0):
        return _pad_cols(a, VW, fill)

    rows = [
        V(e1["fc1"]["b"]), V(e1["bn1"]["gamma"]), V(e1["bn1"]["beta"]),
        V(e1["fc2"]["b"]), V(e1["bn2"]["gamma"]), V(e1["bn2"]["beta"]),
        V(e1["fc3"]["b"]),
        V(e2["fc1"]["b"]), V(e2["bn1"]["gamma"]), V(e2["bn1"]["beta"]),
        V(e2["fc2"]["b"]), V(e2["bn2"]["gamma"]), V(e2["bn2"]["beta"]),
        V(e2["fc3"]["b"]),
        V(b_lat),
        V(_pad_cols(params["dec_bn1"]["gamma"], kc_pad, 1.0)),
        V(_pad_cols(params["dec_bn1"]["beta"], kc_pad, 0.0)),
        V(d1["fc1"]["b"]), V(d1["bn1"]["gamma"]), V(d1["bn1"]["beta"]),
        V(d1["fc2"]["b"]), V(d1["bn2"]["gamma"]), V(d1["bn2"]["beta"]),
        V(d1["fc3"]["b"]),
        V(d2["fc1"]["b"]), V(d2["bn1"]["gamma"]), V(d2["bn1"]["beta"]),
        V(d2["fc2"]["b"]), V(d2["bn2"]["gamma"]), V(d2["bn2"]["beta"]),
        V(d2["fc3"]["b"]),
    ]
    vec_h = jnp.concatenate(rows, axis=0).astype(f32)
    assert vec_h.shape[0] == N_VEC

    return {"args": (w_kx, w_h, w_c, w_z, w_lat, w_head, vec_kx, vec_h, b_head),
            "kx_pad": kx_pad, "kc_pad": kc_pad, "latentD": latentD,
            "H": H, "n_head_pad": n_head_pad}


# ------------------------------- model glue --------------------------------- #
def crot2rotmat(pose):
    # pose: (bs, 55*6) -> (bs*55, 3, 3); matches GrabNet's CRot2rotmat.
    # TODO(synk): kept in plain JAX (tiny, non-hot-path elementwise/norm work).
    r = pose.reshape(-1, 3, 2)
    a1, a2 = r[:, :, 0], r[:, :, 1]
    b1 = a1 / jnp.maximum(jnp.linalg.norm(a1, axis=1, keepdims=True), 1e-12)
    dot = jnp.sum(b1 * a2, axis=1, keepdims=True)
    u2 = a2 - dot * b1
    b2 = u2 / jnp.maximum(jnp.linalg.norm(u2, axis=1, keepdims=True), 1e-12)
    b3 = jnp.cross(b1, b2)
    return jnp.stack([b1, b2, b3], axis=-1)


def gnet_forward(pp, fullpose_rotmat, body_transl, verts, hand_object_dists,
                 bps_dists, object_transl, sample_key):
    bs = fullpose_rotmat.shape[0]
    latentD = pp["latentD"]

    # ----- pack kernel inputs (exact zero-padding to 128-lane multiples) -----
    fullpose_6D = fullpose_rotmat.reshape(bs, 1, 55, 3, 3)[:, :, :, :, :2].reshape(bs, 55 * 6)
    X = jnp.concatenate([fullpose_6D, body_transl, verts.reshape(bs, -1),
                         hand_object_dists, bps_dists, object_transl], axis=1)
    X = _pad_cols(X, pp["kx_pad"])
    cond = _pad_cols(jnp.concatenate([bps_dists, object_transl], axis=1), pp["kc_pad"])

    # Reparameterization carrier: lanes [0:D)=1, [D:2D)=eps, rest 0, so that
    # in-kernel  musc * carrier  yields [mu | scale*eps | 0...] on the z lanes.
    # TODO(synk): pltpu.prng_seed/stateful_normal could generate eps in-kernel and
    # drop this tiny input, but that changes the random stream vs jax.random.
    eps = jax.random.normal(sample_key, (bs, latentD), jnp.float32)
    carrier = jnp.concatenate(
        [jnp.ones((bs, latentD), jnp.float32), eps,
         jnp.zeros((bs, LAT_W - 2 * latentD), jnp.float32)], axis=1)

    args = (X, cond, carrier) + pp["args"]
    # vmem_limit from actual resident bytes (+ headroom for Mosaic temporaries).
    arg_bytes = sum(int(a.size) * a.dtype.itemsize for a in args)
    out_bytes = bs * (LAT_W + pp["n_head_pad"]) * 4
    cparams = pltpu.CompilerParams(
        vmem_limit_bytes=int(arg_bytes + out_bytes) + 16 * 1024 * 1024)

    # TODO(synk): at real batch sizes, add a batch grid axis (M tile 256 on
    # v6e/v7x, 128 on v5e) with dimension_semantics=("parallel",) and constant
    # weight index_maps; gridless is optimal at bs=4. Batch stays un-padded so the
    # training-mode BN batch statistics remain exact.
    lat, heads = pl.pallas_call(
        functools.partial(_gnet_kernel, latentD=latentD),
        out_shape=(jax.ShapeDtypeStruct((bs, LAT_W), jnp.float32),
                   jax.ShapeDtypeStruct((bs, pp["n_head_pad"]), jnp.float32)),
        in_specs=[_VMEM] * len(args),
        out_specs=(_VMEM, _VMEM),
        compiler_params=cparams,
    )(*args)

    mu = lat[:, :latentD]
    scale = lat[:, latentD:2 * latentD]

    d_pose, d_trans, d_ver, d_dis = HEAD_DIMS
    o = 0
    fullpose_6D_o = heads[:, o:o + d_pose]; o += d_pose
    body_transl_o = heads[:, o:o + d_trans]; o += d_trans
    verts_o = heads[:, o:o + d_ver]; o += d_ver
    dists_o = heads[:, o:o + d_dis]
    fullpose_rotmat_o = crot2rotmat(fullpose_6D_o).reshape(bs, 1, 55, 9)

    return {"mean": mu, "std": scale,
            "fullpose_rotmat": fullpose_rotmat_o,
            "body_transl": body_transl_o,
            "verts": verts_o,
            "hand_object_dists": dists_o}


# ------------------------------- init params -------------------------------- #
def init_params(key, in_condition, in_params, n_neurons, latentD):
    keys = list(jax.random.split(key, 64))
    it = iter(keys)

    def lin(fin, fout):
        k1, k2 = jax.random.split(next(it))
        lim = 1.0 / (fin ** 0.5)
        return {"w": jax.random.uniform(k1, (fin, fout), jnp.float32, -lim, lim),
                "b": jax.random.uniform(k2, (1, fout), jnp.float32, -lim, lim)}

    def bn(f):
        return {"gamma": jnp.ones((1, f), jnp.float32),
                "beta": jnp.zeros((1, f), jnp.float32)}

    def rb(fin, fout):
        p = {"fc1": lin(fin, n_neurons), "bn1": bn(n_neurons),
             "fc2": lin(n_neurons, fout), "bn2": bn(fout)}
        if fin != fout:
            p["fc3"] = lin(fin, fout)
        return p

    return {
        "enc_bn1": bn(in_condition + in_params),
        "enc_rb1": rb(in_condition + in_params, n_neurons),
        "enc_rb2": rb(in_condition + in_params + n_neurons, n_neurons),
        "enc_mu": lin(n_neurons, latentD),
        "enc_var": lin(n_neurons, latentD),
        "dec_bn1": bn(in_condition),
        "dec_rb1": rb(latentD + in_condition, n_neurons),
        "dec_rb2": rb(n_neurons + latentD + in_condition, n_neurons),
        "dec_pose": lin(n_neurons, 55 * 6),
        "dec_trans": lin(n_neurons, 3),
        "dec_ver": lin(n_neurons, 400 * 3),
        "dec_dis": lin(n_neurons, 99),
        # NOTE: enc_bn0 and Dropout(p=0.1) exist in __init__ but are unused in forward.
    }


# ----------------------------------- main ------------------------------------ #
if __name__ == "__main__":
    bs = 4
    bps_dim = 128                             # small bps; in_condition = bps_dim + 3
    in_condition = bps_dim + 3
    in_params = 55 * 6 + 3 + 400 * 3 + 99     # = 1632 (fixed by module semantics)
    n_neurons = 256
    latentD = 16

    root = jax.random.PRNGKey(0)
    kp, kx, ks = jax.random.split(root, 3)
    params = init_params(kp, in_condition, in_params, n_neurons, latentD)
    packed = pack_params(params, in_condition, in_params, n_neurons, latentD)

    k1, k2, k3, k4, k5, k6 = jax.random.split(kx, 6)
    fullpose_rotmat = jax.random.normal(k1, (bs, 1, 55, 9), jnp.float32)
    body_transl = jax.random.normal(k2, (bs, 3), jnp.float32)
    verts = jax.random.normal(k3, (bs, 400, 3), jnp.float32)
    hand_object_dists = jax.random.normal(k4, (bs, 99), jnp.float32)
    bps_dists = jax.random.normal(k5, (bs, bps_dim), jnp.float32)
    object_transl = jax.random.normal(k6, (bs, 3), jnp.float32)

    fwd = jax.jit(functools.partial(gnet_forward, packed))
    out = fwd(fullpose_rotmat, body_transl, verts,
              hand_object_dists, bps_dists, object_transl, ks)
    jax.block_until_ready(out)

    assert out["mean"].shape == (bs, latentD)
    assert out["std"].shape == (bs, latentD)
    assert out["fullpose_rotmat"].shape == (bs, 1, 55, 9)
    assert out["body_transl"].shape == (bs, 3)
    assert out["verts"].shape == (bs, 400 * 3)
    assert out["hand_object_dists"].shape == (bs, 99)
    print("KERNEL_OK")
</pallas_src>

<mosaic_0001>
module attributes {stable_mosaic.version = 11 : i64} {
  func.func @_gnet_kernel(%arg0: memref<4x1792xf32, #tpu.memory_space<vmem>>, %arg1: memref<4x256xf32, #tpu.memory_space<vmem>>, %arg2: memref<4x128xf32, #tpu.memory_space<vmem>>, %arg3: memref<4x1792x256xbf16, #tpu.memory_space<vmem>>, %arg4: memref<8x256x256xbf16, #tpu.memory_space<vmem>>, %arg5: memref<4x256x256xbf16, #tpu.memory_space<vmem>>, %arg6: memref<4x128x256xbf16, #tpu.memory_space<vmem>>, %arg7: memref<256x128xbf16, #tpu.memory_space<vmem>>, %arg8: memref<256x1664xbf16, #tpu.memory_space<vmem>>, %arg9: memref<2x1792xf32, #tpu.memory_space<vmem>>, %arg10: memref<31x256xf32, #tpu.memory_space<vmem>>, %arg11: memref<1x1664xf32, #tpu.memory_space<vmem>>, %arg12: memref<4x128xf32, #tpu.memory_space<vmem>>, %arg13: memref<4x1664xf32, #tpu.memory_space<vmem>>) attributes {dimension_semantics = [], scalar_prefetch = 0 : i64, scratch_operands = 0 : i64, tpu.core_type = #tpu.core_type<tc>} {
    %c0 = arith.constant 0 : index
    %c0_0 = arith.constant 0 : index
    %0 = vector.load %arg0[%c0, %c0_0] : memref<4x1792xf32, #tpu.memory_space<vmem>>, vector<4x1792xf32>
    %c0_1 = arith.constant 0 : index
    %c0_2 = arith.constant 0 : index
    %1 = vector.load %arg9[%c0_1, %c0_2] : memref<2x1792xf32, #tpu.memory_space<vmem>>, vector<1x1792xf32>
    %c1 = arith.constant 1 : index
    %c0_3 = arith.constant 0 : index
    %2 = vector.load %arg9[%c1, %c0_3] : memref<2x1792xf32, #tpu.memory_space<vmem>>, vector<1x1792xf32>
    %cst = arith.constant dense<0.000000e+00> : vector<1792xf32>
    %3 = vector.multi_reduction <add>, %0, %cst [0] : vector<4x1792xf32> to vector<1792xf32>
    %4 = vector.shape_cast %3 : vector<1792xf32> to vector<1x1792xf32>
    %cst_4 = arith.constant 4.000000e+00 : f32
    %5 = vector.broadcast %cst_4 : f32 to vector<1x1792xf32>
    %6 = arith.divf %4, %5 : vector<1x1792xf32>
    %7 = vector.broadcast %6 : vector<1x1792xf32> to vector<4x1792xf32>
    %8 = arith.subf %0, %7 : vector<4x1792xf32>
    %9 = arith.mulf %8, %8 : vector<4x1792xf32>
    %cst_5 = arith.constant dense<0.000000e+00> : vector<1792xf32>
    %10 = vector.multi_reduction <add>, %9, %cst_5 [0] : vector<4x1792xf32> to vector<1792xf32>
    %11 = vector.shape_cast %10 : vector<1792xf32> to vector<1x1792xf32>
    %cst_6 = arith.constant 4.000000e+00 : f32
    %12 = vector.broadcast %cst_6 : f32 to vector<1x1792xf32>
    %13 = arith.divf %11, %12 : vector<1x1792xf32>
    %14 = vector.broadcast %6 : vector<1x1792xf32> to vector<4x1792xf32>
    %15 = arith.subf %0, %14 : vector<4x1792xf32>
    %cst_7 = arith.constant 9.99999974E-6 : f32
    %16 = vector.broadcast %cst_7 : f32 to vector<1x1792xf32>
    %17 = arith.addf %13, %16 : vector<1x1792xf32>
    %18 = math.rsqrt %17 : vector<1x1792xf32>
    %19 = vector.broadcast %18 : vector<1x1792xf32> to vector<4x1792xf32>
    %20 = arith.mulf %15, %19 : vector<4x1792xf32>
    %21 = vector.broadcast %1 : vector<1x1792xf32> to vector<4x1792xf32>
    %22 = arith.mulf %20, %21 : vector<4x1792xf32>
    %23 = vector.broadcast %2 : vector<1x1792xf32> to vector<4x1792xf32>
    %24 = arith.addf %22, %23 : vector<4x1792xf32>
    %25 = arith.truncf %24 : vector<4x1792xf32> to vector<4x1792xbf16>
    %c0_8 = arith.constant 0 : index
    %c0_9 = arith.constant 0 : index
    %c0_10 = arith.constant 0 : index
    %26 = vector.load %arg3[%c0_8, %c0_9, %c0_10] : memref<4x1792x256xbf16, #tpu.memory_space<vmem>>, vector<1x1792x256xbf16>
    %27 = vector.shape_cast %26 : vector<1x1792x256xbf16> to vector<1792x256xbf16>
    %cst_11 = arith.constant dense<0.000000e+00> : vector<4x256xf32>
    %28 = tpu.matmul %25, %27, %cst_11 {dimension_numbers = #tpu.dot_dimension_numbers<[1], [0], [0], [1], [0, 0, 1, 1], [], []>} : vector<4x1792xbf16>, vector<1792x256xbf16>, vector<4x256xf32> -> vector<4x256xf32>
    %c0_12 = arith.constant 0 : index
    %c0_13 = arith.constant 0 : index
    %29 = vector.load %arg10[%c0_12, %c0_13] : memref<31x256xf32, #tpu.memory_space<vmem>>, vector<1x256xf32>
    %30 = vector.broadcast %29 : vector<1x256xf32> to vector<4x256xf32>
    %31 = arith.addf %28, %30 : vector<4x256xf32>
    %c1_14 = arith.constant 1 : index
    %c0_15 = arith.constant 0 : index
    %32 = vector.load %arg10[%c1_14, %c0_15] : memref<31x256xf32, #tpu.memory_space<vmem>>, vector<1x256xf32>
    %c2 = arith.constant 2 : index
    %c0_16 = arith.constant 0 : index
    %33 = vector.load %arg10[%c2, %c0_16] : memref<31x256xf32, #tpu.memory_space<vmem>>, vector<1x256xf32>
    %cst_17 = arith.constant dense<0.000000e+00> : vector<256xf32>
    %34 = vector.multi_reduction <add>, %31, %cst_17 [0] : vector<4x256xf32> to vector<256xf32>
    %35 = vector.shape_cast %34 : vector<256xf32> to vector<1x256xf32>
    %cst_18 = arith.constant 4.000000e+00 : f32
    %36 = vector.broadcast %cst_18 : f32 to vector<1x256xf32>
    %37 = arith.divf %35, %36 : vector<1x256xf32>
    %38 = vector.broadcast %37 : vector<1x256xf32> to vector<4x256xf32>
    %39 = arith.subf %31, %38 : vector<4x256xf32>
    %40 = arith.mulf %39, %39 : vector<4x256xf32>
    %cst_19 = arith.constant dense<0.000000e+00> : vector<256xf32>
    %41 = vector.multi_reduction <add>, %40, %cst_19 [0] : vector<4x256xf32> to vector<256xf32>
    %42 = vector.shape_cast %41 : vector<256xf32> to vector<1x256xf32>
    %cst_20 = arith.constant 4.000000e+00 : f32
    %43 = vector.broadcast %cst_20 : f32 to vector<1x256xf32>
    %44 = arith.divf %42, %43 : vector<1x256xf32>
    %45 = vector.broadcast %37 : vector<1x256xf32> to vector<4x256xf32>
    %46 = arith.subf %31, %45 : vector<4x256xf32>
    %cst_21 = arith.constant 9.99999974E-6 : f32
    %47 = vector.broadcast %cst_21 : f32 to vector<1x256xf32>
    %48 = arith.addf %44, %47 : vector<1x256xf32>
    %49 = math.rsqrt %48 : vector<1x256xf32>
    %50 = vector.broadcast %49 : vector<1x256xf32> to vector<4x256xf32>
    %51 = arith.mulf %46, %50 : vector<4x256xf32>
    %52 = vector.broadcast %32 : vector<1x256xf32> to vector<4x256xf32>
    %53 = arith.mulf %51, %52 : vector<4x256xf32>
    %54 = vector.broadcast %33 : vector<1x256xf32> to vector<4x256xf32>
    %55 = arith.addf %53, %54 : vector<4x256xf32>
    %cst_22 = arith.constant 0.000000e+00 : f32
    %56 = vector.broadcast %cst_22 : f32 to vector<4x256xf32>
    %57 = arith.cmpf oge, %55, %56 : vector<4x256xf32>
    %cst_23 = arith.constant 2.000000e-01 : f32
    %58 = vector.broadcast %cst_23 : f32 to vector<4x256xf32>
    %59 = arith.mulf %58, %55 : vector<4x256xf32>
    %60 = arith.select %57, %55, %59 : vector<4x256xi1>, vector<4x256xf32>
    %c0_24 = arith.constant 0 : index
    %c0_25 = arith.constant 0 : index
    %c0_26 = arith.constant 0 : index
    %61 = vector.load %arg4[%c0_24, %c0_25, %c0_26] : memref<8x256x256xbf16, #tpu.memory_space<vmem>>, vector<1x256x256xbf16>
    %62 = vector.shape_cast %61 : vector<1x256x256xbf16> to vector<256x256xbf16>
    %63 = arith.truncf %60 : vector<4x256xf32> to vector<4x256xbf16>
    %cst_27 = arith.constant dense<0.000000e+00> : vector<4x256xf32>
    %64 = tpu.matmul %63, %62, %cst_27 {dimension_numbers = #tpu.dot_dimension_numbers<[1], [0], [0], [1], [0, 0, 1, 1], [], []>} : vector<4x256xbf16>, vector<256x256xbf16>, vector<4x256xf32> -> vector<4x256xf32>
    %c3 = arith.constant 3 : index
    %c0_28 = arith.constant 0 : index
    %65 = vector.load %arg10[%c3, %c0_28] : memref<31x256xf32, #tpu.memory_space<vmem>>, vector<1x256xf32>
    %66 = vector.broadcast %65 : vector<1x256xf32> to vector<4x256xf32>
    %67 = arith.addf %64, %66 : vector<4x256xf32>
    %c4 = arith.constant 4 : index
    %c0_29 = arith.constant 0 : index
    %68 = vector.load %arg10[%c4, %c0_29] : memref<31x256xf32, #tpu.memory_space<vmem>>, vector<1x256xf32>
    %c5 = arith.constant 5 : index
    %c0_30 = arith.constant 0 : index
    %69 = vector.load %arg10[%c5, %c0_30] : memref<31x256xf32, #tpu.memory_space<vmem>>, vector<1x256xf32>
    %cst_31 = arith.constant dense<0.000000e+00> : vector<256xf32>
    %70 = vector.multi_reduction <add>, %67, %cst_31 [0] : vector<4x256xf32> to vector<256xf32>
    %71 = vector.shape_cast %70 : vector<256xf32> to vector<1x256xf32>
    %cst_32 = arith.constant 4.000000e+00 : f32
    %72 = vector.broadcast %cst_32 : f32 to vector<1x256xf32>
    %73 = arith.divf %71, %72 : vector<1x256xf32>
    %74 = vector.broadcast %73 : vector<1x256xf32> to vector<4x256xf32>
    %75 = arith.subf %67, %74 : vector<4x256xf32>
    %76 = arith.mulf %75, %75 : vector<4x256xf32>
    %cst_33 = arith.constant dense<0.000000e+00> : vector<256xf32>
    %77 = vector.multi_reduction <add>, %76, %cst_33 [0] : vector<4x256xf32> to vector<256xf32>
    %78 = vector.shape_cast %77 : vector<256xf32> to vector<1x256xf32>
    %cst_34 = arith.constant 4.000000e+00 : f32
    %79 = vector.broadcast %cst_34 : f32 to vector<1x256xf32>
    %80 = arith.divf %78, %79 : vector<1x256xf32>
    %81 = vector.broadcast %73 : vector<1x256xf32> to vector<4x256xf32>
    %82 = arith.subf %67, %81 : vector<4x256xf32>
    %cst_35 = arith.constant 9.99999974E-6 : f32
    %83 = vector.broadcast %cst_35 : f32 to vector<1x256xf32>
    %84 = arith.addf %80, %83 : vector<1x256xf32>
    %85 = math.rsqrt %84 : vector<1x256xf32>
    %86 = vector.broadcast %85 : vector<1x256xf32> to vector<4x256xf32>
    %87 = arith.mulf %82, %86 : vector<4x256xf32>
    %88 = vector.broadcast %68 : vector<1x256xf32> to vector<4x256xf32>
    %89 = arith.mulf %87, %88 : vector<4x256xf32>
    %90 = vector.broadcast %69 : vector<1x256xf32> to vector<4x256xf32>
    %91 = arith.addf %89, %90 : vector<4x256xf32>
    %c1_36 = arith.constant 1 : index
    %c0_37 = arith.constant 0 : index
    %c0_38 = arith.constant 0 : index
    %92 = vector.load %arg3[%c1_36, %c0_37, %c0_38] : memref<4x1792x256xbf16, #tpu.memory_space<vmem>>, vector<1x1792x256xbf16>
    %93 = vector.shape_cast %92 : vector<1x1792x256xbf16> to vector<1792x256xbf16>
    %cst_39 = arith.constant dense<0.000000e+00> : vector<4x256xf32>
    %94 = tpu.matmul %25, %93, %cst_39 {dimension_numbers = #tpu.dot_dimension_numbers<[1], [0], [0], [1], [0, 0, 1, 1], [], []>} : vector<4x1792xbf16>, vector<1792x256xbf16>, vector<4x256xf32> -> vector<4x256xf32>
    %c6 = arith.constant 6 : index
    %c0_40 = arith.constant 0 : index
    %95 = vector.load %arg10[%c6, %c0_40] : memref<31x256xf32, #tpu.memory_space<vmem>>, vector<1x256xf32>
    %96 = vector.broadcast %95 : vector<1x256xf32> to vector<4x256xf32>
    %97 = arith.addf %94, %96 : vector<4x256xf32>
    %cst_41 = arith.constant 0.000000e+00 : f32
    %98 = vector.broadcast %cst_41 : f32 to vector<4x256xf32>
    %99 = arith.cmpf oge, %97, %98 : vector<4x256xf32>
    %cst_42 = arith.constant 2.000000e-01 : f32
    %100 = vector.broadcast %cst_42 : f32 to vector<4x256xf32>
    %101 = arith.mulf %100, %97 : vector<4x256xf32>
    %102 = arith.select %99, %97, %101 : vector<4x256xi1>, vector<4x256xf32>
    %103 = arith.addf %102, %91 : vector<4x256xf32>
    %cst_43 = arith.constant 0.000000e+00 : f32
    %104 = vector.broadcast %cst_43 : f32 to vector<4x256xf32>
    %105 = arith.cmpf oge, %103, %104 : vector<4x256xf32>
    %cst_44 = arith.constant 2.000000e-01 : f32
    %106 = vector.broadcast %cst_44 : f32 to vector<4x256xf32>
    %107 = arith.mulf %106, %103 : vector<4x256xf32>
    %108 = arith.select %105, %103, %107 : vector<4x256xi1>, vector<4x256xf32>
    %109 = arith.truncf %108 : vector<4x256xf32> to vector<4x256xbf16>
    %c2_45 = arith.constant 2 : index
    %c0_46 = arith.constant 0 : index
    %c0_47 = arith.constant 0 : index
    %110 = vector.load %arg3[%c2_45, %c0_46, %c0_47] : memref<4x1792x256xbf16, #tpu.memory_space<vmem>>, vector<1x1792x256xbf16>
    %111 = vector.shape_cast %110 : vector<1x1792x256xbf16> to vector<1792x256xbf16>
    %cst_48 = arith.constant dense<0.000000e+00> : vector<4x256xf32>
    %112 = tpu.matmul %25, %111, %cst_48 {dimension_numbers = #tpu.dot_dimension_numbers<[1], [0], [0], [1], [0, 0, 1, 1], [], []>} : vector<4x1792xbf16>, vector<1792x256xbf16>, vector<4x256xf32> -> vector<4x256xf32>
    %c1_49 = arith.constant 1 : index
    %c0_50 = arith.constant 0 : index
    %c0_51 = arith.constant 0 : index
    %113 = vector.load %arg4[%c1_49, %c0_50, %c0_51] : memref<8x256x256xbf16, #tpu.memory_space<vmem>>, vector<1x256x256xbf16>
    %114 = vector.shape_cast %113 : vector<1x256x256xbf16> to vector<256x256xbf16>
    %cst_52 = arith.constant dense<0.000000e+00> : vector<4x256xf32>
    %115 = tpu.matmul %109, %114, %cst_52 {dimension_numbers = #tpu.dot_dimension_numbers<[1], [0], [0], [1], [0, 0, 1, 1], [], []>} : vector<4x256xbf16>, vector<256x256xbf16>, vector<4x256xf32> -> vector<4x256xf32>
    %116 = arith.addf %112, %115 : vector<4x256xf32>
    %c7 = arith.constant 7 : index
    %c0_53 = arith.constant 0 : index
    %117 = vector.load %arg10[%c7, %c0_53] : memref<31x256xf32, #tpu.memory_space<vmem>>, vector<1x256xf32>
    %118 = vector.broadcast %117 : vector<1x256xf32> to vector<4x256xf32>
    %119 = arith.addf %116, %118 : vector<4x256xf32>
    %c8 = arith.constant 8 : index
    %c0_54 = arith.constant 0 : index
    %120 = vector.load %arg10[%c8, %c0_54] : memref<31x256xf32, #tpu.memory_space<vmem>>, vector<1x256xf32>
    %c9 = arith.constant 9 : index
    %c0_55 = arith.constant 0 : index
    %121 = vector.load %arg10[%c9, %c0_55] : memref<31x256xf32, #tpu.memory_space<vmem>>, vector<1x256xf32>
    %cst_56 = arith.constant dense<0.000000e+00> : vector<256xf32>
    %122 = vector.multi_reduction <add>, %119, %cst_56 [0] : vector<4x256xf32> to vector<256xf32>
    %123 = vector.shape_cast %122 : vector<256xf32> to vector<1x256xf32>
    %cst_57 = arith.constant 4.000000e+00 : f32
    %124 = vector.broadcast %cst_57 : f32 to vector<1x256xf32>
    %125 = arith.divf %123, %124 : vector<1x256xf32>
    %126 = vector.broadcast %125 : vector<1x256xf32> to vector<4x256xf32>
    %127 = arith.subf %119, %126 : vector<4x256xf32>
    %128 = arith.mulf %127, %127 : vector<4x256xf32>
    %cst_58 = arith.constant dense<0.000000e+00> : vector<256xf32>
    %129 = vector.multi_reduction <add>, %128, %cst_58 [0] : vector<4x256xf32> to vector<256xf32>
    %130 = vector.shape_cast %129 : vector<256xf32> to vector<1x256xf32>
    %cst_59 = arith.constant 4.000000e+00 : f32
    %131 = vector.broadcast %cst_59 : f32 to vector<1x256xf32>
    %132 = arith.divf %130, %131 : vector<1x256xf32>
    %133 = vector.broadcast %125 : vector<1x256xf32> to vector<4x256xf32>
    %134 = arith.subf %119, %133 : vector<4x256xf32>
    %cst_60 = arith.constant 9.99999974E-6 : f32
    %135 = vector.broadcast %cst_60 : f32 to vector<1x256xf32>
    %136 = arith.addf %132, %135 : vector<1x256xf32>
    %137 = math.rsqrt %136 : vector<1x256xf32>
    %138 = vector.broadcast %137 : vector<1x256xf32> to vector<4x256xf32>
    %139 = arith.mulf %134, %138 : vector<4x256xf32>
    %140 = vector.broadcast %120 : vector<1x256xf32> to vector<4x256xf32>
    %141 = arith.mulf %139, %140 : vector<4x256xf32>
    %142 = vector.broadcast %121 : vector<1x256xf32> to vector<4x256xf32>
    %143 = arith.addf %141, %142 : vector<4x256xf32>
    %cst_61 = arith.constant 0.000000e+00 : f32
    %144 = vector.broadcast %cst_61 : f32 to vector<4x256xf32>
    %145 = arith.cmpf oge, %143, %144 : vector<4x256xf32>
    %cst_62 = arith.constant 2.000000e-01 : f32
    %146 = vector.broadcast %cst_62 : f32 to vector<4x256xf32>
    %147 = arith.mulf %146, %143 : vector<4x256xf32>
    %148 = arith.select %145, %143, %147 : vector<4x256xi1>, vector<4x256xf32>
    %c2_63 = arith.constant 2 : index
    %c0_64 = arith.constant 0 : index
    %c0_65 = arith.constant 0 : index
    %149 = vector.load %arg4[%c2_63, %c0_64, %c0_65] : memref<8x256x256xbf16, #tpu.memory_space<vmem>>, vector<1x256x256xbf16>
    %150 = vector.shape_cast %149 : vector<1x256x256xbf16> to vector<256x256xbf16>
    %151 = arith.truncf %148 : vector<4x256xf32> to vector<4x256xbf16>
    %cst_66 = arith.constant dense<0.000000e+00> : vector<4x256xf32>
    %152 = tpu.matmul %151, %150, %cst_66 {dimension_numbers = #tpu.dot_dimension_numbers<[1], [0], [0], [1], [0, 0, 1, 1], [], []>} : vector<4x256xbf16>, vector<256x256xbf16>, vector<4x256xf32> -> vector<4x256xf32>
    %c10 = arith.constant 10 : index
    %c0_67 = arith.constant 0 : index
    %153 = vector.load %arg10[%c10, %c0_67] : memref<31x256xf32, #tpu.memory_space<vmem>>, vector<1x256xf32>
    %154 = vector.broadcast %153 : vector<1x256xf32> to vector<4x256xf32>
    %155 = arith.addf %152, %154 : vector<4x256xf32>
    %c11 = arith.constant 11 : index
    %c0_68 = arith.constant 0 : index
    %156 = vector.load %arg10[%c11, %c0_68] : memref<31x256xf32, #tpu.memory_space<vmem>>, vector<1x256xf32>
    %c12 = arith.constant 12 : index
    %c0_69 = arith.constant 0 : index
    %157 = vector.load %arg10[%c12, %c0_69] : memref<31x256xf32, #tpu.memory_space<vmem>>, vector<1x256xf32>
    %cst_70 = arith.constant dense<0.000000e+00> : vector<256xf32>
    %158 = vector.multi_reduction <add>, %155, %cst_70 [0] : vector<4x256xf32> to vector<256xf32>
    %159 = vector.shape_cast %158 : vector<256xf32> to vector<1x256xf32>
    %cst_71 = arith.constant 4.000000e+00 : f32
    %160 = vector.broadcast %cst_71 : f32 to vector<1x256xf32>
    %161 = arith.divf %159, %160 : vector<1x256xf32>
    %162 = vector.broadcast %161 : vector<1x256xf32> to vector<4x256xf32>
    %163 = arith.subf %155, %162 : vector<4x256xf32>
    %164 = arith.mulf %163, %163 : vector<4x256xf32>
    %cst_72 = arith.constant dense<0.000000e+00> : vector<256xf32>
    %165 = vector.multi_reduction <add>, %164, %cst_72 [0] : vector<4x256xf32> to vector<256xf32>
    %166 = vector.shape_cast %165 : vector<256xf32> to vector<1x256xf32>
    %cst_73 = arith.constant 4.000000e+00 : f32
    %167 = vector.broadcast %cst_73 : f32 to vector<1x256xf32>
    %168 = arith.divf %166, %167 : vector<1x256xf32>
    %169 = vector.broadcast %161 : vector<1x256xf32> to vector<4x256xf32>
    %170 = arith.subf %155, %169 : vector<4x256xf32>
    %cst_74 = arith.constant 9.99999974E-6 : f32
    %171 = vector.broadcast %cst_74 : f32 to vector<1x256xf32>
    %172 = arith.addf %168, %171 : vector<1x256xf32>
    %173 = math.rsqrt %172 : vector<1x256xf32>
    %174 = vector.broadcast %173 : vector<1x256xf32> to vector<4x256xf32>
    %175 = arith.mulf %170, %174 : vector<4x256xf32>
    %176 = vector.broadcast %156 : vector<1x256xf32> to vector<4x256xf32>
    %177 = arith.mulf %175, %176 : vector<4x256xf32>
    %178 = vector.broadcast %157 : vector<1x256xf32> to vector<4x256xf32>
    %179 = arith.addf %177, %178 : vector<4x256xf32>
    %c3_75 = arith.constant 3 : index
    %c0_76 = arith.constant 0 : index
    %c0_77 = arith.constant 0 : index
    %180 = vector.load %arg3[%c3_75, %c0_76, %c0_77] : memref<4x1792x256xbf16, #tpu.memory_space<vmem>>, vector<1x1792x256xbf16>
    %181 = vector.shape_cast %180 : vector<1x1792x256xbf16> to vector<1792x256xbf16>
    %cst_78 = arith.constant dense<0.000000e+00> : vector<4x256xf32>
    %182 = tpu.matmul %25, %181, %cst_78 {dimension_numbers = #tpu.dot_dimension_numbers<[1], [0], [0], [1], [0, 0, 1, 1], [], []>} : vector<4x1792xbf16>, vector<1792x256xbf16>, vector<4x256xf32> -> vector<4x256xf32>
    %c3_79 = arith.constant 3 : index
    %c0_80 = arith.constant 0 : index
    %c0_81 = arith.constant 0 : index
    %183 = vector.load %arg4[%c3_79, %c0_80, %c0_81] : memref<8x256x256xbf16, #tpu.memory_space<vmem>>, vector<1x256x256xbf16>
    %184 = vector.shape_cast %183 : vector<1x256x256xbf16> to vector<256x256xbf16>
    %cst_82 = arith.constant dense<0.000000e+00> : vector<4x256xf32>
    %185 = tpu.matmul %109, %184, %cst_82 {dimension_numbers = #tpu.dot_dimension_numbers<[1], [0], [0], [1], [0, 0, 1, 1], [], []>} : vector<4x256xbf16>, vector<256x256xbf16>, vector<4x256xf32> -> vector<4x256xf32>
    %186 = arith.addf %182, %185 : vector<4x256xf32>
    %c13 = arith.constant 13 : index
    %c0_83 = arith.constant 0 : index
    %187 = vector.load %arg10[%c13, %c0_83] : memref<31x256xf32, #tpu.memory_space<vmem>>, vector<1x256xf32>
    %188 = vector.broadcast %187 : vector<1x256xf32> to vector<4x256xf32>
    %189 = arith.addf %186, %188 : vector<4x256xf32>
    %cst_84 = arith.constant 0.000000e+00 : f32
    %190 = vector.broadcast %cst_84 : f32 to vector<4x256xf32>
    %191 = arith.cmpf oge, %189, %190 : vector<4x256xf32>
    %cst_85 = arith.constant 2.000000e-01 : f32
    %192 = vector.broadcast %cst_85 : f32 to vector<4x256xf32>
    %193 = arith.mulf %192, %189 : vector<4x256xf32>
    %194 = arith.select %191, %189, %193 : vector<4x256xi1>, vector<4x256xf32>
    %195 = arith.addf %194, %179 : vector<4x256xf32>
    %cst_86 = arith.constant 0.000000e+00 : f32
    %196 = vector.broadcast %cst_86 : f32 to vector<4x256xf32>
    %197 = arith.cmpf oge, %195, %196 : vector<4x256xf32>
    %cst_87 = arith.constant 2.000000e-01 : f32
    %198 = vector.broadcast %cst_87 : f32 to vector<4x256xf32>
    %199 = arith.mulf %198, %195 : vector<4x256xf32>
    %200 = arith.select %197, %195, %199 : vector<4x256xi1>, vector<4x256xf32>
    %c0_88 = arith.constant 0 : index
    %c0_89 = arith.constant 0 : index
    %201 = vector.load %arg7[%c0_88, %c0_89] : memref<256x128xbf16, #tpu.memory_space<vmem>>, vector<256x128xbf16>
    %202 = arith.truncf %200 : vector<4x256xf32> to vector<4x256xbf16>
    %cst_90 = arith.constant dense<0.000000e+00> : vector<4x128xf32>
    %203 = tpu.matmul %202, %201, %cst_90 {dimension_numbers = #tpu.dot_dimension_numbers<[1], [0], [0], [1], [0, 0, 1, 1], [], []>} : vector<4x256xbf16>, vector<256x128xbf16>, vector<4x128xf32> -> vector<4x128xf32>
    %c14 = arith.constant 14 : index
    %c0_91 = arith.constant 0 : index
    %204 = vector.load %arg10[%c14, %c0_91] : memref<31x256xf32, #tpu.memory_space<vmem>>, vector<1x256xf32>
    %205 = vector.extract_strided_slice %204 {offsets = [0, 0], sizes = [1, 128], strides = [1, 1]} : vector<1x256xf32> to vector<1x128xf32>
    %206 = vector.broadcast %205 : vector<1x128xf32> to vector<4x128xf32>
    %207 = arith.addf %203, %206 : vector<4x128xf32>
    %208 = tpu.iota {dimensions = array<i32: 1>} : vector<4x128xi32>
    %c16_i32 = arith.constant 16 : i32
    %209 = vector.broadcast %c16_i32 : i32 to vector<4x128xi32>
    %210 = arith.cmpi sge, %208, %209 : vector<4x128xi32>
    %c32_i32 = arith.constant 32 : i32
    %211 = vector.broadcast %c32_i32 : i32 to vector<4x128xi32>
    %212 = arith.cmpi slt, %208, %211 : vector<4x128xi32>
    %213 = arith.andi %210, %212 : vector<4x128xi1>
    %cst_92 = arith.constant 0.000000e+00 : f32
    %214 = vector.broadcast %cst_92 : f32 to vector<4x128xf32>
    %215 = arith.maximumf %207, %214 : vector<4x128xf32>
    %216 = math.absf %207 : vector<4x128xf32>
    %cst_93 = arith.constant 0.000000e+00 : f32
    %217 = vector.broadcast %cst_93 : f32 to vector<4x128xf32>
    %218 = arith.subf %217, %216 : vector<4x128xf32>
    %219 = math.exp %218 : vector<4x128xf32>
    %cst_94 = arith.constant 1.000000e+00 : f32
    %220 = vector.broadcast %cst_94 : f32 to vector<4x128xf32>
    %221 = arith.addf %220, %219 : vector<4x128xf32>
    %222 = math.log %221 : vector<4x128xf32>
    %223 = arith.addf %215, %222 : vector<4x128xf32>
    %224 = arith.select %213, %223, %207 : vector<4x128xi1>, vector<4x128xf32>
    %c0_95 = arith.constant 0 : index
    %c0_96 = arith.constant 0 : index
    %225 = vector.load %arg12[%c0_95, %c0_96] : memref<4x128xf32, #tpu.memory_space<vmem>>, vector<4x128xf32>
    tpu.vector_store %arg12[%c0_95, %c0_96], %224 {strides = array<i32>} : memref<4x128xf32, #tpu.memory_space<vmem>>, vector<4x128xf32>,
    %c0_97 = arith.constant 0 : index
    %c0_98 = arith.constant 0 : index
    %226 = vector.load %arg2[%c0_97, %c0_98] : memref<4x128xf32, #tpu.memory_space<vmem>>, vector<4x128xf32>
    %227 = arith.mulf %224, %226 : vector<4x128xf32>
    %228 = arith.truncf %227 : vector<4x128xf32> to vector<4x128xbf16>
    %c0_99 = arith.constant 0 : index
    %c0_100 = arith.constant 0 : index
    %229 = vector.load %arg1[%c0_99, %c0_100] : memref<4x256xf32, #tpu.memory_space<vmem>>, vector<4x256xf32>
    %c15 = arith.constant 15 : index
    %c0_101 = arith.constant 0 : index
    %230 = vector.load %arg10[%c15, %c0_101] : memref<31x256xf32, #tpu.memory_space<vmem>>, vector<1x256xf32>
    %c16 = arith.constant 16 : index
    %c0_102 = arith.constant 0 : index
    %231 = vector.load %arg10[%c16, %c0_102] : memref<31x256xf32, #tpu.memory_space<vmem>>, vector<1x256xf32>
    %cst_103 = arith.constant dense<0.000000e+00> : vector<256xf32>
    %232 = vector.multi_reduction <add>, %229, %cst_103 [0] : vector<4x256xf32> to vector<256xf32>
    %233 = vector.shape_cast %232 : vector<256xf32> to vector<1x256xf32>
    %cst_104 = arith.constant 4.000000e+00 : f32
    %234 = vector.broadcast %cst_104 : f32 to vector<1x256xf32>
    %235 = arith.divf %233, %234 : vector<1x256xf32>
    %236 = vector.broadcast %235 : vector<1x256xf32> to vector<4x256xf32>
    %237 = arith.subf %229, %236 : vector<4x256xf32>
    %238 = arith.mulf %237, %237 : vector<4x256xf32>
    %cst_105 = arith.constant dense<0.000000e+00> : vector<256xf32>
    %239 = vector.multi_reduction <add>, %238, %cst_105 [0] : vector<4x256xf32> to vector<256xf32>
    %240 = vector.shape_cast %239 : vector<256xf32> to vector<1x256xf32>
    %cst_106 = arith.constant 4.000000e+00 : f32
    %241 = vector.broadcast %cst_106 : f32 to vector<1x256xf32>
    %242 = arith.divf %240, %241 : vector<1x256xf32>
    %243 = vector.broadcast %235 : vector<1x256xf32> to vector<4x256xf32>
    %244 = arith.subf %229, %243 : vector<4x256xf32>
    %cst_107 = arith.constant 9.99999974E-6 : f32
    %245 = vector.broadcast %cst_107 : f32 to vector<1x256xf32>
    %246 = arith.addf %242, %245 : vector<1x256xf32>
    %247 = math.rsqrt %246 : vector<1x256xf32>
    %248 = vector.broadcast %247 : vector<1x256xf32> to vector<4x256xf32>
    %249 = arith.mulf %244, %248 : vector<4x256xf32>
    %250 = vector.broadcast %230 : vector<1x256xf32> to vector<4x256xf32>
    %251 = arith.mulf %249, %250 : vector<4x256xf32>
    %252 = vector.broadcast %231 : vector<1x256xf32> to vector<4x256xf32>
    %253 = arith.addf %251, %252 : vector<4x256xf32>
    %254 = arith.truncf %253 : vector<4x256xf32> to vector<4x256xbf16>
    %c0_108 = arith.constant 0 : index
    %c0_109 = arith.constant 0 : index
    %c0_110 = arith.constant 0 : index
    %255 = vector.load %arg6[%c0_108, %c0_109, %c0_110] : memref<4x128x256xbf16, #tpu.memory_space<vmem>>, vector<1x128x256xbf16>
    %256 = vector.shape_cast %255 : vector<1x128x256xbf16> to vector<128x256xbf16>
    %cst_111 = arith.constant dense<0.000000e+00> : vector<4x256xf32>
    %257 = tpu.matmul %228, %256, %cst_111 {dimension_numbers = #tpu.dot_dimension_numbers<[1], [0], [0], [1], [0, 0, 1, 1], [], []>} : vector<4x128xbf16>, vector<128x256xbf16>, vector<4x256xf32> -> vector<4x256xf32>
    %c0_112 = arith.constant 0 : index
    %c0_113 = arith.constant 0 : index
    %c0_114 = arith.constant 0 : index
    %258 = vector.load %arg5[%c0_112, %c0_113, %c0_114] : memref<4x256x256xbf16, #tpu.memory_space<vmem>>, vector<1x256x256xbf16>
    %259 = vector.shape_cast %258 : vector<1x256x256xbf16> to vector<256x256xbf16>
    %cst_115 = arith.constant dense<0.000000e+00> : vector<4x256xf32>
    %260 = tpu.matmul %254, %259, %cst_115 {dimension_numbers = #tpu.dot_dimension_numbers<[1], [0], [0], [1], [0, 0, 1, 1], [], []>} : vector<4x256xbf16>, vector<256x256xbf16>, vector<4x256xf32> -> vector<4x256xf32>
    %261 = arith.addf %257, %260 : vector<4x256xf32>
    %c17 = arith.constant 17 : index
    %c0_116 = arith.constant 0 : index
    %262 = vector.load %arg10[%c17, %c0_116] : memref<31x256xf32, #tpu.memory_space<vmem>>, vector<1x256xf32>
    %263 = vector.broadcast %262 : vector<1x256xf32> to vector<4x256xf32>
    %264 = arith.addf %261, %263 : vector<4x256xf32>
    %c18 = arith.constant 18 : index
    %c0_117 = arith.constant 0 : index
    %265 = vector.load %arg10[%c18, %c0_117] : memref<31x256xf32, #tpu.memory_space<vmem>>, vector<1x256xf32>
    %c19 = arith.constant 19 : index
    %c0_118 = arith.constant 0 : index
    %266 = vector.load %arg10[%c19, %c0_118] : memref<31x256xf32, #tpu.memory_space<vmem>>, vector<1x256xf32>
    %cst_119 = arith.constant dense<0.000000e+00> : vector<256xf32>
    %267 = vector.multi_reduction <add>, %264, %cst_119 [0] : vector<4x256xf32> to vector<256xf32>
    %268 = vector.shape_cast %267 : vector<256xf32> to vector<1x256xf32>
    %cst_120 = arith.constant 4.000000e+00 : f32
    %269 = vector.broadcast %cst_120 : f32 to vector<1x256xf32>
    %270 = arith.divf %268, %269 : vector<1x256xf32>
    %271 = vector.broadcast %270 : vector<1x256xf32> to vector<4x256xf32>
    %272 = arith.subf %264, %271 : vector<4x256xf32>
    %273 = arith.mulf %272, %272 : vector<4x256xf32>
    %cst_121 = arith.constant dense<0.000000e+00> : vector<256xf32>
    %274 = vector.multi_reduction <add>, %273, %cst_121 [0] : vector<4x256xf32> to vector<256xf32>
    %275 = vector.shape_cast %274 : vector<256xf32> to vector<1x256xf32>
    %cst_122 = arith.constant 4.000000e+00 : f32
    %276 = vector.broadcast %cst_122 : f32 to vector<1x256xf32>
    %277 = arith.divf %275, %276 : vector<1x256xf32>
    %278 = vector.broadcast %270 : vector<1x256xf32> to vector<4x256xf32>
    %279 = arith.subf %264, %278 : vector<4x256xf32>
    %cst_123 = arith.constant 9.99999974E-6 : f32
    %280 = vector.broadcast %cst_123 : f32 to vector<1x256xf32>
    %281 = arith.addf %277, %280 : vector<1x256xf32>
    %282 = math.rsqrt %281 : vector<1x256xf32>
    %283 = vector.broadcast %282 : vector<1x256xf32> to vector<4x256xf32>
    %284 = arith.mulf %279, %283 : vector<4x256xf32>
    %285 = vector.broadcast %265 : vector<1x256xf32> to vector<4x256xf32>
    %286 = arith.mulf %284, %285 : vector<4x256xf32>
    %287 = vector.broadcast %266 : vector<1x256xf32> to vector<4x256xf32>
    %288 = arith.addf %286, %287 : vector<4x256xf32>
    %cst_124 = arith.constant 0.000000e+00 : f32
    %289 = vector.broadcast %cst_124 : f32 to vector<4x256xf32>
    %290 = arith.cmpf oge, %288, %289 : vector<4x256xf32>
    %cst_125 = arith.constant 2.000000e-01 : f32
    %291 = vector.broadcast %cst_125 : f32 to vector<4x256xf32>
    %292 = arith.mulf %291, %288 : vector<4x256xf32>
    %293 = arith.select %290, %288, %292 : vector<4x256xi1>, vector<4x256xf32>
    %c4_126 = arith.constant 4 : index
    %c0_127 = arith.constant 0 : index
    %c0_128 = arith.constant 0 : index
    %294 = vector.load %arg4[%c4_126, %c0_127, %c0_128] : memref<8x256x256xbf16, #tpu.memory_space<vmem>>, vector<1x256x256xbf16>
    %295 = vector.shape_cast %294 : vector<1x256x256xbf16> to vector<256x256xbf16>
    %296 = arith.truncf %293 : vector<4x256xf32> to vector<4x256xbf16>
    %cst_129 = arith.constant dense<0.000000e+00> : vector<4x256xf32>
    %297 = tpu.matmul %296, %295, %cst_129 {dimension_numbers = #tpu.dot_dimension_numbers<[1], [0], [0], [1], [0, 0, 1, 1], [], []>} : vector<4x256xbf16>, vector<256x256xbf16>, vector<4x256xf32> -> vector<4x256xf32>
    %c20 = arith.constant 20 : index
    %c0_130 = arith.constant 0 : index
    %298 = vector.load %arg10[%c20, %c0_130] : memref<31x256xf32, #tpu.memory_space<vmem>>, vector<1x256xf32>
    %299 = vector.broadcast %298 : vector<1x256xf32> to vector<4x256xf32>
    %300 = arith.addf %297, %299 : vector<4x256xf32>
    %c21 = arith.constant 21 : index
    %c0_131 = arith.constant 0 : index
    %301 = vector.load %arg10[%c21, %c0_131] : memref<31x256xf32, #tpu.memory_space<vmem>>, vector<1x256xf32>
    %c22 = arith.constant 22 : index
    %c0_132 = arith.constant 0 : index
    %302 = vector.load %arg10[%c22, %c0_132] : memref<31x256xf32, #tpu.memory_space<vmem>>, vector<1x256xf32>
    %cst_133 = arith.constant dense<0.000000e+00> : vector<256xf32>
    %303 = vector.multi_reduction <add>, %300, %cst_133 [0] : vector<4x256xf32> to vector<256xf32>
    %304 = vector.shape_cast %303 : vector<256xf32> to vector<1x256xf32>
    %cst_134 = arith.constant 4.000000e+00 : f32
    %305 = vector.broadcast %cst_134 : f32 to vector<1x256xf32>
    %306 = arith.divf %304, %305 : vector<1x256xf32>
    %307 = vector.broadcast %306 : vector<1x256xf32> to vector<4x256xf32>
    %308 = arith.subf %300, %307 : vector<4x256xf32>
    %309 = arith.mulf %308, %308 : vector<4x256xf32>
    %cst_135 = arith.constant dense<0.000000e+00> : vector<256xf32>
    %310 = vector.multi_reduction <add>, %309, %cst_135 [0] : vector<4x256xf32> to vector<256xf32>
    %311 = vector.shape_cast %310 : vector<256xf32> to vector<1x256xf32>
    %cst_136 = arith.constant 4.000000e+00 : f32
    %312 = vector.broadcast %cst_136 : f32 to vector<1x256xf32>
    %313 = arith.divf %311, %312 : vector<1x256xf32>
    %314 = vector.broadcast %306 : vector<1x256xf32> to vector<4x256xf32>
    %315 = arith.subf %300, %314 : vector<4x256xf32>
    %cst_137 = arith.constant 9.99999974E-6 : f32
    %316 = vector.broadcast %cst_137 : f32 to vector<1x256xf32>
    %317 = arith.addf %313, %316 : vector<1x256xf32>
    %318 = math.rsqrt %317 : vector<1x256xf32>
    %319 = vector.broadcast %318 : vector<1x256xf32> to vector<4x256xf32>
    %320 = arith.mulf %315, %319 : vector<4x256xf32>
    %321 = vector.broadcast %301 : vector<1x256xf32> to vector<4x256xf32>
    %322 = arith.mulf %320, %321 : vector<4x256xf32>
    %323 = vector.broadcast %302 : vector<1x256xf32> to vector<4x256xf32>
    %324 = arith.addf %322, %323 : vector<4x256xf32>
    %c1_138 = arith.constant 1 : index
    %c0_139 = arith.constant 0 : index
    %c0_140 = arith.constant 0 : index
    %325 = vector.load %arg6[%c1_138, %c0_139, %c0_140] : memref<4x128x256xbf16, #tpu.memory_space<vmem>>, vector<1x128x256xbf16>
    %326 = vector.shape_cast %325 : vector<1x128x256xbf16> to vector<128x256xbf16>
    %cst_141 = arith.constant dense<0.000000e+00> : vector<4x256xf32>
    %327 = tpu.matmul %228, %326, %cst_141 {dimension_numbers = #tpu.dot_dimension_numbers<[1], [0], [0], [1], [0, 0, 1, 1], [], []>} : vector<4x128xbf16>, vector<128x256xbf16>, vector<4x256xf32> -> vector<4x256xf32>
    %c1_142 = arith.constant 1 : index
    %c0_143 = arith.constant 0 : index
    %c0_144 = arith.constant 0 : index
    %328 = vector.load %arg5[%c1_142, %c0_143, %c0_144] : memref<4x256x256xbf16, #tpu.memory_space<vmem>>, vector<1x256x256xbf16>
    %329 = vector.shape_cast %328 : vector<1x256x256xbf16> to vector<256x256xbf16>
    %cst_145 = arith.constant dense<0.000000e+00> : vector<4x256xf32>
    %330 = tpu.matmul %254, %329, %cst_145 {dimension_numbers = #tpu.dot_dimension_numbers<[1], [0], [0], [1], [0, 0, 1, 1], [], []>} : vector<4x256xbf16>, vector<256x256xbf16>, vector<4x256xf32> -> vector<4x256xf32>
    %331 = arith.addf %327, %330 : vector<4x256xf32>
    %c23 = arith.constant 23 : index
    %c0_146 = arith.constant 0 : index
    %332 = vector.load %arg10[%c23, %c0_146] : memref<31x256xf32, #tpu.memory_space<vmem>>, vector<1x256xf32>
    %333 = vector.broadcast %332 : vector<1x256xf32> to vector<4x256xf32>
    %334 = arith.addf %331, %333 : vector<4x256xf32>
    %cst_147 = arith.constant 0.000000e+00 : f32
    %335 = vector.broadcast %cst_147 : f32 to vector<4x256xf32>
    %336 = arith.cmpf oge, %334, %335 : vector<4x256xf32>
    %cst_148 = arith.constant 2.000000e-01 : f32
    %337 = vector.broadcast %cst_148 : f32 to vector<4x256xf32>
    %338 = arith.mulf %337, %334 : vector<4x256xf32>
    %339 = arith.select %336, %334, %338 : vector<4x256xi1>, vector<4x256xf32>
    %340 = arith.addf %339, %324 : vector<4x256xf32>
    %cst_149 = arith.constant 0.000000e+00 : f32
    %341 = vector.broadcast %cst_149 : f32 to vector<4x256xf32>
    %342 = arith.cmpf oge, %340, %341 : vector<4x256xf32>
    %cst_150 = arith.constant 2.000000e-01 : f32
    %343 = vector.broadcast %cst_150 : f32 to vector<4x256xf32>
    %344 = arith.mulf %343, %340 : vector<4x256xf32>
    %345 = arith.select %342, %340, %344 : vector<4x256xi1>, vector<4x256xf32>
    %346 = arith.truncf %345 : vector<4x256xf32> to vector<4x256xbf16>
    %c2_151 = arith.constant 2 : index
    %c0_152 = arith.constant 0 : index
    %c0_153 = arith.constant 0 : index
    %347 = vector.load %arg6[%c2_151, %c0_152, %c0_153] : memref<4x128x256xbf16, #tpu.memory_space<vmem>>, vector<1x128x256xbf16>
    %348 = vector.shape_cast %347 : vector<1x128x256xbf16> to vector<128x256xbf16>
    %cst_154 = arith.constant dense<0.000000e+00> : vector<4x256xf32>
    %349 = tpu.matmul %228, %348, %cst_154 {dimension_numbers = #tpu.dot_dimension_numbers<[1], [0], [0], [1], [0, 0, 1, 1], [], []>} : vector<4x128xbf16>, vector<128x256xbf16>, vector<4x256xf32> -> vector<4x256xf32>
    %c2_155 = arith.constant 2 : index
    %c0_156 = arith.constant 0 : index
    %c0_157 = arith.constant 0 : index
    %350 = vector.load %arg5[%c2_155, %c0_156, %c0_157] : memref<4x256x256xbf16, #tpu.memory_space<vmem>>, vector<1x256x256xbf16>
    %351 = vector.shape_cast %350 : vector<1x256x256xbf16> to vector<256x256xbf16>
    %cst_158 = arith.constant dense<0.000000e+00> : vector<4x256xf32>
    %352 = tpu.matmul %254, %351, %cst_158 {dimension_numbers = #tpu.dot_dimension_numbers<[1], [0], [0], [1], [0, 0, 1, 1], [], []>} : vector<4x256xbf16>, vector<256x256xbf16>, vector<4x256xf32> -> vector<4x256xf32>
    %353 = arith.addf %349, %352 : vector<4x256xf32>
    %c5_159 = arith.constant 5 : index
    %c0_160 = arith.constant 0 : index
    %c0_161 = arith.constant 0 : index
    %354 = vector.load %arg4[%c5_159, %c0_160, %c0_161] : memref<8x256x256xbf16, #tpu.memory_space<vmem>>, vector<1x256x256xbf16>
    %355 = vector.shape_cast %354 : vector<1x256x256xbf16> to vector<256x256xbf16>
    %cst_162 = arith.constant dense<0.000000e+00> : vector<4x256xf32>
    %356 = tpu.matmul %346, %355, %cst_162 {dimension_numbers = #tpu.dot_dimension_numbers<[1], [0], [0], [1], [0, 0, 1, 1], [], []>} : vector<4x256xbf16>, vector<256x256xbf16>, vector<4x256xf32> -> vector<4x256xf32>
    %357 = arith.addf %353, %356 : vector<4x256xf32>
    %c24 = arith.constant 24 : index
    %c0_163 = arith.constant 0 : index
    %358 = vector.load %arg10[%c24, %c0_163] : memref<31x256xf32, #tpu.memory_space<vmem>>, vector<1x256xf32>
    %359 = vector.broadcast %358 : vector<1x256xf32> to vector<4x256xf32>
    %360 = arith.addf %357, %359 : vector<4x256xf32>
    %c25 = arith.constant 25 : index
    %c0_164 = arith.constant 0 : index
    %361 = vector.load %arg10[%c25, %c0_164] : memref<31x256xf32, #tpu.memory_space<vmem>>, vector<1x256xf32>
    %c26 = arith.constant 26 : index
    %c0_165 = arith.constant 0 : index
    %362 = vector.load %arg10[%c26, %c0_165] : memref<31x256xf32, #tpu.memory_space<vmem>>, vector<1x256xf32>
    %cst_166 = arith.constant dense<0.000000e+00> : vector<256xf32>
    %363 = vector.multi_reduction <add>, %360, %cst_166 [0] : vector<4x256xf32> to vector<256xf32>
    %364 = vector.shape_cast %363 : vector<256xf32> to vector<1x256xf32>
    %cst_167 = arith.constant 4.000000e+00 : f32
    %365 = vector.broadcast %cst_167 : f32 to vector<1x256xf32>
    %366 = arith.divf %364, %365 : vector<1x256xf32>
    %367 = vector.broadcast %366 : vector<1x256xf32> to vector<4x256xf32>
    %368 = arith.subf %360, %367 : vector<4x256xf32>
    %369 = arith.mulf %368, %368 : vector<4x256xf32>
    %cst_168 = arith.constant dense<0.000000e+00> : vector<256xf32>
    %370 = vector.multi_reduction <add>, %369, %cst_168 [0] : vector<4x256xf32> to vector<256xf32>
    %371 = vector.shape_cast %370 : vector<256xf32> to vector<1x256xf32>
    %cst_169 = arith.constant 4.000000e+00 : f32
    %372 = vector.broadcast %cst_169 : f32 to vector<1x256xf32>
    %373 = arith.divf %371, %372 : vector<1x256xf32>
    %374 = vector.broadcast %366 : vector<1x256xf32> to vector<4x256xf32>
    %375 = arith.subf %360, %374 : vector<4x256xf32>
    %cst_170 = arith.constant 9.99999974E-6 : f32
    %376 = vector.broadcast %cst_170 : f32 to vector<1x256xf32>
    %377 = arith.addf %373, %376 : vector<1x256xf32>
    %378 = math.rsqrt %377 : vector<1x256xf32>
    %379 = vector.broadcast %378 : vector<1x256xf32> to vector<4x256xf32>
    %380 = arith.mulf %375, %379 : vector<4x256xf32>
    %381 = vector.broadcast %361 : vector<1x256xf32> to vector<4x256xf32>
    %382 = arith.mulf %380, %381 : vector<4x256xf32>
    %383 = vector.broadcast %362 : vector<1x256xf32> to vector<4x256xf32>
    %384 = arith.addf %382, %383 : vector<4x256xf32>
    %cst_171 = arith.constant 0.000000e+00 : f32
    %385 = vector.broadcast %cst_171 : f32 to vector<4x256xf32>
    %386 = arith.cmpf oge, %384, %385 : vector<4x256xf32>
    %cst_172 = arith.constant 2.000000e-01 : f32
    %387 = vector.broadcast %cst_172 : f32 to vector<4x256xf32>
    %388 = arith.mulf %387, %384 : vector<4x256xf32>
    %389 = arith.select %386, %384, %388 : vector<4x256xi1>, vector<4x256xf32>
    %c6_173 = arith.constant 6 : index
    %c0_174 = arith.constant 0 : index
    %c0_175 = arith.constant 0 : index
    %390 = vector.load %arg4[%c6_173, %c0_174, %c0_175] : memref<8x256x256xbf16, #tpu.memory_space<vmem>>, vector<1x256x256xbf16>
    %391 = vector.shape_cast %390 : vector<1x256x256xbf16> to vector<256x256xbf16>
    %392 = arith.truncf %389 : vector<4x256xf32> to vector<4x256xbf16>
    %cst_176 = arith.constant dense<0.000000e+00> : vector<4x256xf32>
    %393 = tpu.matmul %392, %391, %cst_176 {dimension_numbers = #tpu.dot_dimension_numbers<[1], [0], [0], [1], [0, 0, 1, 1], [], []>} : vector<4x256xbf16>, vector<256x256xbf16>, vector<4x256xf32> -> vector<4x256xf32>
    %c27 = arith.constant 27 : index
    %c0_177 = arith.constant 0 : index
    %394 = vector.load %arg10[%c27, %c0_177] : memref<31x256xf32, #tpu.memory_space<vmem>>, vector<1x256xf32>
    %395 = vector.broadcast %394 : vector<1x256xf32> to vector<4x256xf32>
    %396 = arith.addf %393, %395 : vector<4x256xf32>
    %c28 = arith.constant 28 : index
    %c0_178 = arith.constant 0 : index
    %397 = vector.load %arg10[%c28, %c0_178] : memref<31x256xf32, #tpu.memory_space<vmem>>, vector<1x256xf32>
    %c29 = arith.constant 29 : index
    %c0_179 = arith.constant 0 : index
    %398 = vector.load %arg10[%c29, %c0_179] : memref<31x256xf32, #tpu.memory_space<vmem>>, vector<1x256xf32>
    %cst_180 = arith.constant dense<0.000000e+00> : vector<256xf32>
    %399 = vector.multi_reduction <add>, %396, %cst_180 [0] : vector<4x256xf32> to vector<256xf32>
    %400 = vector.shape_cast %399 : vector<256xf32> to vector<1x256xf32>
    %cst_181 = arith.constant 4.000000e+00 : f32
    %401 = vector.broadcast %cst_181 : f32 to vector<1x256xf32>
    %402 = arith.divf %400, %401 : vector<1x256xf32>
    %403 = vector.broadcast %402 : vector<1x256xf32> to vector<4x256xf32>
    %404 = arith.subf %396, %403 : vector<4x256xf32>
    %405 = arith.mulf %404, %404 : vector<4x256xf32>
    %cst_182 = arith.constant dense<0.000000e+00> : vector<256xf32>
    %406 = vector.multi_reduction <add>, %405, %cst_182 [0] : vector<4x256xf32> to vector<256xf32>
    %407 = vector.shape_cast %406 : vector<256xf32> to vector<1x256xf32>
    %cst_183 = arith.constant 4.000000e+00 : f32
    %408 = vector.broadcast %cst_183 : f32 to vector<1x256xf32>
    %409 = arith.divf %407, %408 : vector<1x256xf32>
    %410 = vector.broadcast %402 : vector<1x256xf32> to vector<4x256xf32>
    %411 = arith.subf %396, %410 : vector<4x256xf32>
    %cst_184 = arith.constant 9.99999974E-6 : f32
    %412 = vector.broadcast %cst_184 : f32 to vector<1x256xf32>
    %413 = arith.addf %409, %412 : vector<1x256xf32>
    %414 = math.rsqrt %413 : vector<1x256xf32>
    %415 = vector.broadcast %414 : vector<1x256xf32> to vector<4x256xf32>
    %416 = arith.mulf %411, %415 : vector<4x256xf32>
    %417 = vector.broadcast %397 : vector<1x256xf32> to vector<4x256xf32>
    %418 = arith.mulf %416, %417 : vector<4x256xf32>
    %419 = vector.broadcast %398 : vector<1x256xf32> to vector<4x256xf32>
    %420 = arith.addf %418, %419 : vector<4x256xf32>
    %c3_185 = arith.constant 3 : index
    %c0_186 = arith.constant 0 : index
    %c0_187 = arith.constant 0 : index
    %421 = vector.load %arg6[%c3_185, %c0_186, %c0_187] : memref<4x128x256xbf16, #tpu.memory_space<vmem>>, vector<1x128x256xbf16>
    %422 = vector.shape_cast %421 : vector<1x128x256xbf16> to vector<128x256xbf16>
    %cst_188 = arith.constant dense<0.000000e+00> : vector<4x256xf32>
    %423 = tpu.matmul %228, %422, %cst_188 {dimension_numbers = #tpu.dot_dimension_numbers<[1], [0], [0], [1], [0, 0, 1, 1], [], []>} : vector<4x128xbf16>, vector<128x256xbf16>, vector<4x256xf32> -> vector<4x256xf32>
    %c3_189 = arith.constant 3 : index
    %c0_190 = arith.constant 0 : index
    %c0_191 = arith.constant 0 : index
    %424 = vector.load %arg5[%c3_189, %c0_190, %c0_191] : memref<4x256x256xbf16, #tpu.memory_space<vmem>>, vector<1x256x256xbf16>
    %425 = vector.shape_cast %424 : vector<1x256x256xbf16> to vector<256x256xbf16>
    %cst_192 = arith.constant dense<0.000000e+00> : vector<4x256xf32>
    %426 = tpu.matmul %254, %425, %cst_192 {dimension_numbers = #tpu.dot_dimension_numbers<[1], [0], [0], [1], [0, 0, 1, 1], [], []>} : vector<4x256xbf16>, vector<256x256xbf16>, vector<4x256xf32> -> vector<4x256xf32>
    %427 = arith.addf %423, %426 : vector<4x256xf32>
    %c7_193 = arith.constant 7 : index
    %c0_194 = arith.constant 0 : index
    %c0_195 = arith.constant 0 : index
    %428 = vector.load %arg4[%c7_193, %c0_194, %c0_195] : memref<8x256x256xbf16, #tpu.memory_space<vmem>>, vector<1x256x256xbf16>
    %429 = vector.shape_cast %428 : vector<1x256x256xbf16> to vector<256x256xbf16>
    %cst_196 = arith.constant dense<0.000000e+00> : vector<4x256xf32>
    %430 = tpu.matmul %346, %429, %cst_196 {dimension_numbers = #tpu.dot_dimension_numbers<[1], [0], [0], [1], [0, 0, 1, 1], [], []>} : vector<4x256xbf16>, vector<256x256xbf16>, vector<4x256xf32> -> vector<4x256xf32>
    %431 = arith.addf %427, %430 : vector<4x256xf32>
    %c30 = arith.constant 30 : index
    %c0_197 = arith.constant 0 : index
    %432 = vector.load %arg10[%c30, %c0_197] : memref<31x256xf32, #tpu.memory_space<vmem>>, vector<1x256xf32>
    %433 = vector.broadcast %432 : vector<1x256xf32> to vector<4x256xf32>
    %434 = arith.addf %431, %433 : vector<4x256xf32>
    %cst_198 = arith.constant 0.000000e+00 : f32
    %435 = vector.broadcast %cst_198 : f32 to vector<4x256xf32>
    %436 = arith.cmpf oge, %434, %435 : vector<4x256xf32>
    %cst_199 = arith.constant 2.000000e-01 : f32
    %437 = vector.broadcast %cst_199 : f32 to vector<4x256xf32>
    %438 = arith.mulf %437, %434 : vector<4x256xf32>
    %439 = arith.select %436, %434, %438 : vector<4x256xi1>, vector<4x256xf32>
    %440 = arith.addf %439, %420 : vector<4x256xf32>
    %cst_200 = arith.constant 0.000000e+00 : f32
    %441 = vector.broadcast %cst_200 : f32 to vector<4x256xf32>
    %442 = arith.cmpf oge, %440, %441 : vector<4x256xf32>
    %cst_201 = arith.constant 2.000000e-01 : f32
    %443 = vector.broadcast %cst_201 : f32 to vector<4x256xf32>
    %444 = arith.mulf %443, %440 : vector<4x256xf32>
    %445 = arith.select %442, %440, %444 : vector<4x256xi1>, vector<4x256xf32>
    %c0_202 = arith.constant 0 : index
    %c0_203 = arith.constant 0 : index
    %446 = vector.load %arg8[%c0_202, %c0_203] : memref<256x1664xbf16, #tpu.memory_space<vmem>>, vector<256x1664xbf16>
    %447 = arith.truncf %445 : vector<4x256xf32> to vector<4x256xbf16>
    %cst_204 = arith.constant dense<0.000000e+00> : vector<4x1664xf32>
    %448 = tpu.matmul %447, %446, %cst_204 {dimension_numbers = #tpu.dot_dimension_numbers<[1], [0], [0], [1], [0, 0, 1, 1], [], []>} : vector<4x256xbf16>, vector<256x1664xbf16>, vector<4x1664xf32> -> vector<4x1664xf32>
    %c0_205 = arith.constant 0 : index
    %c0_206 = arith.constant 0 : index
    %449 = vector.load %arg11[%c0_205, %c0_206] : memref<1x1664xf32, #tpu.memory_space<vmem>>, vector<1x1664xf32>
    %450 = vector.broadcast %449 : vector<1x1664xf32> to vector<4x1664xf32>
    %451 = arith.addf %448, %450 : vector<4x1664xf32>
    %c0_207 = arith.constant 0 : index
    %c0_208 = arith.constant 0 : index
    %452 = vector.load %arg13[%c0_207, %c0_208] : memref<4x1664xf32, #tpu.memory_space<vmem>>, vector<4x1664xf32>
    tpu.vector_store %arg13[%c0_207, %c0_208], %451 {strides = array<i32>} : memref<4x1664xf32, #tpu.memory_space<vmem>>, vector<4x1664xf32>,
    return
  }
}

</mosaic_0001>

<bundles_post_ra>
// kernel: gnet_forward.1
= control target key start
LH: loop header
LB: loop body
LE: loop exit
PB: predicated region body
PF: predicated region fallthrough
CT: control target
= control target key end

     0   :  { %19 = vsyncpa [#allocation3], 0  ;;  %s18493_s0 = inlined_call_operand.vmem [shape: f32[4,1792], index: 0, kind: input, shape index: {}]   ;;  %s18494_s1 = inlined_call_operand.vmem [shape: f32[4,256], index: 1, kind: input, shape index: {}]   ;;  %s18495_s2 = inlined_call_operand.vmem [shape: f32[4,128], index: 2, kind: input, shape index: {}]   ;;  %s18496_s3 = inlined_call_operand.hbm [shape: bf16[4,1792,256], index: 3, kind: input, shape index: {}]   ;;  %s18497_s4 = inlined_call_operand.hbm [shape: bf16[8,256,256], index: 4, kind: input, shape index: {}]   ;;  %s18498_s5 = inlined_call_operand.hbm [shape: bf16[4,256,256], index: 5, kind: input, shape index: {}]   ;;  %s18499_s6 = inlined_call_operand.hbm [shape: bf16[4,128,256], index: 6, kind: input, shape index: {}]   ;;  %s18500_s7 = inlined_call_operand.hbm [shape: bf16[256,128], index: 7, kind: input, shape index: {}]   ;;  %s18501_s8 = inlined_call_operand.hbm [shape: bf16[256,1664], index: 8, kind: input, shape index: {}]   ;;  %s18502_s9 = inlined_call_operand.hbm [shape: f32[2,1792], index: 9, kind: input, shape index: {}]   ;;  %s18503_s10 = inlined_call_operand.hbm [shape: f32[31,256], index: 10, kind: input, shape index: {}]   ;;  %s18504_s11 = inlined_call_operand.hbm [shape: f32[1,1664], index: 11, kind: input, shape index: {}]   ;;  %s18505_s12 = inlined_call_operand.vmem [shape: f32[4,128], index: 12, kind: output, shape index: {0}]   ;;  %s18506_s13 = inlined_call_operand.vmem [shape: f32[4,1664], index: 13, kind: output, shape index: {1}]  }
   0x1   :  { %20 = vsyncpa [#allocation5], 0 }
   0x2   :  { %21 = vsyncpa [#allocation8], 0 }
   0x3   :  { %22 = vsyncpa [#allocation11], 0 }
   0x4   :  { %23 = vsyncpa [#allocation14], 0  ;;  %s17662_s25 = smov [#allocation4]   ;;  %s17663_s27 = smov [#allocation7]  }
   0x5   :  { %s47_s26 = sshll.u32 %s17662_s25, 4  ;;  %s71_s28 = sshll.u32 %s17663_s27, 4  ;;  %s48_s26 = int_to_ptr.vmem [resolvable:$true] %s47_s26  ;;  %s72_s28 = int_to_ptr.vmem [resolvable:$true] %s71_s28 }
   0x6   :  { %s17480_s29 = scalar_lea.vmem %s48_s26, 32768  ;;  %p17485_p1 = scmp.lt.s32.totalorder %s48_s26, %s48_s26 }
   0x7   :  { %p17481_p0 = scmp.ne.s32.totalorder %s48_s26, %s17480_s29  ;;  %p17486_p2 = scmp.lt.s32.totalorder %s17480_s29, %s17480_s29 }
   0x9   :  { %p17487_p3 = por %p17486_p2, %p17485_p1 }
   0xb   :  { %p17488_p4 = pnand %p17487_p3, %p17481_p0 }
   0xd   :  { %17491 = shalt.err (!%p17488_p4)
}
   0xe   :  { %s17664_s30 = smov 128   ;;  %s17665_s14 = smov 8  }
   0xf   :  { %53 = dma.hbm_to_vmem [thread:$0]  %s18497_s4, 32768, %s48_s26, [#allocation5], %s17664_s30, %s17664_s30, %s17665_s14  }
  0x10   :  { %s17500_s17 = scalar_lea.vmem %s72_s28, 8192  ;;  %p17505_p6 = scmp.lt.s32.totalorder %s72_s28, %s72_s28 }
  0x11   :  { %p17501_p5 = scmp.ne.s32.totalorder %s72_s28, %s17500_s17  ;;  %p17506_p7 = scmp.lt.s32.totalorder %s17500_s17, %s17500_s17 }
  0x13   :  { %p17507_p8 = por %p17506_p7, %p17505_p6 }
  0x15   :  { %p17508_p9 = pnand %p17507_p8, %p17501_p5 }
  0x17   :  { %17511 = shalt.err (!%p17508_p9)
}
  0x18   :  { %77 = dma.hbm_to_vmem [thread:$0]  %s18499_s6, 8192, %s72_s28, [#allocation8], %s17664_s30, %s17664_s30, %s17665_s14  }
  0x19   :  { %s17666_s20 = smov [#allocation10]  }
  0x1a   :  { %s95_s21 = sshll.u32 %s17666_s20, 4  ;;  %s96_s21 = int_to_ptr.vmem [resolvable:$true] %s95_s21 }
  0x1b   :  { %s17520_s22 = scalar_lea.vmem %s96_s21, 26624  ;;  %p17525_p11 = scmp.lt.s32.totalorder %s96_s21, %s96_s21 }
  0x1c   :  { %p17521_p10 = scmp.ne.s32.totalorder %s96_s21, %s17520_s22  ;;  %p17526_p12 = scmp.lt.s32.totalorder %s17520_s22, %s17520_s22 }
  0x1e   :  { %p17527_p13 = por %p17526_p12, %p17525_p11 }
  0x20   :  { %p17528_p0 = pnand %p17527_p13, %p17521_p10 }
  0x22   :  { %17531 = shalt.err (!%p17528_p0)
}
  0x23   :  { %s17667_s4 = smov 832   ;;  %s17668_s23 = smov 52  }
  0x24   :  { %101 = dma.hbm_to_vmem [thread:$0]  %s18501_s8, 26624, %s96_s21, [#allocation11], %s17667_s4, %s17667_s4, %s17668_s23  }
  0x25   :  { %s17669_s26 = smov [#allocation13]  }
  0x26   :  { %s117_s27 = sshll.u32 %s17669_s26, 4  ;;  %s118_s27 = int_to_ptr.vmem [resolvable:$true] %s117_s27 }
  0x27   :  { %s17540_s6 = scalar_lea.vmem %s118_s27, 1024  ;;  %p17545_p2 = scmp.lt.s32.totalorder %s118_s27, %s118_s27 }
  0x28   :  { %p17541_p1 = scmp.ne.s32.totalorder %s118_s27, %s17540_s6  ;;  %p17546_p3 = scmp.lt.s32.totalorder %s17540_s6, %s17540_s6 }
  0x2a   :  { %p17547_p4 = por %p17546_p3, %p17545_p2 }
  0x2c   :  { %p17548_p5 = pnand %p17547_p4, %p17541_p1 }
  0x2e   :  { %17551 = shalt.err (!%p17548_p5)
}
  0x2f   :  { %s17670_s28 = smov 256   ;;  %s17671_s29 = smov 16  }
  0x30   :  { %123 = dma.hbm_to_vmem [thread:$0]  %s18503_s10, 1024, %s118_s27, [#allocation14], %s17670_s28, %s17670_s28, %s17671_s29  }
  0x31   :  { %s17672_s17 = smov [#allocation2]   ;;  %s17673_s19 = smov [#allocation6]  }
  0x32   :  { %s35_s18 = sshll.u32 %s17672_s17, 4  ;;  %s59_s8 = sshll.u32 %s17673_s19, 4  ;;  %s36_s18 = int_to_ptr.vmem [resolvable:$true] %s35_s18  ;;  %s60_s8 = int_to_ptr.vmem [resolvable:$true] %s59_s8 }
  0x33   :  { %s17560_s20 = scalar_lea.vmem %s36_s18, 114688  ;;  %p17565_p7 = scmp.lt.s32.totalorder %s36_s18, %s36_s18 }
  0x34   :  { %p17561_p6 = scmp.ne.s32.totalorder %s36_s18, %s17560_s20  ;;  %p17566_p8 = scmp.lt.s32.totalorder %s17560_s20, %s17560_s20 }
  0x36   :  { %p17567_p9 = por %p17566_p8, %p17565_p7 }
  0x38   :  { %p17568_p10 = pnand %p17567_p9, %p17561_p6 }
  0x3a   :  { %17571 = shalt.err (!%p17568_p10)
}
  0x3b   :  { %41 = dma.hbm_to_vmem [thread:$0]  %s18496_s3, 114688, %s36_s18, [#allocation3], %s17664_s30, %s17664_s30, %s17665_s14  }
  0x3c   :  { %s17580_s10 = scalar_lea.vmem %s60_s8, 16384  ;;  %p17585_p12 = scmp.lt.s32.totalorder %s60_s8, %s60_s8 }
  0x3d   :  { %p17581_p11 = scmp.ne.s32.totalorder %s60_s8, %s17580_s10  ;;  %p17586_p13 = scmp.lt.s32.totalorder %s17580_s10, %s17580_s10 }
  0x3f   :  { %p17587_p0 = por %p17586_p13, %p17585_p12 }
  0x41   :  { %p17588_p1 = pnand %p17587_p0, %p17581_p11 }
  0x43   :  { %17591 = shalt.err (!%p17588_p1)
}
  0x44   :  { %65 = dma.hbm_to_vmem [thread:$0]  %s18498_s5, 16384, %s60_s8, [#allocation5], %s17664_s30, %s17664_s30, %s17665_s14  }
  0x45   :  { %s17674_s24 = smov [#allocation9]  }
  0x46   :  { %s83_s25 = sshll.u32 %s17674_s24, 4  ;;  %s84_s25 = int_to_ptr.vmem [resolvable:$true] %s83_s25 }
  0x47   :  { %s17600_s26 = scalar_lea.vmem %s84_s25, 2048  ;;  %p17605_p3 = scmp.lt.s32.totalorder %s84_s25, %s84_s25 }
  0x48   :  { %p17601_p2 = scmp.ne.s32.totalorder %s84_s25, %s17600_s26  ;;  %p17606_p4 = scmp.lt.s32.totalorder %s17600_s26, %s17600_s26 }
  0x4a   :  { %p17607_p5 = por %p17606_p4, %p17605_p3 }
  0x4c   :  { %p17608_p6 = pnand %p17607_p5, %p17601_p2 }
  0x4e   :  { %17611 = shalt.err (!%p17608_p6)
}
  0x4f   :  { %s17675_s3 = smov 64   ;;  %s17676_s27 = smov 4  }
  0x50   :  { %89 = dma.hbm_to_vmem [thread:$0]  %s18500_s7, 2048, %s84_s25, [#allocation8], %s17675_s3, %s17675_s3, %s17676_s27  }
  0x51   :  { %s17677_s29 = smov [#allocation12]   ;;  %s17678_s5 = smov [#allocation15]  }
  0x52   :  { %s108_s15 = sshll.u32 %s17677_s29, 4  ;;  %s130_s30 = sshll.u32 %s17678_s5, 4  ;;  %s109_s15 = int_to_ptr.vmem [resolvable:$true] %s108_s15  ;;  %s131_s30 = int_to_ptr.vmem [resolvable:$true] %s130_s30 }
  0x53   :  { %s17620_s14 = scalar_lea.vmem %s109_s15, 448  ;;  %p17625_p8 = scmp.lt.s32.totalorder %s109_s15, %s109_s15 }
  0x54   :  { %p17621_p7 = scmp.ne.s32.totalorder %s109_s15, %s17620_s14  ;;  %p17626_p9 = scmp.lt.s32.totalorder %s17620_s14, %s17620_s14 }
  0x56   :  { %p17627_p10 = por %p17626_p9, %p17625_p8 }
  0x58   :  { %p17628_p11 = pnand %p17627_p10, %p17621_p7 }
  0x5a   :  { %17631 = shalt.err (!%p17628_p11)
}
  0x5b   :  { %111 = dma.hbm_to_vmem [thread:$0]  %s18502_s9, 448, %s109_s15, [#allocation11]  }
  0x5c   :  { %s17640_s18 = scalar_lea.vmem %s131_s30, 208  ;;  %s17644_s7 = scalar_lea.vmem %s131_s30, 224 }
  0x5d   :  { %p17641_p12 = scmp.ne.s32.totalorder %s131_s30, %s17640_s18  ;;  %p17645_p13 = scmp.lt.s32.totalorder %s131_s30, %s131_s30 }
  0x5e   :  { %p17646_p0 = scmp.lt.s32.totalorder %s17644_s7, %s17640_s18 }
  0x60   :  { %p17647_p1 = por %p17646_p0, %p17645_p13 }
  0x62   :  { %p17648_p2 = pnand %p17647_p1, %p17641_p12 }
  0x64   :  { %17651 = shalt.err (!%p17648_p2)
}
  0x65   :  { %133 = dma.hbm_to_vmem [thread:$0]  %s18504_s11, 208, %s131_s30, [#allocation14]  }
  0x66   :  { %17652 = dma.done.wait [#allocation3], 114688  }
  0x67   :  { %17653 = vsyncadd [#allocation3], 4294852608 }
  0x68   :  { %17654 = dma.done.wait [#allocation5], 49152  }
  0x69   :  { %17655 = vsyncadd [#allocation5], 4294918144 }
  0x6a   :  { %17656 = dma.done.wait [#allocation8], 10240  }
  0x6b   :  { %17657 = vsyncadd [#allocation8], 4294957056 }
  0x6c   :  { %17658 = dma.done.wait [#allocation11], 27072  }
  0x6d   :  { %17659 = vsyncadd [#allocation11], 4294940224 }
  0x6e   :  { %17660 = dma.done.wait [#allocation14], 1232  }
  0x6f   :  { %17661 = vsyncadd [#allocation14], 4294966064  ;;  %v15060_v0 = vld [vmem:[#allocation2 + $0x74] ss:$8 sps:$4 sm:$0xff]   ;;  %v15062_v1 = vld [vmem:[#allocation2 + $0x70] ss:$8 sps:$4 sm:$0xff]  }
  0x70   :  { %2098 = vmatprep.subr.bf16.mxu0 %v15060_v0  ;;  %v15063_v2 = vld [vmem:[#allocation2 + $0x174] ss:$8 sps:$4 sm:$0xff]   ;;  %v15065_v3 = vld [vmem:[#allocation2 + $0x170] ss:$8 sps:$4 sm:$0xff]   ;;  %v15066_v4 = vld [vmem:[#allocation2 + $0x64] ss:$8 sps:$4 sm:$0xff]  }
  0x71   :  { %2099 = vmatpush1.bf16.msra.mxu0 %v15062_v1  ;;  %v15068_v5 = vld [vmem:[#allocation2 + $0x60] ss:$8 sps:$4 sm:$0xff]   ;;  %2139 = vmatprep.subr.bf16.mxu1 %v15063_v2  ;;  %v15069_v6 = vld [vmem:[#allocation2 + $0x164] ss:$8 sps:$4 sm:$0xff]   ;;  %v15072_v8 = vld [vmem:[#allocation2 + $0x54] ss:$8 sps:$4 sm:$0xff]  }
  0x72   :  { %2140 = vmatpush1.bf16.msra.mxu1 %v15065_v3  ;;  %2100 = vmatprep.subr.bf16.mxu0 %v15066_v4  ;;  %v15071_v7 = vld [vmem:[#allocation2 + $0x160] ss:$8 sps:$4 sm:$0xff]   ;;  %v15074_v9 = vld [vmem:[#allocation2 + $0x50] ss:$8 sps:$4 sm:$0xff]   ;;  %v15075_v10 = vld [vmem:[#allocation2 + $0x154] ss:$8 sps:$4 sm:$0xff]  }
  0x73   :  { %2141 = vmatprep.subr.bf16.mxu1 %v15069_v6  ;;  %v15078_v11 = vld [vmem:[#allocation2 + $0x44] ss:$8 sps:$4 sm:$0xff]   ;;  %v15077_v12 = vld [vmem:[#allocation2 + $0x150] ss:$8 sps:$4 sm:$0xff]   ;;  %v15080_v14 = vld [vmem:[#allocation2 + $0x40] ss:$8 sps:$4 sm:$0xff]  }
  0x74   :  { %v15081_v13 = vld [vmem:[#allocation2 + $0x144] ss:$8 sps:$4 sm:$0xff]   ;;  %v15084_v15 = vld [vmem:[#allocation2 + $0x34] ss:$8 sps:$4 sm:$0xff]   ;;  %v15083_v16 = vld [vmem:[#allocation2 + $0x140] ss:$8 sps:$4 sm:$0xff]  }
  0x75   :  { %2101 = vmatpush1.bf16.msra.mxu0 %v15068_v5  ;;  %v15087_v17 = vld [vmem:[#allocation2 + $0x134] ss:$8 sps:$4 sm:$0xff]   ;;  %v15086_v18 = vld [vmem:[#allocation2 + $0x30] ss:$8 sps:$4 sm:$0xff]   ;;  %v15090_v19 = vld [vmem:[#allocation2 + $0x24] ss:$8 sps:$4 sm:$0xff]  }
  0x76   :  { %2102 = vmatprep.subr.bf16.mxu0 %v15072_v8  ;;  %2142 = vmatpush1.bf16.msra.mxu1 %v15071_v7  ;;  %v15089_v20 = vld [vmem:[#allocation2 + $0x130] ss:$8 sps:$4 sm:$0xff]   ;;  %v15093_v21 = vld [vmem:[#allocation2 + $0x124] ss:$8 sps:$4 sm:$0xff]   ;;  %v15092_v22 = vld [vmem:[#allocation2 + $0x20] ss:$8 sps:$4 sm:$0xff]  }
  0x77   :  { %2143 = vmatprep.subr.bf16.mxu1 %v15075_v10  ;;  %v15096_v23 = vld [vmem:[#allocation2 + $0x14] ss:$8 sps:$4 sm:$0xff]   ;;  %v15095_v24 = vld [vmem:[#allocation2 + $0x120] ss:$8 sps:$4 sm:$0xff]   ;;  %v15098_v26 = vld [vmem:[#allocation2 + $0x10] ss:$8 sps:$4 sm:$0xff]  }
  0x78   :  { %v15099_v25 = vld [vmem:[#allocation2 + $0x114] ss:$8 sps:$4 sm:$0xff]   ;;  %v15102_v27 = vld [vmem:[#allocation2 + $0x4] ss:$8 sps:$4 sm:$0xff]   ;;  %v15101_v28 = vld [vmem:[#allocation2 + $0x110] ss:$8 sps:$4 sm:$0xff]  }
  0x79   :  { %2103 = vmatpush1.bf16.msra.mxu0 %v15074_v9  ;;  %v15105_v29 = vld [vmem:[#allocation2 + $0x104] ss:$8 sps:$4 sm:$0xff]   ;;  %v15104_v30 = vld [vmem:[#allocation2] ss:$8 sps:$4 sm:$0xff]   ;;  %v15108_v31 = vld [vmem:[#allocation2 + $0xf4] ss:$8 sps:$4 sm:$0xff]  }
  0x7a   :  { %2104 = vmatprep.subr.bf16.mxu0 %v15078_v11  ;;  %2144 = vmatpush1.bf16.msra.mxu1 %v15077_v12  ;;  %v15107_v32 = vld [vmem:[#allocation2 + $0x100] ss:$8 sps:$4 sm:$0xff]   ;;  %v15111_v33 = vld [vmem:[#allocation2 + $0x1f4] ss:$8 sps:$4 sm:$0xff]   ;;  %v15110_v34 = vld [vmem:[#allocation2 + $0xf0] ss:$8 sps:$4 sm:$0xff]  }
  0x7b   :  { %2145 = vmatprep.subr.bf16.mxu1 %v15081_v13  ;;  %v15114_v35 = vld [vmem:[#allocation2 + $0xe4] ss:$8 sps:$4 sm:$0xff]   ;;  %v15113_v36 = vld [vmem:[#allocation2 + $0x1f0] ss:$8 sps:$4 sm:$0xff]   ;;  %v15116_v38 = vld [vmem:[#allocation2 + $0xe0] ss:$8 sps:$4 sm:$0xff]  }
  0x7c   :  { %v15117_v37 = vld [vmem:[#allocation2 + $0x1e4] ss:$8 sps:$4 sm:$0xff]   ;;  %v15120_v39 = vld [vmem:[#allocation2 + $0xd4] ss:$8 sps:$4 sm:$0xff]   ;;  %v15119_v40 = vld [vmem:[#allocation2 + $0x1e0] ss:$8 sps:$4 sm:$0xff]  }
  0x7d   :  { %2105 = vmatpush1.bf16.msra.mxu0 %v15080_v14  ;;  %v15123_v41 = vld [vmem:[#allocation2 + $0x1d4] ss:$8 sps:$4 sm:$0xff]   ;;  %v15122_v42 = vld [vmem:[#allocation2 + $0xd0] ss:$8 sps:$4 sm:$0xff]   ;;  %v15126_v43 = vld [vmem:[#allocation2 + $0xc4] ss:$8 sps:$4 sm:$0xff]  }
  0x7e   :  { %2106 = vmatprep.subr.bf16.mxu0 %v15084_v15  ;;  %2146 = vmatpush1.bf16.msra.mxu1 %v15083_v16  ;;  %vm197_vm0 = vcmask 1043456   ;;  %v15125_v44 = vld [vmem:[#allocation2 + $0x1d0] ss:$8 sps:$4 sm:$0xff]   ;;  %v15129_v45 = vld [vmem:[#allocation2 + $0x1c4] ss:$8 sps:$4 sm:$0xff]  }
  0x7f   :  { %2147 = vmatprep.subr.bf16.mxu1 %v15087_v17  ;;  %v17792_v46 = vld [vmem:[%s18493_s0] sm:$0xff]  ;;  %v15132_v51 = vld [vmem:[#allocation2 + $0xb4] ss:$8 sps:$4 sm:$0xff]   ;;  %v17802_v54 = vld [vmem:[%s18493_s0 + $0x8] sm:$0xff] }
  0x80   :  { %v15128_v47 = vld [vmem:[#allocation2 + $0xc0] ss:$8 sps:$4 sm:$0xff]   ;;  %v183_v48 = vcombine.high %v17792_v46, %v17792_v46  ;;  %v198_v49 = vsel %vm197_vm0, %v17792_v46, 0.0  ;;  %v15135_v55 = vld [vmem:[#allocation2 + $0x1b4] ss:$8 sps:$4 sm:$0xff]   ;;  %v184_v58 = vcombine.high %v17802_v54, %v17802_v54  ;;  %v212_v61 = vsel %vm197_vm0, %v17802_v54, 0.0 }
  0x81   :  { %2107 = vmatpush1.bf16.msra.mxu0 %v15086_v18  ;;  %v15131_v50 = vld [vmem:[#allocation2 + $0x1c0] ss:$8 sps:$4 sm:$0xff]   ;;  %v199_v52 = vrot.slane %v198_v49, 4  ;;  %v15134_v59 = vld [vmem:[#allocation2 + $0xb0] ss:$8 sps:$4 sm:$0xff]   ;;  %v213_v0 = vrot.slane %v212_v61, 4 }
  0x82   :  { %2108 = vmatprep.subr.bf16.mxu0 %v15090_v19  ;;  %2148 = vmatpush1.bf16.msra.mxu1 %v15089_v20  ;;  %v205_v53 = vsel %vm197_vm0, %v183_v48, 0.0  ;;  %v15138_v60 = vld [vmem:[#allocation2 + $0xa4] ss:$8 sps:$4 sm:$0xff]   ;;  %v219_v1 = vsel %vm197_vm0, %v184_v58, 0.0  ;;  %v15137_v2 = vld [vmem:[#allocation2 + $0x1b0] ss:$8 sps:$4 sm:$0xff]  }
  0x83   :  { %2149 = vmatprep.subr.bf16.mxu1 %v15093_v21  ;;  %v200_v56 = vadd.f32 %v199_v52, %v198_v49  ;;  %v206_v57 = vrot.slane %v205_v53, 4  ;;  %v220_v3 = vrot.slane %v219_v1, 4  ;;  %v15141_v4 = vld [vmem:[#allocation2 + $0x1a4] ss:$8 sps:$4 sm:$0xff]   ;;  %v214_v7 = vadd.f32 %v213_v0, %v212_v61  ;;  %v15140_v8 = vld [vmem:[#allocation2 + $0xa0] ss:$8 sps:$4 sm:$0xff]  }
  0x84   :  { %v15144_v10 = vld [vmem:[#allocation2 + $0x94] ss:$8 sps:$4 sm:$0xff]   ;;  %v15143_v14 = vld [vmem:[#allocation2 + $0x1a0] ss:$8 sps:$4 sm:$0xff]   ;;  %v15146_v20 = vld [vmem:[#allocation2 + $0x90] ss:$8 sps:$4 sm:$0xff]  }
  0x85   :  { %2109 = vmatpush1.bf16.msra.mxu0 %v15092_v22  ;;  %v201_v62 = vrot.slane %v200_v56, 2  ;;  %v207_v63 = vadd.f32 %v206_v57, %v205_v53  ;;  %v221_v9 = vadd.f32 %v220_v3, %v219_v1  ;;  %v215_v13 = vrot.slane %v214_v7, 2  ;;  %v15147_v16 = vld [vmem:[#allocation2 + $0x194] ss:$8 sps:$4 sm:$0xff]   ;;  %v15150_v22 = vld [vmem:[#allocation2 + $0x84] ss:$8 sps:$4 sm:$0xff]  }
  0x86   :  { %2110 = vmatprep.subr.bf16.mxu0 %v15096_v23  ;;  %2150 = vmatpush1.bf16.msra.mxu1 %v15095_v24 }
  0x87   :  { %2151 = vmatprep.subr.bf16.mxu1 %v15099_v25  ;;  %v202_v5 = vadd.f32 %v201_v62, %v200_v56  ;;  %v208_v6 = vrot.slane %v207_v63, 2  ;;  %v222_v15 = vrot.slane %v221_v9, 2  ;;  %v216_v19 = vadd.f32 %v215_v13, %v214_v7 }
  0x89   :  { %2111 = vmatpush1.bf16.msra.mxu0 %v15098_v26  ;;  %v203_v11 = vrot.slane %v202_v5, 1  ;;  %v209_v12 = vadd.f32 %v208_v6, %v207_v63  ;;  %v223_v21 = vadd.f32 %v222_v15, %v221_v9  ;;  %v217_v25 = vrot.slane %v216_v19, 1  ;;  %v15149_v26 = vld [vmem:[#allocation2 + $0x190] ss:$8 sps:$4 sm:$0xff]  }
  0x8a   :  { %2112 = vmatprep.subr.bf16.mxu0 %v15102_v27  ;;  %2152 = vmatpush1.bf16.msra.mxu1 %v15101_v28  ;;  %v15153_v28 = vld [vmem:[#allocation2 + $0x184] ss:$8 sps:$4 sm:$0xff]  }
  0x8b   :  { %2153 = vmatprep.subr.bf16.mxu1 %v15105_v29  ;;  %v204_v17 = vadd.f32 %v203_v11, %v202_v5  ;;  %v210_v18 = vrot.slane %v209_v12, 1  ;;  %v224_v27 = vrot.slane %v223_v21, 1 }
  0x8d   :  { %2113 = vmatpush1.bf16.msra.mxu0 %v15104_v30  ;;  %v211_v23 = vadd.f32 %v210_v18, %v209_v12  ;;  %v297_v24 = vmul.f32 0.25, %v204_v17  ;;  %v218_v30 = vadd.f32 %v217_v25, %v216_v19  ;;  %v551_v12 = vlaneseq  ;;  %v17841_v25 = vld [vmem:[%s18493_s0 + $0x18] sm:$0xff] }
  0x8e   :  { %2114 = vmatprep.subr.bf16.mxu0 %v15108_v31  ;;  %2154 = vmatpush1.bf16.msra.mxu1 %v15107_v32  ;;  %v15152_v31 = vld [vmem:[#allocation2 + $0x80] ss:$8 sps:$4 sm:$0xff]   ;;  %v225_v32 = vadd.f32 %v224_v27, %v223_v21 }
  0x8f   :  { %2155 = vmatprep.subr.bf16.mxu1 %v15111_v33  ;;  %v298_v29 = vmul.f32 0.25, %v211_v23  ;;  %v17824_v18 = vshrl.u32 %v551_v12, 7 }
  0x91   :  { %2115 = vmatpush2.bf16.msra.mxu0 %v15110_v34  ;;  %v325_v33 = vcombine.low %v297_v24, %v298_v29  ;;  %v15159_v34 = vld [vmem:[#allocation2 + $0x274] ss:$8 sps:$4 sm:$0xff]   ;;  %v17836_v23 = vsub.s32 0, %v17824_v18  ;;  %v240_v29 = vsel %vm197_vm0, %v17841_v25, 0.0 }
  0x92   :  { %2116 = vmatprep.subr.bf16.mxu0 %v15114_v35  ;;  %2156 = vmatpush2.bf16.msra.mxu1 %v15113_v36  ;;  %v299_v35 = vmul.f32 0.25, %v218_v30  ;;  %v15155_v36 = vld [vmem:[#allocation2 + $0x180] ss:$8 sps:$4 sm:$0xff]  }
  0x93   :  { %2157 = vmatprep.subr.bf16.mxu1 %v15117_v37  ;;  %v300_v37 = vmul.f32 0.25, %v225_v32  ;;  %v17851_v30 = vld [vmem:[#allocation12] ss:$2 sm:$0xff] }
  0x95   :  { %2117 = vmatpush2.bf16.msra.mxu0 %v15116_v38  ;;  %v17810_v38 = vsub.f32 %v17792_v46, %v325_v33  ;;  %v241_v33 = vrot.slane %v240_v29, 4 }
  0x96   :  { %2118 = vmatprep.subr.bf16.mxu0 %v15120_v39  ;;  %2158 = vmatpush2.bf16.msra.mxu1 %v15119_v40  ;;  %v15163_v39 = vld [vmem:[#allocation2 + $0x374] ss:$8 sps:$4 sm:$0xff]   ;;  %v326_v40 = vcombine.low %v299_v35, %v300_v37  ;;  %v17854_v35 = vld [vmem:[#allocation12 + $0x1] ss:$2 sm:$0xff] }
  0x97   :  { %2159 = vmatprep.subr.bf16.mxu1 %v15123_v41  ;;  %v346_v41 = vmul.f32 %v17810_v38, %v17810_v38 }
  0x99   :  { %2119 = vmatpush2.bf16.msra.mxu0 %v15122_v42  ;;  %v17815_v42 = vsub.f32 %v17802_v54, %v326_v40 }
  0x9a   :  { %2120 = vmatprep.subr.bf16.mxu0 %v15126_v43  ;;  %2160 = vmatpush2.bf16.msra.mxu1 %v15125_v44  ;;  %v360_v43 = vcombine.high %v346_v41, %v346_v41  ;;  %v374_v44 = vsel %vm197_vm0, %v346_v41, 0.0  ;;  %v554_v41 = vrot.slane %v17851_v30, %v17836_v23 }
  0x9b   :  { %2161 = vmatprep.subr.bf16.mxu1 %v15129_v45  ;;  %v375_v45 = vrot.slane %v374_v44, 4  ;;  %v347_v46 = vmul.f32 %v17815_v42, %v17815_v42 }
  0x9d   :  { %2121 = vmatpush2.bf16.msra.mxu0 %v15128_v47  ;;  %v381_v47 = vsel %vm197_vm0, %v360_v43, 0.0  ;;  %v376_v48 = vadd.f32 %v375_v45, %v374_v44  ;;  %v17861_v44 = vsub.s32 2, %v17824_v18  ;;  %v17864_v45 = vsub.s32 3, %v17824_v18 }
  0x9e   :  { %2122 = vmatprep.subr.bf16.mxu0 %v15132_v51  ;;  %2162 = vmatpush2.bf16.msra.mxu1 %v15131_v50  ;;  %v382_v49 = vrot.slane %v381_v47, 4  ;;  %v361_v50 = vcombine.high %v347_v46, %v347_v46  ;;  %v388_v51 = vsel %vm197_vm0, %v347_v46, 0.0 }
  0x9f   :  { %2163 = vmatprep.subr.bf16.mxu1 %v15135_v55  ;;  %v389_v52 = vrot.slane %v388_v51, 4  ;;  %v377_v53 = vrot.slane %v376_v48, 2 }
  0xa0   :  { %v383_v55 = vadd.f32 %v382_v49, %v381_v47  ;;  %v395_v54 = vsel %vm197_vm0, %v361_v50, 0.0 }
  0xa1   :  { %2123 = vmatpush2.bf16.msra.mxu0 %v15134_v59  ;;  %v390_v56 = vadd.f32 %v389_v52, %v388_v51  ;;  %v396_v57 = vrot.slane %v395_v54, 4  ;;  %v378_v58 = vadd.f32 %v377_v53, %v376_v48  ;;  %v633_v51 = vrot.slane %v17854_v35, %v17836_v23 }
  0xa2   :  { %2124 = vmatprep.subr.bf16.mxu0 %v15138_v60  ;;  %2164 = vmatpush2.bf16.msra.mxu1 %v15137_v2  ;;  %v384_v59 = vrot.slane %v383_v55, 2 }
  0xa3   :  { %2165 = vmatprep.subr.bf16.mxu1 %v15141_v4  ;;  %v391_v60 = vrot.slane %v390_v56, 2  ;;  %v397_v61 = vadd.f32 %v396_v57, %v395_v54  ;;  %v379_v62 = vrot.slane %v378_v58, 1 }
  0xa4   :  { %v385_v63 = vadd.f32 %v384_v59, %v383_v55  ;;  %v562_v59 = vrot.slane %v17851_v30, %v17861_v44 }
  0xa5   :  { %2125 = vmatpush2.bf16.msra.mxu0 %v15140_v8  ;;  %v392_v0 = vadd.f32 %v391_v60, %v390_v56  ;;  %v398_v1 = vrot.slane %v397_v61, 2  ;;  %v380_v2 = vadd.f32 %v379_v62, %v378_v58  ;;  %v566_v60 = vrot.slane %v17851_v30, %v17864_v45 }
  0xa6   :  { %2126 = vmatprep.subr.bf16.mxu0 %v15144_v10  ;;  %2166 = vmatpush2.bf16.msra.mxu1 %v15143_v14  ;;  %v386_v3 = vrot.slane %v385_v63, 1 }
  0xa7   :  { %2167 = vmatprep.subr.bf16.mxu1 %v15147_v16  ;;  %v393_v4 = vrot.slane %v392_v0, 1  ;;  %v399_v5 = vadd.f32 %v398_v1, %v397_v61  ;;  %v472_v7 = vmul.f32 0.25, %v380_v2 }
  0xa8   :  { %v387_v6 = vadd.f32 %v386_v3, %v385_v63  ;;  %v641_v3 = vrot.slane %v17854_v35, %v17861_v44 }
  0xa9   :  { %2127 = vmatpush2.bf16.msra.mxu0 %v15146_v20  ;;  %v394_v8 = vadd.f32 %v393_v4, %v392_v0  ;;  %v400_v9 = vrot.slane %v399_v5, 1  ;;  %v486_v11 = vadd.f32 1e-05, %v472_v7  ;;  %v17829_v20 = vld [vmem:[%s18493_s0 + $0x10] sm:$0xff]  ;;  %v645_v4 = vrot.slane %v17854_v35, %v17864_v45 }
  0xaa   :  { %2128 = vmatprep.subr.bf16.mxu0 %v15150_v22  ;;  %2168 = vmatpush2.bf16.msra.mxu1 %v15149_v26  ;;  %v473_v10 = vmul.f32 0.25, %v387_v6  ;;  %v185_v21 = vcombine.high %v17829_v20, %v17829_v20  ;;  %v226_v22 = vsel %vm197_vm0, %v17829_v20, 0.0  ;;  %v17844_v26 = vsub.s32 1, %v17824_v18 }
  0xab   :  { %2169 = vmatprep.subr.bf16.mxu1 %v15153_v28  ;;  %v401_v13 = vadd.f32 %v400_v9, %v399_v5  ;;  %v474_v14 = vmul.f32 0.25, %v394_v8  ;;  %17404 = vrsqrt.f32 %v486_v11  ;;  %v227_v24 = vrot.slane %v226_v22, 4 }
  0xac   :  { %v487_v15 = vadd.f32 1e-05, %v473_v10  ;;  %v233_v27 = vsel %vm197_vm0, %v185_v21, 0.0  ;;  %v186_v28 = vcombine.high %v17841_v25, %v17841_v25  ;;  %v558_v43 = vrot.slane %v17851_v30, %v17844_v26 }
  0xad   :  { %2129 = vmatpush2.bf16.msra.mxu0 %v15152_v31  ;;  %v475_v16 = vmul.f32 0.25, %v401_v13  ;;  %v488_v17 = vadd.f32 1e-05, %v474_v14  ;;  %v228_v31 = vadd.f32 %v227_v24, %v226_v22  ;;  %v234_v32 = vrot.slane %v233_v27, 4 }
  0xae   :  { %2180 = vmatprep.subr.bf16.mxu0 %v15159_v34  ;;  %2170 = vmatpush2.bf16.msra.mxu1 %v15155_v36  ;;  %17406 = vrsqrt.f32 %v487_v15  ;;  %v247_v34 = vsel %vm197_vm0, %v186_v28, 0.0  ;;  %v637_v52 = vrot.slane %v17854_v35, %v17844_v26  ;;  %v607_v58 = vcombine.low %v554_v41, %v558_v43 }
  0xaf   :  { %2221 = vmatprep.subr.bf16.mxu1 %v15163_v39  ;;  %v489_v19 = vadd.f32 1e-05, %v475_v16  ;;  %17408 = vrsqrt.f32 %v488_v17  ;;  %v229_v36 = vrot.slane %v228_v31, 2  ;;  %v235_v37 = vadd.f32 %v234_v32, %v233_v27 }
  0xb0   :  { %v242_v39 = vadd.f32 %v241_v33, %v240_v29  ;;  %v248_v40 = vrot.slane %v247_v34, 4  ;;  %v686_v2 = vcombine.low %v633_v51, %v637_v52  ;;  %v608_v13 = vcombine.low %v562_v59, %v566_v60  ;;  %v15164_v51 = vld [vmem:[#allocation2 + $0x260] ss:$8 sps:$4 sm:$0xff]   ;;  %v15170_v60 = vld [vmem:[#allocation2 + $0x250] ss:$8 sps:$4 sm:$0xff]  }
  0xb1   :  { %17410 = vrsqrt.f32 %v489_v19  ;;  %v230_v46 = vadd.f32 %v229_v36, %v228_v31  ;;  %v236_v47 = vrot.slane %v235_v37, 2  ;;  %v687_v19 = vcombine.low %v641_v3, %v645_v4  ;;  %v15167_v59 = vld [vmem:[#allocation2 + $0x360] ss:$8 sps:$4 sm:$0xff]   ;;  %v15178_v3 = vld [vmem:[#allocation2 + $0x244] ss:$8 sps:$4 sm:$0xff]  }
  0xb2   :  { %v243_v48 = vrot.slane %v242_v39, 2  ;;  %v249_v49 = vadd.f32 %v248_v40, %v247_v34  ;;  %v15166_v40 = vld [vmem:[#allocation2 + $0x264] ss:$8 sps:$4 sm:$0xff]  }
  0xb3   :  { %v231_v53 = vrot.slane %v230_v46, 1  ;;  %v237_v55 = vadd.f32 %v236_v47, %v235_v37  ;;  %v15157_v37 = vld [vmem:[#allocation2 + $0x270] ss:$8 sps:$4 sm:$0xff]  }
  0xb4   :  { %v244_v54 = vadd.f32 %v243_v48, %v242_v39  ;;  %v250_v56 = vrot.slane %v249_v49, 2  ;;  %v15161_v48 = vld [vmem:[#allocation2 + $0x370] ss:$8 sps:$4 sm:$0xff]  }
  0xb5   :  { %v232_v63 = vadd.f32 %v231_v53, %v230_v46  ;;  %v238_v0 = vrot.slane %v237_v55, 1  ;;  %v15172_v53 = vld [vmem:[#allocation2 + $0x254] ss:$8 sps:$4 sm:$0xff]  }
  0xb6   :  { %v245_v1 = vrot.slane %v244_v54, 1  ;;  %v251_v5 = vadd.f32 %v250_v56, %v249_v49 }
  0xb7   :  { %v239_v8 = vadd.f32 %v238_v0, %v237_v55  ;;  %v301_v9 = vmul.f32 0.25, %v232_v63  ;;  %v15175_v0 = vld [vmem:[#allocation2 + $0x354] ss:$8 sps:$4 sm:$0xff]  }
  0xb8   :  { %v17405_v50 = vpop.eup %17404  ;;  %v246_v10 = vadd.f32 %v245_v1, %v244_v54  ;;  %v252_v14 = vrot.slane %v251_v5, 1 }
  0xb9   :  { %v302_v16 = vmul.f32 0.25, %v239_v8  ;;  %v15173_v8 = vld [vmem:[#allocation2 + $0x350] ss:$8 sps:$4 sm:$0xff]  }
  0xba   :  { %v253_v21 = vadd.f32 %v252_v14, %v251_v5  ;;  %v303_v22 = vmul.f32 0.25, %v246_v10 }
  0xbb   :  { %v17407_v57 = vpop.eup %17406  ;;  %v327_v27 = vcombine.low %v301_v9, %v302_v16  ;;  %v15176_v9 = vld [vmem:[#allocation2 + $0x240] ss:$8 sps:$4 sm:$0xff]   ;;  %v15184_v16 = vld [vmem:[#allocation2 + $0x234] ss:$8 sps:$4 sm:$0xff]  }
  0xbc   :  { %v17409_v61 = vpop.eup %17408  ;;  %v528_v62 = vcombine.low %v17405_v50, %v17407_v57  ;;  %v304_v29 = vmul.f32 0.25, %v253_v21 }
  0xbe   :  { %v17411_v6 = vpop.eup %17410  ;;  %v542_v7 = vmul.f32 %v528_v62, %v17810_v38  ;;  %v17881_v38 = vsub.f32 %v17829_v20, %v327_v27  ;;  %v328_v34 = vcombine.low %v303_v22, %v304_v29  ;;  %v15182_v27 = vld [vmem:[#allocation2 + $0x230] ss:$8 sps:$4 sm:$0xff]  }
  0xbf   :  { %v529_v11 = vcombine.low %v17409_v61, %v17411_v6 }
  0xc0   :  { %v621_v15 = vmul.f32 %v607_v58, %v542_v7  ;;  %v17890_v41 = vsub.f32 %v17841_v25, %v328_v34  ;;  %v15169_v25 = vld [vmem:[#allocation2 + $0x364] ss:$8 sps:$4 sm:$0xff]  }
  0xc1   :  { %v543_v17 = vmul.f32 %v529_v11, %v17815_v42  ;;  %v348_v42 = vmul.f32 %v17881_v38, %v17881_v38 }
  0xc2   :  { %v700_v24 = vadd.f32 %v686_v2, %v621_v15  ;;  %v349_v50 = vmul.f32 %v17890_v41, %v17890_v41 }
  0xc3   :  { %v622_v28 = vmul.f32 %v608_v13, %v543_v17  ;;  %v362_v20 = vcombine.high %v348_v42, %v348_v42  ;;  %v402_v46 = vsel %vm197_vm0, %v348_v42, 0.0  ;;  %v15181_v13 = vld [vmem:[#allocation2 + $0x344] ss:$8 sps:$4 sm:$0xff]  }
  0xc4   :  { %v714_v31 = vcombine.high %v700_v24, %v700_v24  ;;  %v17883_v32 = vpack.c.bf16 %v700_v24, %v700_v24  ;;  %v403_v49 = vrot.slane %v402_v46, 4  ;;  %v363_v56 = vcombine.high %v349_v50, %v349_v50  ;;  %v15179_v24 = vld [vmem:[#allocation2 + $0x340] ss:$8 sps:$4 sm:$0xff]  }
  0xc5   :  { %v701_v33 = vadd.f32 %v687_v19, %v622_v28  ;;  %v409_v52 = vsel %vm197_vm0, %v362_v20, 0.0  ;;  %v416_v57 = vsel %vm197_vm0, %v349_v50, 0.0  ;;  %v15193_v50 = vld [vmem:[#allocation2 + $0x324] ss:$8 sps:$4 sm:$0xff]  }
  0xc6   :  { %v17885_v36 = vpack.c.bf16 %v714_v31, %v714_v31  ;;  %v404_v55 = vadd.f32 %v403_v49, %v402_v46  ;;  %v410_v54 = vrot.slane %v409_v52, 4  ;;  %v417_v58 = vrot.slane %v416_v57, 4  ;;  %v15187_v31 = vld [vmem:[#allocation2 + $0x334] ss:$8 sps:$4 sm:$0xff]  }
  0xc7   :  { %v715_v39 = vcombine.high %v701_v33, %v701_v33  ;;  %v17893_v43 = vpack.c.bf16 %v701_v33, %v701_v33  ;;  %v423_v63 = vsel %vm197_vm0, %v363_v56, 0.0  ;;  %v17909_v56 = vld [vmem:[%s18493_s0 + $0x20] sm:$0xff] }
  0xc8   :  { %2130 = vmatprep.mubr.bf16.mxu0 %v17885_v36  ;;  %v405_v61 = vrot.slane %v404_v55, 2  ;;  %v411_v62 = vadd.f32 %v410_v54, %v409_v52  ;;  %v418_v1 = vadd.f32 %v417_v58, %v416_v57  ;;  %v424_v2 = vrot.slane %v423_v63, 4  ;;  %v15196_v52 = vld [vmem:[#allocation2 + $0x214] ss:$8 sps:$4 sm:$0xff]   ;;  %v15194_v54 = vld [vmem:[#allocation2 + $0x210] ss:$8 sps:$4 sm:$0xff]  }
  0xc9   :  { %2131 = vmatmul.mubr.bf16.vlgmr.msra.gmra.mxu0 %v17883_v32  ;;  %v17897_v47 = vpack.c.bf16 %v715_v39, %v715_v39  ;;  %v15199_v57 = vld [vmem:[#allocation2 + $0x314] ss:$8 sps:$4 sm:$0xff]   ;;  %v187_v58 = vcombine.high %v17909_v56, %v17909_v56 }
  0xca   :  { %2181 = vmatpush1.bf16.msra.mxu0 %v15157_v37  ;;  %v406_v4 = vadd.f32 %v405_v61, %v404_v55  ;;  %v412_v5 = vrot.slane %v411_v62, 2  ;;  %v419_v6 = vrot.slane %v418_v1, 2  ;;  %v425_v7 = vadd.f32 %v424_v2, %v423_v63  ;;  %v15190_v37 = vld [vmem:[#allocation2 + $0x224] ss:$8 sps:$4 sm:$0xff]   ;;  %v15191_v55 = vld [vmem:[#allocation2 + $0x320] ss:$8 sps:$4 sm:$0xff]  }
  0xcb   :  { %2171 = vmatprep.mubr.bf16.mxu1 %v17897_v47  ;;  %2182 = vmatprep.subr.bf16.mxu0 %v15166_v40  ;;  %v15185_v40 = vld [vmem:[#allocation2 + $0x330] ss:$8 sps:$4 sm:$0xff]   ;;  %v17916_v61 = vsub.s32 4, %v17824_v18  ;;  %v17921_v63 = vld [vmem:[%s18493_s0 + $0x28] sm:$0xff] }
  0xcc   :  { %2172 = vmatmul.mubr.bf16.vlgmr.msra.gmra.mxu1 %v17893_v43  ;;  %v407_v10 = vrot.slane %v406_v4, 1  ;;  %v413_v11 = vadd.f32 %v412_v5, %v411_v62  ;;  %v420_v14 = vadd.f32 %v419_v6, %v418_v1  ;;  %v426_v15 = vrot.slane %v425_v7, 2 }
  0xcd   :  { %2222 = vmatpush1.bf16.msra.mxu1 %v15161_v48  ;;  %v15188_v48 = vld [vmem:[#allocation2 + $0x220] ss:$8 sps:$4 sm:$0xff]   ;;  %v261_v1 = vsel %vm197_vm0, %v187_v58, 0.0  ;;  %v188_v2 = vcombine.high %v17921_v63, %v17921_v63  ;;  %v17932_v5 = vsub.s32 6, %v17824_v18 }
  0xce   :  { %2183 = vmatpush1.bf16.msra.mxu0 %v15164_v51  ;;  %2223 = vmatprep.subr.bf16.mxu1 %v15169_v25  ;;  %v408_v17 = vadd.f32 %v407_v10, %v406_v4  ;;  %v414_v19 = vrot.slane %v413_v11, 1  ;;  %v421_v21 = vrot.slane %v420_v14, 1  ;;  %v427_v22 = vadd.f32 %v426_v15, %v425_v7  ;;  %v15197_v4 = vld [vmem:[#allocation2 + $0x310] ss:$8 sps:$4 sm:$0xff]  }
  0xcf   :  { %2184 = vmatprep.subr.bf16.mxu0 %v15172_v53  ;;  %v262_v7 = vrot.slane %v261_v1, 4 }
  0xd0   :  { %v415_v28 = vadd.f32 %v414_v19, %v413_v11  ;;  %v476_v29 = vmul.f32 0.25, %v408_v17  ;;  %v422_v33 = vadd.f32 %v421_v21, %v420_v14  ;;  %v428_v34 = vrot.slane %v427_v22, 1 }
  0xd1   :  { %2224 = vmatpush1.bf16.msra.mxu1 %v15167_v59  ;;  %v254_v59 = vsel %vm197_vm0, %v17909_v56, 0.0  ;;  %v275_v11 = vsel %vm197_vm0, %v188_v2, 0.0  ;;  %v263_v15 = vadd.f32 %v262_v7, %v261_v1  ;;  %v570_v17 = vrot.slane %v17851_v30, %v17916_v61 }
  0xd2   :  { %2185 = vmatpush1.bf16.msra.mxu0 %v15170_v60  ;;  %2225 = vmatprep.subr.bf16.mxu1 %v15175_v0  ;;  %v477_v42 = vmul.f32 0.25, %v415_v28  ;;  %v490_v39 = vadd.f32 1e-05, %v476_v29  ;;  %v429_v20 = vadd.f32 %v428_v34, %v427_v22  ;;  %v478_v46 = vmul.f32 0.25, %v422_v33  ;;  %v15202_v60 = vld [vmem:[#allocation2 + $0x204] ss:$8 sps:$4 sm:$0xff]  }
  0xd3   :  { %2186 = vmatprep.subr.bf16.mxu0 %v15178_v3  ;;  %v255_v62 = vrot.slane %v254_v59, 4  ;;  %v17924_v0 = vsub.s32 5, %v17824_v18  ;;  %v268_v3 = vsel %vm197_vm0, %v17921_v63, 0.0  ;;  %v17940_v21 = vsub.s32 7, %v17824_v18  ;;  %v15206_v33 = vld [vmem:[#allocation2 + $0x2f0] ss:$8 sps:$4 sm:$0xff]  }
  0xd4   :  { %v491_v49 = vadd.f32 1e-05, %v477_v42  ;;  %17412 = vrsqrt.f32 %v490_v39  ;;  %v479_v51 = vmul.f32 0.25, %v429_v20  ;;  %v492_v25 = vadd.f32 1e-05, %v478_v46 }
  0xd5   :  { %2226 = vmatpush1.bf16.msra.mxu1 %v15173_v8  ;;  %v256_v6 = vadd.f32 %v255_v62, %v254_v59  ;;  %v15200_v8 = vld [vmem:[#allocation2 + $0x200] ss:$8 sps:$4 sm:$0xff]   ;;  %v269_v10 = vrot.slane %v268_v3, 4  ;;  %v574_v19 = vrot.slane %v17851_v30, %v17924_v0  ;;  %v264_v28 = vrot.slane %v263_v15, 2  ;;  %v15211_v34 = vld [vmem:[#allocation2 + $0x3f4] ss:$8 sps:$4 sm:$0xff]  }
  0xd6   :  { %2187 = vmatpush1.bf16.msra.mxu0 %v15176_v9  ;;  %2227 = vmatprep.subr.bf16.mxu1 %v15181_v13  ;;  %17414 = vrsqrt.f32 %v491_v49  ;;  %v493_v53 = vadd.f32 1e-05, %v479_v51  ;;  %v15205_v9 = vld [vmem:[#allocation2 + $0x304] ss:$8 sps:$4 sm:$0xff]   ;;  %v15208_v13 = vld [vmem:[#allocation2 + $0x2f4] ss:$8 sps:$4 sm:$0xff]   ;;  %v653_v42 = vrot.slane %v17854_v35, %v17924_v0  ;;  %v582_v51 = vrot.slane %v17851_v30, %v17940_v21 }
  0xd7   :  { %2188 = vmatprep.subr.bf16.mxu0 %v15184_v16  ;;  %17416 = vrsqrt.f32 %v492_v25  ;;  %v257_v14 = vrot.slane %v256_v6, 2  ;;  %v276_v16 = vrot.slane %v275_v11, 4  ;;  %v270_v22 = vadd.f32 %v269_v10, %v268_v3  ;;  %v15214_v18 = vld [vmem:[#allocation2 + $0x2e4] ss:$8 sps:$4 sm:$0xff]   ;;  %v15212_v59 = vld [vmem:[#allocation2 + $0x2e0] ss:$8 sps:$4 sm:$0xff]  }
  0xd8   :  { %17418 = vrsqrt.f32 %v493_v53  ;;  %v265_v20 = vadd.f32 %v264_v28, %v263_v15  ;;  %v609_v49 = vcombine.low %v570_v17, %v574_v19  ;;  %v15209_v53 = vld [vmem:[#allocation2 + $0x3f0] ss:$8 sps:$4 sm:$0xff]   ;;  %v657_v1 = vrot.slane %v17854_v35, %v17932_v5 }
  0xd9   :  { %2228 = vmatpush1.bf16.msra.mxu1 %v15179_v24  ;;  %v15203_v24 = vld [vmem:[#allocation2 + $0x300] ss:$8 sps:$4 sm:$0xff]   ;;  %v277_v29 = vadd.f32 %v276_v16, %v275_v11  ;;  %v271_v39 = vrot.slane %v270_v22, 2  ;;  %v661_v2 = vrot.slane %v17854_v35, %v17940_v21  ;;  %v15218_v11 = vld [vmem:[#allocation2 + $0x2d0] ss:$8 sps:$4 sm:$0xff]  }
  0xda   :  { %2189 = vmatpush1.bf16.msra.mxu0 %v15182_v27  ;;  %2229 = vmatprep.subr.bf16.mxu1 %v15187_v31  ;;  %v258_v27 = vadd.f32 %v257_v14, %v256_v6  ;;  %v15220_v6 = vld [vmem:[#allocation2 + $0x2d4] ss:$8 sps:$4 sm:$0xff]  }
  0xdb   :  { %2190 = vmatprep.subr.bf16.mxu0 %v15190_v37  ;;  %v649_v37 = vrot.slane %v17854_v35, %v17916_v61  ;;  %v278_v46 = vrot.slane %v277_v29, 2  ;;  %v272_v25 = vadd.f32 %v271_v39, %v270_v22  ;;  %v15223_v35 = vld [vmem:[#allocation2 + $0x3d4] ss:$8 sps:$4 sm:$0xff]   ;;  %v15226_v22 = vld [vmem:[#allocation2 + $0x2c4] ss:$8 sps:$4 sm:$0xff]  }
  0xdd   :  { %2230 = vmatpush1.bf16.msra.mxu1 %v15185_v40  ;;  %v259_v40 = vrot.slane %v258_v27, 1  ;;  %v279_v58 = vadd.f32 %v278_v46, %v277_v29  ;;  %v688_v62 = vcombine.low %v649_v37, %v653_v42 }
  0xde   :  { %2191 = vmatpush1.bf16.msra.mxu0 %v15188_v48  ;;  %2231 = vmatprep.subr.bf16.mxu1 %v15193_v50  ;;  %v578_v50 = vrot.slane %v17851_v30, %v17932_v5  ;;  %v273_v30 = vrot.slane %v272_v25, 1 }
  0xdf   :  { %2192 = vmatprep.subr.bf16.mxu0 %v15196_v52  ;;  %v280_v10 = vrot.slane %v279_v58, 1 }
  0xe0   :  { %v610_v14 = vcombine.low %v578_v50, %v582_v51  ;;  %v274_v15 = vadd.f32 %v273_v30, %v272_v25 }
  0xe1   :  { %2232 = vmatpush1.bf16.msra.mxu1 %v15191_v55  ;;  %v17413_v31 = vpop.eup %17412  ;;  %v281_v19 = vadd.f32 %v280_v10, %v279_v58 }
  0xe2   :  { %2193 = vmatpush1.bf16.msra.mxu0 %v15194_v54  ;;  %2233 = vmatprep.subr.bf16.mxu1 %v15199_v57  ;;  %v260_v54 = vadd.f32 %v259_v40, %v258_v27  ;;  %v266_v57 = vrot.slane %v265_v20, 1  ;;  %v689_v27 = vcombine.low %v657_v1, %v661_v2  ;;  %v307_v28 = vmul.f32 0.25, %v274_v15  ;;  %v15229_v40 = vld [vmem:[#allocation2 + $0x3c4] ss:$8 sps:$4 sm:$0xff]  }
  0xe3   :  { %2194 = vmatprep.subr.bf16.mxu0 %v15202_v60  ;;  %v17415_v48 = vpop.eup %17414  ;;  %v15217_v60 = vld [vmem:[#allocation2 + $0x3e4] ss:$8 sps:$4 sm:$0xff]  }
  0xe4   :  { %v17417_v52 = vpop.eup %17416  ;;  %v530_v55 = vcombine.low %v17413_v31, %v17415_v48 }
  0xe5   :  { %2234 = vmatpush1.bf16.msra.mxu1 %v15197_v4  ;;  %v17419_v3 = vpop.eup %17418  ;;  %v15215_v4 = vld [vmem:[#allocation2 + $0x3e0] ss:$8 sps:$4 sm:$0xff]  }
  0xe6   :  { %2195 = vmatpush1.bf16.msra.mxu0 %v15200_v8  ;;  %2235 = vmatprep.subr.bf16.mxu1 %v15205_v9  ;;  %v544_v7 = vmul.f32 %v530_v55, %v17881_v38  ;;  %v267_v8 = vadd.f32 %v266_v57, %v265_v20  ;;  %v305_v9 = vmul.f32 0.25, %v260_v54  ;;  %v15221_v38 = vld [vmem:[#allocation2 + $0x3d0] ss:$8 sps:$4 sm:$0xff]   ;;  %v15232_v20 = vld [vmem:[#allocation2 + $0x2b4] ss:$8 sps:$4 sm:$0xff]  }
  0xe7   :  { %2196 = vmatprep.subr.bf16.mxu0 %v15208_v13  ;;  %v531_v13 = vcombine.low %v17417_v52, %v17419_v3  ;;  %v15233_v3 = vld [vmem:[#allocation2 + $0x3b0] ss:$8 sps:$4 sm:$0xff]  }
  0xe8   :  { %v623_v16 = vmul.f32 %v609_v49, %v544_v7  ;;  %v306_v17 = vmul.f32 0.25, %v267_v8 }
  0xe9   :  { %2236 = vmatpush1.bf16.msra.mxu1 %v15203_v24  ;;  %v545_v24 = vmul.f32 %v531_v13, %v17890_v41  ;;  %v17966_v41 = vld [vmem:[%s18493_s0 + $0x30] sm:$0xff] }
  0xea   :  { %2197 = vmatpush2.bf16.msra.mxu0 %v15206_v33  ;;  %2237 = vmatprep.subr.bf16.mxu1 %v15211_v34  ;;  %v17956_v29 = vadd.f32 %v688_v62, %v623_v16  ;;  %v329_v31 = vcombine.low %v305_v9, %v306_v17  ;;  %v308_v33 = vmul.f32 0.25, %v281_v19  ;;  %v15224_v34 = vld [vmem:[#allocation2 + $0x2c0] ss:$8 sps:$4 sm:$0xff]   ;;  %v189_v48 = vcombine.high %v17966_v41, %v17966_v41  ;;  %v15238_v62 = vld [vmem:[#allocation2 + $0x2a4] ss:$8 sps:$4 sm:$0xff]  }
  0xeb   :  { %2198 = vmatprep.subr.bf16.mxu0 %v15214_v18  ;;  %v624_v37 = vmul.f32 %v610_v14, %v545_v24  ;;  %v282_v49 = vsel %vm197_vm0, %v17966_v41, 0.0  ;;  %v15236_v9 = vld [vmem:[#allocation2 + $0x2a0] ss:$8 sps:$4 sm:$0xff]   ;;  %v15241_v17 = vld [vmem:[#allocation2 + $0x3a4] ss:$8 sps:$4 sm:$0xff]  }
  0xec   :  { %v716_v42 = vcombine.high %v17956_v29, %v17956_v29  ;;  %v17961_v39 = vsub.f32 %v17909_v56, %v329_v31  ;;  %v330_v18 = vcombine.low %v307_v28, %v308_v33  ;;  %v15227_v56 = vld [vmem:[#allocation2 + $0x3c0] ss:$8 sps:$4 sm:$0xff]   ;;  %v283_v52 = vrot.slane %v282_v49, 4  ;;  %v15244_v19 = vld [vmem:[#allocation2 + $0x294] ss:$8 sps:$4 sm:$0xff]  }
  0xed   :  { %2238 = vmatpush2.bf16.msra.mxu1 %v15209_v53  ;;  %v17968_v46 = vadd.f32 %v689_v27, %v624_v37  ;;  %v15230_v53 = vld [vmem:[#allocation2 + $0x2b0] ss:$8 sps:$4 sm:$0xff]   ;;  %v289_v54 = vsel %vm197_vm0, %v189_v48, 0.0  ;;  %v15239_v28 = vld [vmem:[#allocation2 + $0x3a0] ss:$8 sps:$4 sm:$0xff]  }
  0xee   :  { %2199 = vmatpush2.bf16.msra.mxu0 %v15212_v59  ;;  %2239 = vmatprep.subr.bf16.mxu1 %v15217_v60  ;;  %v17974_v50 = vpack.c.bf16 %v716_v42, %v716_v42  ;;  %v350_v51 = vmul.f32 %v17961_v39, %v17961_v39  ;;  %v17979_v25 = vsub.f32 %v17921_v63, %v330_v18  ;;  %v15235_v63 = vld [vmem:[#allocation2 + $0x3b4] ss:$8 sps:$4 sm:$0xff]   ;;  %v290_v30 = vrot.slane %v289_v54, 4  ;;  %v15242_v33 = vld [vmem:[#allocation2 + $0x290] ss:$8 sps:$4 sm:$0xff]  }
  0xef   :  { %2200 = vmatprep.subr.bf16.mxu0 %v15220_v6  ;;  %v717_v55 = vcombine.high %v17968_v46, %v17968_v46  ;;  %v284_v60 = vadd.f32 %v283_v52, %v282_v49  ;;  %v15247_v48 = vld [vmem:[#allocation2 + $0x394] ss:$8 sps:$4 sm:$0xff]   ;;  %v15250_v49 = vld [vmem:[#allocation2 + $0x284] ss:$8 sps:$4 sm:$0xff]  }
  0xf0   :  { %2212 = vmatprep.mubr.bf16.mxu0 %v17974_v50  ;;  %v364_v57 = vcombine.high %v350_v51, %v350_v51  ;;  %v430_v58 = vsel %vm197_vm0, %v350_v51, 0.0  ;;  %v351_v59 = vmul.f32 %v17979_v25, %v17979_v25  ;;  %v291_v14 = vadd.f32 %v290_v30, %v289_v54  ;;  %v15253_v30 = vld [vmem:[#allocation2 + $0x384] ss:$8 sps:$4 sm:$0xff]  }
  0xf1   :  { %2240 = vmatpush2.bf16.msra.mxu1 %v15215_v4  ;;  %v17988_v1 = vpack.c.bf16 %v717_v55, %v717_v55  ;;  %v431_v2 = vrot.slane %v430_v58, 4  ;;  %v285_v8 = vrot.slane %v284_v60, 2  ;;  %v15245_v55 = vld [vmem:[#allocation2 + $0x390] ss:$8 sps:$4 sm:$0xff]  }
  0xf2   :  { %2201 = vmatpush2.bf16.msra.mxu0 %v15218_v11  ;;  %2241 = vmatprep.subr.bf16.mxu1 %v15223_v35  ;;  %v437_v4 = vsel %vm197_vm0, %v364_v57, 0.0  ;;  %v365_v6 = vcombine.high %v351_v59, %v351_v59  ;;  %v444_v7 = vsel %vm197_vm0, %v351_v59, 0.0  ;;  %v292_v31 = vrot.slane %v291_v14, 2  ;;  %v15248_v57 = vld [vmem:[#allocation2 + $0x280] ss:$8 sps:$4 sm:$0xff]  }
  0xf3   :  { %2202 = vmatprep.subr.bf16.mxu0 %v15226_v22  ;;  %2253 = vmatprep.mubr.bf16.mxu1 %v17988_v1  ;;  %v432_v10 = vadd.f32 %v431_v2, %v430_v58  ;;  %v438_v11 = vrot.slane %v437_v4, 4  ;;  %v445_v13 = vrot.slane %v444_v7, 4  ;;  %v286_v16 = vadd.f32 %v285_v8, %v284_v60 }
  0xf4   :  { %v451_v15 = vsel %vm197_vm0, %v365_v6, 0.0 }
  0xf5   :  { %2242 = vmatpush2.bf16.msra.mxu1 %v15221_v38  ;;  %v433_v35 = vrot.slane %v432_v10, 2  ;;  %v439_v22 = vadd.f32 %v438_v11, %v437_v4  ;;  %v446_v24 = vadd.f32 %v445_v13, %v444_v7  ;;  %v452_v27 = vrot.slane %v451_v15, 4  ;;  %v15255_v11 = vld [vmem:[#allocation2 + $0x470] ss:$8 sps:$4 sm:$0xff]   ;;  %v15261_v13 = vld [vmem:[#allocation2 + $0x574] ss:$8 sps:$4 sm:$0xff]  }
  0xf6   :  { %2203 = vmatpush2.bf16.msra.mxu0 %v15224_v34  ;;  %2243 = vmatprep.subr.bf16.mxu1 %v15229_v40  ;;  %v287_v38 = vrot.slane %v286_v16, 1 }
  0xf7   :  { %2204 = vmatprep.subr.bf16.mxu0 %v15232_v20  ;;  %v434_v34 = vadd.f32 %v433_v35, %v432_v10  ;;  %v440_v37 = vrot.slane %v439_v22, 2  ;;  %v447_v42 = vrot.slane %v446_v24, 2  ;;  %v453_v18 = vadd.f32 %v452_v27, %v451_v15  ;;  %v15264_v35 = vld [vmem:[#allocation2 + $0x464] ss:$8 sps:$4 sm:$0xff]  }
  0xf8   :  { %v288_v40 = vadd.f32 %v287_v38, %v286_v16  ;;  %v293_v20 = vadd.f32 %v292_v31, %v291_v14  ;;  %v15259_v38 = vld [vmem:[#allocation2 + $0x570] ss:$8 sps:$4 sm:$0xff]  }
  0xf9   :  { %2244 = vmatpush2.bf16.msra.mxu1 %v15227_v56  ;;  %v435_v56 = vrot.slane %v434_v34, 1  ;;  %v441_v51 = vadd.f32 %v440_v37, %v439_v22  ;;  %v448_v52 = vadd.f32 %v447_v42, %v446_v24  ;;  %v15270_v42 = vld [vmem:[#allocation2 + $0x454] ss:$8 sps:$4 sm:$0xff]  }
  0xfa   :  { %2205 = vmatpush2.bf16.msra.mxu0 %v15230_v53  ;;  %2245 = vmatprep.subr.bf16.mxu1 %v15235_v63  ;;  %v454_v53 = vrot.slane %v453_v18, 2  ;;  %v294_v54 = vrot.slane %v293_v20, 1  ;;  %v309_v2 = vmul.f32 0.25, %v288_v40 }
  0xfb   :  { %2206 = vmatprep.subr.bf16.mxu0 %v15238_v62  ;;  %v436_v58 = vadd.f32 %v435_v56, %v434_v34  ;;  %v442_v59 = vrot.slane %v441_v51, 1  ;;  %v449_v60 = vrot.slane %v448_v52, 1  ;;  %v15262_v34 = vld [vmem:[#allocation2 + $0x460] ss:$8 sps:$4 sm:$0xff]  }
  0xfc   :  { %v455_v63 = vadd.f32 %v454_v53, %v453_v18  ;;  %v295_v62 = vadd.f32 %v294_v54, %v293_v20  ;;  %v15268_v20 = vld [vmem:[#allocation2 + $0x450] ss:$8 sps:$4 sm:$0xff]  }
  0xfd   :  { %2246 = vmatpush2.bf16.msra.mxu1 %v15233_v3  ;;  %v15257_v3 = vld [vmem:[#allocation2 + $0x474] ss:$8 sps:$4 sm:$0xff]   ;;  %v443_v4 = vadd.f32 %v442_v59, %v441_v51  ;;  %v480_v6 = vmul.f32 0.25, %v436_v58  ;;  %v450_v7 = vadd.f32 %v449_v60, %v448_v52  ;;  %v15276_v51 = vld [vmem:[#allocation2 + $0x444] ss:$8 sps:$4 sm:$0xff]  }
  0xfe   :  { %2207 = vmatpush2.bf16.msra.mxu0 %v15236_v9  ;;  %2247 = vmatprep.subr.bf16.mxu1 %v15241_v17  ;;  %v456_v8 = vrot.slane %v455_v63, 1  ;;  %v15251_v9 = vld [vmem:[#allocation2 + $0x380] ss:$8 sps:$4 sm:$0xff]   ;;  %v310_v10 = vmul.f32 0.25, %v295_v62  ;;  %v15279_v59 = vld [vmem:[#allocation2 + $0x544] ss:$8 sps:$4 sm:$0xff]  }
  0xff   :  { %2208 = vmatprep.subr.bf16.mxu0 %v15244_v19  ;;  %v481_v14 = vmul.f32 0.25, %v443_v4  ;;  %v494_v15 = vadd.f32 1e-05, %v480_v6  ;;  %v482_v17 = vmul.f32 0.25, %v450_v7  ;;  %v17996_v19 = vpack.c.bf16 %v17956_v29, %v17956_v29  ;;  %v15267_v29 = vld [vmem:[#allocation2 + $0x564] ss:$8 sps:$4 sm:$0xff]  }
 0x100   :  { %v457_v16 = vadd.f32 %v456_v8, %v455_v63  ;;  %v331_v22 = vcombine.low %v309_v2, %v310_v10  ;;  %v18013_v53 = vld [vmem:[#allocation12 + $0x11] ss:$2 sm:$0x3f]  ;;  %v15274_v58 = vld [vmem:[#allocation2 + $0x440] ss:$8 sps:$4 sm:$0xff]  }
 0x101   :  { %2248 = vmatpush2.bf16.msra.mxu1 %v15239_v28  ;;  %v495_v24 = vadd.f32 1e-05, %v481_v14  ;;  %17420 = vrsqrt.f32 %v494_v15  ;;  %v496_v28 = vadd.f32 1e-05, %v482_v17  ;;  %v15282_v62 = vld [vmem:[#allocation2 + $0x434] ss:$8 sps:$4 sm:$0xff]   ;;  %v665_v8 = vrot.slane %v18013_v53, %v17836_v23 }
 0x102   :  { %2209 = vmatpush2.bf16.msra.mxu0 %v15242_v33  ;;  %2249 = vmatprep.subr.bf16.mxu1 %v15247_v48  ;;  %v483_v27 = vmul.f32 0.25, %v457_v16  ;;  %v17999_v31 = vsub.f32 %v17966_v41, %v331_v22  ;;  %v18003_v33 = vpack.c.bf16 %v17968_v46, %v17968_v46  ;;  %v15265_v41 = vld [vmem:[#allocation2 + $0x560] ss:$8 sps:$4 sm:$0xff]   ;;  %v15273_v48 = vld [vmem:[#allocation2 + $0x554] ss:$8 sps:$4 sm:$0xff]  }
 0x103   :  { %2210 = vmatprep.subr.bf16.mxu0 %v15250_v49  ;;  %17422 = vrsqrt.f32 %v495_v24  ;;  %v18010_v49 = vld [vmem:[#allocation12 + $0x10] ss:$2 sm:$0x3f]  ;;  %v15277_v7 = vld [vmem:[#allocation2 + $0x540] ss:$8 sps:$4 sm:$0xff]   ;;  %v673_v24 = vrot.slane %v18013_v53, %v17861_v44 }
 0x104   :  { %v497_v37 = vadd.f32 1e-05, %v483_v27  ;;  %17424 = vrsqrt.f32 %v496_v28  ;;  %v352_v18 = vmul.f32 %v17999_v31, %v17999_v31  ;;  %v586_v2 = vrot.slane %v18010_v49, %v17836_v23  ;;  %v15280_v10 = vld [vmem:[#allocation2 + $0x430] ss:$8 sps:$4 sm:$0xff]  }
 0x105   :  { %2250 = vmatpush2.bf16.msra.mxu1 %v15245_v55  ;;  %v598_v14 = vrot.slane %v18010_v49, %v17864_v45 }
 0x106   :  { %2211 = vmatpush2.bf16.msra.mxu0 %v15248_v57  ;;  %2251 = vmatprep.subr.bf16.mxu1 %v15253_v30  ;;  %17426 = vrsqrt.f32 %v497_v37  ;;  %v366_v40 = vcombine.high %v352_v18, %v352_v18  ;;  %v458_v46 = vsel %vm197_vm0, %v352_v18, 0.0  ;;  %v15271_v57 = vld [vmem:[#allocation2 + $0x550] ss:$8 sps:$4 sm:$0xff]   ;;  %v590_v30 = vrot.slane %v18010_v49, %v17844_v26 }
 0x107   :  { %2262 = vmatprep.subr.bf16.mxu0 %v15257_v3  ;;  %v459_v56 = vrot.slane %v458_v46, 4 }
 0x108   :  { %v465_v52 = vsel %vm197_vm0, %v366_v40, 0.0  ;;  %v611_v22 = vcombine.low %v586_v2, %v590_v30  ;;  %v15291_v40 = vld [vmem:[#allocation2 + $0x524] ss:$8 sps:$4 sm:$0xff]  }
 0x109   :  { %2252 = vmatpush2.bf16.msra.mxu1 %v15251_v9  ;;  %2213 = vmatmul.mubr.bf16.vlgmr.msra.gmra.mxu0 %v17996_v19  ;;  %v460_v55 = vadd.f32 %v459_v56, %v458_v46  ;;  %v466_v54 = vrot.slane %v465_v52, 4  ;;  %v669_v9 = vrot.slane %v18013_v53, %v17844_v26  ;;  %v15300_v2 = vld [vmem:[#allocation2 + $0x404] ss:$8 sps:$4 sm:$0xff]  }
 0x10a   :  { %2263 = vmatpush1.bf16.msra.mxu0 %v15255_v11  ;;  %2303 = vmatprep.subr.bf16.mxu1 %v15261_v13  ;;  %v15285_v11 = vld [vmem:[#allocation2 + $0x534] ss:$8 sps:$4 sm:$0xff]   ;;  %v594_v13 = vrot.slane %v18010_v49, %v17861_v44 }
 0x10b   :  { %2264 = vmatprep.subr.bf16.mxu0 %v15264_v35  ;;  %v461_v60 = vrot.slane %v460_v55, 2  ;;  %v467_v63 = vadd.f32 %v466_v54, %v465_v52  ;;  %v15288_v35 = vld [vmem:[#allocation2 + $0x424] ss:$8 sps:$4 sm:$0xff]   ;;  %v690_v18 = vcombine.low %v665_v8, %v669_v9 }
 0x10c   :  { %2254 = vmatmul.mubr.bf16.vlgmr.msra.gmra.mxu1 %v18003_v33  ;;  %v15303_v8 = vld [vmem:[#allocation2 + $0x504] ss:$8 sps:$4 sm:$0xff]  }
 0x10d   :  { %2304 = vmatpush1.bf16.msra.mxu1 %v15259_v38  ;;  %v462_v3 = vadd.f32 %v461_v60, %v460_v55  ;;  %v468_v4 = vrot.slane %v467_v63, 2  ;;  %v677_v38 = vrot.slane %v18013_v53, %v17864_v45  ;;  %v15292_v60 = vld [vmem:[#allocation2 + $0x410] ss:$8 sps:$4 sm:$0xff]  }
 0x10e   :  { %2265 = vmatpush1.bf16.msra.mxu0 %v15262_v34  ;;  %2305 = vmatprep.subr.bf16.mxu1 %v15267_v29  ;;  %v17421_v6 = vpop.eup %17420 }
 0x10f   :  { %2266 = vmatprep.subr.bf16.mxu0 %v15270_v42  ;;  %v463_v15 = vrot.slane %v462_v3, 1  ;;  %v469_v16 = vadd.f32 %v468_v4, %v467_v63  ;;  %v15283_v42 = vld [vmem:[#allocation2 + $0x530] ss:$8 sps:$4 sm:$0xff]   ;;  %v15297_v63 = vld [vmem:[#allocation2 + $0x514] ss:$8 sps:$4 sm:$0xff]  }
 0x110   :  { %v17423_v17 = vpop.eup %17422 }
 0x111   :  { %2306 = vmatpush1.bf16.msra.mxu1 %v15265_v41  ;;  %v17425_v27 = vpop.eup %17424  ;;  %v532_v28 = vcombine.low %v17421_v6, %v17423_v17  ;;  %v464_v34 = vadd.f32 %v463_v15, %v462_v3  ;;  %v470_v29 = vrot.slane %v469_v16, 1  ;;  %v15286_v41 = vld [vmem:[#allocation2 + $0x420] ss:$8 sps:$4 sm:$0xff]   ;;  %v15295_v6 = vld [vmem:[#allocation2 + $0x510] ss:$8 sps:$4 sm:$0xff]  }
 0x112   :  { %2267 = vmatpush1.bf16.msra.mxu0 %v15268_v20  ;;  %2307 = vmatprep.subr.bf16.mxu1 %v15273_v48  ;;  %v612_v48 = vcombine.low %v594_v13, %v598_v14  ;;  %v15301_v14 = vld [vmem:[#allocation2 + $0x500] ss:$8 sps:$4 sm:$0xff]   ;;  %v15304_v15 = vld [vmem:[#allocation2 + $0x4f0] ss:$8 sps:$4 sm:$0xff]   ;;  %v15312_v17 = vld [vmem:[#allocation2 + $0x4e4] ss:$8 sps:$4 sm:$0xff]  }
 0x113   :  { %2268 = vmatprep.subr.bf16.mxu0 %v15276_v51  ;;  %v17427_v37 = vpop.eup %17426  ;;  %v546_v46 = vmul.f32 %v532_v28, %v17961_v39  ;;  %v471_v56 = vadd.f32 %v470_v29, %v469_v16  ;;  %v15294_v51 = vld [vmem:[#allocation2 + $0x414] ss:$8 sps:$4 sm:$0xff]   ;;  %v484_v52 = vmul.f32 0.25, %v464_v34  ;;  %v15313_v28 = vld [vmem:[#allocation2 + $0x5e0] ss:$8 sps:$4 sm:$0xff]  }
 0x114   :  { %v533_v20 = vcombine.low %v17425_v27, %v17427_v37  ;;  %v15309_v16 = vld [vmem:[#allocation2 + $0x5f4] ss:$8 sps:$4 sm:$0xff]   ;;  %v15324_v29 = vld [vmem:[#allocation2 + $0x4c4] ss:$8 sps:$4 sm:$0xff]  }
 0x115   :  { %2308 = vmatpush1.bf16.msra.mxu1 %v15271_v57  ;;  %v625_v55 = vmul.f32 %v611_v22, %v546_v46  ;;  %v691_v57 = vcombine.low %v673_v24, %v677_v38  ;;  %v498_v30 = vadd.f32 1e-05, %v484_v52  ;;  %v15310_v22 = vld [vmem:[#allocation2 + $0x4e0] ss:$8 sps:$4 sm:$0xff]   ;;  %v15315_v24 = vld [vmem:[#allocation2 + $0x5e4] ss:$8 sps:$4 sm:$0xff]  }
 0x116   :  { %2269 = vmatpush1.bf16.msra.mxu0 %v15274_v58  ;;  %2309 = vmatprep.subr.bf16.mxu1 %v15279_v59  ;;  %v547_v54 = vmul.f32 %v533_v20, %v17979_v25  ;;  %v485_v58 = vmul.f32 0.25, %v471_v56  ;;  %v15289_v59 = vld [vmem:[#allocation2 + $0x520] ss:$8 sps:$4 sm:$0xff]   ;;  %v15318_v27 = vld [vmem:[#allocation2 + $0x4d4] ss:$8 sps:$4 sm:$0xff]   ;;  %v602_v20 = vrot.slane %v18010_v49, %v17916_v61 }
 0x117   :  { %2270 = vmatprep.subr.bf16.mxu0 %v15282_v62  ;;  %v18033_v62 = vadd.f32 %v690_v18, %v625_v55  ;;  %17428 = vrsqrt.f32 %v498_v30  ;;  %v15316_v38 = vld [vmem:[#allocation2 + $0x4d0] ss:$8 sps:$4 sm:$0xff]   ;;  %v15321_v34 = vld [vmem:[#allocation2 + $0x5d4] ss:$8 sps:$4 sm:$0xff]  }
 0x118   :  { %v626_v39 = vmul.f32 %v612_v48, %v547_v54  ;;  %v499_v25 = vadd.f32 1e-05, %v485_v58  ;;  %v15319_v18 = vld [vmem:[#allocation2 + $0x5d0] ss:$8 sps:$4 sm:$0xff]   ;;  %v15330_v46 = vld [vmem:[#allocation2 + $0x4b4] ss:$8 sps:$4 sm:$0xff]   ;;  %v606_v48 = vrot.slane %v18010_v49, %v17924_v0  ;;  %v685_v49 = vrot.slane %v18013_v53, %v17924_v0 }
 0x119   :  { %2310 = vmatpush1.bf16.msra.mxu1 %v15277_v7  ;;  %v718_v3 = vcombine.high %v18033_v62, %v18033_v62  ;;  %v15298_v7 = vld [vmem:[#allocation2 + $0x400] ss:$8 sps:$4 sm:$0xff]   ;;  %v15328_v52 = vld [vmem:[#allocation2 + $0x4b0] ss:$8 sps:$4 sm:$0xff]   ;;  %v15333_v55 = vld [vmem:[#allocation2 + $0x5b4] ss:$8 sps:$4 sm:$0xff]  }
 0x11a   :  { %2271 = vmatpush1.bf16.msra.mxu0 %v15280_v10  ;;  %2311 = vmatprep.subr.bf16.mxu1 %v15285_v11  ;;  %v18037_v4 = vadd.f32 %v691_v57, %v626_v39  ;;  %v15306_v11 = vld [vmem:[#allocation2 + $0x4f4] ss:$8 sps:$4 sm:$0xff]   ;;  %17430 = vrsqrt.f32 %v499_v25  ;;  %v15336_v54 = vld [vmem:[#allocation2 + $0x4a4] ss:$8 sps:$4 sm:$0xff]   ;;  %v613_v57 = vcombine.low %v602_v20, %v606_v48  ;;  %v15337_v25 = vld [vmem:[#allocation2 + $0x5a0] ss:$8 sps:$4 sm:$0xff]  }
 0x11b   :  { %2272 = vmatprep.subr.bf16.mxu0 %v15288_v35  ;;  %v18039_v9 = vpack.c.bf16 %v718_v3, %v718_v3  ;;  %v15307_v35 = vld [vmem:[#allocation2 + $0x5f0] ss:$8 sps:$4 sm:$0xff]   ;;  %v15339_v39 = vld [vmem:[#allocation2 + $0x5a4] ss:$8 sps:$4 sm:$0xff]   ;;  %v15375_v20 = vld [vmem:[#allocation2 + $0x600] ss:$8 sps:$4 sm:$0xff]  }
 0x11c   :  { %v719_v10 = vcombine.high %v18037_v4, %v18037_v4  ;;  %v15380_v48 = vld [vmem:[#allocation2 + $0x6f4] ss:$8 sps:$4 sm:$0xff]  }
 0x11d   :  { %2312 = vmatpush1.bf16.msra.mxu1 %v15283_v42  ;;  %2294 = vmatprep.mubr.bf16.mxu0 %v18039_v9 }
 0x11e   :  { %2273 = vmatpush1.bf16.msra.mxu0 %v15286_v41  ;;  %2313 = vmatprep.subr.bf16.mxu1 %v15291_v40  ;;  %v18043_v13 = vpack.c.bf16 %v719_v10, %v719_v10  ;;  %v15322_v41 = vld [vmem:[#allocation2 + $0x4c0] ss:$8 sps:$4 sm:$0xff]   ;;  %v15327_v40 = vld [vmem:[#allocation2 + $0x5c4] ss:$8 sps:$4 sm:$0xff]  }
 0x11f   :  { %2274 = vmatprep.subr.bf16.mxu0 %v15294_v51  ;;  %v15325_v51 = vld [vmem:[#allocation2 + $0x5c0] ss:$8 sps:$4 sm:$0xff]  }
 0x120   :  { %2335 = vmatprep.mubr.bf16.mxu1 %v18043_v13  ;;  %v15346_v10 = vld [vmem:[#allocation2 + $0x480] ss:$8 sps:$4 sm:$0xff]  }
 0x121   :  { %2314 = vmatpush1.bf16.msra.mxu1 %v15289_v59  ;;  %v681_v59 = vrot.slane %v18013_v53, %v17916_v61  ;;  %v15343_v53 = vld [vmem:[#allocation2 + $0x590] ss:$8 sps:$4 sm:$0xff]  }
 0x122   :  { %2275 = vmatpush1.bf16.msra.mxu0 %v15292_v60  ;;  %2315 = vmatprep.subr.bf16.mxu1 %v15297_v63  ;;  %v15331_v60 = vld [vmem:[#allocation2 + $0x5b0] ss:$8 sps:$4 sm:$0xff]   ;;  %v15334_v63 = vld [vmem:[#allocation2 + $0x4a0] ss:$8 sps:$4 sm:$0xff]  }
 0x123   :  { %2276 = vmatprep.subr.bf16.mxu0 %v15300_v2  ;;  %v15342_v2 = vld [vmem:[#allocation2 + $0x494] ss:$8 sps:$4 sm:$0xff]   ;;  %v692_v3 = vcombine.low %v681_v59, %v685_v49  ;;  %v15390_v49 = vld [vmem:[#allocation2 + $0x6b0] ss:$8 sps:$4 sm:$0xff]  }
 0x124   :  { %v17429_v37 = vpop.eup %17428  ;;  %v15392_v59 = vld [vmem:[#allocation2 + $0x6b4] ss:$8 sps:$4 sm:$0xff]  }
 0x125   :  { %2316 = vmatpush1.bf16.msra.mxu1 %v15295_v6  ;;  %v15340_v6 = vld [vmem:[#allocation2 + $0x490] ss:$8 sps:$4 sm:$0xff]  }
 0x126   :  { %2277 = vmatpush1.bf16.msra.mxu0 %v15298_v7  ;;  %2317 = vmatprep.subr.bf16.mxu1 %v15303_v8  ;;  %v15348_v7 = vld [vmem:[#allocation2 + $0x484] ss:$8 sps:$4 sm:$0xff]  }
 0x127   :  { %2278 = vmatprep.subr.bf16.mxu0 %v15306_v11  ;;  %v17431_v42 = vpop.eup %17430  ;;  %v15351_v11 = vld [vmem:[#allocation2 + $0x584] ss:$8 sps:$4 sm:$0xff]  }
 0x128   :  { %v534_v56 = vcombine.low %v17429_v37, %v17431_v42  ;;  %v15366_v37 = vld [vmem:[#allocation2 + $0x630] ss:$8 sps:$4 sm:$0xff]   ;;  %v15371_v42 = vld [vmem:[#allocation2 + $0x624] ss:$8 sps:$4 sm:$0xff]  }
 0x129   :  { %2318 = vmatpush1.bf16.msra.mxu1 %v15301_v14  ;;  %v15355_v14 = vld [vmem:[#allocation2 + $0x674] ss:$8 sps:$4 sm:$0xff]  }
 0x12a   :  { %2279 = vmatpush2.bf16.msra.mxu0 %v15304_v15  ;;  %2319 = vmatprep.subr.bf16.mxu1 %v15309_v16  ;;  %v548_v58 = vmul.f32 %v534_v56, %v17999_v31  ;;  %v15345_v31 = vld [vmem:[#allocation2 + $0x594] ss:$8 sps:$4 sm:$0xff]   ;;  %v15349_v16 = vld [vmem:[#allocation2 + $0x580] ss:$8 sps:$4 sm:$0xff]   ;;  %v15378_v56 = vld [vmem:[#allocation2 + $0x6f0] ss:$8 sps:$4 sm:$0xff]  }
 0x12b   :  { %2280 = vmatprep.subr.bf16.mxu0 %v15312_v17  ;;  %v15353_v17 = vld [vmem:[#allocation2 + $0x670] ss:$8 sps:$4 sm:$0xff]  }
 0x12c   :  { %v627_v30 = vmul.f32 %v613_v57, %v548_v58  ;;  %v15389_v57 = vld [vmem:[#allocation2 + $0x6c4] ss:$8 sps:$4 sm:$0xff]   ;;  %v15387_v58 = vld [vmem:[#allocation2 + $0x6c0] ss:$8 sps:$4 sm:$0xff]  }
 0x12d   :  { %2320 = vmatpush2.bf16.msra.mxu1 %v15307_v35  ;;  %v18062_v35 = vpack.c.bf16 %v18033_v62, %v18033_v62  ;;  %v15360_v62 = vld [vmem:[#allocation2 + $0x650] ss:$8 sps:$4 sm:$0xff]  }
 0x12e   :  { %2281 = vmatpush2.bf16.msra.mxu0 %v15310_v22  ;;  %2321 = vmatprep.subr.bf16.mxu1 %v15315_v24  ;;  %v18056_v8 = vadd.f32 %v692_v3, %v627_v30  ;;  %v15359_v22 = vld [vmem:[#allocation2 + $0x664] ss:$8 sps:$4 sm:$0xff]   ;;  %v15399_v3 = vld [vmem:[#allocation2 + $0x680] ss:$8 sps:$4 sm:$0xff]  }
 0x12f   :  { %2282 = vmatprep.subr.bf16.mxu0 %v15318_v27  ;;  %v18068_v27 = vpack.c.bf16 %v18037_v4, %v18037_v4  ;;  %v15368_v4 = vld [vmem:[#allocation2 + $0x634] ss:$8 sps:$4 sm:$0xff]   ;;  %v15401_v30 = vld [vmem:[#allocation2 + $0x684] ss:$8 sps:$4 sm:$0xff]  }
 0x130   :  { %v720_v15 = vcombine.high %v18056_v8, %v18056_v8 }
 0x131   :  { %2322 = vmatpush2.bf16.msra.mxu1 %v15313_v28  ;;  %v15357_v28 = vld [vmem:[#allocation2 + $0x660] ss:$8 sps:$4 sm:$0xff]  }
 0x132   :  { %2283 = vmatpush2.bf16.msra.mxu0 %v15316_v38  ;;  %2323 = vmatprep.subr.bf16.mxu1 %v15321_v34  ;;  %v18064_v24 = vpack.c.bf16 %v720_v15, %v720_v15  ;;  %v15362_v38 = vld [vmem:[#allocation2 + $0x654] ss:$8 sps:$4 sm:$0xff]   ;;  %v15365_v34 = vld [vmem:[#allocation2 + $0x644] ss:$8 sps:$4 sm:$0xff]  }
 0x133   :  { %2284 = vmatprep.subr.bf16.mxu0 %v15324_v29  ;;  %v15363_v29 = vld [vmem:[#allocation2 + $0x640] ss:$8 sps:$4 sm:$0xff]  }
 0x135   :  { %2324 = vmatpush2.bf16.msra.mxu1 %v15319_v18  ;;  %v15369_v18 = vld [vmem:[#allocation2 + $0x620] ss:$8 sps:$4 sm:$0xff]  }
 0x136   :  { %2285 = vmatpush2.bf16.msra.mxu0 %v15322_v41  ;;  %2325 = vmatprep.subr.bf16.mxu1 %v15327_v40  ;;  %v15374_v41 = vld [vmem:[#allocation2 + $0x614] ss:$8 sps:$4 sm:$0xff]   ;;  %v15372_v40 = vld [vmem:[#allocation2 + $0x610] ss:$8 sps:$4 sm:$0xff]  }
 0x137   :  { %2286 = vmatprep.subr.bf16.mxu0 %v15330_v46  ;;  %v15377_v46 = vld [vmem:[#allocation2 + $0x604] ss:$8 sps:$4 sm:$0xff]  }
 0x139   :  { %2326 = vmatpush2.bf16.msra.mxu1 %v15325_v51  ;;  %v15383_v51 = vld [vmem:[#allocation2 + $0x6e4] ss:$8 sps:$4 sm:$0xff]  }
 0x13a   :  { %2287 = vmatpush2.bf16.msra.mxu0 %v15328_v52  ;;  %2327 = vmatprep.subr.bf16.mxu1 %v15333_v55  ;;  %v15381_v52 = vld [vmem:[#allocation2 + $0x6e0] ss:$8 sps:$4 sm:$0xff]   ;;  %v15386_v55 = vld [vmem:[#allocation2 + $0x6d4] ss:$8 sps:$4 sm:$0xff]  }
 0x13b   :  { %2288 = vmatprep.subr.bf16.mxu0 %v15336_v54  ;;  %v15384_v54 = vld [vmem:[#allocation2 + $0x6d0] ss:$8 sps:$4 sm:$0xff]  }
 0x13d   :  { %2328 = vmatpush2.bf16.msra.mxu1 %v15331_v60  ;;  %v15395_v60 = vld [vmem:[#allocation2 + $0x6a4] ss:$8 sps:$4 sm:$0xff]  }
 0x13e   :  { %2289 = vmatpush2.bf16.msra.mxu0 %v15334_v63  ;;  %2329 = vmatprep.subr.bf16.mxu1 %v15339_v39  ;;  %v15393_v63 = vld [vmem:[#allocation2 + $0x6a0] ss:$8 sps:$4 sm:$0xff]   ;;  %v15398_v39 = vld [vmem:[#allocation2 + $0x694] ss:$8 sps:$4 sm:$0xff]  }
 0x13f   :  { %2290 = vmatprep.subr.bf16.mxu0 %v15342_v2  ;;  %v15396_v2 = vld [vmem:[#allocation2 + $0x690] ss:$8 sps:$4 sm:$0xff]  }
 0x141   :  { %2330 = vmatpush2.bf16.msra.mxu1 %v15337_v25  ;;  %v966_v25 = vld [vmem:[#allocation13] ss:$8 sm:$0x3] }
 0x142   :  { %2291 = vmatpush2.bf16.msra.mxu0 %v15340_v6  ;;  %2331 = vmatprep.subr.bf16.mxu1 %v15345_v31  ;;  %v15405_v6 = vld [vmem:[#allocation2 + $0x774] ss:$8 sps:$4 sm:$0xff]   ;;  %v15403_v31 = vld [vmem:[#allocation2 + $0x770] ss:$8 sps:$4 sm:$0xff]  }
 0x143   :  { %2292 = vmatprep.subr.bf16.mxu0 %v15348_v7  ;;  %v18075_v7 = vpack.c.bf16 %v18056_v8, %v18056_v8 }
 0x145   :  { %2332 = vmatpush2.bf16.msra.mxu1 %v15343_v53  ;;  %v15408_v53 = vld [vmem:[#allocation2 + $0x764] ss:$8 sps:$4 sm:$0xff]  }
 0x146   :  { %2293 = vmatpush2.bf16.msra.mxu0 %v15346_v10  ;;  %2333 = vmatprep.subr.bf16.mxu1 %v15351_v11  ;;  %v971_v10 = vrot.slane %v966_v25, %v17836_v23  ;;  %v975_v11 = vrot.slane %v966_v25, %v17844_v26  ;;  %v15444_v25 = vld [vmem:[#allocation2 + $0x7a4] ss:$8 sps:$4 sm:$0xff]  }
 0x147   :  { %2344 = vmatprep.subr.bf16.mxu0 %v15355_v14  ;;  %v15406_v14 = vld [vmem:[#allocation2 + $0x760] ss:$8 sps:$4 sm:$0xff]  }
 0x149   :  { %2334 = vmatpush2.bf16.msra.mxu1 %v15349_v16  ;;  %2295 = vmatmul.mubr.bf16.vlgmr.msra.gmra.mxu0 %v18062_v35  ;;  %v15411_v16 = vld [vmem:[#allocation2 + $0x754] ss:$8 sps:$4 sm:$0xff]  }
 0x14a   :  { %2345 = vmatpush1.bf16.msra.mxu0 %v15353_v17  ;;  %2376 = vmatprep.mubr.bf16.mxu0 %v18064_v24 }
 0x14b   :  { %2346 = vmatprep.subr.bf16.mxu0 %v15359_v22 }
 0x14c   :  { %2336 = vmatmul.mubr.bf16.vlgmr.msra.gmra.mxu1 %v18068_v27 }
 0x14e   :  { %2347 = vmatpush1.bf16.msra.mxu0 %v15357_v28 }
 0x14f   :  { %2348 = vmatprep.subr.bf16.mxu0 %v15362_v38 }
 0x152   :  { %2349 = vmatpush1.bf16.msra.mxu0 %v15360_v62 }
 0x153   :  { %2350 = vmatprep.subr.bf16.mxu0 %v15365_v34  ;;  %v15409_v34 = vld [vmem:[#allocation2 + $0x750] ss:$8 sps:$4 sm:$0xff]  }
 0x156   :  { %2351 = vmatpush1.bf16.msra.mxu0 %v15363_v29 }
 0x157   :  { %2352 = vmatprep.subr.bf16.mxu0 %v15368_v4 }
 0x15a   :  { %2353 = vmatpush1.bf16.msra.mxu0 %v15366_v37 }
 0x15b   :  { %2354 = vmatprep.subr.bf16.mxu0 %v15371_v42  ;;  %v15414_v42 = vld [vmem:[#allocation2 + $0x744] ss:$8 sps:$4 sm:$0xff]  }
 0x15e   :  { %2355 = vmatpush1.bf16.msra.mxu0 %v15369_v18 }
 0x15f   :  { %2356 = vmatprep.subr.bf16.mxu0 %v15374_v41 }
 0x162   :  { %2357 = vmatpush1.bf16.msra.mxu0 %v15372_v40  ;;  %v15412_v40 = vld [vmem:[#allocation2 + $0x740] ss:$8 sps:$4 sm:$0xff]  }
 0x163   :  { %2358 = vmatprep.subr.bf16.mxu0 %v15377_v46  ;;  %v15417_v46 = vld [vmem:[#allocation2 + $0x734] ss:$8 sps:$4 sm:$0xff]  }
 0x166   :  { %2359 = vmatpush1.bf16.msra.mxu0 %v15375_v20  ;;  %v15415_v20 = vld [vmem:[#allocation2 + $0x730] ss:$8 sps:$4 sm:$0xff]  }
 0x167   :  { %2360 = vmatprep.subr.bf16.mxu0 %v15380_v48  ;;  %v15420_v48 = vld [vmem:[#allocation2 + $0x724] ss:$8 sps:$4 sm:$0xff]  }
 0x16a   :  { %2361 = vmatpush2.bf16.msra.mxu0 %v15378_v56  ;;  %v15418_v56 = vld [vmem:[#allocation2 + $0x720] ss:$8 sps:$4 sm:$0xff]  }
 0x16b   :  { %2362 = vmatprep.subr.bf16.mxu0 %v15383_v51  ;;  %v15423_v51 = vld [vmem:[#allocation2 + $0x714] ss:$8 sps:$4 sm:$0xff]  }
 0x16e   :  { %2363 = vmatpush2.bf16.msra.mxu0 %v15381_v52  ;;  %v15421_v52 = vld [vmem:[#allocation2 + $0x710] ss:$8 sps:$4 sm:$0xff]  }
 0x16f   :  { %2364 = vmatprep.subr.bf16.mxu0 %v15386_v55  ;;  %v15426_v55 = vld [vmem:[#allocation2 + $0x704] ss:$8 sps:$4 sm:$0xff]  }
 0x172   :  { %2365 = vmatpush2.bf16.msra.mxu0 %v15384_v54  ;;  %v15424_v54 = vld [vmem:[#allocation2 + $0x700] ss:$8 sps:$4 sm:$0xff]  }
 0x173   :  { %2366 = vmatprep.subr.bf16.mxu0 %v15389_v57  ;;  %v15429_v57 = vld [vmem:[#allocation2 + $0x7f4] ss:$8 sps:$4 sm:$0xff]  }
 0x176   :  { %2367 = vmatpush2.bf16.msra.mxu0 %v15387_v58  ;;  %v15427_v58 = vld [vmem:[#allocation2 + $0x7f0] ss:$8 sps:$4 sm:$0xff]  }
 0x177   :  { %2368 = vmatprep.subr.bf16.mxu0 %v15392_v59  ;;  %v15432_v59 = vld [vmem:[#allocation2 + $0x7e4] ss:$8 sps:$4 sm:$0xff]  }
 0x17a   :  { %2369 = vmatpush2.bf16.msra.mxu0 %v15390_v49  ;;  %v15430_v49 = vld [vmem:[#allocation2 + $0x7e0] ss:$8 sps:$4 sm:$0xff]  }
 0x17b   :  { %2370 = vmatprep.subr.bf16.mxu0 %v15395_v60  ;;  %v15435_v60 = vld [vmem:[#allocation2 + $0x7d4] ss:$8 sps:$4 sm:$0xff]  }
 0x17e   :  { %2371 = vmatpush2.bf16.msra.mxu0 %v15393_v63  ;;  %v15433_v63 = vld [vmem:[#allocation2 + $0x7d0] ss:$8 sps:$4 sm:$0xff]  }
 0x17f   :  { %2372 = vmatprep.subr.bf16.mxu0 %v15398_v39  ;;  %v15438_v39 = vld [vmem:[#allocation2 + $0x7c4] ss:$8 sps:$4 sm:$0xff]  }
 0x182   :  { %2373 = vmatpush2.bf16.msra.mxu0 %v15396_v2  ;;  %v15436_v2 = vld [vmem:[#allocation2 + $0x7c0] ss:$8 sps:$4 sm:$0xff]  }
 0x183   :  { %2374 = vmatprep.subr.bf16.mxu0 %v15401_v30  ;;  %v15441_v30 = vld [vmem:[#allocation2 + $0x7b4] ss:$8 sps:$4 sm:$0xff]  }
 0x186   :  { %2375 = vmatpush2.bf16.msra.mxu0 %v15399_v3  ;;  %v15439_v3 = vld [vmem:[#allocation2 + $0x7b0] ss:$8 sps:$4 sm:$0xff]  }
 0x187   :  { %4141 = vmatprep.subr.bf16.mxu0 %v15405_v6  ;;  %v15442_v6 = vld [vmem:[#allocation2 + $0x7a0] ss:$8 sps:$4 sm:$0xff]  }
 0x189   :  { %2377 = vmatmul.mubr.bf16.vlgmr.msra.gmra.mxu0 %v18075_v7  ;;  %v2132_v15 = vpop.f32.mrf.mxu0 }
 0x18a   :  { %v2133_v17 = vadd.f32 %v2132_v15, %v971_v10  ;;  %4142 = vmatpush1.bf16.msra.mxu0 %v15403_v31  ;;  %4173 = vmatprep.mubr.bf16.mxu0 %v17885_v36  ;;  %v15447_v31 = vld [vmem:[#allocation2 + $0x794] ss:$8 sps:$4 sm:$0xff]   ;;  %v15450_v10 = vld [vmem:[#allocation2 + $0x784] ss:$8 sps:$4 sm:$0xff]   ;;  %v15451_v15 = vld [vmem:[#allocation2 + $0x970] ss:$8 sps:$4 sm:$0xff]  }
 0x18b   :  { %v2134_v22 = vpop.f32.mrf.mxu0  ;;  %4143 = vmatprep.subr.bf16.mxu0 %v15408_v53  ;;  %v15445_v53 = vld [vmem:[#allocation2 + $0x790] ss:$8 sps:$4 sm:$0xff]  }
 0x18c   :  { %v2135_v8 = vadd.f32 %v2134_v22, %v975_v11  ;;  %v2173_v28 = vpop.f32.mrf.mxu1  ;;  %v15448_v11 = vld [vmem:[#allocation2 + $0x780] ss:$8 sps:$4 sm:$0xff]  }
 0x18d   :  { %v18081_v38 = vadd.f32 %v2173_v28, %v2133_v17  ;;  %v2136_v62 = vpop.f32.mrf.mxu0  ;;  %v15459_v28 = vld [vmem:[#allocation2 + $0x954] ss:$8 sps:$4 sm:$0xff]  }
 0x18e   :  { %v2175_v29 = vpop.f32.mrf.mxu1  ;;  %4144 = vmatpush1.bf16.msra.mxu0 %v15406_v14  ;;  %v15453_v14 = vld [vmem:[#allocation2 + $0x974] ss:$8 sps:$4 sm:$0xff]  }
 0x18f   :  { %v18083_v4 = vadd.f32 %v2175_v29, %v2135_v8  ;;  %v2137_v37 = vpop.f32.mrf.mxu0  ;;  %4145 = vmatprep.subr.bf16.mxu0 %v15411_v16  ;;  %v15456_v16 = vld [vmem:[#allocation2 + $0x964] ss:$8 sps:$4 sm:$0xff]   ;;  %v15454_v8 = vld [vmem:[#allocation2 + $0x960] ss:$8 sps:$4 sm:$0xff]   ;;  %v15489_v29 = vld [vmem:[#allocation4 + $0x74] ss:$8 sps:$4 sm:$0xff]  }
 0x190   :  { %v2177_v18 = vpop.f32.mrf.mxu1  ;;  %2670 = vmatprep.subr.bf16.mxu1 %v15489_v29  ;;  %v15535_v29 = vld [vmem:[#allocation4 + $0xf0] ss:$8 sps:$4 sm:$0xff]  }
 0x191   :  { %v15457_v18 = vld [vmem:[#allocation2 + $0x950] ss:$8 sps:$4 sm:$0xff]  }
 0x192   :  { %v2178_v41 = vpop.f32.mrf.mxu1  ;;  %4146 = vmatpush1.bf16.msra.mxu0 %v15409_v34  ;;  %v15487_v34 = vld [vmem:[#allocation4 + $0x70] ss:$8 sps:$4 sm:$0xff]  }
 0x193   :  { %4147 = vmatprep.subr.bf16.mxu0 %v15414_v42  ;;  %2671 = vmatpush1.bf16.msra.mxu1 %v15487_v34  ;;  %v15537_v34 = vld [vmem:[#allocation4 + $0xf4] ss:$8 sps:$4 sm:$0xff]  }
 0x196   :  { %4148 = vmatpush1.bf16.msra.mxu0 %v15412_v40 }
 0x197   :  { %4149 = vmatprep.subr.bf16.mxu0 %v15417_v46  ;;  %v15462_v46 = vld [vmem:[#allocation2 + $0x944] ss:$8 sps:$4 sm:$0xff]  }
 0x19a   :  { %4150 = vmatpush1.bf16.msra.mxu0 %v15415_v20 }
 0x19b   :  { %4151 = vmatprep.subr.bf16.mxu0 %v15420_v48 }
 0x19e   :  { %4152 = vmatpush1.bf16.msra.mxu0 %v15418_v56 }
 0x19f   :  { %4153 = vmatprep.subr.bf16.mxu0 %v15423_v51  ;;  %v15493_v51 = vld [vmem:[#allocation4 + $0x60] ss:$8 sps:$4 sm:$0xff]  }
 0x1a2   :  { %4154 = vmatpush1.bf16.msra.mxu0 %v15421_v52 }
 0x1a3   :  { %4155 = vmatprep.subr.bf16.mxu0 %v15426_v55  ;;  %v15460_v55 = vld [vmem:[#allocation2 + $0x940] ss:$8 sps:$4 sm:$0xff]  }
 0x1a6   :  { %4156 = vmatpush1.bf16.msra.mxu0 %v15424_v54 }
 0x1a7   :  { %4157 = vmatprep.subr.bf16.mxu0 %v15429_v57  ;;  %v15501_v57 = vld [vmem:[#allocation4 + $0x54] ss:$8 sps:$4 sm:$0xff]  }
 0x1aa   :  { %4158 = vmatpush2.bf16.msra.mxu0 %v15427_v58  ;;  %v15499_v58 = vld [vmem:[#allocation4 + $0x50] ss:$8 sps:$4 sm:$0xff]  }
 0x1ab   :  { %4159 = vmatprep.subr.bf16.mxu0 %v15432_v59  ;;  %v15463_v59 = vld [vmem:[#allocation2 + $0x930] ss:$8 sps:$4 sm:$0xff]  }
 0x1ae   :  { %4160 = vmatpush2.bf16.msra.mxu0 %v15430_v49  ;;  %v15468_v49 = vld [vmem:[#allocation2 + $0x924] ss:$8 sps:$4 sm:$0xff]  }
 0x1af   :  { %4161 = vmatprep.subr.bf16.mxu0 %v15435_v60  ;;  %v15507_v60 = vld [vmem:[#allocation4 + $0x44] ss:$8 sps:$4 sm:$0xff]  }
 0x1b2   :  { %4162 = vmatpush2.bf16.msra.mxu0 %v15433_v63  ;;  %v15505_v63 = vld [vmem:[#allocation4 + $0x40] ss:$8 sps:$4 sm:$0xff]  }
 0x1b3   :  { %4163 = vmatprep.subr.bf16.mxu0 %v15438_v39  ;;  %v15466_v39 = vld [vmem:[#allocation2 + $0x920] ss:$8 sps:$4 sm:$0xff]  }
 0x1b6   :  { %4164 = vmatpush2.bf16.msra.mxu0 %v15436_v2  ;;  %v15471_v2 = vld [vmem:[#allocation2 + $0x914] ss:$8 sps:$4 sm:$0xff]  }
 0x1b7   :  { %4165 = vmatprep.subr.bf16.mxu0 %v15441_v30  ;;  %v15513_v30 = vld [vmem:[#allocation4 + $0x34] ss:$8 sps:$4 sm:$0xff]  }
 0x1ba   :  { %4166 = vmatpush2.bf16.msra.mxu0 %v15439_v3  ;;  %v15511_v3 = vld [vmem:[#allocation4 + $0x30] ss:$8 sps:$4 sm:$0xff]  }
 0x1bb   :  { %4167 = vmatprep.subr.bf16.mxu0 %v15444_v25  ;;  %v15469_v25 = vld [vmem:[#allocation2 + $0x910] ss:$8 sps:$4 sm:$0xff]  }
 0x1be   :  { %4168 = vmatpush2.bf16.msra.mxu0 %v15442_v6  ;;  %v15474_v6 = vld [vmem:[#allocation2 + $0x904] ss:$8 sps:$4 sm:$0xff]  }
 0x1bf   :  { %4169 = vmatprep.subr.bf16.mxu0 %v15447_v31  ;;  %v15519_v31 = vld [vmem:[#allocation4 + $0x24] ss:$8 sps:$4 sm:$0xff]  }
 0x1c2   :  { %4170 = vmatpush2.bf16.msra.mxu0 %v15445_v53  ;;  %v15517_v53 = vld [vmem:[#allocation4 + $0x20] ss:$8 sps:$4 sm:$0xff]  }
 0x1c3   :  { %4171 = vmatprep.subr.bf16.mxu0 %v15450_v10  ;;  %v15472_v10 = vld [vmem:[#allocation2 + $0x900] ss:$8 sps:$4 sm:$0xff]  }
 0x1c6   :  { %4172 = vmatpush2.bf16.msra.mxu0 %v15448_v11  ;;  %v15477_v11 = vld [vmem:[#allocation2 + $0x9f4] ss:$8 sps:$4 sm:$0xff]  }
 0x1c7   :  { %4223 = vmatprep.subr.bf16.mxu0 %v15453_v14  ;;  %v15525_v14 = vld [vmem:[#allocation4 + $0x14] ss:$8 sps:$4 sm:$0xff]  }
 0x1c9   :  { %v2214_v17 = vpop.f32.mrf.mxu0  ;;  %4174 = vmatmul.mubr.bf16.vlgmr.msra.gmra.mxu0 %v17883_v32 }
 0x1ca   :  { %v2215_v22 = vadd.f32 %v2214_v17, %v18081_v38  ;;  %4224 = vmatpush1.bf16.msra.mxu0 %v15451_v15  ;;  %4255 = vmatprep.mubr.bf16.mxu0 %v17974_v50  ;;  %v15495_v38 = vld [vmem:[#allocation4 + $0x64] ss:$8 sps:$4 sm:$0xff]   ;;  %v15523_v15 = vld [vmem:[#allocation4 + $0x10] ss:$8 sps:$4 sm:$0xff]  }
 0x1cb   :  { %v2216_v62 = vpop.f32.mrf.mxu0  ;;  %4225 = vmatprep.subr.bf16.mxu0 %v15456_v16  ;;  %2672 = vmatprep.subr.bf16.mxu1 %v15495_v38  ;;  %v15475_v16 = vld [vmem:[#allocation2 + $0x9f0] ss:$8 sps:$4 sm:$0xff]   ;;  %v15480_v17 = vld [vmem:[#allocation2 + $0x9e4] ss:$8 sps:$4 sm:$0xff]   ;;  %v15549_v38 = vld [vmem:[#allocation4 + $0xd4] ss:$8 sps:$4 sm:$0xff]  }
 0x1cc   :  { %v2217_v37 = vadd.f32 %v2216_v62, %v18083_v4  ;;  %v2255_v42 = vpop.f32.mrf.mxu1  ;;  %v15465_v4 = vld [vmem:[#allocation2 + $0x934] ss:$8 sps:$4 sm:$0xff]   ;;  %2673 = vmatpush1.bf16.msra.mxu1 %v15493_v51  ;;  %v15490_v51 = vld [vmem:[#allocation2 + $0x9b0] ss:$8 sps:$4 sm:$0xff]  }
 0x1cd   :  { %v18089_v41 = vadd.f32 %v2255_v42, %v2215_v22  ;;  %v2218_v40 = vpop.f32.mrf.mxu0  ;;  %2674 = vmatprep.subr.bf16.mxu1 %v15501_v57  ;;  %v15531_v22 = vld [vmem:[#allocation4 + $0x4] ss:$8 sps:$4 sm:$0xff]   ;;  %v15483_v62 = vld [vmem:[#allocation2 + $0x9d4] ss:$8 sps:$4 sm:$0xff]  }
 0x1ce   :  { %v2257_v20 = vpop.f32.mrf.mxu1  ;;  %4226 = vmatpush1.bf16.msra.mxu0 %v15454_v8  ;;  %v15529_v8 = vld [vmem:[#allocation4] ss:$8 sps:$4 sm:$0xff]   ;;  %v15486_v42 = vld [vmem:[#allocation2 + $0x9c4] ss:$8 sps:$4 sm:$0xff]   ;;  %v15504_v57 = vld [vmem:[#allocation2 + $0x994] ss:$8 sps:$4 sm:$0xff]  }
 0x1cf   :  { %v18091_v48 = vadd.f32 %v2257_v20, %v2217_v37  ;;  %v2219_v56 = vpop.f32.mrf.mxu0  ;;  %4227 = vmatprep.subr.bf16.mxu0 %v15459_v28  ;;  %v15478_v28 = vld [vmem:[#allocation2 + $0x9e0] ss:$8 sps:$4 sm:$0xff]   ;;  %v15481_v37 = vld [vmem:[#allocation2 + $0x9d0] ss:$8 sps:$4 sm:$0xff]   ;;  %v15492_v20 = vld [vmem:[#allocation2 + $0x9b4] ss:$8 sps:$4 sm:$0xff]  }
 0x1d0   :  { %v2259_v52 = vpop.f32.mrf.mxu1  ;;  %2675 = vmatpush1.bf16.msra.mxu1 %v15499_v58  ;;  %v15541_v40 = vld [vmem:[#allocation4 + $0xe0] ss:$8 sps:$4 sm:$0xff]   ;;  %v15547_v56 = vld [vmem:[#allocation4 + $0xd0] ss:$8 sps:$4 sm:$0xff]   ;;  %v15561_v58 = vld [vmem:[#allocation4 + $0xb4] ss:$8 sps:$4 sm:$0xff]  }
 0x1d1   :  { %2676 = vmatprep.subr.bf16.mxu1 %v15507_v60  ;;  %v15498_v52 = vld [vmem:[#allocation2 + $0x9a4] ss:$8 sps:$4 sm:$0xff]  }
 0x1d2   :  { %v2260_v54 = vpop.f32.mrf.mxu1  ;;  %4228 = vmatpush1.bf16.msra.mxu0 %v15457_v18  ;;  %v15543_v18 = vld [vmem:[#allocation4 + $0xe4] ss:$8 sps:$4 sm:$0xff]  }
 0x1d3   :  { %4229 = vmatprep.subr.bf16.mxu0 %v15462_v46  ;;  %v15484_v46 = vld [vmem:[#allocation2 + $0x9c0] ss:$8 sps:$4 sm:$0xff]   ;;  %v15510_v60 = vld [vmem:[#allocation2 + $0x984] ss:$8 sps:$4 sm:$0xff]  }
 0x1d4   :  { %2677 = vmatpush1.bf16.msra.mxu1 %v15505_v63  ;;  %v15496_v54 = vld [vmem:[#allocation2 + $0x9a0] ss:$8 sps:$4 sm:$0xff]   ;;  %v15567_v63 = vld [vmem:[#allocation4 + $0xa4] ss:$8 sps:$4 sm:$0xff]  }
 0x1d5   :  { %2678 = vmatprep.subr.bf16.mxu1 %v15513_v30  ;;  %v15516_v30 = vld [vmem:[#allocation2 + $0xb74] ss:$8 sps:$4 sm:$0xff]  }
 0x1d6   :  { %4230 = vmatpush1.bf16.msra.mxu0 %v15460_v55  ;;  %v15555_v55 = vld [vmem:[#allocation4 + $0xc4] ss:$8 sps:$4 sm:$0xff]  }
 0x1d7   :  { %4231 = vmatprep.subr.bf16.mxu0 %v15465_v4  ;;  %v15553_v4 = vld [vmem:[#allocation4 + $0xc0] ss:$8 sps:$4 sm:$0xff]  }
 0x1d8   :  { %2679 = vmatpush1.bf16.msra.mxu1 %v15511_v3  ;;  %v15573_v3 = vld [vmem:[#allocation4 + $0x94] ss:$8 sps:$4 sm:$0xff]  }
 0x1d9   :  { %2680 = vmatprep.subr.bf16.mxu1 %v15519_v31  ;;  %v15522_v31 = vld [vmem:[#allocation2 + $0xb64] ss:$8 sps:$4 sm:$0xff]  }
 0x1da   :  { %4232 = vmatpush1.bf16.msra.mxu0 %v15463_v59  ;;  %v15559_v59 = vld [vmem:[#allocation4 + $0xb0] ss:$8 sps:$4 sm:$0xff]  }
 0x1db   :  { %4233 = vmatprep.subr.bf16.mxu0 %v15468_v49  ;;  %v15502_v49 = vld [vmem:[#allocation2 + $0x990] ss:$8 sps:$4 sm:$0xff]  }
 0x1dc   :  { %2681 = vmatpush1.bf16.msra.mxu1 %v15517_v53  ;;  %v15577_v53 = vld [vmem:[#allocation4 + $0x80] ss:$8 sps:$4 sm:$0xff]  }
 0x1dd   :  { %2682 = vmatprep.subr.bf16.mxu1 %v15525_v14 }
 0x1de   :  { %4234 = vmatpush1.bf16.msra.mxu0 %v15466_v39  ;;  %v15565_v39 = vld [vmem:[#allocation4 + $0xa0] ss:$8 sps:$4 sm:$0xff]  }
 0x1df   :  { %4235 = vmatprep.subr.bf16.mxu0 %v15471_v2  ;;  %v15508_v2 = vld [vmem:[#allocation2 + $0x980] ss:$8 sps:$4 sm:$0xff]  }
 0x1e0   :  { %2683 = vmatpush1.bf16.msra.mxu1 %v15523_v15  ;;  %v15585_v15 = vld [vmem:[#allocation2 + $0x874] ss:$8 sps:$4 sm:$0xff]  }
 0x1e1   :  { %2684 = vmatprep.subr.bf16.mxu1 %v15531_v22 }
 0x1e2   :  { %4236 = vmatpush1.bf16.msra.mxu0 %v15469_v25  ;;  %v15571_v25 = vld [vmem:[#allocation4 + $0x90] ss:$8 sps:$4 sm:$0xff]  }
 0x1e3   :  { %4237 = vmatprep.subr.bf16.mxu0 %v15474_v6  ;;  %v15514_v6 = vld [vmem:[#allocation2 + $0xb70] ss:$8 sps:$4 sm:$0xff]  }
 0x1e4   :  { %2685 = vmatpush1.bf16.msra.mxu1 %v15529_v8 }
 0x1e5   :  { %2686 = vmatprep.subr.bf16.mxu1 %v15537_v34 }
 0x1e6   :  { %4238 = vmatpush1.bf16.msra.mxu0 %v15472_v10  ;;  %v15579_v10 = vld [vmem:[#allocation4 + $0x84] ss:$8 sps:$4 sm:$0xff]  }
 0x1e7   :  { %4239 = vmatprep.subr.bf16.mxu0 %v15477_v11  ;;  %v15520_v11 = vld [vmem:[#allocation2 + $0xb60] ss:$8 sps:$4 sm:$0xff]  }
 0x1e8   :  { %2687 = vmatpush2.bf16.msra.mxu1 %v15535_v29 }
 0x1e9   :  { %2688 = vmatprep.subr.bf16.mxu1 %v15543_v18  ;;  %v15540_v18 = vld [vmem:[#allocation2 + $0xb34] ss:$8 sps:$4 sm:$0xff]  }
 0x1ea   :  { %4240 = vmatpush2.bf16.msra.mxu0 %v15475_v16 }
 0x1eb   :  { %4241 = vmatprep.subr.bf16.mxu0 %v15480_v17  ;;  %v15528_v17 = vld [vmem:[#allocation2 + $0xb54] ss:$8 sps:$4 sm:$0xff]  }
 0x1ec   :  { %2689 = vmatpush2.bf16.msra.mxu1 %v15541_v40 }
 0x1ed   :  { %2690 = vmatprep.subr.bf16.mxu1 %v15549_v38  ;;  %v15544_v38 = vld [vmem:[#allocation2 + $0xb20] ss:$8 sps:$4 sm:$0xff]  }
 0x1ee   :  { %4242 = vmatpush2.bf16.msra.mxu0 %v15478_v28  ;;  %v15526_v28 = vld [vmem:[#allocation2 + $0xb50] ss:$8 sps:$4 sm:$0xff]  }
 0x1ef   :  { %4243 = vmatprep.subr.bf16.mxu0 %v15483_v62  ;;  %v15534_v62 = vld [vmem:[#allocation2 + $0xb44] ss:$8 sps:$4 sm:$0xff]  }
 0x1f0   :  { %2691 = vmatpush2.bf16.msra.mxu1 %v15547_v56  ;;  %v15552_v56 = vld [vmem:[#allocation2 + $0xb14] ss:$8 sps:$4 sm:$0xff]  }
 0x1f1   :  { %2692 = vmatprep.subr.bf16.mxu1 %v15555_v55  ;;  %v15556_v55 = vld [vmem:[#allocation2 + $0xb00] ss:$8 sps:$4 sm:$0xff]  }
 0x1f2   :  { %4244 = vmatpush2.bf16.msra.mxu0 %v15481_v37 }
 0x1f3   :  { %4245 = vmatprep.subr.bf16.mxu0 %v15486_v42  ;;  %v15532_v42 = vld [vmem:[#allocation2 + $0xb40] ss:$8 sps:$4 sm:$0xff]  }
 0x1f4   :  { %2693 = vmatpush2.bf16.msra.mxu1 %v15553_v4  ;;  %v15564_v4 = vld [vmem:[#allocation2 + $0xbf4] ss:$8 sps:$4 sm:$0xff]  }
 0x1f5   :  { %2694 = vmatprep.subr.bf16.mxu1 %v15561_v58  ;;  %v15568_v58 = vld [vmem:[#allocation2 + $0xbe0] ss:$8 sps:$4 sm:$0xff]  }
 0x1f6   :  { %4246 = vmatpush2.bf16.msra.mxu0 %v15484_v46  ;;  %v15538_v46 = vld [vmem:[#allocation2 + $0xb30] ss:$8 sps:$4 sm:$0xff]  }
 0x1f7   :  { %4247 = vmatprep.subr.bf16.mxu0 %v15492_v20  ;;  %v15546_v20 = vld [vmem:[#allocation2 + $0xb24] ss:$8 sps:$4 sm:$0xff]  }
 0x1f8   :  { %2695 = vmatpush2.bf16.msra.mxu1 %v15559_v59  ;;  %v15576_v59 = vld [vmem:[#allocation2 + $0xbd4] ss:$8 sps:$4 sm:$0xff]  }
 0x1f9   :  { %2696 = vmatprep.subr.bf16.mxu1 %v15567_v63  ;;  %v15580_v63 = vld [vmem:[#allocation2 + $0xbc0] ss:$8 sps:$4 sm:$0xff]  }
 0x1fa   :  { %4248 = vmatpush2.bf16.msra.mxu0 %v15490_v51  ;;  %v15550_v51 = vld [vmem:[#allocation2 + $0xb10] ss:$8 sps:$4 sm:$0xff]  }
 0x1fb   :  { %4249 = vmatprep.subr.bf16.mxu0 %v15498_v52  ;;  %v15558_v52 = vld [vmem:[#allocation2 + $0xb04] ss:$8 sps:$4 sm:$0xff]  }
 0x1fc   :  { %2697 = vmatpush2.bf16.msra.mxu1 %v15565_v39  ;;  %v15588_v39 = vld [vmem:[#allocation2 + $0xbb4] ss:$8 sps:$4 sm:$0xff]  }
 0x1fd   :  { %2698 = vmatprep.subr.bf16.mxu1 %v15573_v3  ;;  %v15592_v3 = vld [vmem:[#allocation2 + $0xba0] ss:$8 sps:$4 sm:$0xff]  }
 0x1fe   :  { %4250 = vmatpush2.bf16.msra.mxu0 %v15496_v54  ;;  %v15562_v54 = vld [vmem:[#allocation2 + $0xbf0] ss:$8 sps:$4 sm:$0xff]  }
 0x1ff   :  { %4251 = vmatprep.subr.bf16.mxu0 %v15504_v57  ;;  %v15570_v57 = vld [vmem:[#allocation2 + $0xbe4] ss:$8 sps:$4 sm:$0xff]  }
 0x200   :  { %2699 = vmatpush2.bf16.msra.mxu1 %v15571_v25  ;;  %v15600_v25 = vld [vmem:[#allocation2 + $0xb94] ss:$8 sps:$4 sm:$0xff]  }
 0x201   :  { %2700 = vmatprep.subr.bf16.mxu1 %v15579_v10  ;;  %v15612_v10 = vld [vmem:[#allocation2 + $0xd74] ss:$8 sps:$4 sm:$0xff]  }
 0x202   :  { %4252 = vmatpush2.bf16.msra.mxu0 %v15502_v49  ;;  %v15574_v49 = vld [vmem:[#allocation2 + $0xbd0] ss:$8 sps:$4 sm:$0xff]  }
 0x203   :  { %4253 = vmatprep.subr.bf16.mxu0 %v15510_v60  ;;  %v15582_v60 = vld [vmem:[#allocation2 + $0xbc4] ss:$8 sps:$4 sm:$0xff]  }
 0x204   :  { %2701 = vmatpush2.bf16.msra.mxu1 %v15577_v53  ;;  %v15604_v53 = vld [vmem:[#allocation2 + $0xb80] ss:$8 sps:$4 sm:$0xff]  }
 0x205   :  { %4182 = vmatprep.subr.bf16.mxu1 %v15585_v15  ;;  %v15610_v15 = vld [vmem:[#allocation2 + $0xd70] ss:$8 sps:$4 sm:$0xff]  }
 0x206   :  { %4254 = vmatpush2.bf16.msra.mxu0 %v15508_v2  ;;  %v15586_v2 = vld [vmem:[#allocation2 + $0xbb0] ss:$8 sps:$4 sm:$0xff]  }
 0x207   :  { %4305 = vmatprep.subr.bf16.mxu0 %v15516_v30  ;;  %v15594_v30 = vld [vmem:[#allocation2 + $0xba4] ss:$8 sps:$4 sm:$0xff]  }
 0x209   :  { %v18093_v14 = vpop.f32.mrf.mxu0  ;;  %4256 = vmatmul.mubr.bf16.vlgmr.msra.gmra.mxu0 %v17996_v19 }
 0x20a   :  { %4306 = vmatpush1.bf16.msra.mxu0 %v15514_v6  ;;  %4337 = vmatprep.mubr.bf16.mxu0 %v18039_v9  ;;  %v15598_v6 = vld [vmem:[#allocation2 + $0xb90] ss:$8 sps:$4 sm:$0xff]  }
 0x20b   :  { %v18096_v16 = vpop.f32.mrf.mxu0  ;;  %4307 = vmatprep.subr.bf16.mxu0 %v15522_v31  ;;  %v15606_v31 = vld [vmem:[#allocation2 + $0xb84] ss:$8 sps:$4 sm:$0xff]  }
 0x20c   :  { %v18099_v22 = vpop.f32.mrf.mxu1 }
 0x20d   :  { %v2300_v8 = vpop.f32.mrf.mxu0 }
 0x20e   :  { %v18101_v34 = vpop.f32.mrf.mxu1  ;;  %4308 = vmatpush1.bf16.msra.mxu0 %v15520_v11  ;;  %v2297_v11 = vadd.f32 %v18093_v14, %v18089_v41  ;;  %v2299_v8 = vadd.f32 %v18096_v16, %v18091_v48  ;;  %v15624_v14 = vld [vmem:[#allocation2 + $0xd54] ss:$8 sps:$4 sm:$0xff]  }
 0x20f   :  { %v2301_v29 = vpop.f32.mrf.mxu0  ;;  %4309 = vmatprep.subr.bf16.mxu0 %v15528_v17  ;;  %v15618_v17 = vld [vmem:[#allocation2 + $0xd64] ss:$8 sps:$4 sm:$0xff]  }
 0x210   :  { %v2341_v37 = vpop.f32.mrf.mxu1  ;;  %v2340_v29 = vadd.f32 %v18101_v34, %v2299_v8 }
 0x212   :  { %v2342_v40 = vpop.f32.mrf.mxu1  ;;  %4310 = vmatpush1.bf16.msra.mxu0 %v15526_v28  ;;  %v2338_v28 = vadd.f32 %v18099_v22, %v2297_v11  ;;  %v15646_v11 = vld [vmem:[#allocation2 + $0xd10] ss:$8 sps:$4 sm:$0xff]  }
 0x213   :  { %4311 = vmatprep.subr.bf16.mxu0 %v15534_v62 }
 0x216   :  { %4312 = vmatpush1.bf16.msra.mxu0 %v15532_v42  ;;  %v15616_v42 = vld [vmem:[#allocation2 + $0xd60] ss:$8 sps:$4 sm:$0xff]  }
 0x217   :  { %4313 = vmatprep.subr.bf16.mxu0 %v15540_v18 }
 0x21a   :  { %4314 = vmatpush1.bf16.msra.mxu0 %v15538_v46  ;;  %v15622_v46 = vld [vmem:[#allocation2 + $0xd50] ss:$8 sps:$4 sm:$0xff]  }
 0x21b   :  { %4315 = vmatprep.subr.bf16.mxu0 %v15546_v20  ;;  %v15630_v20 = vld [vmem:[#allocation2 + $0xd44] ss:$8 sps:$4 sm:$0xff]  }
 0x21e   :  { %4316 = vmatpush1.bf16.msra.mxu0 %v15544_v38 }
 0x21f   :  { %4317 = vmatprep.subr.bf16.mxu0 %v15552_v56 }
 0x222   :  { %4318 = vmatpush1.bf16.msra.mxu0 %v15550_v51 }
 0x223   :  { %4319 = vmatprep.subr.bf16.mxu0 %v15558_v52 }
 0x226   :  { %4320 = vmatpush1.bf16.msra.mxu0 %v15556_v55  ;;  %v15628_v55 = vld [vmem:[#allocation2 + $0xd40] ss:$8 sps:$4 sm:$0xff]  }
 0x227   :  { %4321 = vmatprep.subr.bf16.mxu0 %v15564_v4  ;;  %v15636_v4 = vld [vmem:[#allocation2 + $0xd34] ss:$8 sps:$4 sm:$0xff]  }
 0x22a   :  { %4322 = vmatpush2.bf16.msra.mxu0 %v15562_v54 }
 0x22b   :  { %4323 = vmatprep.subr.bf16.mxu0 %v15570_v57 }
 0x22e   :  { %4324 = vmatpush2.bf16.msra.mxu0 %v15568_v58 }
 0x22f   :  { %4325 = vmatprep.subr.bf16.mxu0 %v15576_v59 }
 0x232   :  { %4326 = vmatpush2.bf16.msra.mxu0 %v15574_v49  ;;  %v15634_v49 = vld [vmem:[#allocation2 + $0xd30] ss:$8 sps:$4 sm:$0xff]  }
 0x233   :  { %4327 = vmatprep.subr.bf16.mxu0 %v15582_v60  ;;  %v15642_v60 = vld [vmem:[#allocation2 + $0xd24] ss:$8 sps:$4 sm:$0xff]  }
 0x236   :  { %4328 = vmatpush2.bf16.msra.mxu0 %v15580_v63 }
 0x237   :  { %4329 = vmatprep.subr.bf16.mxu0 %v15588_v39 }
 0x23a   :  { %4330 = vmatpush2.bf16.msra.mxu0 %v15586_v2 }
 0x23b   :  { %4331 = vmatprep.subr.bf16.mxu0 %v15594_v30 }
 0x23e   :  { %4332 = vmatpush2.bf16.msra.mxu0 %v15592_v3  ;;  %v15640_v3 = vld [vmem:[#allocation2 + $0xd20] ss:$8 sps:$4 sm:$0xff]  }
 0x23f   :  { %4333 = vmatprep.subr.bf16.mxu0 %v15600_v25  ;;  %v15648_v25 = vld [vmem:[#allocation2 + $0xd14] ss:$8 sps:$4 sm:$0xff]  }
 0x242   :  { %4334 = vmatpush2.bf16.msra.mxu0 %v15598_v6 }
 0x243   :  { %4335 = vmatprep.subr.bf16.mxu0 %v15606_v31 }
 0x246   :  { %4336 = vmatpush2.bf16.msra.mxu0 %v15604_v53 }
 0x247   :  { %4387 = vmatprep.subr.bf16.mxu0 %v15612_v10 }
 0x249   :  { %v2378_v62 = vpop.f32.mrf.mxu0  ;;  %4338 = vmatmul.mubr.bf16.vlgmr.msra.gmra.mxu0 %v18062_v35 }
 0x24a   :  { %v2379_v37 = vadd.f32 %v2378_v62, %v2338_v28  ;;  %4388 = vmatpush1.bf16.msra.mxu0 %v15610_v15  ;;  %4419 = vmatprep.mubr.bf16.mxu0 %v18064_v24  ;;  %v15654_v15 = vld [vmem:[#allocation2 + $0xd04] ss:$8 sps:$4 sm:$0xff]  }
 0x24b   :  { %v2380_v41 = vpop.f32.mrf.mxu0  ;;  %4389 = vmatprep.subr.bf16.mxu0 %v15618_v17 }
 0x24c   :  { %v2389_v18 = vsel %vm197_vm0, %v2379_v37, 0.0  ;;  %v2381_v48 = vadd.f32 %v2380_v41, %v2340_v29  ;;  %v15652_v29 = vld [vmem:[#allocation2 + $0xd00] ss:$8 sps:$4 sm:$0xff]   ;;  %v15660_v41 = vld [vmem:[#allocation2 + $0xdf4] ss:$8 sps:$4 sm:$0xff]  }
 0x24d   :  { %v2390_v16 = vrot.slane %v2389_v18, 4  ;;  %v2382_v40 = vpop.f32.mrf.mxu0 }
 0x24e   :  { %v2396_v22 = vsel %vm197_vm0, %v2381_v48, 0.0  ;;  %4390 = vmatpush1.bf16.msra.mxu0 %v15616_v42 }
 0x24f   :  { %v2391_v38 = vadd.f32 %v2390_v16, %v2389_v18  ;;  %v2397_v34 = vrot.slane %v2396_v22, 4  ;;  %v2383_v56 = vpop.f32.mrf.mxu0  ;;  %4391 = vmatprep.subr.bf16.mxu0 %v15624_v14  ;;  %v15666_v16 = vld [vmem:[#allocation2 + $0xde4] ss:$8 sps:$4 sm:$0xff]  }
 0x251   :  { %v2392_v51 = vrot.slane %v2391_v38, 2  ;;  %v2398_v52 = vadd.f32 %v2397_v34, %v2396_v22  ;;  %v15672_v34 = vld [vmem:[#allocation2 + $0xdd4] ss:$8 sps:$4 sm:$0xff]  }
 0x252   :  { %4392 = vmatpush1.bf16.msra.mxu0 %v15622_v46 }
 0x253   :  { %v2393_v54 = vadd.f32 %v2392_v51, %v2391_v38  ;;  %v2399_v57 = vrot.slane %v2398_v52, 2  ;;  %4393 = vmatprep.subr.bf16.mxu0 %v15630_v20  ;;  %v15664_v38 = vld [vmem:[#allocation2 + $0xde0] ss:$8 sps:$4 sm:$0xff]  }
 0x255   :  { %v2394_v58 = vrot.slane %v2393_v54, 1  ;;  %v2400_v59 = vadd.f32 %v2399_v57, %v2398_v52 }
 0x256   :  { %4394 = vmatpush1.bf16.msra.mxu0 %v15628_v55 }
 0x257   :  { %v2395_v63 = vadd.f32 %v2394_v58, %v2393_v54  ;;  %v2401_v39 = vrot.slane %v2400_v59, 1  ;;  %4395 = vmatprep.subr.bf16.mxu0 %v15636_v4  ;;  %v15670_v4 = vld [vmem:[#allocation2 + $0xdd0] ss:$8 sps:$4 sm:$0xff]   ;;  %v15678_v54 = vld [vmem:[#allocation2 + $0xdc4] ss:$8 sps:$4 sm:$0xff]  }
 0x259   :  { %v2403_v2 = vmul.f32 0.25, %v2395_v63  ;;  %v2402_v30 = vadd.f32 %v2401_v39, %v2400_v59  ;;  %v15682_v63 = vld [vmem:[#allocation2 + $0xdb0] ss:$8 sps:$4 sm:$0xff]   ;;  %v15690_v39 = vld [vmem:[#allocation2 + $0xda4] ss:$8 sps:$4 sm:$0xff]  }
 0x25a   :  { %4396 = vmatpush1.bf16.msra.mxu0 %v15634_v49  ;;  %v15676_v49 = vld [vmem:[#allocation2 + $0xdc0] ss:$8 sps:$4 sm:$0xff]  }
 0x25b   :  { %v18113_v6 = vsub.f32 %v2379_v37, %v2403_v2  ;;  %v2404_v31 = vmul.f32 0.25, %v2402_v30  ;;  %4397 = vmatprep.subr.bf16.mxu0 %v15642_v60  ;;  %v15684_v60 = vld [vmem:[#allocation2 + $0xdb4] ss:$8 sps:$4 sm:$0xff]  }
 0x25c   :  { %v2386_v2 = vld [vmem:[#allocation13 + $0x1] ss:$8 sm:$0x3]  ;;  %v2388_v30 = vld [vmem:[#allocation13 + $0x2] ss:$8 sm:$0x3] }
 0x25d   :  { %v2407_v53 = vmul.f32 %v18113_v6, %v18113_v6  ;;  %v18117_v10 = vsub.f32 %v2381_v48, %v2404_v31  ;;  %v15658_v48 = vld [vmem:[#allocation2 + $0xdf0] ss:$8 sps:$4 sm:$0xff]   ;;  %v2435_v31 = vrot.slane %v2386_v2, %v17836_v23 }
 0x25e   :  { %4398 = vmatpush1.bf16.msra.mxu0 %v15640_v3  ;;  %v15688_v3 = vld [vmem:[#allocation2 + $0xda0] ss:$8 sps:$4 sm:$0xff]  }
 0x25f   :  { %v2409_v17 = vsel %vm197_vm0, %v2407_v53, 0.0  ;;  %v2408_v8 = vmul.f32 %v18117_v10, %v18117_v10  ;;  %4399 = vmatprep.subr.bf16.mxu0 %v15648_v25  ;;  %v15696_v25 = vld [vmem:[#allocation2 + $0xd94] ss:$8 sps:$4 sm:$0xff]  }
 0x260   :  { %v2410_v28 = vrot.slane %v2409_v17, 4 }
 0x261   :  { %v2416_v62 = vsel %vm197_vm0, %v2408_v8, 0.0  ;;  %v2448_v8 = vrot.slane %v2388_v30, %v17836_v23 }
 0x262   :  { %v2411_v37 = vadd.f32 %v2410_v28, %v2409_v17  ;;  %v2417_v42 = vrot.slane %v2416_v62, 4  ;;  %4400 = vmatpush1.bf16.msra.mxu0 %v15646_v11  ;;  %v15694_v11 = vld [vmem:[#allocation2 + $0xd90] ss:$8 sps:$4 sm:$0xff]   ;;  %v2439_v28 = vrot.slane %v2386_v2, %v17844_v26  ;;  %v15609_v2 = vld [vmem:[#allocation2 + $0x834] ss:$8 sps:$4 sm:$0xff]  }
 0x263   :  { %4401 = vmatprep.subr.bf16.mxu0 %v15654_v15  ;;  %v15702_v15 = vld [vmem:[#allocation2 + $0xd84] ss:$8 sps:$4 sm:$0xff]  }
 0x264   :  { %v2412_v14 = vrot.slane %v2411_v37, 2  ;;  %v2418_v18 = vadd.f32 %v2417_v42, %v2416_v62  ;;  %v2452_v42 = vrot.slane %v2388_v30, %v17844_v26  ;;  %v15730_v30 = vld [vmem:[#allocation2 + $0xe30] ss:$8 sps:$4 sm:$0xff]  }
 0x266   :  { %v2413_v40 = vadd.f32 %v2412_v14, %v2411_v37  ;;  %v2419_v46 = vrot.slane %v2418_v18, 2  ;;  %4402 = vmatpush1.bf16.msra.mxu0 %v15652_v29  ;;  %v15708_v14 = vld [vmem:[#allocation2 + $0xe74] ss:$8 sps:$4 sm:$0xff]  }
 0x267   :  { %4403 = vmatprep.subr.bf16.mxu0 %v15660_v41  ;;  %v15700_v41 = vld [vmem:[#allocation2 + $0xd80] ss:$8 sps:$4 sm:$0xff]  }
 0x268   :  { %v2414_v22 = vrot.slane %v2413_v40, 1  ;;  %v2420_v20 = vadd.f32 %v2419_v46, %v2418_v18  ;;  %v15714_v46 = vld [vmem:[#allocation2 + $0xe64] ss:$8 sps:$4 sm:$0xff]  }
 0x26a   :  { %v2415_v56 = vadd.f32 %v2414_v22, %v2413_v40  ;;  %v2421_v51 = vrot.slane %v2420_v20, 1  ;;  %4404 = vmatpush2.bf16.msra.mxu0 %v15658_v48  ;;  %v15706_v40 = vld [vmem:[#allocation2 + $0xe70] ss:$8 sps:$4 sm:$0xff]  }
 0x26b   :  { %4405 = vmatprep.subr.bf16.mxu0 %v15666_v16 }
 0x26c   :  { %v2423_v52 = vmul.f32 0.25, %v2415_v56  ;;  %v2422_v55 = vadd.f32 %v2421_v51, %v2420_v20  ;;  %v15591_v56 = vld [vmem:[#allocation2 + $0x864] ss:$8 sps:$4 sm:$0xff]  }
 0x26e   :  { %v2425_v57 = vadd.f32 1e-05, %v2423_v52  ;;  %v2424_v58 = vmul.f32 0.25, %v2422_v55  ;;  %4406 = vmatpush2.bf16.msra.mxu0 %v15664_v38  ;;  %v15712_v52 = vld [vmem:[#allocation2 + $0xe60] ss:$8 sps:$4 sm:$0xff]  }
 0x26f   :  { %4407 = vmatprep.subr.bf16.mxu0 %v15672_v34  ;;  %v15720_v55 = vld [vmem:[#allocation2 + $0xe54] ss:$8 sps:$4 sm:$0xff]  }
 0x270   :  { %17432 = vrsqrt.f32 %v2425_v57  ;;  %v2426_v59 = vadd.f32 1e-05, %v2424_v58  ;;  %v15718_v57 = vld [vmem:[#allocation2 + $0xe50] ss:$8 sps:$4 sm:$0xff]   ;;  %v15726_v58 = vld [vmem:[#allocation2 + $0xe44] ss:$8 sps:$4 sm:$0xff]  }
 0x272   :  { %17434 = vrsqrt.f32 %v2426_v59  ;;  %4408 = vmatpush2.bf16.msra.mxu0 %v15670_v4  ;;  %v15589_v4 = vld [vmem:[#allocation2 + $0x860] ss:$8 sps:$4 sm:$0xff]   ;;  %v15595_v59 = vld [vmem:[#allocation2 + $0x850] ss:$8 sps:$4 sm:$0xff]  }
 0x273   :  { %4409 = vmatprep.subr.bf16.mxu0 %v15678_v54  ;;  %v15597_v54 = vld [vmem:[#allocation2 + $0x854] ss:$8 sps:$4 sm:$0xff]  }
 0x276   :  { %4410 = vmatpush2.bf16.msra.mxu0 %v15676_v49  ;;  %v15603_v49 = vld [vmem:[#allocation2 + $0x844] ss:$8 sps:$4 sm:$0xff]  }
 0x277   :  { %4411 = vmatprep.subr.bf16.mxu0 %v15684_v60  ;;  %v15724_v60 = vld [vmem:[#allocation2 + $0xe40] ss:$8 sps:$4 sm:$0xff]  }
 0x27a   :  { %4412 = vmatpush2.bf16.msra.mxu0 %v15682_v63  ;;  %v15732_v63 = vld [vmem:[#allocation2 + $0xe34] ss:$8 sps:$4 sm:$0xff]  }
 0x27b   :  { %4413 = vmatprep.subr.bf16.mxu0 %v15690_v39  ;;  %v15601_v39 = vld [vmem:[#allocation2 + $0x840] ss:$8 sps:$4 sm:$0xff]  }
 0x27d   :  { %v17433_v53 = vpop.eup %17432 }
 0x27e   :  { %v2429_v17 = vmul.f32 %v17433_v53, %v18113_v6  ;;  %4414 = vmatpush2.bf16.msra.mxu0 %v15688_v3  ;;  %v15738_v3 = vld [vmem:[#allocation2 + $0xe24] ss:$8 sps:$4 sm:$0xff]   ;;  %v15736_v53 = vld [vmem:[#allocation2 + $0xe20] ss:$8 sps:$4 sm:$0xff]  }
 0x27f   :  { %v17435_v62 = vpop.eup %17434  ;;  %4415 = vmatprep.subr.bf16.mxu0 %v15696_v25  ;;  %v15607_v25 = vld [vmem:[#allocation2 + $0x830] ss:$8 sps:$4 sm:$0xff]  }
 0x280   :  { %v2442_v29 = vmul.f32 %v2435_v31, %v2429_v17  ;;  %v2430_v37 = vmul.f32 %v17435_v62, %v18117_v10  ;;  %v15583_v10 = vld [vmem:[#allocation2 + $0x870] ss:$8 sps:$4 sm:$0xff]   ;;  %v15615_v31 = vld [vmem:[#allocation2 + $0x824] ss:$8 sps:$4 sm:$0xff]   ;;  %v15621_v17 = vld [vmem:[#allocation2 + $0x814] ss:$8 sps:$4 sm:$0xff]  }
 0x281   :  { %v15619_v62 = vld [vmem:[#allocation2 + $0x810] ss:$8 sps:$4 sm:$0xff]  }
 0x282   :  { %v2455_v18 = vadd.f32 %v2448_v8, %v2442_v29  ;;  %v2443_v48 = vmul.f32 %v2439_v28, %v2430_v37  ;;  %4416 = vmatpush2.bf16.msra.mxu0 %v15694_v11  ;;  %v15744_v11 = vld [vmem:[#allocation2 + $0xe14] ss:$8 sps:$4 sm:$0xff]   ;;  %v15742_v8 = vld [vmem:[#allocation2 + $0xe10] ss:$8 sps:$4 sm:$0xff]   ;;  %v15750_v28 = vld [vmem:[#allocation2 + $0xe04] ss:$8 sps:$4 sm:$0xff]  }
 0x283   :  { %4417 = vmatprep.subr.bf16.mxu0 %v15702_v15  ;;  %v15613_v15 = vld [vmem:[#allocation2 + $0x820] ss:$8 sps:$4 sm:$0xff]   ;;  %v15627_v29 = vld [vmem:[#allocation2 + $0x804] ss:$8 sps:$4 sm:$0xff]  }
 0x284   :  { %v2456_v16 = vadd.f32 %v2452_v42, %v2443_v48  ;;  %vm2457_vm1 = vcmp.ge.f32.partialorder %v2455_v18, 0.0  ;;  %v2459_v6 = vmul.f32 0.2, %v2455_v18  ;;  %v15748_v37 = vld [vmem:[#allocation2 + $0xe00] ss:$8 sps:$4 sm:$0xff]  }
 0x285   :  { %v15756_v42 = vld [vmem:[#allocation2 + $0xef4] ss:$8 sps:$4 sm:$0xff]   ;;  %v15762_v48 = vld [vmem:[#allocation2 + $0xee4] ss:$8 sps:$4 sm:$0xff]  }
 0x286   :  { %vm2458_vm2 = vcmp.ge.f32.partialorder %v2456_v16, 0.0  ;;  %v2460_v22 = vmul.f32 0.2, %v2456_v16  ;;  %4418 = vmatpush2.bf16.msra.mxu0 %v15700_v41  ;;  %v2461_v20 = vsel %vm2457_vm1, %v2455_v18, %v2459_v6  ;;  %v15625_v41 = vld [vmem:[#allocation2 + $0x800] ss:$8 sps:$4 sm:$0xff]  }
 0x287   :  { %6023 = vmatprep.subr.bf16.mxu0 %v15708_v14  ;;  %v2495_v51 = vpack.c.bf16 %v2461_v20, %v2461_v20  ;;  %v15633_v14 = vld [vmem:[#allocation2 + $0x8f4] ss:$8 sps:$4 sm:$0xff]   ;;  %v15754_v18 = vld [vmem:[#allocation2 + $0xef0] ss:$8 sps:$4 sm:$0xff]   ;;  %v15639_v6 = vld [vmem:[#allocation2 + $0x8e4] ss:$8 sps:$4 sm:$0xff]  }
 0x288   :  { %v2462_v38 = vsel %vm2458_vm2, %v2456_v16, %v2460_v22  ;;  %v15631_v16 = vld [vmem:[#allocation2 + $0x8f0] ss:$8 sps:$4 sm:$0xff]   ;;  %v15637_v22 = vld [vmem:[#allocation2 + $0x8e0] ss:$8 sps:$4 sm:$0xff]   ;;  %v15645_v20 = vld [vmem:[#allocation2 + $0x8d4] ss:$8 sps:$4 sm:$0xff]  }
 0x289   :  { %v2496_v34 = vpack.c.bf16 %v2462_v38, %v2462_v38  ;;  %4420 = vmatmul.mubr.bf16.vlgmr.msra.gmra.mxu0 %v18075_v7  ;;  %v15766_v38 = vld [vmem:[#allocation2 + $0xed0] ss:$8 sps:$4 sm:$0xff]  }
 0x28a   :  { %6024 = vmatpush1.bf16.msra.mxu0 %v15706_v40  ;;  %6055 = vmatprep.mubr.bf16.mxu0 %v17885_v36  ;;  %v15760_v40 = vld [vmem:[#allocation2 + $0xee0] ss:$8 sps:$4 sm:$0xff]  }
 0x28b   :  { %2702 = vmatprep.mubr.bf16.mxu1 %v2496_v34  ;;  %6025 = vmatprep.subr.bf16.mxu0 %v15714_v46  ;;  %v15768_v46 = vld [vmem:[#allocation2 + $0xed4] ss:$8 sps:$4 sm:$0xff]   ;;  %v15643_v34 = vld [vmem:[#allocation2 + $0x8d0] ss:$8 sps:$4 sm:$0xff]  }
 0x28c   :  { %2703 = vmatmul.mubr.bf16.vlgmr.msra.gmra.mxu1 %v2495_v51  ;;  %v15772_v51 = vld [vmem:[#allocation2 + $0xec0] ss:$8 sps:$4 sm:$0xff]  }
 0x28d   :  { %4183 = vmatpush1.bf16.msra.mxu1 %v15583_v10  ;;  %4214 = vmatprep.mubr.bf16.mxu1 %v17897_v47  ;;  %v15774_v10 = vld [vmem:[#allocation2 + $0xec4] ss:$8 sps:$4 sm:$0xff]  }
 0x28e   :  { %4184 = vmatprep.subr.bf16.mxu1 %v15591_v56  ;;  %6026 = vmatpush1.bf16.msra.mxu0 %v15712_v52  ;;  %v15651_v56 = vld [vmem:[#allocation2 + $0x8c4] ss:$8 sps:$4 sm:$0xff]   ;;  %v15780_v52 = vld [vmem:[#allocation2 + $0xeb4] ss:$8 sps:$4 sm:$0xff]  }
 0x28f   :  { %6027 = vmatprep.subr.bf16.mxu0 %v15720_v55  ;;  %v15649_v55 = vld [vmem:[#allocation2 + $0x8c0] ss:$8 sps:$4 sm:$0xff]  }
 0x291   :  { %4185 = vmatpush1.bf16.msra.mxu1 %v15589_v4  ;;  %v15657_v4 = vld [vmem:[#allocation2 + $0x8b4] ss:$8 sps:$4 sm:$0xff]  }
 0x292   :  { %4186 = vmatprep.subr.bf16.mxu1 %v15597_v54  ;;  %6028 = vmatpush1.bf16.msra.mxu0 %v15718_v57  ;;  %v15778_v54 = vld [vmem:[#allocation2 + $0xeb0] ss:$8 sps:$4 sm:$0xff]   ;;  %v15786_v57 = vld [vmem:[#allocation2 + $0xea4] ss:$8 sps:$4 sm:$0xff]  }
 0x293   :  { %6029 = vmatprep.subr.bf16.mxu0 %v15726_v58  ;;  %v15655_v58 = vld [vmem:[#allocation2 + $0x8b0] ss:$8 sps:$4 sm:$0xff]  }
 0x295   :  { %4187 = vmatpush1.bf16.msra.mxu1 %v15595_v59  ;;  %v15663_v59 = vld [vmem:[#allocation2 + $0x8a4] ss:$8 sps:$4 sm:$0xff]  }
 0x296   :  { %4188 = vmatprep.subr.bf16.mxu1 %v15603_v49  ;;  %6030 = vmatpush1.bf16.msra.mxu0 %v15724_v60  ;;  %v15784_v49 = vld [vmem:[#allocation2 + $0xea0] ss:$8 sps:$4 sm:$0xff]   ;;  %v15792_v60 = vld [vmem:[#allocation2 + $0xe94] ss:$8 sps:$4 sm:$0xff]  }
 0x297   :  { %6031 = vmatprep.subr.bf16.mxu0 %v15732_v63  ;;  %v15661_v63 = vld [vmem:[#allocation2 + $0x8a0] ss:$8 sps:$4 sm:$0xff]  }
 0x299   :  { %4189 = vmatpush1.bf16.msra.mxu1 %v15601_v39  ;;  %v15669_v39 = vld [vmem:[#allocation2 + $0x894] ss:$8 sps:$4 sm:$0xff]  }
 0x29a   :  { %4190 = vmatprep.subr.bf16.mxu1 %v15609_v2  ;;  %6032 = vmatpush1.bf16.msra.mxu0 %v15730_v30  ;;  %v15790_v2 = vld [vmem:[#allocation2 + $0xe90] ss:$8 sps:$4 sm:$0xff]   ;;  %v15798_v30 = vld [vmem:[#allocation2 + $0xe84] ss:$8 sps:$4 sm:$0xff]  }
 0x29b   :  { %6033 = vmatprep.subr.bf16.mxu0 %v15738_v3  ;;  %v15667_v3 = vld [vmem:[#allocation2 + $0x890] ss:$8 sps:$4 sm:$0xff]  }
 0x29d   :  { %4191 = vmatpush1.bf16.msra.mxu1 %v15607_v25  ;;  %v15675_v25 = vld [vmem:[#allocation2 + $0x884] ss:$8 sps:$4 sm:$0xff]  }
 0x29e   :  { %4192 = vmatprep.subr.bf16.mxu1 %v15615_v31  ;;  %6034 = vmatpush1.bf16.msra.mxu0 %v15736_v53  ;;  %v15796_v31 = vld [vmem:[#allocation2 + $0xe80] ss:$8 sps:$4 sm:$0xff]   ;;  %v15804_v53 = vld [vmem:[#allocation2 + $0x1074] ss:$8 sps:$4 sm:$0xff]  }
 0x29f   :  { %6035 = vmatprep.subr.bf16.mxu0 %v15744_v11  ;;  %v15673_v11 = vld [vmem:[#allocation2 + $0x880] ss:$8 sps:$4 sm:$0xff]  }
 0x2a1   :  { %4193 = vmatpush1.bf16.msra.mxu1 %v15613_v15  ;;  %v15681_v15 = vld [vmem:[#allocation2 + $0xa74] ss:$8 sps:$4 sm:$0xff]  }
 0x2a2   :  { %4194 = vmatprep.subr.bf16.mxu1 %v15621_v17  ;;  %6036 = vmatpush1.bf16.msra.mxu0 %v15742_v8  ;;  %v15802_v17 = vld [vmem:[#allocation2 + $0x1070] ss:$8 sps:$4 sm:$0xff]   ;;  %v15810_v8 = vld [vmem:[#allocation2 + $0x1064] ss:$8 sps:$4 sm:$0xff]  }
 0x2a3   :  { %6037 = vmatprep.subr.bf16.mxu0 %v15750_v28  ;;  %v18132_v28 = vpop.f32.mrf.mxu0 }
 0x2a5   :  { %4195 = vmatpush1.bf16.msra.mxu1 %v15619_v62  ;;  %v15679_v62 = vld [vmem:[#allocation2 + $0xa70] ss:$8 sps:$4 sm:$0xff]  }
 0x2a6   :  { %4196 = vmatprep.subr.bf16.mxu1 %v15627_v29  ;;  %6038 = vmatpush1.bf16.msra.mxu0 %v15748_v37  ;;  %v15687_v29 = vld [vmem:[#allocation2 + $0xa64] ss:$8 sps:$4 sm:$0xff]   ;;  %v15808_v37 = vld [vmem:[#allocation2 + $0x1060] ss:$8 sps:$4 sm:$0xff]  }
 0x2a7   :  { %6039 = vmatprep.subr.bf16.mxu0 %v15756_v42  ;;  %v18135_v42 = vpop.f32.mrf.mxu0 }
 0x2a9   :  { %4197 = vmatpush1.bf16.msra.mxu1 %v15625_v41  ;;  %v15816_v41 = vld [vmem:[#allocation2 + $0x1054] ss:$8 sps:$4 sm:$0xff]  }
 0x2aa   :  { %4198 = vmatprep.subr.bf16.mxu1 %v15633_v14  ;;  %6040 = vmatpush2.bf16.msra.mxu0 %v15754_v18  ;;  %v4179_v14 = vpop.f32.mrf.mxu0  ;;  %v15685_v18 = vld [vmem:[#allocation2 + $0xa60] ss:$8 sps:$4 sm:$0xff]  }
 0x2ab   :  { %6041 = vmatprep.subr.bf16.mxu0 %v15762_v48  ;;  %v15693_v48 = vld [vmem:[#allocation2 + $0xa54] ss:$8 sps:$4 sm:$0xff]   ;;  %v15747_v14 = vld [vmem:[#allocation2 + $0xac4] ss:$8 sps:$4 sm:$0xff]  }
 0x2ad   :  { %4199 = vmatpush2.bf16.msra.mxu1 %v15631_v16  ;;  %v15814_v16 = vld [vmem:[#allocation2 + $0x1050] ss:$8 sps:$4 sm:$0xff]  }
 0x2ae   :  { %4200 = vmatprep.subr.bf16.mxu1 %v15639_v6  ;;  %6042 = vmatpush2.bf16.msra.mxu0 %v15760_v40  ;;  %v4180_v6 = vpop.f32.mrf.mxu0  ;;  %v15822_v40 = vld [vmem:[#allocation2 + $0x1044] ss:$8 sps:$4 sm:$0xff]  }
 0x2af   :  { %6043 = vmatprep.subr.bf16.mxu0 %v15768_v46  ;;  %v15691_v46 = vld [vmem:[#allocation2 + $0xa50] ss:$8 sps:$4 sm:$0xff]   ;;  %v15753_v6 = vld [vmem:[#allocation2 + $0xab4] ss:$8 sps:$4 sm:$0xff]  }
 0x2b1   :  { %4201 = vmatpush2.bf16.msra.mxu1 %v15637_v22  ;;  %v15699_v22 = vld [vmem:[#allocation2 + $0xa44] ss:$8 sps:$4 sm:$0xff]  }
 0x2b2   :  { %4202 = vmatprep.subr.bf16.mxu1 %v15645_v20  ;;  %6044 = vmatpush2.bf16.msra.mxu0 %v15766_v38  ;;  %v15820_v20 = vld [vmem:[#allocation2 + $0x1040] ss:$8 sps:$4 sm:$0xff]   ;;  %v15828_v38 = vld [vmem:[#allocation2 + $0x1034] ss:$8 sps:$4 sm:$0xff]  }
 0x2b3   :  { %6045 = vmatprep.subr.bf16.mxu0 %v15774_v10  ;;  %v15697_v10 = vld [vmem:[#allocation2 + $0xa40] ss:$8 sps:$4 sm:$0xff]  }
 0x2b5   :  { %4203 = vmatpush2.bf16.msra.mxu1 %v15643_v34  ;;  %v15705_v34 = vld [vmem:[#allocation2 + $0xa34] ss:$8 sps:$4 sm:$0xff]  }
 0x2b6   :  { %4204 = vmatprep.subr.bf16.mxu1 %v15651_v56  ;;  %6046 = vmatpush2.bf16.msra.mxu0 %v15772_v51  ;;  %v15826_v56 = vld [vmem:[#allocation2 + $0x1030] ss:$8 sps:$4 sm:$0xff]   ;;  %v15834_v51 = vld [vmem:[#allocation2 + $0x1024] ss:$8 sps:$4 sm:$0xff]  }
 0x2b7   :  { %6047 = vmatprep.subr.bf16.mxu0 %v15780_v52  ;;  %v15703_v52 = vld [vmem:[#allocation2 + $0xa30] ss:$8 sps:$4 sm:$0xff]  }
 0x2b9   :  { %4205 = vmatpush2.bf16.msra.mxu1 %v15649_v55  ;;  %v15711_v55 = vld [vmem:[#allocation2 + $0xa24] ss:$8 sps:$4 sm:$0xff]  }
 0x2ba   :  { %4206 = vmatprep.subr.bf16.mxu1 %v15657_v4  ;;  %6048 = vmatpush2.bf16.msra.mxu0 %v15778_v54  ;;  %v15832_v4 = vld [vmem:[#allocation2 + $0x1020] ss:$8 sps:$4 sm:$0xff]   ;;  %v15840_v54 = vld [vmem:[#allocation2 + $0x1014] ss:$8 sps:$4 sm:$0xff]  }
 0x2bb   :  { %6049 = vmatprep.subr.bf16.mxu0 %v15786_v57  ;;  %v15709_v57 = vld [vmem:[#allocation2 + $0xa20] ss:$8 sps:$4 sm:$0xff]  }
 0x2bd   :  { %4207 = vmatpush2.bf16.msra.mxu1 %v15655_v58  ;;  %v15717_v58 = vld [vmem:[#allocation2 + $0xa14] ss:$8 sps:$4 sm:$0xff]  }
 0x2be   :  { %4208 = vmatprep.subr.bf16.mxu1 %v15663_v59  ;;  %6050 = vmatpush2.bf16.msra.mxu0 %v15784_v49  ;;  %v15838_v59 = vld [vmem:[#allocation2 + $0x1010] ss:$8 sps:$4 sm:$0xff]   ;;  %v15846_v49 = vld [vmem:[#allocation2 + $0x1004] ss:$8 sps:$4 sm:$0xff]  }
 0x2bf   :  { %6051 = vmatprep.subr.bf16.mxu0 %v15792_v60  ;;  %v15715_v60 = vld [vmem:[#allocation2 + $0xa10] ss:$8 sps:$4 sm:$0xff]  }
 0x2c1   :  { %4209 = vmatpush2.bf16.msra.mxu1 %v15661_v63  ;;  %v15723_v63 = vld [vmem:[#allocation2 + $0xa04] ss:$8 sps:$4 sm:$0xff]  }
 0x2c2   :  { %4210 = vmatprep.subr.bf16.mxu1 %v15669_v39  ;;  %6052 = vmatpush2.bf16.msra.mxu0 %v15790_v2  ;;  %v15844_v39 = vld [vmem:[#allocation2 + $0x1000] ss:$8 sps:$4 sm:$0xff]   ;;  %v15852_v2 = vld [vmem:[#allocation2 + $0x10f4] ss:$8 sps:$4 sm:$0xff]  }
 0x2c3   :  { %6053 = vmatprep.subr.bf16.mxu0 %v15798_v30  ;;  %v15721_v30 = vld [vmem:[#allocation2 + $0xa00] ss:$8 sps:$4 sm:$0xff]  }
 0x2c5   :  { %4211 = vmatpush2.bf16.msra.mxu1 %v15667_v3  ;;  %v15729_v3 = vld [vmem:[#allocation2 + $0xaf4] ss:$8 sps:$4 sm:$0xff]  }
 0x2c6   :  { %4212 = vmatprep.subr.bf16.mxu1 %v15675_v25  ;;  %6054 = vmatpush2.bf16.msra.mxu0 %v15796_v31  ;;  %v15850_v25 = vld [vmem:[#allocation2 + $0x10f0] ss:$8 sps:$4 sm:$0xff]   ;;  %v15858_v31 = vld [vmem:[#allocation2 + $0x10e4] ss:$8 sps:$4 sm:$0xff]  }
 0x2c7   :  { %6105 = vmatprep.subr.bf16.mxu0 %v15804_v53  ;;  %v15727_v53 = vld [vmem:[#allocation2 + $0xaf0] ss:$8 sps:$4 sm:$0xff]  }
 0x2c9   :  { %4213 = vmatpush2.bf16.msra.mxu1 %v15673_v11  ;;  %6056 = vmatmul.mubr.bf16.vlgmr.msra.gmra.mxu0 %v17883_v32  ;;  %v15735_v11 = vld [vmem:[#allocation2 + $0xae4] ss:$8 sps:$4 sm:$0xff]  }
 0x2ca   :  { %4264 = vmatprep.subr.bf16.mxu1 %v15681_v15  ;;  %6106 = vmatpush1.bf16.msra.mxu0 %v15802_v17  ;;  %v15856_v15 = vld [vmem:[#allocation2 + $0x10e0] ss:$8 sps:$4 sm:$0xff]   ;;  %v15864_v17 = vld [vmem:[#allocation2 + $0x10d4] ss:$8 sps:$4 sm:$0xff]  }
 0x2cb   :  { %6107 = vmatprep.subr.bf16.mxu0 %v15810_v8  ;;  %6137 = vmatprep.mubr.bf16.mxu0 %v17974_v50  ;;  %v15733_v8 = vld [vmem:[#allocation2 + $0xae0] ss:$8 sps:$4 sm:$0xff]  }
 0x2cc   :  { %4215 = vmatmul.mubr.bf16.vlgmr.msra.gmra.mxu1 %v17893_v43 }
 0x2cd   :  { %4265 = vmatpush1.bf16.msra.mxu1 %v15679_v62  ;;  %4296 = vmatprep.mubr.bf16.mxu1 %v17988_v1  ;;  %v15741_v62 = vld [vmem:[#allocation2 + $0xad4] ss:$8 sps:$4 sm:$0xff]  }
 0x2ce   :  { %4266 = vmatprep.subr.bf16.mxu1 %v15687_v29  ;;  %6108 = vmatpush1.bf16.msra.mxu0 %v15808_v37  ;;  %v15862_v29 = vld [vmem:[#allocation2 + $0x10d0] ss:$8 sps:$4 sm:$0xff]   ;;  %v15870_v37 = vld [vmem:[#allocation2 + $0x10c4] ss:$8 sps:$4 sm:$0xff]  }
 0x2cf   :  { %6109 = vmatprep.subr.bf16.mxu0 %v15816_v41  ;;  %v15739_v41 = vld [vmem:[#allocation2 + $0xad0] ss:$8 sps:$4 sm:$0xff]  }
 0x2d1   :  { %4267 = vmatpush1.bf16.msra.mxu1 %v15685_v18  ;;  %v15868_v18 = vld [vmem:[#allocation2 + $0x10c0] ss:$8 sps:$4 sm:$0xff]  }
 0x2d2   :  { %4268 = vmatprep.subr.bf16.mxu1 %v15693_v48  ;;  %6110 = vmatpush1.bf16.msra.mxu0 %v15814_v16  ;;  %v15873_v48 = vld [vmem:[#allocation2 + $0x10b4] ss:$8 sps:$4 sm:$0xff]   ;;  %v15745_v16 = vld [vmem:[#allocation2 + $0xac0] ss:$8 sps:$4 sm:$0xff]  }
 0x2d3   :  { %6111 = vmatprep.subr.bf16.mxu0 %v15822_v40  ;;  %v15871_v40 = vld [vmem:[#allocation2 + $0x10b0] ss:$8 sps:$4 sm:$0xff]  }
 0x2d5   :  { %4269 = vmatpush1.bf16.msra.mxu1 %v15691_v46  ;;  %v15876_v46 = vld [vmem:[#allocation2 + $0x10a4] ss:$8 sps:$4 sm:$0xff]  }
 0x2d6   :  { %4270 = vmatprep.subr.bf16.mxu1 %v15699_v22  ;;  %6112 = vmatpush1.bf16.msra.mxu0 %v15820_v20  ;;  %v15751_v22 = vld [vmem:[#allocation2 + $0xab0] ss:$8 sps:$4 sm:$0xff]   ;;  %v15759_v20 = vld [vmem:[#allocation2 + $0xaa4] ss:$8 sps:$4 sm:$0xff]  }
 0x2d7   :  { %6113 = vmatprep.subr.bf16.mxu0 %v15828_v38  ;;  %v15874_v38 = vld [vmem:[#allocation2 + $0x10a0] ss:$8 sps:$4 sm:$0xff]  }
 0x2d9   :  { %4271 = vmatpush1.bf16.msra.mxu1 %v15697_v10  ;;  %v15879_v10 = vld [vmem:[#allocation2 + $0x1094] ss:$8 sps:$4 sm:$0xff]  }
 0x2da   :  { %4272 = vmatprep.subr.bf16.mxu1 %v15705_v34  ;;  %6114 = vmatpush1.bf16.msra.mxu0 %v15826_v56  ;;  %v15757_v34 = vld [vmem:[#allocation2 + $0xaa0] ss:$8 sps:$4 sm:$0xff]   ;;  %v15765_v56 = vld [vmem:[#allocation2 + $0xa94] ss:$8 sps:$4 sm:$0xff]  }
 0x2db   :  { %6115 = vmatprep.subr.bf16.mxu0 %v15834_v51  ;;  %v15877_v51 = vld [vmem:[#allocation2 + $0x1090] ss:$8 sps:$4 sm:$0xff]  }
 0x2dd   :  { %4273 = vmatpush1.bf16.msra.mxu1 %v15703_v52  ;;  %v15882_v52 = vld [vmem:[#allocation2 + $0x1084] ss:$8 sps:$4 sm:$0xff]  }
 0x2de   :  { %4274 = vmatprep.subr.bf16.mxu1 %v15711_v55  ;;  %6116 = vmatpush1.bf16.msra.mxu0 %v15832_v4  ;;  %v15763_v55 = vld [vmem:[#allocation2 + $0xa90] ss:$8 sps:$4 sm:$0xff]   ;;  %v15771_v4 = vld [vmem:[#allocation2 + $0xa84] ss:$8 sps:$4 sm:$0xff]  }
 0x2df   :  { %6117 = vmatprep.subr.bf16.mxu0 %v15840_v54  ;;  %v15880_v54 = vld [vmem:[#allocation2 + $0x1080] ss:$8 sps:$4 sm:$0xff]  }
 0x2e1   :  { %4275 = vmatpush1.bf16.msra.mxu1 %v15709_v57  ;;  %v15885_v57 = vld [vmem:[#allocation2 + $0x1274] ss:$8 sps:$4 sm:$0xff]  }
 0x2e2   :  { %4276 = vmatprep.subr.bf16.mxu1 %v15717_v58  ;;  %6118 = vmatpush1.bf16.msra.mxu0 %v15838_v59  ;;  %v15769_v58 = vld [vmem:[#allocation2 + $0xa80] ss:$8 sps:$4 sm:$0xff]   ;;  %v15777_v59 = vld [vmem:[#allocation2 + $0xc74] ss:$8 sps:$4 sm:$0xff]  }
 0x2e3   :  { %6119 = vmatprep.subr.bf16.mxu0 %v15846_v49  ;;  %v15883_v49 = vld [vmem:[#allocation2 + $0x1270] ss:$8 sps:$4 sm:$0xff]  }
 0x2e5   :  { %4277 = vmatpush1.bf16.msra.mxu1 %v15715_v60  ;;  %v15775_v60 = vld [vmem:[#allocation2 + $0xc70] ss:$8 sps:$4 sm:$0xff]  }
 0x2e6   :  { %4278 = vmatprep.subr.bf16.mxu1 %v15723_v63  ;;  %6120 = vmatpush1.bf16.msra.mxu0 %v15844_v39  ;;  %v15888_v63 = vld [vmem:[#allocation2 + $0x1264] ss:$8 sps:$4 sm:$0xff]   ;;  %v18140_v39 = vpop.f32.mrf.mxu0 }
 0x2e7   :  { %6121 = vmatprep.subr.bf16.mxu0 %v15852_v2  ;;  %v15783_v2 = vld [vmem:[#allocation2 + $0xc64] ss:$8 sps:$4 sm:$0xff]  }
 0x2e9   :  { %4279 = vmatpush1.bf16.msra.mxu1 %v15721_v30  ;;  %v15886_v30 = vld [vmem:[#allocation2 + $0x1260] ss:$8 sps:$4 sm:$0xff]  }
 0x2ea   :  { %4280 = vmatprep.subr.bf16.mxu1 %v15729_v3  ;;  %6122 = vmatpush2.bf16.msra.mxu0 %v15850_v25  ;;  %v15891_v3 = vld [vmem:[#allocation2 + $0x1254] ss:$8 sps:$4 sm:$0xff]   ;;  %v18143_v25 = vpop.f32.mrf.mxu0 }
 0x2eb   :  { %6123 = vmatprep.subr.bf16.mxu0 %v15858_v31  ;;  %v15781_v31 = vld [vmem:[#allocation2 + $0xc60] ss:$8 sps:$4 sm:$0xff]  }
 0x2ed   :  { %4281 = vmatpush2.bf16.msra.mxu1 %v15727_v53  ;;  %v4261_v53 = vpop.f32.mrf.mxu0 }
 0x2ee   :  { %4282 = vmatprep.subr.bf16.mxu1 %v15735_v11  ;;  %6124 = vmatpush2.bf16.msra.mxu0 %v15856_v15  ;;  %v15789_v11 = vld [vmem:[#allocation2 + $0xc54] ss:$8 sps:$4 sm:$0xff]   ;;  %v15889_v15 = vld [vmem:[#allocation2 + $0x1250] ss:$8 sps:$4 sm:$0xff]   ;;  %v15829_v53 = vld [vmem:[#allocation2 + $0xce0] ss:$8 sps:$4 sm:$0xff]  }
 0x2ef   :  { %6125 = vmatprep.subr.bf16.mxu0 %v15864_v17  ;;  %v15894_v17 = vld [vmem:[#allocation2 + $0x1244] ss:$8 sps:$4 sm:$0xff]  }
 0x2f1   :  { %4283 = vmatpush2.bf16.msra.mxu1 %v15733_v8  ;;  %v4262_v8 = vpop.f32.mrf.mxu0 }
 0x2f2   :  { %4284 = vmatprep.subr.bf16.mxu1 %v15741_v62  ;;  %6126 = vmatpush2.bf16.msra.mxu0 %v15862_v29  ;;  %v15787_v62 = vld [vmem:[#allocation2 + $0xc50] ss:$8 sps:$4 sm:$0xff]   ;;  %v15795_v29 = vld [vmem:[#allocation2 + $0xc44] ss:$8 sps:$4 sm:$0xff]  }
 0x2f3   :  { %6127 = vmatprep.subr.bf16.mxu0 %v15870_v37  ;;  %v15892_v37 = vld [vmem:[#allocation2 + $0x1240] ss:$8 sps:$4 sm:$0xff]   ;;  %v15835_v8 = vld [vmem:[#allocation2 + $0xcd0] ss:$8 sps:$4 sm:$0xff]  }
 0x2f5   :  { %4285 = vmatpush2.bf16.msra.mxu1 %v15739_v41 }
 0x2f6   :  { %4286 = vmatprep.subr.bf16.mxu1 %v15747_v14  ;;  %6128 = vmatpush2.bf16.msra.mxu0 %v15868_v18  ;;  %v15897_v14 = vld [vmem:[#allocation2 + $0x1234] ss:$8 sps:$4 sm:$0xff]  }
 0x2f7   :  { %6129 = vmatprep.subr.bf16.mxu0 %v15873_v48  ;;  %v15793_v48 = vld [vmem:[#allocation2 + $0xc40] ss:$8 sps:$4 sm:$0xff]  }
 0x2f9   :  { %4287 = vmatpush2.bf16.msra.mxu1 %v15745_v16  ;;  %v15801_v16 = vld [vmem:[#allocation2 + $0xc34] ss:$8 sps:$4 sm:$0xff]  }
 0x2fa   :  { %4288 = vmatprep.subr.bf16.mxu1 %v15753_v6  ;;  %6130 = vmatpush2.bf16.msra.mxu0 %v15871_v40  ;;  %v15895_v6 = vld [vmem:[#allocation2 + $0x1230] ss:$8 sps:$4 sm:$0xff]  }
 0x2fb   :  { %6131 = vmatprep.subr.bf16.mxu0 %v15876_v46  ;;  %v15900_v46 = vld [vmem:[#allocation2 + $0x1224] ss:$8 sps:$4 sm:$0xff]  }
 0x2fd   :  { %4289 = vmatpush2.bf16.msra.mxu1 %v15751_v22 }
 0x2fe   :  { %4290 = vmatprep.subr.bf16.mxu1 %v15759_v20  ;;  %6132 = vmatpush2.bf16.msra.mxu0 %v15874_v38  ;;  %v15799_v20 = vld [vmem:[#allocation2 + $0xc30] ss:$8 sps:$4 sm:$0xff]   ;;  %v15807_v38 = vld [vmem:[#allocation2 + $0xc24] ss:$8 sps:$4 sm:$0xff]  }
 0x2ff   :  { %6133 = vmatprep.subr.bf16.mxu0 %v15879_v10  ;;  %v15898_v10 = vld [vmem:[#allocation2 + $0x1220] ss:$8 sps:$4 sm:$0xff]  }
 0x301   :  { %4291 = vmatpush2.bf16.msra.mxu1 %v15757_v34  ;;  %v15805_v34 = vld [vmem:[#allocation2 + $0xc20] ss:$8 sps:$4 sm:$0xff]  }
 0x302   :  { %4292 = vmatprep.subr.bf16.mxu1 %v15765_v56  ;;  %6134 = vmatpush2.bf16.msra.mxu0 %v15877_v51  ;;  %v15903_v56 = vld [vmem:[#allocation2 + $0x1214] ss:$8 sps:$4 sm:$0xff]  }
 0x303   :  { %6135 = vmatprep.subr.bf16.mxu0 %v15882_v52  ;;  %v15813_v51 = vld [vmem:[#allocation2 + $0xc14] ss:$8 sps:$4 sm:$0xff]   ;;  %v15901_v52 = vld [vmem:[#allocation2 + $0x1210] ss:$8 sps:$4 sm:$0xff]  }
 0x305   :  { %4293 = vmatpush2.bf16.msra.mxu1 %v15763_v55  ;;  %v15906_v55 = vld [vmem:[#allocation2 + $0x1204] ss:$8 sps:$4 sm:$0xff]  }
 0x306   :  { %4294 = vmatprep.subr.bf16.mxu1 %v15771_v4  ;;  %6136 = vmatpush2.bf16.msra.mxu0 %v15880_v54  ;;  %v15811_v4 = vld [vmem:[#allocation2 + $0xc10] ss:$8 sps:$4 sm:$0xff]   ;;  %v15819_v54 = vld [vmem:[#allocation2 + $0xc04] ss:$8 sps:$4 sm:$0xff]  }
 0x307   :  { %6187 = vmatprep.subr.bf16.mxu0 %v15885_v57  ;;  %v15904_v57 = vld [vmem:[#allocation2 + $0x1200] ss:$8 sps:$4 sm:$0xff]  }
 0x309   :  { %4295 = vmatpush2.bf16.msra.mxu1 %v15769_v58  ;;  %6138 = vmatmul.mubr.bf16.vlgmr.msra.gmra.mxu0 %v17996_v19  ;;  %v18148_v41 = vpop.f32.mrf.mxu0  ;;  %v15909_v58 = vld [vmem:[#allocation2 + $0x12f4] ss:$8 sps:$4 sm:$0xff]  }
 0x30a   :  { %4346 = vmatprep.subr.bf16.mxu1 %v15777_v59  ;;  %6188 = vmatpush1.bf16.msra.mxu0 %v15883_v49  ;;  %v15817_v59 = vld [vmem:[#allocation2 + $0xc00] ss:$8 sps:$4 sm:$0xff]   ;;  %v15825_v49 = vld [vmem:[#allocation2 + $0xcf4] ss:$8 sps:$4 sm:$0xff]  }
 0x30b   :  { %6189 = vmatprep.subr.bf16.mxu0 %v15888_v63  ;;  %6219 = vmatprep.mubr.bf16.mxu0 %v18039_v9  ;;  %v18150_v18 = vpop.f32.mrf.mxu0  ;;  %v15912_v63 = vld [vmem:[#allocation2 + $0x12e4] ss:$8 sps:$4 sm:$0xff]  }
 0x30c   :  { %4297 = vmatmul.mubr.bf16.vlgmr.msra.gmra.mxu1 %v18003_v33 }
 0x30d   :  { %4347 = vmatpush1.bf16.msra.mxu1 %v15775_v60  ;;  %4378 = vmatprep.mubr.bf16.mxu1 %v18043_v13  ;;  %v4343_v40 = vpop.f32.mrf.mxu0  ;;  %v15907_v60 = vld [vmem:[#allocation2 + $0x12f0] ss:$8 sps:$4 sm:$0xff]  }
 0x30e   :  { %4348 = vmatprep.subr.bf16.mxu1 %v15783_v2  ;;  %6190 = vmatpush1.bf16.msra.mxu0 %v15886_v30  ;;  %v15823_v2 = vld [vmem:[#allocation2 + $0xcf0] ss:$8 sps:$4 sm:$0xff]   ;;  %v15831_v30 = vld [vmem:[#allocation2 + $0xce4] ss:$8 sps:$4 sm:$0xff]  }
 0x30f   :  { %6191 = vmatprep.subr.bf16.mxu0 %v15891_v3  ;;  %v4344_v22 = vpop.f32.mrf.mxu0  ;;  %v15910_v3 = vld [vmem:[#allocation2 + $0x12e0] ss:$8 sps:$4 sm:$0xff]   ;;  %v15847_v40 = vld [vmem:[#allocation2 + $0xcb0] ss:$8 sps:$4 sm:$0xff]  }
 0x310   :  { %v15922_v22 = vld [vmem:[#allocation2 + $0x12a0] ss:$8 sps:$4 sm:$0xff]  }
 0x311   :  { %4349 = vmatpush1.bf16.msra.mxu1 %v15781_v31  ;;  %v15915_v31 = vld [vmem:[#allocation2 + $0x12d4] ss:$8 sps:$4 sm:$0xff]  }
 0x312   :  { %4350 = vmatprep.subr.bf16.mxu1 %v15789_v11  ;;  %6192 = vmatpush1.bf16.msra.mxu0 %v15889_v15  ;;  %v15837_v11 = vld [vmem:[#allocation2 + $0xcd4] ss:$8 sps:$4 sm:$0xff]   ;;  %v15913_v15 = vld [vmem:[#allocation2 + $0x12d0] ss:$8 sps:$4 sm:$0xff]  }
 0x313   :  { %6193 = vmatprep.subr.bf16.mxu0 %v15894_v17  ;;  %v15918_v17 = vld [vmem:[#allocation2 + $0x12c4] ss:$8 sps:$4 sm:$0xff]  }
 0x315   :  { %4351 = vmatpush1.bf16.msra.mxu1 %v15787_v62  ;;  %v15843_v62 = vld [vmem:[#allocation2 + $0xcc4] ss:$8 sps:$4 sm:$0xff]  }
 0x316   :  { %4352 = vmatprep.subr.bf16.mxu1 %v15795_v29  ;;  %6194 = vmatpush1.bf16.msra.mxu0 %v15892_v37  ;;  %v15916_v29 = vld [vmem:[#allocation2 + $0x12c0] ss:$8 sps:$4 sm:$0xff]   ;;  %v15921_v37 = vld [vmem:[#allocation2 + $0x12b4] ss:$8 sps:$4 sm:$0xff]  }
 0x317   :  { %6195 = vmatprep.subr.bf16.mxu0 %v15897_v14  ;;  %v15841_v14 = vld [vmem:[#allocation2 + $0xcc0] ss:$8 sps:$4 sm:$0xff]  }
 0x319   :  { %4353 = vmatpush1.bf16.msra.mxu1 %v15793_v48  ;;  %v15849_v48 = vld [vmem:[#allocation2 + $0xcb4] ss:$8 sps:$4 sm:$0xff]  }
 0x31a   :  { %4354 = vmatprep.subr.bf16.mxu1 %v15801_v16  ;;  %6196 = vmatpush1.bf16.msra.mxu0 %v15895_v6  ;;  %v15919_v16 = vld [vmem:[#allocation2 + $0x12b0] ss:$8 sps:$4 sm:$0xff]   ;;  %v15924_v6 = vld [vmem:[#allocation2 + $0x12a4] ss:$8 sps:$4 sm:$0xff]  }
 0x31b   :  { %6197 = vmatprep.subr.bf16.mxu0 %v15900_v46  ;;  %v15855_v46 = vld [vmem:[#allocation2 + $0xca4] ss:$8 sps:$4 sm:$0xff]  }
 0x31d   :  { %4355 = vmatpush1.bf16.msra.mxu1 %v15799_v20  ;;  %v15927_v20 = vld [vmem:[#allocation2 + $0x1294] ss:$8 sps:$4 sm:$0xff]  }
 0x31e   :  { %4356 = vmatprep.subr.bf16.mxu1 %v15807_v38  ;;  %6198 = vmatpush1.bf16.msra.mxu0 %v15898_v10  ;;  %v15853_v38 = vld [vmem:[#allocation2 + $0xca0] ss:$8 sps:$4 sm:$0xff]   ;;  %v15861_v10 = vld [vmem:[#allocation2 + $0xc94] ss:$8 sps:$4 sm:$0xff]  }
 0x31f   :  { %6199 = vmatprep.subr.bf16.mxu0 %v15903_v56  ;;  %v15930_v56 = vld [vmem:[#allocation2 + $0x1284] ss:$8 sps:$4 sm:$0xff]  }
 0x321   :  { %4357 = vmatpush1.bf16.msra.mxu1 %v15805_v34  ;;  %v15925_v34 = vld [vmem:[#allocation2 + $0x1290] ss:$8 sps:$4 sm:$0xff]  }
 0x322   :  { %4358 = vmatprep.subr.bf16.mxu1 %v15813_v51  ;;  %6200 = vmatpush1.bf16.msra.mxu0 %v15901_v52  ;;  %v15859_v51 = vld [vmem:[#allocation2 + $0xc90] ss:$8 sps:$4 sm:$0xff]   ;;  %v15867_v52 = vld [vmem:[#allocation2 + $0xc84] ss:$8 sps:$4 sm:$0xff]  }
 0x323   :  { %6201 = vmatprep.subr.bf16.mxu0 %v15906_v55  ;;  %v15928_v55 = vld [vmem:[#allocation2 + $0x1280] ss:$8 sps:$4 sm:$0xff]  }
 0x325   :  { %4359 = vmatpush1.bf16.msra.mxu1 %v15811_v4  ;;  %v15933_v4 = vld [vmem:[#allocation2 + $0x1474] ss:$8 sps:$4 sm:$0xff]  }
 0x326   :  { %4360 = vmatprep.subr.bf16.mxu1 %v15819_v54  ;;  %6202 = vmatpush1.bf16.msra.mxu0 %v15904_v57  ;;  %v15865_v54 = vld [vmem:[#allocation2 + $0xc80] ss:$8 sps:$4 sm:$0xff]   ;;  %v15931_v57 = vld [vmem:[#allocation2 + $0x1470] ss:$8 sps:$4 sm:$0xff]  }
 0x327   :  { %6203 = vmatprep.subr.bf16.mxu0 %v15909_v58  ;;  %v15936_v58 = vld [vmem:[#allocation2 + $0x1464] ss:$8 sps:$4 sm:$0xff]  }
 0x329   :  { %4361 = vmatpush1.bf16.msra.mxu1 %v15817_v59  ;;  %v15934_v59 = vld [vmem:[#allocation2 + $0x1460] ss:$8 sps:$4 sm:$0xff]  }
 0x32a   :  { %4362 = vmatprep.subr.bf16.mxu1 %v15825_v49  ;;  %6204 = vmatpush2.bf16.msra.mxu0 %v15907_v60  ;;  %v15939_v49 = vld [vmem:[#allocation2 + $0x1454] ss:$8 sps:$4 sm:$0xff]  }
 0x32b   :  { %6205 = vmatprep.subr.bf16.mxu0 %v15912_v63 }
 0x32d   :  { %4363 = vmatpush2.bf16.msra.mxu1 %v15823_v2  ;;  %v15937_v2 = vld [vmem:[#allocation2 + $0x1450] ss:$8 sps:$4 sm:$0xff]  }
 0x32e   :  { %4364 = vmatprep.subr.bf16.mxu1 %v15831_v30  ;;  %6206 = vmatpush2.bf16.msra.mxu0 %v15910_v3  ;;  %v15942_v30 = vld [vmem:[#allocation2 + $0x1444] ss:$8 sps:$4 sm:$0xff]  }
 0x32f   :  { %6207 = vmatprep.subr.bf16.mxu0 %v15915_v31 }
 0x331   :  { %4365 = vmatpush2.bf16.msra.mxu1 %v15829_v53  ;;  %v15940_v53 = vld [vmem:[#allocation2 + $0x1440] ss:$8 sps:$4 sm:$0xff]  }
 0x332   :  { %4366 = vmatprep.subr.bf16.mxu1 %v15837_v11  ;;  %6208 = vmatpush2.bf16.msra.mxu0 %v15913_v15  ;;  %v15945_v15 = vld [vmem:[#allocation2 + $0x1434] ss:$8 sps:$4 sm:$0xff]  }
 0x333   :  { %6209 = vmatprep.subr.bf16.mxu0 %v15918_v17  ;;  %v15979_v17 = vld [vmem:[#allocation4 + $0x170] ss:$8 sps:$4 sm:$0xff]  }
 0x335   :  { %4367 = vmatpush2.bf16.msra.mxu1 %v15835_v8  ;;  %v15981_v8 = vld [vmem:[#allocation4 + $0x174] ss:$8 sps:$4 sm:$0xff]  }
 0x336   :  { %4368 = vmatprep.subr.bf16.mxu1 %v15843_v62  ;;  %6210 = vmatpush2.bf16.msra.mxu0 %v15916_v29  ;;  %v15987_v29 = vld [vmem:[#allocation4 + $0x164] ss:$8 sps:$4 sm:$0xff]  }
 0x337   :  { %6211 = vmatprep.subr.bf16.mxu0 %v15921_v37  ;;  %v15943_v37 = vld [vmem:[#allocation2 + $0x1430] ss:$8 sps:$4 sm:$0xff]  }
 0x339   :  { %4369 = vmatpush2.bf16.msra.mxu1 %v15841_v14 }
 0x33a   :  { %4370 = vmatprep.subr.bf16.mxu1 %v15849_v48  ;;  %6212 = vmatpush2.bf16.msra.mxu0 %v15919_v16  ;;  %v15948_v48 = vld [vmem:[#allocation2 + $0x1424] ss:$8 sps:$4 sm:$0xff]   ;;  %v15985_v16 = vld [vmem:[#allocation4 + $0x160] ss:$8 sps:$4 sm:$0xff]  }
 0x33b   :  { %6213 = vmatprep.subr.bf16.mxu0 %v15924_v6  ;;  %v15993_v6 = vld [vmem:[#allocation4 + $0x154] ss:$8 sps:$4 sm:$0xff]  }
 0x33d   :  { %4371 = vmatpush2.bf16.msra.mxu1 %v15847_v40 }
 0x33e   :  { %4372 = vmatprep.subr.bf16.mxu1 %v15855_v46  ;;  %6214 = vmatpush2.bf16.msra.mxu0 %v15922_v22  ;;  %v15946_v46 = vld [vmem:[#allocation2 + $0x1420] ss:$8 sps:$4 sm:$0xff]   ;;  %v15951_v22 = vld [vmem:[#allocation2 + $0x1414] ss:$8 sps:$4 sm:$0xff]  }
 0x33f   :  { %6215 = vmatprep.subr.bf16.mxu0 %v15927_v20  ;;  %v15991_v20 = vld [vmem:[#allocation4 + $0x150] ss:$8 sps:$4 sm:$0xff]  }
 0x341   :  { %4373 = vmatpush2.bf16.msra.mxu1 %v15853_v38  ;;  %v15999_v38 = vld [vmem:[#allocation4 + $0x144] ss:$8 sps:$4 sm:$0xff]  }
 0x342   :  { %4374 = vmatprep.subr.bf16.mxu1 %v15861_v10  ;;  %6216 = vmatpush2.bf16.msra.mxu0 %v15925_v34  ;;  %v15949_v10 = vld [vmem:[#allocation2 + $0x1410] ss:$8 sps:$4 sm:$0xff]   ;;  %v15954_v34 = vld [vmem:[#allocation2 + $0x1404] ss:$8 sps:$4 sm:$0xff]  }
 0x343   :  { %6217 = vmatprep.subr.bf16.mxu0 %v15930_v56  ;;  %v15997_v56 = vld [vmem:[#allocation4 + $0x140] ss:$8 sps:$4 sm:$0xff]  }
 0x345   :  { %4375 = vmatpush2.bf16.msra.mxu1 %v15859_v51  ;;  %v16005_v51 = vld [vmem:[#allocation4 + $0x134] ss:$8 sps:$4 sm:$0xff]  }
 0x346   :  { %4376 = vmatprep.subr.bf16.mxu1 %v15867_v52  ;;  %6218 = vmatpush2.bf16.msra.mxu0 %v15928_v55  ;;  %v15952_v52 = vld [vmem:[#allocation2 + $0x1400] ss:$8 sps:$4 sm:$0xff]   ;;  %v15957_v55 = vld [vmem:[#allocation2 + $0x14f4] ss:$8 sps:$4 sm:$0xff]  }
 0x347   :  { %6269 = vmatprep.subr.bf16.mxu0 %v15933_v4  ;;  %v16003_v4 = vld [vmem:[#allocation4 + $0x130] ss:$8 sps:$4 sm:$0xff]  }
 0x349   :  { %4377 = vmatpush2.bf16.msra.mxu1 %v15865_v54  ;;  %6220 = vmatmul.mubr.bf16.vlgmr.msra.gmra.mxu0 %v18062_v35  ;;  %v18159_v11 = vpop.f32.mrf.mxu0  ;;  %v16011_v54 = vld [vmem:[#allocation4 + $0x124] ss:$8 sps:$4 sm:$0xff]  }
 0x34a   :  { %6270 = vmatpush1.bf16.msra.mxu0 %v15931_v57  ;;  %6301 = vmatprep.mubr.bf16.mxu0 %v18064_v24  ;;  %v15955_v57 = vld [vmem:[#allocation2 + $0x14f0] ss:$8 sps:$4 sm:$0xff]  }
 0x34b   :  { %6271 = vmatprep.subr.bf16.mxu0 %v15936_v58  ;;  %v18161_v62 = vpop.f32.mrf.mxu0  ;;  %4862 = vmatprep.subr.bf16.mxu1 %v15981_v8  ;;  %v15960_v58 = vld [vmem:[#allocation2 + $0x14e4] ss:$8 sps:$4 sm:$0xff]   ;;  %v16029_v8 = vld [vmem:[#allocation4 + $0x1f4] ss:$8 sps:$4 sm:$0xff]  }
 0x34c   :  { %4379 = vmatmul.mubr.bf16.vlgmr.msra.gmra.mxu1 %v18068_v27  ;;  %v18155_v60 = vpop.f32.mrf.mxu1 }
 0x34d   :  { %v4425_v14 = vpop.f32.mrf.mxu0  ;;  %4863 = vmatpush1.bf16.msra.mxu1 %v15979_v17  ;;  %v16021_v17 = vld [vmem:[#allocation4 + $0x100] ss:$8 sps:$4 sm:$0xff]  }
 0x34e   :  { %v18157_v63 = vpop.f32.mrf.mxu1  ;;  %6272 = vmatpush1.bf16.msra.mxu0 %v15934_v59  ;;  %4864 = vmatprep.subr.bf16.mxu1 %v15987_v29  ;;  %v16009_v59 = vld [vmem:[#allocation4 + $0x120] ss:$8 sps:$4 sm:$0xff]   ;;  %v16027_v14 = vld [vmem:[#allocation4 + $0x1f0] ss:$8 sps:$4 sm:$0xff]  }
 0x34f   :  { %6273 = vmatprep.subr.bf16.mxu0 %v15939_v49  ;;  %v4426_v40 = vpop.f32.mrf.mxu0  ;;  %v16017_v49 = vld [vmem:[#allocation4 + $0x114] ss:$8 sps:$4 sm:$0xff]   ;;  %v15964_v29 = vld [vmem:[#allocation2 + $0x14c0] ss:$8 sps:$4 sm:$0xff]  }
 0x350   :  { %v2708_v3 = vpop.f32.mrf.mxu1  ;;  %v16033_v40 = vld [vmem:[#allocation4 + $0x1e0] ss:$8 sps:$4 sm:$0xff]  }
 0x351   :  { %4865 = vmatpush1.bf16.msra.mxu1 %v15985_v16  ;;  %v16015_v3 = vld [vmem:[#allocation4 + $0x110] ss:$8 sps:$4 sm:$0xff]  }
 0x352   :  { %v2709_v31 = vpop.f32.mrf.mxu1  ;;  %6274 = vmatpush1.bf16.msra.mxu0 %v15937_v2  ;;  %4866 = vmatprep.subr.bf16.mxu1 %v15993_v6  ;;  %v15958_v2 = vld [vmem:[#allocation2 + $0x14e0] ss:$8 sps:$4 sm:$0xff]   ;;  %v15967_v16 = vld [vmem:[#allocation2 + $0x14b0] ss:$8 sps:$4 sm:$0xff]   ;;  %v15972_v6 = vld [vmem:[#allocation2 + $0x14a4] ss:$8 sps:$4 sm:$0xff]  }
 0x353   :  { %6275 = vmatprep.subr.bf16.mxu0 %v15942_v30  ;;  %v15963_v30 = vld [vmem:[#allocation2 + $0x14d4] ss:$8 sps:$4 sm:$0xff]   ;;  %v16023_v31 = vld [vmem:[#allocation4 + $0x104] ss:$8 sps:$4 sm:$0xff]  }
 0x355   :  { %4867 = vmatpush1.bf16.msra.mxu1 %v15991_v20  ;;  %v15975_v20 = vld [vmem:[#allocation2 + $0x1494] ss:$8 sps:$4 sm:$0xff]  }
 0x356   :  { %6276 = vmatpush1.bf16.msra.mxu0 %v15940_v53  ;;  %4868 = vmatprep.subr.bf16.mxu1 %v15999_v38  ;;  %v15961_v53 = vld [vmem:[#allocation2 + $0x14d0] ss:$8 sps:$4 sm:$0xff]  }
 0x357   :  { %6277 = vmatprep.subr.bf16.mxu0 %v15945_v15  ;;  %v15966_v15 = vld [vmem:[#allocation2 + $0x14c4] ss:$8 sps:$4 sm:$0xff]   ;;  %v16039_v38 = vld [vmem:[#allocation4 + $0x1d0] ss:$8 sps:$4 sm:$0xff]  }
 0x359   :  { %4869 = vmatpush1.bf16.msra.mxu1 %v15997_v56  ;;  %v15978_v56 = vld [vmem:[#allocation2 + $0x1484] ss:$8 sps:$4 sm:$0xff]  }
 0x35a   :  { %6278 = vmatpush1.bf16.msra.mxu0 %v15943_v37  ;;  %4870 = vmatprep.subr.bf16.mxu1 %v16005_v51  ;;  %v15969_v37 = vld [vmem:[#allocation2 + $0x14b4] ss:$8 sps:$4 sm:$0xff]   ;;  %v16045_v51 = vld [vmem:[#allocation4 + $0x1c0] ss:$8 sps:$4 sm:$0xff]  }
 0x35b   :  { %6279 = vmatprep.subr.bf16.mxu0 %v15948_v48  ;;  %v16035_v48 = vld [vmem:[#allocation4 + $0x1e4] ss:$8 sps:$4 sm:$0xff]  }
 0x35d   :  { %4871 = vmatpush1.bf16.msra.mxu1 %v16003_v4  ;;  %v3009_v4 = vld [vmem:[#allocation13 + $0x6] ss:$8 sm:$0x3] }
 0x35e   :  { %6280 = vmatpush1.bf16.msra.mxu0 %v15946_v46  ;;  %4872 = vmatprep.subr.bf16.mxu1 %v16011_v54  ;;  %v16041_v46 = vld [vmem:[#allocation4 + $0x1d4] ss:$8 sps:$4 sm:$0xff]   ;;  %v15982_v54 = vld [vmem:[#allocation4 + $0x370] ss:$8 sps:$4 sm:$0xff]  }
 0x35f   :  { %6281 = vmatprep.subr.bf16.mxu0 %v15951_v22  ;;  %v15970_v22 = vld [vmem:[#allocation2 + $0x14a0] ss:$8 sps:$4 sm:$0xff]  }
 0x361   :  { %4873 = vmatpush1.bf16.msra.mxu1 %v16009_v59  ;;  %v3018_v59 = vrot.slane %v3009_v4, %v17844_v26 }
 0x362   :  { %6282 = vmatpush1.bf16.msra.mxu0 %v15949_v10  ;;  %4874 = vmatprep.subr.bf16.mxu1 %v16017_v49  ;;  %v16047_v10 = vld [vmem:[#allocation4 + $0x1c4] ss:$8 sps:$4 sm:$0xff]   ;;  %v15988_v49 = vld [vmem:[#allocation4 + $0x360] ss:$8 sps:$4 sm:$0xff]  }
 0x363   :  { %6283 = vmatprep.subr.bf16.mxu0 %v15954_v34  ;;  %v15973_v34 = vld [vmem:[#allocation2 + $0x1490] ss:$8 sps:$4 sm:$0xff]  }
 0x365   :  { %4875 = vmatpush1.bf16.msra.mxu1 %v16015_v3  ;;  %v16053_v3 = vld [vmem:[#allocation4 + $0x1b4] ss:$8 sps:$4 sm:$0xff]  }
 0x366   :  { %6284 = vmatpush1.bf16.msra.mxu0 %v15952_v52  ;;  %4876 = vmatprep.subr.bf16.mxu1 %v16023_v31  ;;  %v15976_v52 = vld [vmem:[#allocation2 + $0x1480] ss:$8 sps:$4 sm:$0xff]  }
 0x367   :  { %6285 = vmatprep.subr.bf16.mxu0 %v15957_v55  ;;  %v15984_v55 = vld [vmem:[#allocation4 + $0x374] ss:$8 sps:$4 sm:$0xff]  }
 0x369   :  { %4877 = vmatpush1.bf16.msra.mxu1 %v16021_v17 }
 0x36a   :  { %6286 = vmatpush2.bf16.msra.mxu0 %v15955_v57  ;;  %4878 = vmatprep.subr.bf16.mxu1 %v16029_v8  ;;  %v3014_v57 = vrot.slane %v3009_v4, %v17836_v23  ;;  %v16026_v4 = vld [vmem:[#allocation4 + $0x304] ss:$8 sps:$4 sm:$0xff]  }
 0x36b   :  { %6287 = vmatprep.subr.bf16.mxu0 %v15960_v58  ;;  %v15990_v58 = vld [vmem:[#allocation4 + $0x364] ss:$8 sps:$4 sm:$0xff]  }
 0x36d   :  { %4879 = vmatpush2.bf16.msra.mxu1 %v16027_v14  ;;  %v16002_v14 = vld [vmem:[#allocation4 + $0x344] ss:$8 sps:$4 sm:$0xff]  }
 0x36e   :  { %6288 = vmatpush2.bf16.msra.mxu0 %v15958_v2  ;;  %4880 = vmatprep.subr.bf16.mxu1 %v16035_v48  ;;  %v4176_v2 = vadd.f32 %v18132_v28, %v3014_v57  ;;  %v16059_v48 = vld [vmem:[#allocation4 + $0x1a4] ss:$8 sps:$4 sm:$0xff]   ;;  %v16032_v57 = vld [vmem:[#allocation4 + $0x3f4] ss:$8 sps:$4 sm:$0xff]  }
 0x36f   :  { %6289 = vmatprep.subr.bf16.mxu0 %v15963_v30  ;;  %v15996_v30 = vld [vmem:[#allocation4 + $0x354] ss:$8 sps:$4 sm:$0xff]  }
 0x371   :  { %4881 = vmatpush2.bf16.msra.mxu1 %v16033_v40  ;;  %v16000_v40 = vld [vmem:[#allocation4 + $0x340] ss:$8 sps:$4 sm:$0xff]  }
 0x372   :  { %6290 = vmatpush2.bf16.msra.mxu0 %v15961_v53  ;;  %4882 = vmatprep.subr.bf16.mxu1 %v16041_v46  ;;  %v16051_v53 = vld [vmem:[#allocation4 + $0x1b0] ss:$8 sps:$4 sm:$0xff]   ;;  %v16065_v46 = vld [vmem:[#allocation4 + $0x194] ss:$8 sps:$4 sm:$0xff]  }
 0x373   :  { %6291 = vmatprep.subr.bf16.mxu0 %v15966_v15  ;;  %v4178_v15 = vadd.f32 %v18135_v42, %v3018_v59  ;;  %v16008_v42 = vld [vmem:[#allocation4 + $0x334] ss:$8 sps:$4 sm:$0xff]   ;;  %v16030_v59 = vld [vmem:[#allocation4 + $0x3f0] ss:$8 sps:$4 sm:$0xff]  }
 0x375   :  { %4883 = vmatpush2.bf16.msra.mxu1 %v16039_v38  ;;  %v16069_v38 = vld [vmem:[#allocation4 + $0x180] ss:$8 sps:$4 sm:$0xff]  }
 0x376   :  { %6292 = vmatpush2.bf16.msra.mxu0 %v15964_v29  ;;  %4884 = vmatprep.subr.bf16.mxu1 %v16047_v10  ;;  %v15994_v29 = vld [vmem:[#allocation4 + $0x350] ss:$8 sps:$4 sm:$0xff]   ;;  %v16071_v10 = vld [vmem:[#allocation4 + $0x184] ss:$8 sps:$4 sm:$0xff]  }
 0x377   :  { %6293 = vmatprep.subr.bf16.mxu0 %v15969_v37 }
 0x379   :  { %4885 = vmatpush2.bf16.msra.mxu1 %v16045_v51  ;;  %v16020_v51 = vld [vmem:[#allocation4 + $0x314] ss:$8 sps:$4 sm:$0xff]  }
 0x37a   :  { %6294 = vmatpush2.bf16.msra.mxu0 %v15967_v16  ;;  %4886 = vmatprep.subr.bf16.mxu1 %v16053_v3  ;;  %v16057_v16 = vld [vmem:[#allocation4 + $0x1a0] ss:$8 sps:$4 sm:$0xff]  }
 0x37b   :  { %6295 = vmatprep.subr.bf16.mxu0 %v15972_v6  ;;  %v16036_v3 = vld [vmem:[#allocation4 + $0x3e0] ss:$8 sps:$4 sm:$0xff]  }
 0x37d   :  { %4887 = vmatpush2.bf16.msra.mxu1 %v16051_v53 }
 0x37e   :  { %6296 = vmatpush2.bf16.msra.mxu0 %v15970_v22  ;;  %4888 = vmatprep.subr.bf16.mxu1 %v16059_v48  ;;  %v16063_v22 = vld [vmem:[#allocation4 + $0x190] ss:$8 sps:$4 sm:$0xff]  }
 0x37f   :  { %6297 = vmatprep.subr.bf16.mxu0 %v15975_v20  ;;  %v16006_v20 = vld [vmem:[#allocation4 + $0x330] ss:$8 sps:$4 sm:$0xff]  }
 0x381   :  { %4889 = vmatpush2.bf16.msra.mxu1 %v16057_v16 }
 0x382   :  { %6298 = vmatpush2.bf16.msra.mxu0 %v15973_v34  ;;  %4890 = vmatprep.subr.bf16.mxu1 %v16065_v46  ;;  %v16014_v34 = vld [vmem:[#allocation4 + $0x324] ss:$8 sps:$4 sm:$0xff]  }
 0x383   :  { %6299 = vmatprep.subr.bf16.mxu0 %v15978_v56  ;;  %v16012_v56 = vld [vmem:[#allocation4 + $0x320] ss:$8 sps:$4 sm:$0xff]  }
 0x385   :  { %4891 = vmatpush2.bf16.msra.mxu1 %v16063_v22  ;;  %v16060_v22 = vld [vmem:[#allocation4 + $0x3a0] ss:$8 sps:$4 sm:$0xff]  }
 0x386   :  { %6300 = vmatpush2.bf16.msra.mxu0 %v15976_v52  ;;  %4892 = vmatprep.subr.bf16.mxu1 %v16071_v10  ;;  %v16077_v52 = vld [vmem:[#allocation2 + $0xf74] ss:$8 sps:$4 sm:$0xff]  }
 0x387   :  { %7142 = vmatprep.subr.bf16.mxu0 %v15984_v55  ;;  %v16018_v55 = vld [vmem:[#allocation4 + $0x310] ss:$8 sps:$4 sm:$0xff]  }
 0x389   :  { %6302 = vmatmul.mubr.bf16.vlgmr.msra.gmra.mxu0 %v18075_v7  ;;  %4893 = vmatpush2.bf16.msra.mxu1 %v16069_v38  ;;  %v16068_v38 = vld [vmem:[#allocation4 + $0x394] ss:$8 sps:$4 sm:$0xff]  }
 0x38a   :  { %7143 = vmatpush1.bf16.msra.mxu0 %v15982_v54  ;;  %6064 = vmatprep.subr.bf16.mxu1 %v16077_v52  ;;  %v16024_v54 = vld [vmem:[#allocation4 + $0x300] ss:$8 sps:$4 sm:$0xff]  }
 0x38b   :  { %7144 = vmatprep.subr.bf16.mxu0 %v15990_v58  ;;  %v2498_v58 = vld [vmem:[#allocation13 + $0x3] ss:$8 sm:$0x3] }
 0x38c   :  { %v4216_v31 = vpop.f32.mrf.mxu1 }
 0x38d   :  { %v18168_v17 = vadd.f32 %v4216_v31, %v4176_v2  ;;  %v2503_v2 = vrot.slane %v2498_v58, %v17836_v23  ;;  %v16044_v31 = vld [vmem:[#allocation4 + $0x3d4] ss:$8 sps:$4 sm:$0xff]  }
 0x38e   :  { %v4218_v8 = vpop.f32.mrf.mxu1  ;;  %7145 = vmatpush1.bf16.msra.mxu0 %v15988_v49  ;;  %v16038_v49 = vld [vmem:[#allocation4 + $0x3e4] ss:$8 sps:$4 sm:$0xff]  }
 0x38f   :  { %v18170_v37 = vadd.f32 %v4218_v8, %v4178_v15  ;;  %7146 = vmatprep.subr.bf16.mxu0 %v15996_v30  ;;  %v2507_v30 = vrot.slane %v2498_v58, %v17844_v26  ;;  %v2705_v53 = vadd.f32 %v18155_v60, %v2503_v2  ;;  %v16042_v8 = vld [vmem:[#allocation4 + $0x3d0] ss:$8 sps:$4 sm:$0xff]   ;;  %v16062_v60 = vld [vmem:[#allocation4 + $0x3a4] ss:$8 sps:$4 sm:$0xff]  }
 0x390   :  { %v4220_v28 = vpop.f32.mrf.mxu1 }
 0x391   :  { %v2707_v15 = vadd.f32 %v18157_v63, %v2507_v30  ;;  %v16048_v28 = vld [vmem:[#allocation4 + $0x3c0] ss:$8 sps:$4 sm:$0xff]  }
 0x392   :  { %v4221_v6 = vpop.f32.mrf.mxu1  ;;  %7147 = vmatpush1.bf16.msra.mxu0 %v15994_v29  ;;  %v16050_v29 = vld [vmem:[#allocation4 + $0x3c4] ss:$8 sps:$4 sm:$0xff]  }
 0x393   :  { %7148 = vmatprep.subr.bf16.mxu0 %v16002_v14  ;;  %v2715_v14 = vsel %vm197_vm0, %v2705_v53, 0.0  ;;  %v2722_v48 = vsel %vm197_vm0, %v2707_v15, 0.0  ;;  %v16056_v6 = vld [vmem:[#allocation4 + $0x3b4] ss:$8 sps:$4 sm:$0xff]  }
 0x394   :  { %v2716_v16 = vrot.slane %v2715_v14, 4 }
 0x396   :  { %7149 = vmatpush1.bf16.msra.mxu0 %v16000_v40  ;;  %v2723_v40 = vrot.slane %v2722_v48, 4  ;;  %v2717_v46 = vadd.f32 %v2716_v16, %v2715_v14 }
 0x397   :  { %7150 = vmatprep.subr.bf16.mxu0 %v16008_v42  ;;  %v16054_v42 = vld [vmem:[#allocation4 + $0x3b0] ss:$8 sps:$4 sm:$0xff]  }
 0x398   :  { %v2724_v63 = vadd.f32 %v2723_v40, %v2722_v48 }
 0x39a   :  { %7151 = vmatpush1.bf16.msra.mxu0 %v16006_v20  ;;  %v2718_v20 = vrot.slane %v2717_v46, 2  ;;  %v2725_v10 = vrot.slane %v2724_v63, 2 }
 0x39b   :  { %7152 = vmatprep.subr.bf16.mxu0 %v16014_v34  ;;  %v16066_v34 = vld [vmem:[#allocation4 + $0x390] ss:$8 sps:$4 sm:$0xff]  }
 0x39c   :  { %v2726_v52 = vadd.f32 %v2725_v10, %v2724_v63 }
 0x39e   :  { %7153 = vmatpush1.bf16.msra.mxu0 %v16012_v56  ;;  %v2719_v56 = vadd.f32 %v2718_v20, %v2717_v46 }
 0x39f   :  { %7154 = vmatprep.subr.bf16.mxu0 %v16020_v51  ;;  %v16074_v51 = vld [vmem:[#allocation4 + $0x384] ss:$8 sps:$4 sm:$0xff]  }
 0x3a2   :  { %7155 = vmatpush1.bf16.msra.mxu0 %v16018_v55  ;;  %v16072_v55 = vld [vmem:[#allocation4 + $0x380] ss:$8 sps:$4 sm:$0xff]  }
 0x3a3   :  { %7156 = vmatprep.subr.bf16.mxu0 %v16026_v4  ;;  %v2720_v4 = vrot.slane %v2719_v56, 1 }
 0x3a6   :  { %7157 = vmatpush1.bf16.msra.mxu0 %v16024_v54  ;;  %v2727_v54 = vrot.slane %v2726_v52, 1 }
 0x3a7   :  { %7158 = vmatprep.subr.bf16.mxu0 %v16032_v57  ;;  %v2721_v57 = vadd.f32 %v2720_v4, %v2719_v56 }
 0x3a8   :  { %v2728_v58 = vadd.f32 %v2727_v54, %v2726_v52  ;;  %v2712_v54 = vld [vmem:[#allocation13 + $0x4] ss:$8 sm:$0x3] }
 0x3aa   :  { %7159 = vmatpush2.bf16.msra.mxu0 %v16030_v59  ;;  %v2729_v59 = vmul.f32 0.25, %v2721_v57  ;;  %v2730_v2 = vmul.f32 0.25, %v2728_v58  ;;  %v4260_v58 = vadd.f32 %v18143_v25, %v18170_v37 }
 0x3ab   :  { %7160 = vmatprep.subr.bf16.mxu0 %v16038_v49 }
 0x3ae   :  { %7161 = vmatpush2.bf16.msra.mxu0 %v16036_v3  ;;  %v2731_v3 = vsub.f32 %v2705_v53, %v2729_v59 }
 0x3af   :  { %7162 = vmatprep.subr.bf16.mxu0 %v16044_v31 }
 0x3b0   :  { %v2733_v14 = vmul.f32 %v2731_v3, %v2731_v3 }
 0x3b2   :  { %7163 = vmatpush2.bf16.msra.mxu0 %v16042_v8  ;;  %v2732_v8 = vsub.f32 %v2707_v15, %v2730_v2 }
 0x3b3   :  { %7164 = vmatprep.subr.bf16.mxu0 %v16050_v29 }
 0x3b4   :  { %v2734_v48 = vmul.f32 %v2732_v8, %v2732_v8 }
 0x3b6   :  { %7165 = vmatpush2.bf16.msra.mxu0 %v16048_v28  ;;  %v2735_v28 = vsel %vm197_vm0, %v2733_v14, 0.0  ;;  %v2742_v16 = vsel %vm197_vm0, %v2734_v48, 0.0  ;;  %v2714_v14 = vld [vmem:[#allocation13 + $0x5] ss:$8 sm:$0x3] }
 0x3b7   :  { %7166 = vmatprep.subr.bf16.mxu0 %v16056_v6  ;;  %v2736_v6 = vrot.slane %v2735_v28, 4  ;;  %v2743_v40 = vrot.slane %v2742_v16, 4 }
 0x3b9   :  { %v2744_v46 = vadd.f32 %v2743_v40, %v2742_v16  ;;  %v2765_v16 = vrot.slane %v2712_v54, %v17844_v26 }
 0x3ba   :  { %7167 = vmatpush2.bf16.msra.mxu0 %v16054_v42  ;;  %v2737_v42 = vadd.f32 %v2736_v6, %v2735_v28 }
 0x3bb   :  { %7168 = vmatprep.subr.bf16.mxu0 %v16062_v60  ;;  %v2745_v63 = vrot.slane %v2744_v46, 2 }
 0x3bc   :  { %v2738_v60 = vrot.slane %v2737_v42, 2 }
 0x3bd   :  { %v2746_v20 = vadd.f32 %v2745_v63, %v2744_v46 }
 0x3be   :  { %7169 = vmatpush2.bf16.msra.mxu0 %v16060_v22  ;;  %v2739_v22 = vadd.f32 %v2738_v60, %v2737_v42 }
 0x3bf   :  { %7170 = vmatprep.subr.bf16.mxu0 %v16068_v38  ;;  %v2747_v10 = vrot.slane %v2746_v20, 1 }
 0x3c0   :  { %v2740_v38 = vrot.slane %v2739_v22, 1 }
 0x3c2   :  { %7171 = vmatpush2.bf16.msra.mxu0 %v16066_v34  ;;  %v2741_v53 = vadd.f32 %v2740_v38, %v2739_v22  ;;  %v2748_v34 = vadd.f32 %v2747_v10, %v2746_v20 }
 0x3c3   :  { %7172 = vmatprep.subr.bf16.mxu0 %v16074_v51 }
 0x3c4   :  { %v2749_v15 = vmul.f32 0.25, %v2741_v53  ;;  %v2750_v56 = vmul.f32 0.25, %v2748_v34 }
 0x3c6   :  { %7173 = vmatpush2.bf16.msra.mxu0 %v16072_v55  ;;  %v2751_v51 = vadd.f32 1e-05, %v2749_v15  ;;  %v2752_v52 = vadd.f32 1e-05, %v2750_v56  ;;  %v4258_v55 = vadd.f32 %v18140_v39, %v18168_v17 }
 0x3c8   :  { %17436 = vrsqrt.f32 %v2751_v51 }
 0x3c9   :  { %17438 = vrsqrt.f32 %v2752_v52  ;;  %v16075_v52 = vld [vmem:[#allocation2 + $0xf70] ss:$8 sps:$4 sm:$0xff]  }
 0x3cc   :  { %v4298_v49 = vpop.f32.mrf.mxu1 }
 0x3cd   :  { %v4299_v57 = vadd.f32 %v4298_v49, %v4258_v55  ;;  %v2774_v49 = vrot.slane %v2714_v14, %v17836_v23 }
 0x3ce   :  { %v4300_v30 = vpop.f32.mrf.mxu1 }
 0x3cf   :  { %v4301_v2 = vadd.f32 %v4300_v30, %v4260_v58  ;;  %v4340_v48 = vadd.f32 %v18148_v41, %v4299_v57  ;;  %v16081_v57 = vld [vmem:[#allocation2 + $0xf50] ss:$8 sps:$4 sm:$0xff]   ;;  %v16086_v58 = vld [vmem:[#allocation2 + $0xf44] ss:$8 sps:$4 sm:$0xff]  }
 0x3d0   :  { %v4302_v31 = vpop.f32.mrf.mxu1 }
 0x3d1   :  { %v4342_v39 = vadd.f32 %v18150_v18, %v4301_v2  ;;  %v16089_v2 = vld [vmem:[#allocation2 + $0xf34] ss:$8 sps:$4 sm:$0xff]  }
 0x3d2   :  { %v4303_v29 = vpop.f32.mrf.mxu1 }
 0x3d3   :  { %v2761_v29 = vrot.slane %v2712_v54, %v17836_v23  ;;  %v16083_v54 = vld [vmem:[#allocation2 + $0xf54] ss:$8 sps:$4 sm:$0xff]  }
 0x3d5   :  { %v17437_v4 = vpop.eup %17436 }
 0x3d6   :  { %v17439_v59 = vpop.eup %17438  ;;  %v2755_v31 = vmul.f32 %v17437_v4, %v2731_v3  ;;  %v2778_v3 = vrot.slane %v2714_v14, %v17844_v26  ;;  %v16080_v4 = vld [vmem:[#allocation2 + $0xf64] ss:$8 sps:$4 sm:$0xff]   ;;  %v16090_v14 = vld [vmem:[#allocation2 + $0xf20] ss:$8 sps:$4 sm:$0xff]  }
 0x3d7   :  { %v2756_v28 = vmul.f32 %v17439_v59, %v2732_v8  ;;  %v16084_v59 = vld [vmem:[#allocation2 + $0xf40] ss:$8 sps:$4 sm:$0xff]  }
 0x3d8   :  { %v2768_v17 = vmul.f32 %v2761_v29, %v2755_v31  ;;  %v16087_v31 = vld [vmem:[#allocation2 + $0xf30] ss:$8 sps:$4 sm:$0xff]   ;;  %v16092_v29 = vld [vmem:[#allocation2 + $0xf24] ss:$8 sps:$4 sm:$0xff]  }
 0x3d9   :  { %v2769_v30 = vmul.f32 %v2765_v16, %v2756_v28  ;;  %v16093_v28 = vld [vmem:[#allocation2 + $0xf10] ss:$8 sps:$4 sm:$0xff]   ;;  %v16096_v16 = vld [vmem:[#allocation2 + $0xf00] ss:$8 sps:$4 sm:$0xff]  }
 0x3da   :  { %v2781_v60 = vadd.f32 %v2774_v49, %v2768_v17  ;;  %v18194_v17 = vpop.f32.mrf.mxu0  ;;  %v16102_v49 = vld [vmem:[#allocation2 + $0xfe0] ss:$8 sps:$4 sm:$0xff]  }
 0x3db   :  { %v2782_v20 = vadd.f32 %v2778_v3, %v2769_v30  ;;  %v16105_v30 = vld [vmem:[#allocation2 + $0xfd0] ss:$8 sps:$4 sm:$0xff]  }
 0x40c   :  { %v4380_v6 = vpop.f32.mrf.mxu1 }
 0x40d   :  { %v4381_v40 = vadd.f32 %v4380_v6, %v4340_v48  ;;  %v16095_v48 = vld [vmem:[#allocation2 + $0xf14] ss:$8 sps:$4 sm:$0xff]  }
 0x40e   :  { %v4382_v42 = vpop.f32.mrf.mxu1  ;;  %v16101_v6 = vld [vmem:[#allocation2 + $0xff4] ss:$8 sps:$4 sm:$0xff]  }
 0x40f   :  { %v4422_v25 = vadd.f32 %v18159_v11, %v4381_v40  ;;  %v4383_v37 = vadd.f32 %v4382_v42, %v4342_v39  ;;  %v16099_v40 = vld [vmem:[#allocation2 + $0xff0] ss:$8 sps:$4 sm:$0xff]   ;;  %v16104_v39 = vld [vmem:[#allocation2 + $0xfe4] ss:$8 sps:$4 sm:$0xff]   ;;  %v18196_v42 = vpop.f32.mrf.mxu0 }
 0x410   :  { %v4384_v46 = vpop.f32.mrf.mxu1 }
 0x411   :  { %vm4428_vm3 = vcmp.ge.f32.partialorder %v4422_v25, 0.0  ;;  %v4430_v41 = vmul.f32 0.2, %v4422_v25  ;;  %v4424_v8 = vadd.f32 %v18161_v62, %v4383_v37  ;;  %v16078_v62 = vld [vmem:[#allocation2 + $0xf60] ss:$8 sps:$4 sm:$0xff]   ;;  %v6061_v37 = vpop.f32.mrf.mxu0 }
 0x412   :  { %v4385_v63 = vpop.f32.mrf.mxu1  ;;  %v16110_v46 = vld [vmem:[#allocation2 + $0xfc4] ss:$8 sps:$4 sm:$0xff]   ;;  %v16144_v37 = vld [vmem:[#allocation2 + $0x1100] ss:$8 sps:$4 sm:$0xff]  }
 0x413   :  { %v4432_v22 = vsel %vm4428_vm3, %v4422_v25, %v4430_v41  ;;  %vm4429_vm4 = vcmp.ge.f32.partialorder %v4424_v8, 0.0  ;;  %v4431_v18 = vmul.f32 0.2, %v4424_v8  ;;  %v16107_v25 = vld [vmem:[#allocation2 + $0xfd4] ss:$8 sps:$4 sm:$0xff]   ;;  %v6062_v3 = vpop.f32.mrf.mxu0 }
 0x414   :  { %v4434_v38 = vadd.f32 %v4432_v22, %v2781_v60  ;;  %v16113_v63 = vld [vmem:[#allocation2 + $0xfb4] ss:$8 sps:$4 sm:$0xff]   ;;  %v16147_v3 = vld [vmem:[#allocation2 + $0x11f0] ss:$8 sps:$4 sm:$0xff]  }
 0x415   :  { %v4433_v10 = vsel %vm4429_vm4, %v4424_v8, %v4431_v18  ;;  %v18198_v41 = vpop.f32.mrf.mxu0  ;;  %v16108_v8 = vld [vmem:[#allocation2 + $0xfc0] ss:$8 sps:$4 sm:$0xff]   ;;  %v16111_v18 = vld [vmem:[#allocation2 + $0xfb0] ss:$8 sps:$4 sm:$0xff]  }
 0x416   :  { %v4435_v53 = vadd.f32 %v4433_v10, %v2782_v20  ;;  %vm4436_vm5 = vcmp.ge.f32.partialorder %v4434_v38, 0.0  ;;  %v4438_v11 = vmul.f32 0.2, %v4434_v38 }
 0x417   :  { %v18200_v60 = vpop.f32.mrf.mxu0 }
 0x418   :  { %vm4437_vm6 = vcmp.ge.f32.partialorder %v4435_v53, 0.0  ;;  %v4439_v34 = vmul.f32 0.2, %v4435_v53  ;;  %v4440_v15 = vsel %vm4436_vm5, %v4434_v38, %v4438_v11  ;;  %v16116_v38 = vld [vmem:[#allocation2 + $0xfa4] ss:$8 sps:$4 sm:$0xff]  }
 0x419   :  { %v4442_v55 = vpack.c.bf16 %v4440_v15, %v4440_v15  ;;  %v6143_v22 = vpop.f32.mrf.mxu0 }
 0x41a   :  { %v4441_v56 = vsel %vm4437_vm6, %v4435_v53, %v4439_v34  ;;  %v16114_v53 = vld [vmem:[#allocation2 + $0xfa0] ss:$8 sps:$4 sm:$0xff]   ;;  %v16119_v34 = vld [vmem:[#allocation2 + $0xf94] ss:$8 sps:$4 sm:$0xff]   ;;  %v16153_v22 = vld [vmem:[#allocation2 + $0x11d0] ss:$8 sps:$4 sm:$0xff]  }
 0x41b   :  { %v4443_v51 = vpack.c.bf16 %v4441_v56, %v4441_v56  ;;  %v6144_v20 = vpop.f32.mrf.mxu0  ;;  %v16117_v56 = vld [vmem:[#allocation2 + $0xf90] ss:$8 sps:$4 sm:$0xff]  }
 0x41c   :  { %v16156_v20 = vld [vmem:[#allocation2 + $0x11c0] ss:$8 sps:$4 sm:$0xff]  }
 0x41d   :  { %4894 = vmatprep.mubr.bf16.mxu1 %v4443_v51  ;;  %7174 = vmatprep.mubr.bf16.mxu0 %v4443_v51  ;;  %v18202_v10 = vpop.f32.mrf.mxu0 }
 0x41e   :  { %4895 = vmatmul.mubr.bf16.vlgmr.msra.gmra.mxu1 %v4442_v55  ;;  %7175 = vmatmul.mubr.bf16.vlgmr.msra.gmra.mxu0 %v4442_v55  ;;  %v16120_v55 = vld [vmem:[#allocation2 + $0xf80] ss:$8 sps:$4 sm:$0xff]  }
 0x41f   :  { %6065 = vmatpush1.bf16.msra.mxu1 %v16075_v52  ;;  %6096 = vmatprep.mubr.bf16.mxu1 %v17897_v47  ;;  %v18204_v11 = vpop.f32.mrf.mxu0  ;;  %v16122_v52 = vld [vmem:[#allocation2 + $0xf84] ss:$8 sps:$4 sm:$0xff]  }
 0x420   :  { %6066 = vmatprep.subr.bf16.mxu1 %v16080_v4  ;;  %8376 = vmatprep.mubr.bf16.mxu0 %v17897_v47  ;;  %v16098_v47 = vld [vmem:[#allocation2 + $0xf04] ss:$8 sps:$4 sm:$0xff]  }
 0x421   :  { %v6225_v15 = vpop.f32.mrf.mxu0 }
 0x422   :  { %v16162_v15 = vld [vmem:[#allocation2 + $0x11a0] ss:$8 sps:$4 sm:$0xff]  }
 0x423   :  { %6067 = vmatpush1.bf16.msra.mxu1 %v16078_v62  ;;  %v6226_v51 = vpop.f32.mrf.mxu0  ;;  %v16125_v62 = vld [vmem:[#allocation2 + $0x1174] ss:$8 sps:$4 sm:$0xff]  }
 0x424   :  { %6068 = vmatprep.subr.bf16.mxu1 %v16083_v54  ;;  %v16165_v51 = vld [vmem:[#allocation2 + $0x1190] ss:$8 sps:$4 sm:$0xff]  }
 0x427   :  { %6069 = vmatpush1.bf16.msra.mxu1 %v16081_v57  ;;  %v16123_v57 = vld [vmem:[#allocation2 + $0x1170] ss:$8 sps:$4 sm:$0xff]  }
 0x428   :  { %6070 = vmatprep.subr.bf16.mxu1 %v16086_v58 }
 0x42b   :  { %6071 = vmatpush1.bf16.msra.mxu1 %v16084_v59  ;;  %v16128_v59 = vld [vmem:[#allocation2 + $0x1164] ss:$8 sps:$4 sm:$0xff]  }
 0x42c   :  { %6072 = vmatprep.subr.bf16.mxu1 %v16089_v2 }
 0x42f   :  { %6073 = vmatpush1.bf16.msra.mxu1 %v16087_v31  ;;  %v16126_v31 = vld [vmem:[#allocation2 + $0x1160] ss:$8 sps:$4 sm:$0xff]  }
 0x430   :  { %6074 = vmatprep.subr.bf16.mxu1 %v16092_v29  ;;  %v16131_v29 = vld [vmem:[#allocation2 + $0x1154] ss:$8 sps:$4 sm:$0xff]  }
 0x433   :  { %6075 = vmatpush1.bf16.msra.mxu1 %v16090_v14  ;;  %v16129_v14 = vld [vmem:[#allocation2 + $0x1150] ss:$8 sps:$4 sm:$0xff]  }
 0x434   :  { %6076 = vmatprep.subr.bf16.mxu1 %v16095_v48  ;;  %v16134_v48 = vld [vmem:[#allocation2 + $0x1144] ss:$8 sps:$4 sm:$0xff]  }
 0x437   :  { %6077 = vmatpush1.bf16.msra.mxu1 %v16093_v28  ;;  %v16132_v28 = vld [vmem:[#allocation2 + $0x1140] ss:$8 sps:$4 sm:$0xff]  }
 0x438   :  { %6078 = vmatprep.subr.bf16.mxu1 %v16098_v47  ;;  %v16137_v47 = vld [vmem:[#allocation2 + $0x1134] ss:$8 sps:$4 sm:$0xff]  }
 0x43b   :  { %6079 = vmatpush1.bf16.msra.mxu1 %v16096_v16  ;;  %v16135_v16 = vld [vmem:[#allocation2 + $0x1130] ss:$8 sps:$4 sm:$0xff]  }
 0x43c   :  { %6080 = vmatprep.subr.bf16.mxu1 %v16101_v6  ;;  %v16140_v6 = vld [vmem:[#allocation2 + $0x1124] ss:$8 sps:$4 sm:$0xff]  }
 0x43f   :  { %6081 = vmatpush2.bf16.msra.mxu1 %v16099_v40  ;;  %v16138_v40 = vld [vmem:[#allocation2 + $0x1120] ss:$8 sps:$4 sm:$0xff]  }
 0x440   :  { %6082 = vmatprep.subr.bf16.mxu1 %v16104_v39  ;;  %v16143_v39 = vld [vmem:[#allocation2 + $0x1114] ss:$8 sps:$4 sm:$0xff]  }
 0x443   :  { %6083 = vmatpush2.bf16.msra.mxu1 %v16102_v49  ;;  %v16141_v49 = vld [vmem:[#allocation2 + $0x1110] ss:$8 sps:$4 sm:$0xff]  }
 0x444   :  { %6084 = vmatprep.subr.bf16.mxu1 %v16107_v25  ;;  %v16146_v25 = vld [vmem:[#allocation2 + $0x1104] ss:$8 sps:$4 sm:$0xff]  }
 0x447   :  { %6085 = vmatpush2.bf16.msra.mxu1 %v16105_v30  ;;  %v16149_v30 = vld [vmem:[#allocation2 + $0x11f4] ss:$8 sps:$4 sm:$0xff]  }
 0x448   :  { %6086 = vmatprep.subr.bf16.mxu1 %v16110_v46  ;;  %v16152_v46 = vld [vmem:[#allocation2 + $0x11e4] ss:$8 sps:$4 sm:$0xff]  }
 0x449   :  { %v18206_v4 = vpop.f32.mrf.mxu0 }
 0x44b   :  { %6087 = vmatpush2.bf16.msra.mxu1 %v16108_v8  ;;  %v18208_v54 = vpop.f32.mrf.mxu0  ;;  %v16150_v8 = vld [vmem:[#allocation2 + $0x11e0] ss:$8 sps:$4 sm:$0xff]  }
 0x44c   :  { %6088 = vmatprep.subr.bf16.mxu1 %v16113_v63  ;;  %v16155_v63 = vld [vmem:[#allocation2 + $0x11d4] ss:$8 sps:$4 sm:$0xff]  }
 0x44d   :  { %v6307_v58 = vpop.f32.mrf.mxu0 }
 0x44e   :  { %v16176_v58 = vld [vmem:[#allocation2 + $0x1364] ss:$8 sps:$4 sm:$0xff]  }
 0x44f   :  { %6089 = vmatpush2.bf16.msra.mxu1 %v16111_v18  ;;  %v6308_v2 = vpop.f32.mrf.mxu0  ;;  %v16158_v18 = vld [vmem:[#allocation2 + $0x11c4] ss:$8 sps:$4 sm:$0xff]  }
 0x450   :  { %6090 = vmatprep.subr.bf16.mxu1 %v16116_v38  ;;  %v16161_v38 = vld [vmem:[#allocation2 + $0x11b4] ss:$8 sps:$4 sm:$0xff]  }
 0x451   :  { %v16179_v2 = vld [vmem:[#allocation2 + $0x1354] ss:$8 sps:$4 sm:$0xff]  }
 0x453   :  { %6091 = vmatpush2.bf16.msra.mxu1 %v16114_v53  ;;  %v16159_v53 = vld [vmem:[#allocation2 + $0x11b0] ss:$8 sps:$4 sm:$0xff]  }
 0x454   :  { %6092 = vmatprep.subr.bf16.mxu1 %v16119_v34  ;;  %v16164_v34 = vld [vmem:[#allocation2 + $0x11a4] ss:$8 sps:$4 sm:$0xff]  }
 0x457   :  { %6093 = vmatpush2.bf16.msra.mxu1 %v16117_v56  ;;  %v16167_v56 = vld [vmem:[#allocation2 + $0x1194] ss:$8 sps:$4 sm:$0xff]  }
 0x458   :  { %6094 = vmatprep.subr.bf16.mxu1 %v16122_v52  ;;  %v16170_v52 = vld [vmem:[#allocation2 + $0x1184] ss:$8 sps:$4 sm:$0xff]  }
 0x45b   :  { %6095 = vmatpush2.bf16.msra.mxu1 %v16120_v55  ;;  %v16168_v55 = vld [vmem:[#allocation2 + $0x1180] ss:$8 sps:$4 sm:$0xff]  }
 0x45c   :  { %6146 = vmatprep.subr.bf16.mxu1 %v16125_v62  ;;  %v16173_v62 = vld [vmem:[#allocation2 + $0x1374] ss:$8 sps:$4 sm:$0xff]  }
 0x45e   :  { %6097 = vmatmul.mubr.bf16.vlgmr.msra.gmra.mxu1 %v17893_v43 }
 0x45f   :  { %6147 = vmatpush1.bf16.msra.mxu1 %v16123_v57  ;;  %6178 = vmatprep.mubr.bf16.mxu1 %v17988_v1  ;;  %v16171_v57 = vld [vmem:[#allocation2 + $0x1370] ss:$8 sps:$4 sm:$0xff]  }
 0x460   :  { %6148 = vmatprep.subr.bf16.mxu1 %v16128_v59  ;;  %v16174_v59 = vld [vmem:[#allocation2 + $0x1360] ss:$8 sps:$4 sm:$0xff]  }
 0x463   :  { %6149 = vmatpush1.bf16.msra.mxu1 %v16126_v31  ;;  %v16177_v31 = vld [vmem:[#allocation2 + $0x1350] ss:$8 sps:$4 sm:$0xff]  }
 0x464   :  { %6150 = vmatprep.subr.bf16.mxu1 %v16131_v29  ;;  %v16182_v29 = vld [vmem:[#allocation2 + $0x1344] ss:$8 sps:$4 sm:$0xff]  }
 0x467   :  { %6151 = vmatpush1.bf16.msra.mxu1 %v16129_v14  ;;  %v16180_v14 = vld [vmem:[#allocation2 + $0x1340] ss:$8 sps:$4 sm:$0xff]  }
 0x468   :  { %6152 = vmatprep.subr.bf16.mxu1 %v16134_v48  ;;  %v16185_v48 = vld [vmem:[#allocation2 + $0x1334] ss:$8 sps:$4 sm:$0xff]  }
 0x46b   :  { %6153 = vmatpush1.bf16.msra.mxu1 %v16132_v28  ;;  %v16183_v28 = vld [vmem:[#allocation2 + $0x1330] ss:$8 sps:$4 sm:$0xff]  }
 0x46c   :  { %6154 = vmatprep.subr.bf16.mxu1 %v16137_v47  ;;  %v16188_v47 = vld [vmem:[#allocation2 + $0x1324] ss:$8 sps:$4 sm:$0xff]  }
 0x46f   :  { %6155 = vmatpush1.bf16.msra.mxu1 %v16135_v16  ;;  %v16186_v16 = vld [vmem:[#allocation2 + $0x1320] ss:$8 sps:$4 sm:$0xff]  }
 0x470   :  { %6156 = vmatprep.subr.bf16.mxu1 %v16140_v6  ;;  %v16191_v6 = vld [vmem:[#allocation2 + $0x1314] ss:$8 sps:$4 sm:$0xff]  }
 0x473   :  { %6157 = vmatpush1.bf16.msra.mxu1 %v16138_v40  ;;  %v16189_v40 = vld [vmem:[#allocation2 + $0x1310] ss:$8 sps:$4 sm:$0xff]  }
 0x474   :  { %6158 = vmatprep.subr.bf16.mxu1 %v16143_v39  ;;  %v16194_v39 = vld [vmem:[#allocation2 + $0x1304] ss:$8 sps:$4 sm:$0xff]  }
 0x477   :  { %6159 = vmatpush1.bf16.msra.mxu1 %v16141_v49  ;;  %v16192_v49 = vld [vmem:[#allocation2 + $0x1300] ss:$8 sps:$4 sm:$0xff]  }
 0x478   :  { %6160 = vmatprep.subr.bf16.mxu1 %v16146_v25  ;;  %v16197_v25 = vld [vmem:[#allocation2 + $0x13f4] ss:$8 sps:$4 sm:$0xff]  }
 0x47b   :  { %6161 = vmatpush1.bf16.msra.mxu1 %v16144_v37  ;;  %v16195_v37 = vld [vmem:[#allocation2 + $0x13f0] ss:$8 sps:$4 sm:$0xff]  }
 0x47c   :  { %6162 = vmatprep.subr.bf16.mxu1 %v16149_v30  ;;  %v16200_v30 = vld [vmem:[#allocation2 + $0x13e4] ss:$8 sps:$4 sm:$0xff]  }
 0x47f   :  { %6163 = vmatpush2.bf16.msra.mxu1 %v16147_v3  ;;  %v16198_v3 = vld [vmem:[#allocation2 + $0x13e0] ss:$8 sps:$4 sm:$0xff]  }
 0x480   :  { %6164 = vmatprep.subr.bf16.mxu1 %v16152_v46  ;;  %v16203_v46 = vld [vmem:[#allocation2 + $0x13d4] ss:$8 sps:$4 sm:$0xff]  }
 0x483   :  { %6165 = vmatpush2.bf16.msra.mxu1 %v16150_v8  ;;  %v16201_v8 = vld [vmem:[#allocation2 + $0x13d0] ss:$8 sps:$4 sm:$0xff]  }
 0x484   :  { %6166 = vmatprep.subr.bf16.mxu1 %v16155_v63  ;;  %v16206_v63 = vld [vmem:[#allocation2 + $0x13c4] ss:$8 sps:$4 sm:$0xff]  }
 0x487   :  { %6167 = vmatpush2.bf16.msra.mxu1 %v16153_v22  ;;  %v16204_v22 = vld [vmem:[#allocation2 + $0x13c0] ss:$8 sps:$4 sm:$0xff]  }
 0x488   :  { %6168 = vmatprep.subr.bf16.mxu1 %v16158_v18  ;;  %v16209_v18 = vld [vmem:[#allocation2 + $0x13b4] ss:$8 sps:$4 sm:$0xff]  }
 0x48b   :  { %6169 = vmatpush2.bf16.msra.mxu1 %v16156_v20  ;;  %v16207_v20 = vld [vmem:[#allocation2 + $0x13b0] ss:$8 sps:$4 sm:$0xff]  }
 0x48c   :  { %6170 = vmatprep.subr.bf16.mxu1 %v16161_v38  ;;  %v16212_v38 = vld [vmem:[#allocation2 + $0x13a4] ss:$8 sps:$4 sm:$0xff]  }
 0x48f   :  { %6171 = vmatpush2.bf16.msra.mxu1 %v16159_v53  ;;  %v16210_v53 = vld [vmem:[#allocation2 + $0x13a0] ss:$8 sps:$4 sm:$0xff]  }
 0x490   :  { %6172 = vmatprep.subr.bf16.mxu1 %v16164_v34  ;;  %v16215_v34 = vld [vmem:[#allocation2 + $0x1394] ss:$8 sps:$4 sm:$0xff]  }
 0x493   :  { %6173 = vmatpush2.bf16.msra.mxu1 %v16162_v15  ;;  %v16213_v15 = vld [vmem:[#allocation2 + $0x1390] ss:$8 sps:$4 sm:$0xff]  }
 0x494   :  { %6174 = vmatprep.subr.bf16.mxu1 %v16167_v56  ;;  %v16218_v56 = vld [vmem:[#allocation2 + $0x1384] ss:$8 sps:$4 sm:$0xff]  }
 0x497   :  { %6175 = vmatpush2.bf16.msra.mxu1 %v16165_v51  ;;  %v16216_v51 = vld [vmem:[#allocation2 + $0x1380] ss:$8 sps:$4 sm:$0xff]  }
 0x498   :  { %6176 = vmatprep.subr.bf16.mxu1 %v16170_v52 }
 0x49b   :  { %6177 = vmatpush2.bf16.msra.mxu1 %v16168_v55 }
 0x49c   :  { %6228 = vmatprep.subr.bf16.mxu1 %v16173_v62 }
 0x49e   :  { %6179 = vmatmul.mubr.bf16.vlgmr.msra.gmra.mxu1 %v18003_v33 }
 0x49f   :  { %6229 = vmatpush1.bf16.msra.mxu1 %v16171_v57  ;;  %6260 = vmatprep.mubr.bf16.mxu1 %v18043_v13 }
 0x4a0   :  { %6230 = vmatprep.subr.bf16.mxu1 %v16176_v58 }
 0x4a3   :  { %6231 = vmatpush1.bf16.msra.mxu1 %v16174_v59 }
 0x4a4   :  { %6232 = vmatprep.subr.bf16.mxu1 %v16179_v2 }
 0x4a7   :  { %6233 = vmatpush1.bf16.msra.mxu1 %v16177_v31 }
 0x4a8   :  { %6234 = vmatprep.subr.bf16.mxu1 %v16182_v29 }
 0x4ab   :  { %6235 = vmatpush1.bf16.msra.mxu1 %v16180_v14 }
 0x4ac   :  { %6236 = vmatprep.subr.bf16.mxu1 %v16185_v48 }
 0x4af   :  { %6237 = vmatpush1.bf16.msra.mxu1 %v16183_v28 }
 0x4b0   :  { %6238 = vmatprep.subr.bf16.mxu1 %v16188_v47 }
 0x4b3   :  { %6239 = vmatpush1.bf16.msra.mxu1 %v16186_v16 }
 0x4b4   :  { %6240 = vmatprep.subr.bf16.mxu1 %v16191_v6 }
 0x4b7   :  { %6241 = vmatpush1.bf16.msra.mxu1 %v16189_v40  ;;  %v16221_v40 = vld [vmem:[#allocation4 + $0x274] ss:$8 sps:$4 sm:$0xff]  }
 0x4b8   :  { %6242 = vmatprep.subr.bf16.mxu1 %v16194_v39  ;;  %v16219_v39 = vld [vmem:[#allocation4 + $0x270] ss:$8 sps:$4 sm:$0xff]  }
 0x4bb   :  { %6243 = vmatpush1.bf16.msra.mxu1 %v16192_v49 }
 0x4bc   :  { %6244 = vmatprep.subr.bf16.mxu1 %v16197_v25  ;;  %v16224_v25 = vld [vmem:[#allocation4 + $0x264] ss:$8 sps:$4 sm:$0xff]  }
 0x4bf   :  { %6245 = vmatpush2.bf16.msra.mxu1 %v16195_v37  ;;  %v16222_v37 = vld [vmem:[#allocation4 + $0x260] ss:$8 sps:$4 sm:$0xff]  }
 0x4c0   :  { %6246 = vmatprep.subr.bf16.mxu1 %v16200_v30  ;;  %v16227_v30 = vld [vmem:[#allocation4 + $0x254] ss:$8 sps:$4 sm:$0xff]  }
 0x4c3   :  { %6247 = vmatpush2.bf16.msra.mxu1 %v16198_v3  ;;  %v16228_v3 = vld [vmem:[#allocation4 + $0x240] ss:$8 sps:$4 sm:$0xff]  }
 0x4c4   :  { %6248 = vmatprep.subr.bf16.mxu1 %v16203_v46  ;;  %v16233_v46 = vld [vmem:[#allocation4 + $0x234] ss:$8 sps:$4 sm:$0xff]  }
 0x4c7   :  { %6249 = vmatpush2.bf16.msra.mxu1 %v16201_v8  ;;  %v16231_v8 = vld [vmem:[#allocation4 + $0x230] ss:$8 sps:$4 sm:$0xff]  }
 0x4c8   :  { %6250 = vmatprep.subr.bf16.mxu1 %v16206_v63  ;;  %v16236_v63 = vld [vmem:[#allocation4 + $0x224] ss:$8 sps:$4 sm:$0xff]  }
 0x4cb   :  { %6251 = vmatpush2.bf16.msra.mxu1 %v16204_v22  ;;  %v16234_v22 = vld [vmem:[#allocation4 + $0x220] ss:$8 sps:$4 sm:$0xff]  }
 0x4cc   :  { %6252 = vmatprep.subr.bf16.mxu1 %v16209_v18  ;;  %v16239_v18 = vld [vmem:[#allocation4 + $0x214] ss:$8 sps:$4 sm:$0xff]  }
 0x4cf   :  { %6253 = vmatpush2.bf16.msra.mxu1 %v16207_v20  ;;  %v16237_v20 = vld [vmem:[#allocation4 + $0x210] ss:$8 sps:$4 sm:$0xff]  }
 0x4d0   :  { %6254 = vmatprep.subr.bf16.mxu1 %v16212_v38  ;;  %v16242_v38 = vld [vmem:[#allocation4 + $0x204] ss:$8 sps:$4 sm:$0xff]  }
 0x4d3   :  { %6255 = vmatpush2.bf16.msra.mxu1 %v16210_v53  ;;  %v16240_v53 = vld [vmem:[#allocation4 + $0x200] ss:$8 sps:$4 sm:$0xff]  }
 0x4d4   :  { %6256 = vmatprep.subr.bf16.mxu1 %v16215_v34  ;;  %v16245_v34 = vld [vmem:[#allocation4 + $0x2f4] ss:$8 sps:$4 sm:$0xff]  }
 0x4d7   :  { %6257 = vmatpush2.bf16.msra.mxu1 %v16213_v15  ;;  %v16243_v15 = vld [vmem:[#allocation4 + $0x2f0] ss:$8 sps:$4 sm:$0xff]  }
 0x4d8   :  { %6258 = vmatprep.subr.bf16.mxu1 %v16218_v56  ;;  %v16248_v56 = vld [vmem:[#allocation4 + $0x2e4] ss:$8 sps:$4 sm:$0xff]  }
 0x4db   :  { %6259 = vmatpush2.bf16.msra.mxu1 %v16216_v51  ;;  %v16246_v51 = vld [vmem:[#allocation4 + $0x2e0] ss:$8 sps:$4 sm:$0xff]  }
 0x4dc   :  { %6611 = vmatprep.subr.bf16.mxu1 %v16221_v40  ;;  %v16264_v40 = vld [vmem:[#allocation4 + $0x280] ss:$8 sps:$4 sm:$0xff]  }
 0x4de   :  { %6261 = vmatmul.mubr.bf16.vlgmr.msra.gmra.mxu1 %v18068_v27  ;;  %v4896_v52 = vpop.f32.mrf.mxu1  ;;  %v18215_v55 = vpop.f32.mrf.mxu0 }
 0x4df   :  { %v6058_v29 = vadd.f32 %v18194_v17, %v4896_v52  ;;  %6612 = vmatpush1.bf16.msra.mxu1 %v16219_v39  ;;  %v16225_v17 = vld [vmem:[#allocation4 + $0x250] ss:$8 sps:$4 sm:$0xff]   ;;  %v16251_v52 = vld [vmem:[#allocation4 + $0x2d4] ss:$8 sps:$4 sm:$0xff]  }
 0x4e0   :  { %v4898_v62 = vpop.f32.mrf.mxu1  ;;  %v18217_v57 = vpop.f32.mrf.mxu0  ;;  %6613 = vmatprep.subr.bf16.mxu1 %v16224_v25 }
 0x4e1   :  { %v6060_v48 = vadd.f32 %v18196_v42, %v4898_v62  ;;  %v16230_v42 = vld [vmem:[#allocation4 + $0x244] ss:$8 sps:$4 sm:$0xff]   ;;  %v16249_v62 = vld [vmem:[#allocation4 + $0x2d0] ss:$8 sps:$4 sm:$0xff]  }
 0x4e2   :  { %v4900_v58 = vpop.f32.mrf.mxu1  ;;  %v7180_v59 = vpop.f32.mrf.mxu0 }
 0x4e3   :  { %6614 = vmatpush1.bf16.msra.mxu1 %v16222_v37  ;;  %v16254_v58 = vld [vmem:[#allocation4 + $0x2c4] ss:$8 sps:$4 sm:$0xff]   ;;  %v16252_v59 = vld [vmem:[#allocation4 + $0x2c0] ss:$8 sps:$4 sm:$0xff]   ;;  %v16269_v37 = vld [vmem:[#allocation2 + $0x1574] ss:$8 sps:$4 sm:$0xff]  }
 0x4e4   :  { %v4901_v2 = vpop.f32.mrf.mxu1  ;;  %v7181_v31 = vpop.f32.mrf.mxu0  ;;  %6615 = vmatprep.subr.bf16.mxu1 %v16227_v30 }
 0x4e5   :  { %v16257_v2 = vld [vmem:[#allocation4 + $0x2b4] ss:$8 sps:$4 sm:$0xff]   ;;  %v16255_v31 = vld [vmem:[#allocation4 + $0x2b0] ss:$8 sps:$4 sm:$0xff]  }
 0x4e7   :  { %6616 = vmatpush1.bf16.msra.mxu1 %v16225_v17  ;;  %v16272_v17 = vld [vmem:[#allocation2 + $0x1674] ss:$8 sps:$4 sm:$0xff]  }
 0x4e8   :  { %6617 = vmatprep.subr.bf16.mxu1 %v16230_v42  ;;  %v16270_v42 = vld [vmem:[#allocation2 + $0x1670] ss:$8 sps:$4 sm:$0xff]   ;;  %8344 = vmatprep.subr.bf16.mxu0 %v16272_v17  ;;  %v16348_v17 = vld [vmem:[#allocation2 + $0x16a0] ss:$8 sps:$4 sm:$0xff]  }
 0x4e9   :  { %8345 = vmatpush1.bf16.msra.mxu0 %v16270_v42 }
 0x4eb   :  { %6618 = vmatpush1.bf16.msra.mxu1 %v16228_v3  ;;  %v16278_v3 = vld [vmem:[#allocation2 + $0x1664] ss:$8 sps:$4 sm:$0xff]  }
 0x4ec   :  { %6619 = vmatprep.subr.bf16.mxu1 %v16233_v46  ;;  %v16276_v46 = vld [vmem:[#allocation2 + $0x1660] ss:$8 sps:$4 sm:$0xff]   ;;  %8346 = vmatprep.subr.bf16.mxu0 %v16278_v3 }
 0x4ed   :  { %8347 = vmatpush1.bf16.msra.mxu0 %v16276_v46  ;;  %v6311_v3 = vld [vmem:[#allocation13 + $0x7] ss:$8 sm:$0x3] }
 0x4ef   :  { %6620 = vmatpush1.bf16.msra.mxu1 %v16231_v8  ;;  %v16284_v8 = vld [vmem:[#allocation2 + $0x1654] ss:$8 sps:$4 sm:$0xff]  }
 0x4f0   :  { %6621 = vmatprep.subr.bf16.mxu1 %v16236_v63  ;;  %v16282_v63 = vld [vmem:[#allocation2 + $0x1650] ss:$8 sps:$4 sm:$0xff]   ;;  %8348 = vmatprep.subr.bf16.mxu0 %v16284_v8  ;;  %v16356_v8 = vld [vmem:[#allocation2 + $0x1694] ss:$8 sps:$4 sm:$0xff]  }
 0x4f1   :  { %8349 = vmatpush1.bf16.msra.mxu0 %v16282_v63 }
 0x4f3   :  { %6622 = vmatpush1.bf16.msra.mxu1 %v16234_v22  ;;  %v16290_v22 = vld [vmem:[#allocation2 + $0x1644] ss:$8 sps:$4 sm:$0xff]  }
 0x4f4   :  { %6623 = vmatprep.subr.bf16.mxu1 %v16239_v18  ;;  %v16288_v18 = vld [vmem:[#allocation2 + $0x1640] ss:$8 sps:$4 sm:$0xff]   ;;  %8350 = vmatprep.subr.bf16.mxu0 %v16290_v22  ;;  %v16354_v22 = vld [vmem:[#allocation2 + $0x1690] ss:$8 sps:$4 sm:$0xff]  }
 0x4f5   :  { %8351 = vmatpush1.bf16.msra.mxu0 %v16288_v18 }
 0x4f7   :  { %6624 = vmatpush1.bf16.msra.mxu1 %v16237_v20  ;;  %v16296_v20 = vld [vmem:[#allocation2 + $0x1634] ss:$8 sps:$4 sm:$0xff]  }
 0x4f8   :  { %6625 = vmatprep.subr.bf16.mxu1 %v16242_v38  ;;  %v16294_v38 = vld [vmem:[#allocation2 + $0x1630] ss:$8 sps:$4 sm:$0xff]   ;;  %8352 = vmatprep.subr.bf16.mxu0 %v16296_v20  ;;  %v16362_v20 = vld [vmem:[#allocation2 + $0x1684] ss:$8 sps:$4 sm:$0xff]  }
 0x4f9   :  { %8353 = vmatpush1.bf16.msra.mxu0 %v16294_v38 }
 0x4fb   :  { %6626 = vmatpush1.bf16.msra.mxu1 %v16240_v53  ;;  %v16302_v53 = vld [vmem:[#allocation2 + $0x1624] ss:$8 sps:$4 sm:$0xff]  }
 0x4fc   :  { %6627 = vmatprep.subr.bf16.mxu1 %v16245_v34  ;;  %v16300_v34 = vld [vmem:[#allocation2 + $0x1620] ss:$8 sps:$4 sm:$0xff]   ;;  %8354 = vmatprep.subr.bf16.mxu0 %v16302_v53 }
 0x4fd   :  { %8355 = vmatpush1.bf16.msra.mxu0 %v16300_v34  ;;  %v16360_v53 = vld [vmem:[#allocation2 + $0x1680] ss:$8 sps:$4 sm:$0xff]  }
 0x4ff   :  { %6628 = vmatpush2.bf16.msra.mxu1 %v16243_v15  ;;  %v16308_v15 = vld [vmem:[#allocation2 + $0x1614] ss:$8 sps:$4 sm:$0xff]  }
 0x500   :  { %6629 = vmatprep.subr.bf16.mxu1 %v16248_v56  ;;  %v16306_v56 = vld [vmem:[#allocation2 + $0x1610] ss:$8 sps:$4 sm:$0xff]   ;;  %8356 = vmatprep.subr.bf16.mxu0 %v16308_v15 }
 0x501   :  { %8357 = vmatpush1.bf16.msra.mxu0 %v16306_v56 }
 0x503   :  { %6630 = vmatpush2.bf16.msra.mxu1 %v16246_v51  ;;  %v16314_v51 = vld [vmem:[#allocation2 + $0x1604] ss:$8 sps:$4 sm:$0xff]  }
 0x504   :  { %6631 = vmatprep.subr.bf16.mxu1 %v16251_v52  ;;  %v16312_v52 = vld [vmem:[#allocation2 + $0x1600] ss:$8 sps:$4 sm:$0xff]   ;;  %8358 = vmatprep.subr.bf16.mxu0 %v16314_v51  ;;  %v16368_v51 = vld [vmem:[#allocation2 + $0x1874] ss:$8 sps:$4 sm:$0xff]  }
 0x505   :  { %8359 = vmatpush1.bf16.msra.mxu0 %v16312_v52 }
 0x507   :  { %6632 = vmatpush2.bf16.msra.mxu1 %v16249_v62  ;;  %v16320_v62 = vld [vmem:[#allocation2 + $0x16f4] ss:$8 sps:$4 sm:$0xff]  }
 0x508   :  { %6633 = vmatprep.subr.bf16.mxu1 %v16254_v58  ;;  %v16318_v58 = vld [vmem:[#allocation2 + $0x16f0] ss:$8 sps:$4 sm:$0xff]   ;;  %8360 = vmatprep.subr.bf16.mxu0 %v16320_v62 }
 0x509   :  { %8361 = vmatpush2.bf16.msra.mxu0 %v16318_v58  ;;  %v16366_v62 = vld [vmem:[#allocation2 + $0x1870] ss:$8 sps:$4 sm:$0xff]  }
 0x50b   :  { %6634 = vmatpush2.bf16.msra.mxu1 %v16252_v59  ;;  %v16326_v59 = vld [vmem:[#allocation2 + $0x16e4] ss:$8 sps:$4 sm:$0xff]  }
 0x50c   :  { %6635 = vmatprep.subr.bf16.mxu1 %v16257_v2  ;;  %v16324_v2 = vld [vmem:[#allocation2 + $0x16e0] ss:$8 sps:$4 sm:$0xff]   ;;  %8362 = vmatprep.subr.bf16.mxu0 %v16326_v59 }
 0x50d   :  { %8363 = vmatpush2.bf16.msra.mxu0 %v16324_v2 }
 0x50f   :  { %6636 = vmatpush2.bf16.msra.mxu1 %v16255_v31  ;;  %v16332_v31 = vld [vmem:[#allocation2 + $0x16d4] ss:$8 sps:$4 sm:$0xff]  }
 0x510   :  { %8364 = vmatprep.subr.bf16.mxu0 %v16332_v31 }
 0x51e   :  { %v6098_v14 = vpop.f32.mrf.mxu1 }
 0x51f   :  { %v18221_v28 = vadd.f32 %v6098_v14, %v6058_v29  ;;  %v16260_v29 = vld [vmem:[#allocation4 + $0x2a4] ss:$8 sps:$4 sm:$0xff]   ;;  %v16258_v14 = vld [vmem:[#allocation4 + $0x2a0] ss:$8 sps:$4 sm:$0xff]  }
 0x520   :  { %v6100_v47 = vpop.f32.mrf.mxu1  ;;  %6637 = vmatprep.subr.bf16.mxu1 %v16260_v29  ;;  %v16330_v29 = vld [vmem:[#allocation2 + $0x16d0] ss:$8 sps:$4 sm:$0xff]  }
 0x521   :  { %v18223_v16 = vadd.f32 %v6100_v47, %v6060_v48  ;;  %6638 = vmatpush2.bf16.msra.mxu1 %v16258_v14  ;;  %v16263_v48 = vld [vmem:[#allocation4 + $0x294] ss:$8 sps:$4 sm:$0xff]   ;;  %v16261_v47 = vld [vmem:[#allocation4 + $0x290] ss:$8 sps:$4 sm:$0xff]   ;;  %8365 = vmatpush2.bf16.msra.mxu0 %v16330_v29  ;;  %v16338_v14 = vld [vmem:[#allocation2 + $0x16c4] ss:$8 sps:$4 sm:$0xff]  }
 0x522   :  { %v6102_v6 = vpop.f32.mrf.mxu1  ;;  %6639 = vmatprep.subr.bf16.mxu1 %v16263_v48  ;;  %v16336_v48 = vld [vmem:[#allocation2 + $0x16c0] ss:$8 sps:$4 sm:$0xff]   ;;  %8366 = vmatprep.subr.bf16.mxu0 %v16338_v14 }
 0x523   :  { %v16266_v6 = vld [vmem:[#allocation4 + $0x284] ss:$8 sps:$4 sm:$0xff]   ;;  %v16372_v29 = vld [vmem:[#allocation2 + $0x1860] ss:$8 sps:$4 sm:$0xff]  }
 0x524   :  { %v6103_v49 = vpop.f32.mrf.mxu1 }
 0x525   :  { %6640 = vmatpush2.bf16.msra.mxu1 %v16261_v47  ;;  %8367 = vmatpush2.bf16.msra.mxu0 %v16336_v48  ;;  %v16344_v47 = vld [vmem:[#allocation2 + $0x16b4] ss:$8 sps:$4 sm:$0xff]  }
 0x526   :  { %6641 = vmatprep.subr.bf16.mxu1 %v16266_v6  ;;  %v16342_v6 = vld [vmem:[#allocation2 + $0x16b0] ss:$8 sps:$4 sm:$0xff]   ;;  %8368 = vmatprep.subr.bf16.mxu0 %v16344_v47  ;;  %v16380_v47 = vld [vmem:[#allocation2 + $0x1854] ss:$8 sps:$4 sm:$0xff]  }
 0x529   :  { %6642 = vmatpush2.bf16.msra.mxu1 %v16264_v40  ;;  %v6140_v40 = vadd.f32 %v18198_v41, %v18221_v28  ;;  %8369 = vmatpush2.bf16.msra.mxu0 %v16342_v6  ;;  %v6316_v41 = vrot.slane %v6311_v3, %v17836_v23 }
 0x52a   :  { %8303 = vmatprep.subr.bf16.mxu1 %v16269_v37  ;;  %v6142_v37 = vadd.f32 %v18200_v60, %v18223_v16 }
 0x55e   :  { %v6180_v39 = vpop.f32.mrf.mxu1 }
 0x560   :  { %v18225_v49 = vpop.f32.mrf.mxu1 }
 0x561   :  { %v6183_v42 = vadd.f32 %v18225_v49, %v6142_v37  ;;  %v6320_v49 = vrot.slane %v6311_v3, %v17844_v26 }
 0x562   :  { %v6184_v25 = vpop.f32.mrf.mxu1 }
 0x563   :  { %v6181_v25 = vadd.f32 %v6180_v39, %v6140_v40  ;;  %v6224_v28 = vadd.f32 %v18204_v11, %v6183_v42 }
 0x564   :  { %v6185_v30 = vpop.f32.mrf.mxu1 }
 0x565   :  { %v16350_v30 = vld [vmem:[#allocation2 + $0x16a4] ss:$8 sps:$4 sm:$0xff]   ;;  %v6222_v46 = vadd.f32 %v18202_v10, %v6181_v25  ;;  %v16378_v25 = vld [vmem:[#allocation2 + $0x1850] ss:$8 sps:$4 sm:$0xff]  }
 0x566   :  { %8370 = vmatprep.subr.bf16.mxu0 %v16350_v30  ;;  %v16386_v30 = vld [vmem:[#allocation2 + $0x1844] ss:$8 sps:$4 sm:$0xff]  }
 0x567   :  { %8371 = vmatpush2.bf16.msra.mxu0 %v16348_v17 }
 0x568   :  { %8372 = vmatprep.subr.bf16.mxu0 %v16356_v8  ;;  %v16392_v8 = vld [vmem:[#allocation2 + $0x1834] ss:$8 sps:$4 sm:$0xff]  }
 0x56b   :  { %8373 = vmatpush2.bf16.msra.mxu0 %v16354_v22 }
 0x56c   :  { %8374 = vmatprep.subr.bf16.mxu0 %v16362_v20 }
 0x56f   :  { %8375 = vmatpush2.bf16.msra.mxu0 %v16360_v53 }
 0x570   :  { %8426 = vmatprep.subr.bf16.mxu0 %v16368_v51 }
 0x572   :  { %8377 = vmatmul.mubr.bf16.vlgmr.msra.gmra.mxu0 %v17893_v43 }
 0x573   :  { %8427 = vmatpush1.bf16.msra.mxu0 %v16366_v62  ;;  %8458 = vmatprep.mubr.bf16.mxu0 %v17988_v1  ;;  %v16384_v1 = vld [vmem:[#allocation2 + $0x1840] ss:$8 sps:$4 sm:$0xff]   ;;  %v16410_v62 = vld [vmem:[#allocation2 + $0x1804] ss:$8 sps:$4 sm:$0xff]  }
 0x59e   :  { %v6262_v63 = vpop.f32.mrf.mxu1 }
 0x59f   :  { %v6263_v18 = vadd.f32 %v6262_v63, %v6222_v46 }
 0x5a0   :  { %v6264_v39 = vpop.f32.mrf.mxu1 }
 0x5a1   :  { %v6304_v60 = vadd.f32 %v18206_v4, %v6263_v18  ;;  %v6265_v16 = vadd.f32 %v6264_v39, %v6224_v28  ;;  %v16390_v18 = vld [vmem:[#allocation2 + $0x1830] ss:$8 sps:$4 sm:$0xff]  }
 0x5a2   :  { %v6266_v38 = vpop.f32.mrf.mxu1 }
 0x5a3   :  { %v6323_v10 = vadd.f32 %v6316_v41, %v6304_v60  ;;  %v6306_v34 = vadd.f32 %v18208_v54, %v6265_v16  ;;  %v16374_v54 = vld [vmem:[#allocation2 + $0x1864] ss:$8 sps:$4 sm:$0xff]  }
 0x5a4   :  { %v6267_v15 = vpop.f32.mrf.mxu1  ;;  %8428 = vmatprep.subr.bf16.mxu0 %v16374_v54  ;;  %v16398_v60 = vld [vmem:[#allocation2 + $0x1824] ss:$8 sps:$4 sm:$0xff]  }
 0x5a5   :  { %v6329_v56 = vsel %vm197_vm0, %v6323_v10, 0.0  ;;  %v6324_v11 = vadd.f32 %v6320_v49, %v6306_v34  ;;  %8429 = vmatpush1.bf16.msra.mxu0 %v16372_v29  ;;  %v16396_v49 = vld [vmem:[#allocation2 + $0x1820] ss:$8 sps:$4 sm:$0xff]   ;;  %v16404_v34 = vld [vmem:[#allocation2 + $0x1814] ss:$8 sps:$4 sm:$0xff]  }
 0x5a6   :  { %v6330_v52 = vrot.slane %v6329_v56, 4  ;;  %8430 = vmatprep.subr.bf16.mxu0 %v16380_v47  ;;  %v16402_v15 = vld [vmem:[#allocation2 + $0x1810] ss:$8 sps:$4 sm:$0xff]  }
 0x5a7   :  { %v6336_v4 = vsel %vm197_vm0, %v6324_v11, 0.0  ;;  %v16414_v29 = vld [vmem:[#allocation2 + $0x18f0] ss:$8 sps:$4 sm:$0xff]  }
 0x5a8   :  { %v6331_v58 = vadd.f32 %v6330_v52, %v6329_v56  ;;  %v6337_v59 = vrot.slane %v6336_v4, 4 }
 0x5a9   :  { %8431 = vmatpush1.bf16.msra.mxu0 %v16378_v25  ;;  %v16428_v25 = vld [vmem:[#allocation2 + $0x18d4] ss:$8 sps:$4 sm:$0xff]  }
 0x5aa   :  { %v6332_v2 = vrot.slane %v6331_v58, 2  ;;  %v6338_v31 = vadd.f32 %v6337_v59, %v6336_v4  ;;  %8432 = vmatprep.subr.bf16.mxu0 %v16386_v30  ;;  %v16408_v4 = vld [vmem:[#allocation2 + $0x1800] ss:$8 sps:$4 sm:$0xff]   ;;  %v6326_v30 = vld [vmem:[#allocation13 + $0x10] ss:$8 sm:$0x3] }
 0x5ac   :  { %v6333_v14 = vadd.f32 %v6332_v2, %v6331_v58  ;;  %v6339_v48 = vrot.slane %v6338_v31, 2 }
 0x5ad   :  { %8433 = vmatpush1.bf16.msra.mxu0 %v16384_v1  ;;  %v6375_v1 = vrot.slane %v6326_v30, %v17836_v23 }
 0x5ae   :  { %v6334_v6 = vrot.slane %v6333_v14, 1  ;;  %v6340_v40 = vadd.f32 %v6339_v48, %v6338_v31  ;;  %8434 = vmatprep.subr.bf16.mxu0 %v16392_v8  ;;  %v16416_v31 = vld [vmem:[#allocation2 + $0x18f4] ss:$8 sps:$4 sm:$0xff]  }
 0x5b0   :  { %v6335_v43 = vadd.f32 %v6334_v6, %v6333_v14  ;;  %v6341_v37 = vrot.slane %v6340_v40, 1  ;;  %v16422_v6 = vld [vmem:[#allocation2 + $0x18e4] ss:$8 sps:$4 sm:$0xff]  }
 0x5b1   :  { %8435 = vmatpush1.bf16.msra.mxu0 %v16390_v18 }
 0x5b2   :  { %v6343_v17 = vmul.f32 0.25, %v6335_v43  ;;  %v6342_v42 = vadd.f32 %v6341_v37, %v6340_v40  ;;  %8436 = vmatprep.subr.bf16.mxu0 %v16398_v60  ;;  %v16420_v40 = vld [vmem:[#allocation2 + $0x18e0] ss:$8 sps:$4 sm:$0xff]   ;;  %v16426_v43 = vld [vmem:[#allocation2 + $0x18d0] ss:$8 sps:$4 sm:$0xff]  }
 0x5b3   :  { %v16434_v37 = vld [vmem:[#allocation2 + $0x18c4] ss:$8 sps:$4 sm:$0xff]  }
 0x5b4   :  { %v18242_v3 = vsub.f32 %v6323_v10, %v6343_v17  ;;  %v6344_v46 = vmul.f32 0.25, %v6342_v42  ;;  %v16432_v17 = vld [vmem:[#allocation2 + $0x18c0] ss:$8 sps:$4 sm:$0xff]   ;;  %v6328_v42 = vld [vmem:[#allocation13 + $0x11] ss:$8 sm:$0x3] }
 0x5b5   :  { %8437 = vmatpush1.bf16.msra.mxu0 %v16396_v49  ;;  %v6392_v49 = vrot.slane %v6328_v42, %v17844_v26 }
 0x5b6   :  { %v6347_v63 = vmul.f32 %v18242_v3, %v18242_v3  ;;  %v18246_v22 = vsub.f32 %v6324_v11, %v6344_v46  ;;  %8438 = vmatprep.subr.bf16.mxu0 %v16404_v34  ;;  %v16440_v46 = vld [vmem:[#allocation2 + $0x18b4] ss:$8 sps:$4 sm:$0xff]  }
 0x5b8   :  { %v6349_v41 = vsel %vm197_vm0, %v6347_v63, 0.0  ;;  %v6348_v28 = vmul.f32 %v18246_v22, %v18246_v22  ;;  %v16438_v63 = vld [vmem:[#allocation2 + $0x18b0] ss:$8 sps:$4 sm:$0xff]  }
 0x5b9   :  { %v6350_v39 = vrot.slane %v6349_v41, 4  ;;  %8439 = vmatpush1.bf16.msra.mxu0 %v16402_v15  ;;  %v16452_v15 = vld [vmem:[#allocation2 + $0x1894] ss:$8 sps:$4 sm:$0xff]  }
 0x5ba   :  { %v6356_v16 = vsel %vm197_vm0, %v6348_v28, 0.0  ;;  %8440 = vmatprep.subr.bf16.mxu0 %v16410_v62  ;;  %v6388_v28 = vrot.slane %v6328_v42, %v17836_v23  ;;  %v16488_v42 = vld [vmem:[#allocation2 + $0x1a34] ss:$8 sps:$4 sm:$0xff]  }
 0x5bb   :  { %v6351_v20 = vadd.f32 %v6350_v39, %v6349_v41  ;;  %v6357_v38 = vrot.slane %v6356_v16, 4  ;;  %v6379_v41 = vrot.slane %v6326_v30, %v17844_v26  ;;  %v16480_v30 = vld [vmem:[#allocation2 + $0x1a40] ss:$8 sps:$4 sm:$0xff]  }
 0x5bd   :  { %v6352_v53 = vrot.slane %v6351_v20, 2  ;;  %v6358_v10 = vadd.f32 %v6357_v38, %v6356_v16  ;;  %8441 = vmatpush1.bf16.msra.mxu0 %v16408_v4  ;;  %v16444_v38 = vld [vmem:[#allocation2 + $0x18a0] ss:$8 sps:$4 sm:$0xff]   ;;  %v16267_v4 = vld [vmem:[#allocation2 + $0x1570] ss:$8 sps:$4 sm:$0xff]  }
 0x5be   :  { %8442 = vmatprep.subr.bf16.mxu0 %v16416_v31  ;;  %v16273_v31 = vld [vmem:[#allocation2 + $0x1560] ss:$8 sps:$4 sm:$0xff]  }
 0x5bf   :  { %v6353_v56 = vadd.f32 %v6352_v53, %v6351_v20  ;;  %v6359_v11 = vrot.slane %v6358_v10, 2  ;;  %v16446_v20 = vld [vmem:[#allocation2 + $0x18a4] ss:$8 sps:$4 sm:$0xff]  }
 0x5c1   :  { %v6354_v51 = vrot.slane %v6353_v56, 1  ;;  %v6360_v52 = vadd.f32 %v6359_v11, %v6358_v10  ;;  %8443 = vmatpush2.bf16.msra.mxu0 %v16414_v29  ;;  %v16462_v29 = vld [vmem:[#allocation2 + $0x1a70] ss:$8 sps:$4 sm:$0xff]  }
 0x5c2   :  { %8444 = vmatprep.subr.bf16.mxu0 %v16422_v6  ;;  %v16468_v6 = vld [vmem:[#allocation2 + $0x1a60] ss:$8 sps:$4 sm:$0xff]  }
 0x5c3   :  { %v6355_v58 = vadd.f32 %v6354_v51, %v6353_v56  ;;  %v6361_v59 = vrot.slane %v6360_v52, 1  ;;  %v16450_v56 = vld [vmem:[#allocation2 + $0x1890] ss:$8 sps:$4 sm:$0xff]  }
 0x5c5   :  { %v6363_v54 = vmul.f32 0.25, %v6355_v58  ;;  %v6362_v2 = vadd.f32 %v6361_v59, %v6360_v52  ;;  %8445 = vmatpush2.bf16.msra.mxu0 %v16420_v40  ;;  %v16456_v58 = vld [vmem:[#allocation2 + $0x1880] ss:$8 sps:$4 sm:$0xff]   ;;  %v16287_v40 = vld [vmem:[#allocation2 + $0x1544] ss:$8 sps:$4 sm:$0xff]  }
 0x5c6   :  { %8446 = vmatprep.subr.bf16.mxu0 %v16428_v25  ;;  %v16476_v25 = vld [vmem:[#allocation2 + $0x1a54] ss:$8 sps:$4 sm:$0xff]  }
 0x5c7   :  { %v6365_v14 = vadd.f32 1e-05, %v6363_v54  ;;  %v6364_v48 = vmul.f32 0.25, %v6362_v2  ;;  %v16275_v54 = vld [vmem:[#allocation2 + $0x1564] ss:$8 sps:$4 sm:$0xff]  }
 0x5c8   :  { %v16464_v2 = vld [vmem:[#allocation2 + $0x1a74] ss:$8 sps:$4 sm:$0xff]  }
 0x5c9   :  { %17440 = vrsqrt.f32 %v6365_v14  ;;  %v6366_v47 = vadd.f32 1e-05, %v6364_v48  ;;  %8447 = vmatpush2.bf16.msra.mxu0 %v16426_v43  ;;  %v16281_v14 = vld [vmem:[#allocation2 + $0x1554] ss:$8 sps:$4 sm:$0xff]   ;;  %v16470_v48 = vld [vmem:[#allocation2 + $0x1a64] ss:$8 sps:$4 sm:$0xff]  }
 0x5ca   :  { %8448 = vmatprep.subr.bf16.mxu0 %v16434_v37  ;;  %v16474_v43 = vld [vmem:[#allocation2 + $0x1a50] ss:$8 sps:$4 sm:$0xff]   ;;  %v16293_v37 = vld [vmem:[#allocation2 + $0x1534] ss:$8 sps:$4 sm:$0xff]  }
 0x5cb   :  { %17442 = vrsqrt.f32 %v6366_v47  ;;  %v16279_v47 = vld [vmem:[#allocation2 + $0x1550] ss:$8 sps:$4 sm:$0xff]  }
 0x5cd   :  { %8449 = vmatpush2.bf16.msra.mxu0 %v16432_v17  ;;  %v16299_v17 = vld [vmem:[#allocation2 + $0x1524] ss:$8 sps:$4 sm:$0xff]  }
 0x5ce   :  { %8450 = vmatprep.subr.bf16.mxu0 %v16440_v46  ;;  %v16486_v46 = vld [vmem:[#allocation2 + $0x1a30] ss:$8 sps:$4 sm:$0xff]  }
 0x5d1   :  { %8451 = vmatpush2.bf16.msra.mxu0 %v16438_v63  ;;  %v16494_v63 = vld [vmem:[#allocation2 + $0x1a24] ss:$8 sps:$4 sm:$0xff]  }
 0x5d2   :  { %8452 = vmatprep.subr.bf16.mxu0 %v16446_v20  ;;  %v16506_v20 = vld [vmem:[#allocation2 + $0x1a04] ss:$8 sps:$4 sm:$0xff]  }
 0x5d5   :  { %8453 = vmatpush2.bf16.msra.mxu0 %v16444_v38  ;;  %v16315_v38 = vld [vmem:[#allocation2 + $0x15f0] ss:$8 sps:$4 sm:$0xff]  }
 0x5d6   :  { %v17441_v8 = vpop.eup %17440  ;;  %8454 = vmatprep.subr.bf16.mxu0 %v16452_v15  ;;  %v16510_v15 = vld [vmem:[#allocation2 + $0x1af0] ss:$8 sps:$4 sm:$0xff]  }
 0x5d7   :  { %v6369_v18 = vmul.f32 %v17441_v8, %v18242_v3  ;;  %v16305_v8 = vld [vmem:[#allocation2 + $0x1514] ss:$8 sps:$4 sm:$0xff]  }
 0x5d8   :  { %v17443_v39 = vpop.eup %17442 }
 0x5d9   :  { %v6382_v60 = vmul.f32 %v6375_v1, %v6369_v18  ;;  %v6370_v16 = vmul.f32 %v17443_v39, %v18246_v22  ;;  %8455 = vmatpush2.bf16.msra.mxu0 %v16450_v56  ;;  %v16458_v22 = vld [vmem:[#allocation2 + $0x1884] ss:$8 sps:$4 sm:$0xff]   ;;  %v16297_v1 = vld [vmem:[#allocation2 + $0x1520] ss:$8 sps:$4 sm:$0xff]   ;;  %v16303_v18 = vld [vmem:[#allocation2 + $0x1510] ss:$8 sps:$4 sm:$0xff]  }
 0x5da   :  { %8456 = vmatprep.subr.bf16.mxu0 %v16458_v22  ;;  %v16500_v39 = vld [vmem:[#allocation2 + $0x1a14] ss:$8 sps:$4 sm:$0xff]   ;;  %v16335_v22 = vld [vmem:[#allocation2 + $0x15c4] ss:$8 sps:$4 sm:$0xff]  }
 0x5db   :  { %v6383_v53 = vmul.f32 %v6379_v41, %v6370_v16  ;;  %v6395_v10 = vadd.f32 %v6388_v28, %v6382_v60  ;;  %v16492_v41 = vld [vmem:[#allocation2 + $0x1a20] ss:$8 sps:$4 sm:$0xff]   ;;  %v16311_v28 = vld [vmem:[#allocation2 + $0x1504] ss:$8 sps:$4 sm:$0xff]   ;;  %v16498_v16 = vld [vmem:[#allocation2 + $0x1a10] ss:$8 sps:$4 sm:$0xff]  }
 0x5dc   :  { %v16309_v60 = vld [vmem:[#allocation2 + $0x1500] ss:$8 sps:$4 sm:$0xff]   ;;  %v16329_v56 = vld [vmem:[#allocation2 + $0x15d4] ss:$8 sps:$4 sm:$0xff]  }
 0x5dd   :  { %v6396_v34 = vadd.f32 %v6392_v49, %v6383_v53  ;;  %vm6397_vm7 = vcmp.ge.f32.partialorder %v6395_v10, 0.0  ;;  %v6399_v3 = vmul.f32 0.2, %v6395_v10  ;;  %8457 = vmatpush2.bf16.msra.mxu0 %v16456_v58  ;;  %v16317_v49 = vld [vmem:[#allocation2 + $0x15f4] ss:$8 sps:$4 sm:$0xff]  }
 0x5de   :  { %8508 = vmatprep.subr.bf16.mxu0 %v16464_v2  ;;  %v16504_v53 = vld [vmem:[#allocation2 + $0x1a00] ss:$8 sps:$4 sm:$0xff]   ;;  %v16522_v58 = vld [vmem:[#allocation2 + $0x1ad0] ss:$8 sps:$4 sm:$0xff]  }
 0x5df   :  { %vm6398_vm8 = vcmp.ge.f32.partialorder %v6396_v34, 0.0  ;;  %v6400_v11 = vmul.f32 0.2, %v6396_v34  ;;  %v6401_v51 = vsel %vm6397_vm7, %v6395_v10, %v6399_v3  ;;  %v16323_v10 = vld [vmem:[#allocation2 + $0x15e4] ss:$8 sps:$4 sm:$0xff]  }
 0x5e0   :  { %v6436_v59 = vpack.c.bf16 %v6401_v51, %v6401_v51  ;;  %8459 = vmatmul.mubr.bf16.vlgmr.msra.gmra.mxu0 %v18003_v33  ;;  %v16482_v33 = vld [vmem:[#allocation2 + $0x1a44] ss:$8 sps:$4 sm:$0xff]   ;;  %v16321_v3 = vld [vmem:[#allocation2 + $0x15e0] ss:$8 sps:$4 sm:$0xff]   ;;  %v16327_v51 = vld [vmem:[#allocation2 + $0x15d0] ss:$8 sps:$4 sm:$0xff]  }
 0x5e1   :  { %v6402_v52 = vsel %vm6398_vm8, %v6396_v34, %v6400_v11  ;;  %8540 = vmatprep.mubr.bf16.mxu0 %v18043_v13  ;;  %8509 = vmatpush1.bf16.msra.mxu0 %v16462_v29  ;;  %v16291_v13 = vld [vmem:[#allocation2 + $0x1530] ss:$8 sps:$4 sm:$0xff]   ;;  %v16512_v34 = vld [vmem:[#allocation2 + $0x1af4] ss:$8 sps:$4 sm:$0xff]   ;;  %v16518_v11 = vld [vmem:[#allocation2 + $0x1ae4] ss:$8 sps:$4 sm:$0xff]  }
 0x5e2   :  { %v6437_v62 = vpack.c.bf16 %v6402_v52, %v6402_v52  ;;  %8510 = vmatprep.subr.bf16.mxu0 %v16470_v48  ;;  %v16516_v52 = vld [vmem:[#allocation2 + $0x1ae0] ss:$8 sps:$4 sm:$0xff]   ;;  %v16339_v2 = vld [vmem:[#allocation2 + $0x15b0] ss:$8 sps:$4 sm:$0xff]   ;;  %v16347_v29 = vld [vmem:[#allocation2 + $0x15a4] ss:$8 sps:$4 sm:$0xff]  }
 0x5e3   :  { %v16345_v48 = vld [vmem:[#allocation2 + $0x15a0] ss:$8 sps:$4 sm:$0xff]  }
 0x5e4   :  { %6643 = vmatprep.mubr.bf16.mxu1 %v6437_v62  ;;  %v16524_v62 = vld [vmem:[#allocation2 + $0x1ad4] ss:$8 sps:$4 sm:$0xff]  }
 0x5e5   :  { %6644 = vmatmul.mubr.bf16.vlgmr.msra.gmra.mxu1 %v6436_v59  ;;  %8511 = vmatpush1.bf16.msra.mxu0 %v16468_v6  ;;  %v16341_v59 = vld [vmem:[#allocation2 + $0x15b4] ss:$8 sps:$4 sm:$0xff]  }
 0x5e6   :  { %8304 = vmatpush1.bf16.msra.mxu1 %v16267_v4  ;;  %8335 = vmatprep.mubr.bf16.mxu1 %v17885_v36  ;;  %v16285_v36 = vld [vmem:[#allocation2 + $0x1540] ss:$8 sps:$4 sm:$0xff]   ;;  %v16353_v6 = vld [vmem:[#allocation2 + $0x1594] ss:$8 sps:$4 sm:$0xff]  }
 0x5e7   :  { %8305 = vmatprep.subr.bf16.mxu1 %v16275_v54  ;;  %8512 = vmatprep.subr.bf16.mxu0 %v16476_v25  ;;  %v16333_v4 = vld [vmem:[#allocation2 + $0x15c0] ss:$8 sps:$4 sm:$0xff]   ;;  %v16530_v54 = vld [vmem:[#allocation2 + $0x1ac4] ss:$8 sps:$4 sm:$0xff]   ;;  %v16351_v25 = vld [vmem:[#allocation2 + $0x1590] ss:$8 sps:$4 sm:$0xff]  }
 0x5e9   :  { %8513 = vmatpush1.bf16.msra.mxu0 %v16474_v43  ;;  %v16359_v43 = vld [vmem:[#allocation2 + $0x1584] ss:$8 sps:$4 sm:$0xff]  }
 0x5ea   :  { %8306 = vmatpush1.bf16.msra.mxu1 %v16273_v31  ;;  %8514 = vmatprep.subr.bf16.mxu0 %v16482_v33  ;;  %v16528_v31 = vld [vmem:[#allocation2 + $0x1ac0] ss:$8 sps:$4 sm:$0xff]  }
 0x5eb   :  { %8307 = vmatprep.subr.bf16.mxu1 %v16281_v14  ;;  %v16536_v14 = vld [vmem:[#allocation2 + $0x1ab4] ss:$8 sps:$4 sm:$0xff]   ;;  %v16357_v33 = vld [vmem:[#allocation2 + $0x1580] ss:$8 sps:$4 sm:$0xff]  }
 0x5ed   :  { %8515 = vmatpush1.bf16.msra.mxu0 %v16480_v30  ;;  %v16365_v30 = vld [vmem:[#allocation2 + $0x1774] ss:$8 sps:$4 sm:$0xff]  }
 0x5ee   :  { %8308 = vmatpush1.bf16.msra.mxu1 %v16279_v47  ;;  %8516 = vmatprep.subr.bf16.mxu0 %v16488_v42  ;;  %v16534_v47 = vld [vmem:[#allocation2 + $0x1ab0] ss:$8 sps:$4 sm:$0xff]  }
 0x5ef   :  { %8309 = vmatprep.subr.bf16.mxu1 %v16287_v40  ;;  %v16542_v40 = vld [vmem:[#allocation2 + $0x1aa4] ss:$8 sps:$4 sm:$0xff]   ;;  %v16363_v42 = vld [vmem:[#allocation2 + $0x1770] ss:$8 sps:$4 sm:$0xff]  }
 0x5f1   :  { %8517 = vmatpush1.bf16.msra.mxu0 %v16486_v46  ;;  %v16371_v46 = vld [vmem:[#allocation2 + $0x1764] ss:$8 sps:$4 sm:$0xff]  }
 0x5f2   :  { %8310 = vmatpush1.bf16.msra.mxu1 %v16285_v36  ;;  %8518 = vmatprep.subr.bf16.mxu0 %v16494_v63  ;;  %v16540_v36 = vld [vmem:[#allocation2 + $0x1aa0] ss:$8 sps:$4 sm:$0xff]   ;;  %v16377_v63 = vld [vmem:[#allocation2 + $0x1754] ss:$8 sps:$4 sm:$0xff]  }
 0x5f3   :  { %8311 = vmatprep.subr.bf16.mxu1 %v16293_v37  ;;  %v16548_v37 = vld [vmem:[#allocation2 + $0x1a94] ss:$8 sps:$4 sm:$0xff]  }
 0x5f5   :  { %8519 = vmatpush1.bf16.msra.mxu0 %v16492_v41  ;;  %v16383_v41 = vld [vmem:[#allocation2 + $0x1744] ss:$8 sps:$4 sm:$0xff]  }
 0x5f6   :  { %8312 = vmatpush1.bf16.msra.mxu1 %v16291_v13  ;;  %8520 = vmatprep.subr.bf16.mxu0 %v16500_v39  ;;  %v16546_v13 = vld [vmem:[#allocation2 + $0x1a90] ss:$8 sps:$4 sm:$0xff]   ;;  %v16389_v39 = vld [vmem:[#allocation2 + $0x1734] ss:$8 sps:$4 sm:$0xff]  }
 0x5f7   :  { %8313 = vmatprep.subr.bf16.mxu1 %v16299_v17  ;;  %v16554_v17 = vld [vmem:[#allocation2 + $0x1a84] ss:$8 sps:$4 sm:$0xff]  }
 0x5f9   :  { %8521 = vmatpush1.bf16.msra.mxu0 %v16498_v16  ;;  %v16393_v16 = vld [vmem:[#allocation2 + $0x1720] ss:$8 sps:$4 sm:$0xff]  }
 0x5fa   :  { %8314 = vmatpush1.bf16.msra.mxu1 %v16297_v1  ;;  %8522 = vmatprep.subr.bf16.mxu0 %v16506_v20  ;;  %v16552_v1 = vld [vmem:[#allocation2 + $0x1a80] ss:$8 sps:$4 sm:$0xff]  }
 0x5fb   :  { %8315 = vmatprep.subr.bf16.mxu1 %v16305_v8  ;;  %v16369_v8 = vld [vmem:[#allocation2 + $0x1760] ss:$8 sps:$4 sm:$0xff]  }
 0x5fc   :  { %v16405_v20 = vld [vmem:[#allocation2 + $0x1700] ss:$8 sps:$4 sm:$0xff]  }
 0x5fd   :  { %8523 = vmatpush1.bf16.msra.mxu0 %v16504_v53  ;;  %v16411_v53 = vld [vmem:[#allocation2 + $0x17f0] ss:$8 sps:$4 sm:$0xff]  }
 0x5fe   :  { %8316 = vmatpush1.bf16.msra.mxu1 %v16303_v18  ;;  %8524 = vmatprep.subr.bf16.mxu0 %v16512_v34  ;;  %v16375_v18 = vld [vmem:[#allocation2 + $0x1750] ss:$8 sps:$4 sm:$0xff]   ;;  %v16417_v34 = vld [vmem:[#allocation2 + $0x17e0] ss:$8 sps:$4 sm:$0xff]  }
 0x5ff   :  { %8317 = vmatprep.subr.bf16.mxu1 %v16311_v28  ;;  %v16381_v28 = vld [vmem:[#allocation2 + $0x1740] ss:$8 sps:$4 sm:$0xff]  }
 0x601   :  { %8525 = vmatpush2.bf16.msra.mxu0 %v16510_v15  ;;  %v16423_v15 = vld [vmem:[#allocation2 + $0x17d0] ss:$8 sps:$4 sm:$0xff]  }
 0x602   :  { %8318 = vmatpush1.bf16.msra.mxu1 %v16309_v60  ;;  %8526 = vmatprep.subr.bf16.mxu0 %v16518_v11  ;;  %v16387_v60 = vld [vmem:[#allocation2 + $0x1730] ss:$8 sps:$4 sm:$0xff]   ;;  %v16429_v11 = vld [vmem:[#allocation2 + $0x17c0] ss:$8 sps:$4 sm:$0xff]  }
 0x603   :  { %8319 = vmatprep.subr.bf16.mxu1 %v16317_v49  ;;  %v16399_v49 = vld [vmem:[#allocation2 + $0x1710] ss:$8 sps:$4 sm:$0xff]  }
 0x605   :  { %8527 = vmatpush2.bf16.msra.mxu0 %v16516_v52  ;;  %v16435_v52 = vld [vmem:[#allocation2 + $0x17b0] ss:$8 sps:$4 sm:$0xff]  }
 0x606   :  { %8320 = vmatpush2.bf16.msra.mxu1 %v16315_v38  ;;  %8528 = vmatprep.subr.bf16.mxu0 %v16524_v62  ;;  %v16413_v38 = vld [vmem:[#allocation2 + $0x17f4] ss:$8 sps:$4 sm:$0xff]   ;;  %v16441_v62 = vld [vmem:[#allocation2 + $0x17a0] ss:$8 sps:$4 sm:$0xff]  }
 0x607   :  { %8321 = vmatprep.subr.bf16.mxu1 %v16323_v10  ;;  %v16419_v10 = vld [vmem:[#allocation2 + $0x17e4] ss:$8 sps:$4 sm:$0xff]  }
 0x609   :  { %8529 = vmatpush2.bf16.msra.mxu0 %v16522_v58  ;;  %v16447_v58 = vld [vmem:[#allocation2 + $0x1790] ss:$8 sps:$4 sm:$0xff]  }
 0x60a   :  { %8322 = vmatpush2.bf16.msra.mxu1 %v16321_v3  ;;  %8530 = vmatprep.subr.bf16.mxu0 %v16530_v54  ;;  %v16425_v3 = vld [vmem:[#allocation2 + $0x17d4] ss:$8 sps:$4 sm:$0xff]   ;;  %v16453_v54 = vld [vmem:[#allocation2 + $0x1780] ss:$8 sps:$4 sm:$0xff]  }
 0x60b   :  { %8323 = vmatprep.subr.bf16.mxu1 %v16329_v56  ;;  %v16431_v56 = vld [vmem:[#allocation2 + $0x17c4] ss:$8 sps:$4 sm:$0xff]  }
 0x60d   :  { %8531 = vmatpush2.bf16.msra.mxu0 %v16528_v31  ;;  %v16459_v31 = vld [vmem:[#allocation2 + $0x1970] ss:$8 sps:$4 sm:$0xff]  }
 0x60e   :  { %8324 = vmatpush2.bf16.msra.mxu1 %v16327_v51  ;;  %8532 = vmatprep.subr.bf16.mxu0 %v16536_v14  ;;  %v16437_v51 = vld [vmem:[#allocation2 + $0x17b4] ss:$8 sps:$4 sm:$0xff]   ;;  %v16465_v14 = vld [vmem:[#allocation2 + $0x1960] ss:$8 sps:$4 sm:$0xff]  }
 0x60f   :  { %8325 = vmatprep.subr.bf16.mxu1 %v16335_v22  ;;  %v16443_v22 = vld [vmem:[#allocation2 + $0x17a4] ss:$8 sps:$4 sm:$0xff]  }
 0x611   :  { %8533 = vmatpush2.bf16.msra.mxu0 %v16534_v47 }
 0x612   :  { %8326 = vmatpush2.bf16.msra.mxu1 %v16333_v4  ;;  %8534 = vmatprep.subr.bf16.mxu0 %v16542_v40  ;;  %v16449_v4 = vld [vmem:[#allocation2 + $0x1794] ss:$8 sps:$4 sm:$0xff]   ;;  %v16471_v40 = vld [vmem:[#allocation2 + $0x1950] ss:$8 sps:$4 sm:$0xff]  }
 0x613   :  { %8327 = vmatprep.subr.bf16.mxu1 %v16341_v59  ;;  %v16455_v59 = vld [vmem:[#allocation2 + $0x1784] ss:$8 sps:$4 sm:$0xff]  }
 0x615   :  { %8535 = vmatpush2.bf16.msra.mxu0 %v16540_v36 }
 0x616   :  { %8328 = vmatpush2.bf16.msra.mxu1 %v16339_v2  ;;  %8536 = vmatprep.subr.bf16.mxu0 %v16548_v37  ;;  %v16461_v2 = vld [vmem:[#allocation2 + $0x1974] ss:$8 sps:$4 sm:$0xff]   ;;  %v16477_v37 = vld [vmem:[#allocation2 + $0x1940] ss:$8 sps:$4 sm:$0xff]  }
 0x617   :  { %8329 = vmatprep.subr.bf16.mxu1 %v16347_v29  ;;  %v16467_v29 = vld [vmem:[#allocation2 + $0x1964] ss:$8 sps:$4 sm:$0xff]  }
 0x619   :  { %8537 = vmatpush2.bf16.msra.mxu0 %v16546_v13  ;;  %v16489_v13 = vld [vmem:[#allocation2 + $0x1920] ss:$8 sps:$4 sm:$0xff]  }
 0x61a   :  { %8330 = vmatpush2.bf16.msra.mxu1 %v16345_v48  ;;  %8538 = vmatprep.subr.bf16.mxu0 %v16554_v17  ;;  %v16473_v48 = vld [vmem:[#allocation2 + $0x1954] ss:$8 sps:$4 sm:$0xff]   ;;  %v16495_v17 = vld [vmem:[#allocation2 + $0x1910] ss:$8 sps:$4 sm:$0xff]  }
 0x61b   :  { %8331 = vmatprep.subr.bf16.mxu1 %v16353_v6 }
 0x61d   :  { %8539 = vmatpush2.bf16.msra.mxu0 %v16552_v1  ;;  %v16501_v1 = vld [vmem:[#allocation2 + $0x1900] ss:$8 sps:$4 sm:$0xff]  }
 0x61e   :  { %8332 = vmatpush2.bf16.msra.mxu1 %v16351_v25  ;;  %v16479_v25 = vld [vmem:[#allocation2 + $0x1944] ss:$8 sps:$4 sm:$0xff]  }
 0x61f   :  { %8333 = vmatprep.subr.bf16.mxu1 %v16359_v43 }
 0x620   :  { %8541 = vmatmul.mubr.bf16.vlgmr.msra.gmra.mxu0 %v18068_v27  ;;  %v16407_v27 = vld [vmem:[#allocation2 + $0x1704] ss:$8 sps:$4 sm:$0xff]  }
 0x622   :  { %8334 = vmatpush2.bf16.msra.mxu1 %v16357_v33  ;;  %v16483_v33 = vld [vmem:[#allocation2 + $0x1930] ss:$8 sps:$4 sm:$0xff]  }
 0x623   :  { %8385 = vmatprep.subr.bf16.mxu1 %v16365_v30  ;;  %v16497_v30 = vld [vmem:[#allocation2 + $0x1914] ss:$8 sps:$4 sm:$0xff]  }
 0x625   :  { %8336 = vmatmul.mubr.bf16.vlgmr.msra.gmra.mxu1 %v17883_v32  ;;  %v16395_v32 = vld [vmem:[#allocation2 + $0x1724] ss:$8 sps:$4 sm:$0xff]  }
 0x626   :  { %8386 = vmatpush1.bf16.msra.mxu1 %v16363_v42  ;;  %8417 = vmatprep.mubr.bf16.mxu1 %v17974_v50  ;;  %v16401_v50 = vld [vmem:[#allocation2 + $0x1714] ss:$8 sps:$4 sm:$0xff]   ;;  %v16503_v42 = vld [vmem:[#allocation2 + $0x1904] ss:$8 sps:$4 sm:$0xff]  }
 0x627   :  { %8387 = vmatprep.subr.bf16.mxu1 %v16371_v46  ;;  %v16509_v46 = vld [vmem:[#allocation2 + $0x19f4] ss:$8 sps:$4 sm:$0xff]  }
 0x62a   :  { %8388 = vmatpush1.bf16.msra.mxu1 %v16369_v8  ;;  %v16507_v8 = vld [vmem:[#allocation2 + $0x19f0] ss:$8 sps:$4 sm:$0xff]  }
 0x62b   :  { %8389 = vmatprep.subr.bf16.mxu1 %v16377_v63  ;;  %v16515_v63 = vld [vmem:[#allocation2 + $0x19e4] ss:$8 sps:$4 sm:$0xff]  }
 0x62e   :  { %8390 = vmatpush1.bf16.msra.mxu1 %v16375_v18  ;;  %v16513_v18 = vld [vmem:[#allocation2 + $0x19e0] ss:$8 sps:$4 sm:$0xff]  }
 0x62f   :  { %8391 = vmatprep.subr.bf16.mxu1 %v16383_v41  ;;  %v16521_v41 = vld [vmem:[#allocation2 + $0x19d4] ss:$8 sps:$4 sm:$0xff]  }
 0x632   :  { %8392 = vmatpush1.bf16.msra.mxu1 %v16381_v28  ;;  %v18266_v47 = vpop.f32.mrf.mxu0  ;;  %v16519_v28 = vld [vmem:[#allocation2 + $0x19d0] ss:$8 sps:$4 sm:$0xff]  }
 0x633   :  { %8393 = vmatprep.subr.bf16.mxu1 %v16389_v39  ;;  %v16527_v39 = vld [vmem:[#allocation2 + $0x19c4] ss:$8 sps:$4 sm:$0xff]  }
 0x634   :  { %v18268_v6 = vpop.f32.mrf.mxu0 }
 0x636   :  { %8394 = vmatpush1.bf16.msra.mxu1 %v16387_v60  ;;  %v8382_v36 = vpop.f32.mrf.mxu0  ;;  %v16525_v60 = vld [vmem:[#allocation2 + $0x19c0] ss:$8 sps:$4 sm:$0xff]  }
 0x637   :  { %8395 = vmatprep.subr.bf16.mxu1 %v16395_v32  ;;  %v16533_v32 = vld [vmem:[#allocation2 + $0x19b4] ss:$8 sps:$4 sm:$0xff]   ;;  %v16576_v36 = vld [vmem:[#allocation2 + $0x1b00] ss:$8 sps:$4 sm:$0xff]  }
 0x638   :  { %v8383_v43 = vpop.f32.mrf.mxu0 }
 0x639   :  { %v16581_v43 = vld [vmem:[#allocation2 + $0x1bf4] ss:$8 sps:$4 sm:$0xff]  }
 0x63a   :  { %8396 = vmatpush1.bf16.msra.mxu1 %v16393_v16  ;;  %v16531_v16 = vld [vmem:[#allocation2 + $0x19b0] ss:$8 sps:$4 sm:$0xff]  }
 0x63b   :  { %8397 = vmatprep.subr.bf16.mxu1 %v16401_v50  ;;  %v16539_v50 = vld [vmem:[#allocation2 + $0x19a4] ss:$8 sps:$4 sm:$0xff]  }
 0x63e   :  { %8398 = vmatpush1.bf16.msra.mxu1 %v16399_v49  ;;  %v16537_v49 = vld [vmem:[#allocation2 + $0x19a0] ss:$8 sps:$4 sm:$0xff]  }
 0x63f   :  { %8399 = vmatprep.subr.bf16.mxu1 %v16407_v27  ;;  %v16545_v27 = vld [vmem:[#allocation2 + $0x1994] ss:$8 sps:$4 sm:$0xff]  }
 0x642   :  { %8400 = vmatpush1.bf16.msra.mxu1 %v16405_v20  ;;  %v16543_v20 = vld [vmem:[#allocation2 + $0x1990] ss:$8 sps:$4 sm:$0xff]  }
 0x643   :  { %8401 = vmatprep.subr.bf16.mxu1 %v16413_v38  ;;  %v16551_v38 = vld [vmem:[#allocation2 + $0x1984] ss:$8 sps:$4 sm:$0xff]  }
 0x646   :  { %8402 = vmatpush2.bf16.msra.mxu1 %v16411_v53  ;;  %v16549_v53 = vld [vmem:[#allocation2 + $0x1980] ss:$8 sps:$4 sm:$0xff]  }
 0x647   :  { %8403 = vmatprep.subr.bf16.mxu1 %v16419_v10  ;;  %v16557_v10 = vld [vmem:[#allocation2 + $0x1b74] ss:$8 sps:$4 sm:$0xff]  }
 0x64a   :  { %8404 = vmatpush2.bf16.msra.mxu1 %v16417_v34  ;;  %v16555_v34 = vld [vmem:[#allocation2 + $0x1b70] ss:$8 sps:$4 sm:$0xff]  }
 0x64b   :  { %8405 = vmatprep.subr.bf16.mxu1 %v16425_v3  ;;  %v16560_v3 = vld [vmem:[#allocation2 + $0x1b64] ss:$8 sps:$4 sm:$0xff]  }
 0x64e   :  { %8406 = vmatpush2.bf16.msra.mxu1 %v16423_v15 }
 0x64f   :  { %8407 = vmatprep.subr.bf16.mxu1 %v16431_v56  ;;  %v16558_v56 = vld [vmem:[#allocation2 + $0x1b60] ss:$8 sps:$4 sm:$0xff]  }
 0x652   :  { %8408 = vmatpush2.bf16.msra.mxu1 %v16429_v11 }
 0x653   :  { %8409 = vmatprep.subr.bf16.mxu1 %v16437_v51  ;;  %v16563_v51 = vld [vmem:[#allocation2 + $0x1b54] ss:$8 sps:$4 sm:$0xff]  }
 0x656   :  { %8410 = vmatpush2.bf16.msra.mxu1 %v16435_v52 }
 0x657   :  { %8411 = vmatprep.subr.bf16.mxu1 %v16443_v22 }
 0x65a   :  { %8412 = vmatpush2.bf16.msra.mxu1 %v16441_v62 }
 0x65b   :  { %8413 = vmatprep.subr.bf16.mxu1 %v16449_v4  ;;  %v16561_v4 = vld [vmem:[#allocation2 + $0x1b50] ss:$8 sps:$4 sm:$0xff]  }
 0x65e   :  { %8414 = vmatpush2.bf16.msra.mxu1 %v16447_v58 }
 0x65f   :  { %8415 = vmatprep.subr.bf16.mxu1 %v16455_v59 }
 0x662   :  { %8416 = vmatpush2.bf16.msra.mxu1 %v16453_v54 }
 0x663   :  { %8467 = vmatprep.subr.bf16.mxu1 %v16461_v2  ;;  %v16564_v2 = vld [vmem:[#allocation2 + $0x1b40] ss:$8 sps:$4 sm:$0xff]  }
 0x665   :  { %8418 = vmatmul.mubr.bf16.vlgmr.msra.gmra.mxu1 %v17996_v19  ;;  %v16485_v19 = vld [vmem:[#allocation2 + $0x1934] ss:$8 sps:$4 sm:$0xff]  }
 0x666   :  { %8468 = vmatpush1.bf16.msra.mxu1 %v16459_v31  ;;  %8499 = vmatprep.mubr.bf16.mxu1 %v18039_v9  ;;  %v16491_v9 = vld [vmem:[#allocation2 + $0x1924] ss:$8 sps:$4 sm:$0xff]   ;;  %v16567_v31 = vld [vmem:[#allocation2 + $0x1b30] ss:$8 sps:$4 sm:$0xff]  }
 0x667   :  { %8469 = vmatprep.subr.bf16.mxu1 %v16467_v29  ;;  %v16572_v29 = vld [vmem:[#allocation2 + $0x1b24] ss:$8 sps:$4 sm:$0xff]  }
 0x66a   :  { %8470 = vmatpush1.bf16.msra.mxu1 %v16465_v14  ;;  %v16570_v14 = vld [vmem:[#allocation2 + $0x1b20] ss:$8 sps:$4 sm:$0xff]  }
 0x66b   :  { %8471 = vmatprep.subr.bf16.mxu1 %v16473_v48  ;;  %v16575_v48 = vld [vmem:[#allocation2 + $0x1b14] ss:$8 sps:$4 sm:$0xff]  }
 0x66e   :  { %8472 = vmatpush1.bf16.msra.mxu1 %v16471_v40  ;;  %v16573_v40 = vld [vmem:[#allocation2 + $0x1b10] ss:$8 sps:$4 sm:$0xff]  }
 0x66f   :  { %8473 = vmatprep.subr.bf16.mxu1 %v16479_v25  ;;  %v16578_v25 = vld [vmem:[#allocation2 + $0x1b04] ss:$8 sps:$4 sm:$0xff]  }
 0x672   :  { %8474 = vmatpush1.bf16.msra.mxu1 %v16477_v37  ;;  %v16579_v37 = vld [vmem:[#allocation2 + $0x1bf0] ss:$8 sps:$4 sm:$0xff]  }
 0x673   :  { %8475 = vmatprep.subr.bf16.mxu1 %v16485_v19  ;;  %v16584_v19 = vld [vmem:[#allocation2 + $0x1be4] ss:$8 sps:$4 sm:$0xff]  }
 0x676   :  { %8476 = vmatpush1.bf16.msra.mxu1 %v16483_v33  ;;  %v16582_v33 = vld [vmem:[#allocation2 + $0x1be0] ss:$8 sps:$4 sm:$0xff]  }
 0x677   :  { %8477 = vmatprep.subr.bf16.mxu1 %v16491_v9  ;;  %v16587_v9 = vld [vmem:[#allocation2 + $0x1bd4] ss:$8 sps:$4 sm:$0xff]  }
 0x67a   :  { %8478 = vmatpush1.bf16.msra.mxu1 %v16489_v13  ;;  %v16585_v13 = vld [vmem:[#allocation2 + $0x1bd0] ss:$8 sps:$4 sm:$0xff]  }
 0x67b   :  { %8479 = vmatprep.subr.bf16.mxu1 %v16497_v30  ;;  %v16590_v30 = vld [vmem:[#allocation2 + $0x1bc4] ss:$8 sps:$4 sm:$0xff]  }
 0x67e   :  { %8480 = vmatpush1.bf16.msra.mxu1 %v16495_v17  ;;  %v16588_v17 = vld [vmem:[#allocation2 + $0x1bc0] ss:$8 sps:$4 sm:$0xff]  }
 0x67f   :  { %8481 = vmatprep.subr.bf16.mxu1 %v16503_v42  ;;  %v16593_v42 = vld [vmem:[#allocation2 + $0x1bb4] ss:$8 sps:$4 sm:$0xff]  }
 0x682   :  { %8482 = vmatpush1.bf16.msra.mxu1 %v16501_v1  ;;  %v16591_v1 = vld [vmem:[#allocation2 + $0x1bb0] ss:$8 sps:$4 sm:$0xff]  }
 0x683   :  { %8483 = vmatprep.subr.bf16.mxu1 %v16509_v46  ;;  %v16596_v46 = vld [vmem:[#allocation2 + $0x1ba4] ss:$8 sps:$4 sm:$0xff]  }
 0x686   :  { %8484 = vmatpush2.bf16.msra.mxu1 %v16507_v8  ;;  %v16594_v8 = vld [vmem:[#allocation2 + $0x1ba0] ss:$8 sps:$4 sm:$0xff]  }
 0x687   :  { %8485 = vmatprep.subr.bf16.mxu1 %v16515_v63  ;;  %v16599_v63 = vld [vmem:[#allocation2 + $0x1b94] ss:$8 sps:$4 sm:$0xff]  }
 0x68a   :  { %8486 = vmatpush2.bf16.msra.mxu1 %v16513_v18  ;;  %v16597_v18 = vld [vmem:[#allocation2 + $0x1b90] ss:$8 sps:$4 sm:$0xff]  }
 0x68b   :  { %8487 = vmatprep.subr.bf16.mxu1 %v16521_v41  ;;  %v16602_v41 = vld [vmem:[#allocation2 + $0x1b84] ss:$8 sps:$4 sm:$0xff]  }
 0x68e   :  { %8488 = vmatpush2.bf16.msra.mxu1 %v16519_v28  ;;  %v16600_v28 = vld [vmem:[#allocation2 + $0x1b80] ss:$8 sps:$4 sm:$0xff]  }
 0x68f   :  { %8489 = vmatprep.subr.bf16.mxu1 %v16527_v39 }
 0x692   :  { %8490 = vmatpush2.bf16.msra.mxu1 %v16525_v60 }
 0x693   :  { %8491 = vmatprep.subr.bf16.mxu1 %v16533_v32 }
 0x696   :  { %8492 = vmatpush2.bf16.msra.mxu1 %v16531_v16 }
 0x697   :  { %8493 = vmatprep.subr.bf16.mxu1 %v16539_v50 }
 0x69a   :  { %8494 = vmatpush2.bf16.msra.mxu1 %v16537_v49 }
 0x69b   :  { %8495 = vmatprep.subr.bf16.mxu1 %v16545_v27  ;;  %v16603_v27 = vld [vmem:[#allocation9 + $0x78] sm:$0xff]  }
 0x69c   :  { %14998 = vmatprep.subr.bf16.mxu0 %v16603_v27 }
 0x69e   :  { %8496 = vmatpush2.bf16.msra.mxu1 %v16543_v20  ;;  %v16604_v20 = vld [vmem:[#allocation9 + $0x38] sm:$0xff]  }
 0x69f   :  { %8497 = vmatprep.subr.bf16.mxu1 %v16551_v38  ;;  %v16605_v38 = vld [vmem:[#allocation9 + $0x70] sm:$0xff]   ;;  %14999 = vmatpush3.bf16.msra.mxu0 %v16604_v20 }
 0x6a0   :  { %v18276_v52 = vpop.f32.mrf.mxu0  ;;  %15000 = vmatprep.subr.bf16.mxu0 %v16605_v38 }
 0x6a2   :  { %8498 = vmatpush2.bf16.msra.mxu1 %v16549_v53  ;;  %v18278_v62 = vpop.f32.mrf.mxu0 }
 0x6a3   :  { %8549 = vmatprep.subr.bf16.mxu1 %v16557_v10  ;;  %v16606_v10 = vld [vmem:[#allocation9 + $0x30] sm:$0xff]  }
 0x6a4   :  { %v8464_v59 = vpop.f32.mrf.mxu0  ;;  %15001 = vmatpush3.bf16.msra.mxu0 %v16606_v10 }
 0x6a5   :  { %8500 = vmatmul.mubr.bf16.vlgmr.msra.gmra.mxu1 %v18062_v35  ;;  %v18271_v15 = vpop.f32.mrf.mxu1  ;;  %v16566_v35 = vld [vmem:[#allocation2 + $0x1b44] ss:$8 sps:$4 sm:$0xff]   ;;  %v16611_v59 = vld [vmem:[#allocation9 + $0x58] sm:$0xff]  }
 0x6a6   :  { %8550 = vmatpush1.bf16.msra.mxu1 %v16555_v34  ;;  %8581 = vmatprep.mubr.bf16.mxu1 %v18064_v24  ;;  %v8465_v54 = vpop.f32.mrf.mxu0  ;;  %v16569_v24 = vld [vmem:[#allocation2 + $0x1b34] ss:$8 sps:$4 sm:$0xff]  }
 0x6a7   :  { %v18274_v11 = vpop.f32.mrf.mxu1  ;;  %8551 = vmatprep.subr.bf16.mxu1 %v16560_v3  ;;  %v16607_v3 = vld [vmem:[#allocation9 + $0x68] sm:$0xff]  }
 0x6a8   :  { %15002 = vmatprep.subr.bf16.mxu0 %v16607_v3 }
 0x6a9   :  { %v6649_v22 = vpop.f32.mrf.mxu1 }
 0x6aa   :  { %8552 = vmatpush1.bf16.msra.mxu1 %v16558_v56  ;;  %v16608_v56 = vld [vmem:[#allocation9 + $0x28] sm:$0xff]  }
 0x6ab   :  { %v6650_v58 = vpop.f32.mrf.mxu1  ;;  %8553 = vmatprep.subr.bf16.mxu1 %v16563_v51  ;;  %15003 = vmatpush3.bf16.msra.mxu0 %v16608_v56  ;;  %v16610_v51 = vld [vmem:[#allocation9 + $0x20] sm:$0xff]  }
 0x6ae   :  { %8554 = vmatpush1.bf16.msra.mxu1 %v16561_v4 }
 0x6af   :  { %8555 = vmatprep.subr.bf16.mxu1 %v16566_v35 }
 0x6b2   :  { %8556 = vmatpush1.bf16.msra.mxu1 %v16564_v2 }
 0x6b3   :  { %8557 = vmatprep.subr.bf16.mxu1 %v16569_v24  ;;  %v16612_v24 = vld [vmem:[#allocation9 + $0x18] sm:$0xff]  }
 0x6b6   :  { %8558 = vmatpush1.bf16.msra.mxu1 %v16567_v31 }
 0x6b7   :  { %8559 = vmatprep.subr.bf16.mxu1 %v16572_v29 }
 0x6ba   :  { %8560 = vmatpush1.bf16.msra.mxu1 %v16570_v14 }
 0x6bb   :  { %8561 = vmatprep.subr.bf16.mxu1 %v16575_v48  ;;  %v16613_v48 = vld [vmem:[#allocation9 + $0x50] sm:$0xff]  }
 0x6be   :  { %8562 = vmatpush1.bf16.msra.mxu1 %v16573_v40  ;;  %v16614_v40 = vld [vmem:[#allocation9 + $0x10] sm:$0xff]  }
 0x6bf   :  { %8563 = vmatprep.subr.bf16.mxu1 %v16578_v25  ;;  %v16617_v25 = vld [vmem:[#allocation9 + $0x40] sm:$0xff]  }
 0x6c2   :  { %8564 = vmatpush1.bf16.msra.mxu1 %v16576_v36  ;;  %v16619_v36 = vld [vmem:[#allocation6 + $0x70] ss:$8 sps:$4 sm:$0xff]  }
 0x6c3   :  { %8565 = vmatprep.subr.bf16.mxu1 %v16581_v43  ;;  %v16621_v43 = vld [vmem:[#allocation6 + $0x74] ss:$8 sps:$4 sm:$0xff]  }
 0x6c6   :  { %8566 = vmatpush2.bf16.msra.mxu1 %v16579_v37  ;;  %v16624_v37 = vld [vmem:[#allocation6 + $0x64] ss:$8 sps:$4 sm:$0xff]  }
 0x6c7   :  { %8567 = vmatprep.subr.bf16.mxu1 %v16584_v19  ;;  %v16622_v19 = vld [vmem:[#allocation6 + $0x60] ss:$8 sps:$4 sm:$0xff]  }
 0x6ca   :  { %8568 = vmatpush2.bf16.msra.mxu1 %v16582_v33  ;;  %v16627_v33 = vld [vmem:[#allocation6 + $0x54] ss:$8 sps:$4 sm:$0xff]  }
 0x6cb   :  { %8569 = vmatprep.subr.bf16.mxu1 %v16587_v9  ;;  %v6439_v9 = vld [vmem:[#allocation13 + $0x12] ss:$8 sm:$0x3] }
 0x6ce   :  { %8570 = vmatpush2.bf16.msra.mxu1 %v16585_v13  ;;  %v16625_v13 = vld [vmem:[#allocation6 + $0x50] ss:$8 sps:$4 sm:$0xff]  }
 0x6cf   :  { %8571 = vmatprep.subr.bf16.mxu1 %v16590_v30  ;;  %v16630_v30 = vld [vmem:[#allocation6 + $0x44] ss:$8 sps:$4 sm:$0xff]  }
 0x6d2   :  { %8572 = vmatpush2.bf16.msra.mxu1 %v16588_v17  ;;  %v6444_v17 = vrot.slane %v6439_v9, %v17836_v23 }
 0x6d3   :  { %8573 = vmatprep.subr.bf16.mxu1 %v16593_v42  ;;  %v16628_v42 = vld [vmem:[#allocation6 + $0x40] ss:$8 sps:$4 sm:$0xff]  }
 0x6d6   :  { %8574 = vmatpush2.bf16.msra.mxu1 %v16591_v1  ;;  %v6448_v1 = vrot.slane %v6439_v9, %v17844_v26 }
 0x6d7   :  { %8575 = vmatprep.subr.bf16.mxu1 %v16596_v46  ;;  %v16633_v46 = vld [vmem:[#allocation6 + $0x34] ss:$8 sps:$4 sm:$0xff]  }
 0x6da   :  { %8576 = vmatpush2.bf16.msra.mxu1 %v16594_v8  ;;  %v6646_v8 = vadd.f32 %v18271_v15, %v6444_v17 }
 0x6db   :  { %8577 = vmatprep.subr.bf16.mxu1 %v16599_v63  ;;  %v16631_v63 = vld [vmem:[#allocation6 + $0x30] ss:$8 sps:$4 sm:$0xff]  }
 0x6de   :  { %8578 = vmatpush2.bf16.msra.mxu1 %v16597_v18  ;;  %v6648_v18 = vadd.f32 %v18274_v11, %v6448_v1  ;;  %v6653_v1 = vld [vmem:[#allocation13 + $0x13] ss:$8 sm:$0x3] }
 0x6df   :  { %8579 = vmatprep.subr.bf16.mxu1 %v16602_v41  ;;  %v6656_v41 = vsel %vm197_vm0, %v6646_v8, 0.0 }
 0x6e0   :  { %v18281_v32 = vpop.f32.mrf.mxu0 }
 0x6e2   :  { %8580 = vmatpush2.bf16.msra.mxu1 %v16600_v28  ;;  %v18283_v50 = vpop.f32.mrf.mxu0  ;;  %v6663_v28 = vsel %vm197_vm0, %v6648_v18, 0.0 }
 0x6e3   :  { %9111 = vmatprep.subr.bf16.mxu1 %v16621_v43 }
 0x6e4   :  { %v8546_v53 = vpop.f32.mrf.mxu0 }
 0x6e5   :  { %v8337_v39 = vpop.f32.mrf.mxu1  ;;  %8582 = vmatmul.mubr.bf16.vlgmr.msra.gmra.mxu1 %v18075_v7  ;;  %v16609_v7 = vld [vmem:[#allocation9 + $0x60] sm:$0xff]  }
 0x6e6   :  { %v8547_v34 = vpop.f32.mrf.mxu0  ;;  %15004 = vmatprep.subr.bf16.mxu0 %v16609_v7  ;;  %v8338_v22 = vadd.f32 %v8337_v39, %v18215_v55  ;;  %9112 = vmatpush1.bf16.msra.mxu1 %v16619_v36  ;;  %v6657_v39 = vrot.slane %v6656_v41, 4 }
 0x6e7   :  { %v8339_v60 = vpop.f32.mrf.mxu1  ;;  %15005 = vmatpush3.bf16.msra.mxu0 %v16610_v51  ;;  %9113 = vmatprep.subr.bf16.mxu1 %v16624_v37 }
 0x6e8   :  { %v8340_v4 = vadd.f32 %v8339_v60, %v18217_v57  ;;  %v8379_v58 = vadd.f32 %v18266_v47, %v8338_v22  ;;  %15006 = vmatprep.subr.bf16.mxu0 %v16611_v59  ;;  %v16615_v57 = vld [vmem:[#allocation9 + $0x48] sm:$0xff]   ;;  %v6664_v60 = vrot.slane %v6663_v28, 4 }
 0x6e9   :  { %v8341_v16 = vpop.f32.mrf.mxu1  ;;  %v16616_v47 = vld [vmem:[#allocation9 + $0x8] sm:$0xff]  }
 0x6ea   :  { %v8381_v54 = vadd.f32 %v18268_v6, %v8340_v4  ;;  %v16618_v6 = vld [vmem:[#allocation9] sm:$0xff]   ;;  %9114 = vmatpush1.bf16.msra.mxu1 %v16622_v19  ;;  %v6658_v16 = vadd.f32 %v6657_v39, %v6656_v41  ;;  %v6702_v39 = vrot.slane %v6653_v1, %v17836_v23 }
 0x6eb   :  { %v8342_v49 = vpop.f32.mrf.mxu1  ;;  %15007 = vmatpush3.bf16.msra.mxu0 %v16612_v24  ;;  %9115 = vmatprep.subr.bf16.mxu1 %v16627_v33 }
 0x6ec   :  { %15008 = vmatprep.subr.bf16.mxu0 %v16613_v48  ;;  %v6665_v49 = vadd.f32 %v6664_v60, %v6663_v28  ;;  %v6659_v27 = vrot.slane %v6658_v16, 2  ;;  %v6655_v60 = vld [vmem:[#allocation13 + $0x14] ss:$8 sm:$0x3] }
 0x6ee   :  { %9116 = vmatpush1.bf16.msra.mxu1 %v16625_v13  ;;  %v6666_v20 = vrot.slane %v6665_v49, 2  ;;  %v6660_v38 = vadd.f32 %v6659_v27, %v6658_v16 }
 0x6ef   :  { %15009 = vmatpush3.bf16.msra.mxu0 %v16614_v40  ;;  %9117 = vmatprep.subr.bf16.mxu1 %v16630_v30 }
 0x6f0   :  { %15010 = vmatprep.subr.bf16.mxu0 %v16615_v57  ;;  %v6667_v53 = vadd.f32 %v6666_v20, %v6665_v49  ;;  %v6661_v10 = vrot.slane %v6660_v38, 1 }
 0x6f2   :  { %9118 = vmatpush1.bf16.msra.mxu1 %v16628_v42  ;;  %v6668_v15 = vrot.slane %v6667_v53, 1  ;;  %v6662_v34 = vadd.f32 %v6661_v10, %v6660_v38 }
 0x6f3   :  { %15011 = vmatpush3.bf16.msra.mxu0 %v16616_v47  ;;  %9119 = vmatprep.subr.bf16.mxu1 %v16633_v46 }
 0x6f4   :  { %15012 = vmatprep.subr.bf16.mxu0 %v16617_v25  ;;  %v6669_v3 = vadd.f32 %v6668_v15, %v6667_v53  ;;  %v6670_v56 = vmul.f32 0.25, %v6662_v34  ;;  %v6715_v53 = vrot.slane %v6655_v60, %v17836_v23 }
 0x6f6   :  { %9120 = vmatpush1.bf16.msra.mxu1 %v16631_v63  ;;  %v6671_v7 = vmul.f32 0.25, %v6669_v3  ;;  %v6672_v22 = vsub.f32 %v6646_v8, %v6670_v56  ;;  %v8591_v63 = vld [vmem:[#allocation13 + $0x15] ss:$8 sm:$0x3] }
 0x6f7   :  { %15013 = vmatpush3.bf16.msra.mxu0 %v16618_v6  ;;  %v8596_v49 = vrot.slane %v8591_v63, %v17836_v23 }
 0x6f8   :  { %v6674_v59 = vmul.f32 %v6672_v22, %v6672_v22 }
 0x6fa   :  { %v6676_v24 = vsel %vm197_vm0, %v6674_v59, 0.0 }
 0x725   :  { %v8419_v35 = vpop.f32.mrf.mxu1 }
 0x726   :  { %v18289_v2 = vadd.f32 %v8419_v35, %v8379_v58  ;;  %v6673_v58 = vsub.f32 %v6648_v18, %v6671_v7 }
 0x727   :  { %v8421_v31 = vpop.f32.mrf.mxu1 }
 0x728   :  { %v18291_v29 = vadd.f32 %v8421_v31, %v8381_v54  ;;  %v6675_v54 = vmul.f32 %v6673_v58, %v6673_v58  ;;  %v8461_v17 = vadd.f32 %v18276_v52, %v18289_v2  ;;  %v6706_v52 = vrot.slane %v6653_v1, %v17844_v26 }
 0x729   :  { %v8423_v14 = vpop.f32.mrf.mxu1 }
 0x72a   :  { %v6683_v31 = vsel %vm197_vm0, %v6675_v54, 0.0  ;;  %v6677_v14 = vrot.slane %v6676_v24, 4  ;;  %v8463_v46 = vadd.f32 %v18278_v62, %v18291_v29  ;;  %v8600_v62 = vrot.slane %v8591_v63, %v17844_v26 }
 0x72b   :  { %v8424_v55 = vpop.f32.mrf.mxu1  ;;  %v6684_v48 = vrot.slane %v6683_v31, 4 }
 0x72c   :  { %v6678_v40 = vadd.f32 %v6677_v14, %v6676_v24 }
 0x72d   :  { %v6685_v55 = vadd.f32 %v6684_v48, %v6683_v31 }
 0x72e   :  { %v6679_v57 = vrot.slane %v6678_v40, 2 }
 0x72f   :  { %v6686_v47 = vrot.slane %v6685_v55, 2 }
 0x730   :  { %v6680_v25 = vadd.f32 %v6679_v57, %v6678_v40  ;;  %v8816_v57 = vld [vmem:[%s18494_s1] sm:$0xff] }
 0x731   :  { %v6687_v6 = vadd.f32 %v6686_v47, %v6685_v55  ;;  %v8822_v47 = vcombine.high %v8816_v57, %v8816_v57 }
 0x732   :  { %v6681_v36 = vrot.slane %v6680_v25, 1 }
 0x733   :  { %v6688_v43 = vrot.slane %v6687_v6, 1 }
 0x734   :  { %v6682_v37 = vadd.f32 %v6681_v36, %v6680_v25  ;;  %v8824_v25 = vsel %vm197_vm0, %v8816_v57, 0.0 }
 0x735   :  { %v6689_v19 = vadd.f32 %v6688_v43, %v6687_v6  ;;  %v8831_v6 = vsel %vm197_vm0, %v8822_v47, 0.0  ;;  %v8825_v36 = vrot.slane %v8824_v25, 4  ;;  %v16660_v47 = vld [vmem:[#allocation6 + $0xc4] ss:$8 sps:$4 sm:$0xff]  }
 0x736   :  { %v6690_v33 = vmul.f32 0.25, %v6682_v37  ;;  %v8832_v43 = vrot.slane %v8831_v6, 4 }
 0x737   :  { %v6691_v9 = vmul.f32 0.25, %v6689_v19  ;;  %v8826_v37 = vadd.f32 %v8825_v36, %v8824_v25  ;;  %v16658_v25 = vld [vmem:[#allocation6 + $0xc0] ss:$8 sps:$4 sm:$0xff]   ;;  %v16661_v36 = vld [vmem:[#allocation7 + $0x50] ss:$8 sps:$4 sm:$0xff]  }
 0x738   :  { %v6692_v13 = vadd.f32 1e-05, %v6690_v33  ;;  %v8833_v19 = vadd.f32 %v8832_v43, %v8831_v6  ;;  %v16663_v6 = vld [vmem:[#allocation7 + $0x54] ss:$8 sps:$4 sm:$0xff]  }
 0x739   :  { %v6693_v30 = vadd.f32 1e-05, %v6691_v9  ;;  %v8827_v33 = vrot.slane %v8826_v37, 2  ;;  %v16666_v43 = vld [vmem:[#allocation6 + $0xb4] ss:$8 sps:$4 sm:$0xff]  }
 0x73a   :  { %17444 = vrsqrt.f32 %v6692_v13  ;;  %v8834_v9 = vrot.slane %v8833_v19, 2 }
 0x73b   :  { %17446 = vrsqrt.f32 %v6693_v30  ;;  %v8828_v13 = vadd.f32 %v8827_v33, %v8826_v37  ;;  %v16664_v37 = vld [vmem:[#allocation6 + $0xb0] ss:$8 sps:$4 sm:$0xff]   ;;  %v16667_v33 = vld [vmem:[#allocation7 + $0x40] ss:$8 sps:$4 sm:$0xff]  }
 0x73c   :  { %v8835_v30 = vadd.f32 %v8834_v9, %v8833_v19  ;;  %v16669_v19 = vld [vmem:[#allocation7 + $0x44] ss:$8 sps:$4 sm:$0xff]  }
 0x747   :  { %v17445_v42 = vpop.eup %17444 }
 0x748   :  { %v17447_v18 = vpop.eup %17446  ;;  %v6696_v28 = vmul.f32 %v17445_v42, %v6672_v22  ;;  %v8836_v42 = vrot.slane %v8835_v30, 1 }
 0x749   :  { %v6697_v27 = vmul.f32 %v17447_v18, %v6673_v58 }
 0x74a   :  { %v6709_v29 = vmul.f32 %v6702_v39, %v6696_v28  ;;  %v16636_v39 = vld [vmem:[#allocation6 + $0x24] ss:$8 sps:$4 sm:$0xff]  }
 0x74b   :  { %v6710_v3 = vmul.f32 %v6706_v52, %v6697_v27  ;;  %9121 = vmatprep.subr.bf16.mxu1 %v16636_v39 }
 0x765   :  { %v8501_v11 = vpop.f32.mrf.mxu1 }
 0x766   :  { %v8502_v8 = vadd.f32 %v8501_v11, %v8461_v17  ;;  %v8829_v17 = vrot.slane %v8828_v13, 1 }
 0x767   :  { %v8503_v51 = vpop.f32.mrf.mxu1 }
 0x768   :  { %v8504_v41 = vadd.f32 %v8503_v51, %v8463_v46  ;;  %v8543_v16 = vadd.f32 %v18281_v32, %v8502_v8  ;;  %v6719_v32 = vrot.slane %v6655_v60, %v17844_v26  ;;  %v6722_v51 = vadd.f32 %v6715_v53, %v6709_v29 }
 0x769   :  { %v8505_v4 = vpop.f32.mrf.mxu1  ;;  %v8830_v1 = vadd.f32 %v8829_v17, %v8828_v13  ;;  %v8837_v46 = vadd.f32 %v8836_v42, %v8835_v30  ;;  %v16672_v13 = vld [vmem:[#allocation6 + $0xa4] ss:$8 sps:$4 sm:$0xff]   ;;  %v8818_v30 = vld [vmem:[#allocation13 + $0x17] ss:$8 sm:$0x3] }
 0x76a   :  { %v8545_v20 = vadd.f32 %v18283_v50, %v8504_v41  ;;  %v6723_v58 = vadd.f32 %v6719_v32, %v6710_v3  ;;  %v16670_v42 = vld [vmem:[#allocation6 + $0xa0] ss:$8 sps:$4 sm:$0xff]  }
 0x76b   :  { %v8506_v35 = vpop.f32.mrf.mxu1  ;;  %v8838_v8 = vmul.f32 0.25, %v8830_v1  ;;  %v8839_v63 = vmul.f32 0.25, %v8837_v46  ;;  %v8878_v1 = vrot.slane %v8818_v30, %v17836_v23  ;;  %v8882_v46 = vrot.slane %v8818_v30, %v17844_v26  ;;  %v16694_v30 = vld [vmem:[#allocation4 + $0x474] ss:$8 sps:$4 sm:$0xff]  }
 0x76d   :  { %v8842_v18 = vcombine.low %v8838_v8, %v8839_v63  ;;  %v16675_v8 = vld [vmem:[#allocation7 + $0x34] ss:$8 sps:$4 sm:$0xff]   ;;  %v8883_v39 = vcombine.low %v8878_v1, %v8882_v46  ;;  %v16695_v1 = vld [vmem:[#allocation6 + $0x170] ss:$8 sps:$4 sm:$0xff]   ;;  %v16700_v46 = vld [vmem:[#allocation4 + $0x464] ss:$8 sps:$4 sm:$0xff]  }
 0x76e   :  { %v8820_v63 = vld [vmem:[#allocation13 + $0x20] ss:$8 sm:$0x3] }
 0x76f   :  { %v18318_v41 = vsub.f32 %v8816_v57, %v8842_v18  ;;  %v16655_v57 = vld [vmem:[#allocation7 + $0x60] ss:$8 sps:$4 sm:$0xff]  }
 0x771   :  { %v8845_v28 = vmul.f32 %v18318_v41, %v18318_v41 }
 0x773   :  { %v8847_v60 = vcombine.high %v8845_v28, %v8845_v28 }
 0x775   :  { %v8856_v27 = vsel %vm197_vm0, %v8847_v60, 0.0  ;;  %v8890_v60 = vrot.slane %v8820_v63, %v17836_v23 }
 0x7a5   :  { %v8583_v2 = vpop.f32.mrf.mxu1 }
 0x7a6   :  { %v8584_v38 = vadd.f32 %v8583_v2, %v8543_v16  ;;  %v16634_v16 = vld [vmem:[#allocation6 + $0x20] ss:$8 sps:$4 sm:$0xff]   ;;  %v8857_v2 = vrot.slane %v8856_v27, 4 }
 0x7a7   :  { %v8585_v10 = vpop.f32.mrf.mxu1  ;;  %9122 = vmatpush1.bf16.msra.mxu1 %v16634_v16  ;;  %v8894_v16 = vrot.slane %v8820_v63, %v17844_v26  ;;  %v16698_v63 = vld [vmem:[#allocation4 + $0x460] ss:$8 sps:$4 sm:$0xff]  }
 0x7a8   :  { %v8603_v15 = vadd.f32 %v8596_v49, %v8584_v38  ;;  %v8586_v34 = vadd.f32 %v8585_v10, %v8545_v20  ;;  %v8849_v49 = vsel %vm197_vm0, %v8845_v28, 0.0  ;;  %v16639_v20 = vld [vmem:[#allocation6 + $0x14] ss:$8 sps:$4 sm:$0xff]   ;;  %v16637_v38 = vld [vmem:[#allocation6 + $0x10] ss:$8 sps:$4 sm:$0xff]   ;;  %v8858_v29 = vadd.f32 %v8857_v2, %v8856_v27 }
 0x7a9   :  { %v8587_v56 = vpop.f32.mrf.mxu1  ;;  %v8850_v52 = vrot.slane %v8849_v49, 4  ;;  %9123 = vmatprep.subr.bf16.mxu1 %v16639_v20  ;;  %v16673_v28 = vld [vmem:[#allocation7 + $0x30] ss:$8 sps:$4 sm:$0xff]   ;;  %v8895_v2 = vcombine.low %v8890_v60, %v8894_v16  ;;  %v16681_v20 = vld [vmem:[#allocation7 + $0x24] ss:$8 sps:$4 sm:$0xff]  }
 0x7aa   :  { %vm8605_vm9 = vcmp.ge.f32.partialorder %v8603_v15, 0.0  ;;  %v8607_v11 = vmul.f32 0.2, %v8603_v15  ;;  %v8604_v7 = vadd.f32 %v8600_v62, %v8586_v34  ;;  %v8859_v10 = vrot.slane %v8858_v29, 2  ;;  %v16640_v34 = vld [vmem:[#allocation6] ss:$8 sps:$4 sm:$0xff]  }
 0x7ab   :  { %v8588_v22 = vpop.f32.mrf.mxu1  ;;  %v8851_v62 = vadd.f32 %v8850_v52, %v8849_v49  ;;  %9124 = vmatpush1.bf16.msra.mxu1 %v16637_v38  ;;  %v16678_v49 = vld [vmem:[#allocation6 + $0x94] ss:$8 sps:$4 sm:$0xff]   ;;  %v16676_v52 = vld [vmem:[#allocation6 + $0x90] ss:$8 sps:$4 sm:$0xff]  }
 0x7ac   :  { %v8609_v4 = vsel %vm8605_vm9, %v8603_v15, %v8607_v11  ;;  %vm8606_vm10 = vcmp.ge.f32.partialorder %v8604_v7, 0.0  ;;  %v8608_v50 = vmul.f32 0.2, %v8604_v7  ;;  %v16642_v15 = vld [vmem:[#allocation6 + $0x4] ss:$8 sps:$4 sm:$0xff]   ;;  %v8860_v32 = vadd.f32 %v8859_v10, %v8858_v29 }
 0x7ad   :  { %v8611_v35 = vadd.f32 %v8609_v4, %v6722_v51  ;;  %v8852_v53 = vrot.slane %v8851_v62, 2  ;;  %9125 = vmatprep.subr.bf16.mxu1 %v16642_v15  ;;  %v16643_v51 = vld [vmem:[#allocation6 + $0xf0] ss:$8 sps:$4 sm:$0xff]   ;;  %v16684_v29 = vld [vmem:[#allocation6 + $0x84] ss:$8 sps:$4 sm:$0xff]  }
 0x7ae   :  { %v8610_v59 = vsel %vm8606_vm10, %v8604_v7, %v8608_v50  ;;  %v8861_v11 = vrot.slane %v8860_v32, 1  ;;  %v16645_v7 = vld [vmem:[#allocation6 + $0xf4] ss:$8 sps:$4 sm:$0xff]   ;;  %v16682_v10 = vld [vmem:[#allocation6 + $0x80] ss:$8 sps:$4 sm:$0xff]  }
 0x7af   :  { %v8612_v54 = vadd.f32 %v8610_v59, %v6723_v58  ;;  %vm8613_vm11 = vcmp.ge.f32.partialorder %v8611_v35, 0.0  ;;  %v8615_v24 = vmul.f32 0.2, %v8611_v35  ;;  %v8853_v3 = vadd.f32 %v8852_v53, %v8851_v62  ;;  %9126 = vmatpush1.bf16.msra.mxu1 %v16640_v34  ;;  %v16646_v59 = vld [vmem:[#allocation6 + $0xe0] ss:$8 sps:$4 sm:$0xff]  }
 0x7b0   :  { %v8862_v4 = vadd.f32 %v8861_v11, %v8860_v32  ;;  %9127 = vmatprep.subr.bf16.mxu1 %v16645_v7  ;;  %v16679_v62 = vld [vmem:[#allocation7 + $0x20] ss:$8 sps:$4 sm:$0xff]   ;;  %v16687_v15 = vld [vmem:[#allocation7 + $0x14] ss:$8 sps:$4 sm:$0xff]   ;;  %v17679_v7 = vmov 0  }
 0x7b1   :  { %vm8614_vm12 = vcmp.ge.f32.partialorder %v8612_v54, 0.0  ;;  %v8616_v31 = vmul.f32 0.2, %v8612_v54  ;;  %v8617_v14 = vsel %vm8613_vm11, %v8611_v35, %v8615_v24  ;;  %v8854_v56 = vrot.slane %v8853_v3, 1  ;;  %v16648_v35 = vld [vmem:[#allocation6 + $0xe4] ss:$8 sps:$4 sm:$0xff]  }
 0x7b2   :  { %v8651_v55 = vpack.c.bf16 %v8617_v14, %v8617_v14  ;;  %v8864_v58 = vmul.f32 0.25, %v8862_v4  ;;  %v16649_v14 = vld [vmem:[#allocation7 + $0x70] ss:$8 sps:$4 sm:$0xff]   ;;  %v16689_v11 = vld [vmem:[#allocation7] ss:$8 sps:$4 sm:$0xff]  }
 0x7b3   :  { %v8618_v48 = vsel %vm8614_vm12, %v8612_v54, %v8616_v31  ;;  %v8855_v22 = vadd.f32 %v8854_v56, %v8853_v3  ;;  %9128 = vmatpush2.bf16.msra.mxu1 %v16643_v51  ;;  %v16651_v31 = vld [vmem:[#allocation7 + $0x74] ss:$8 sps:$4 sm:$0xff]   ;;  %v16685_v3 = vld [vmem:[#allocation7 + $0x10] ss:$8 sps:$4 sm:$0xff]   ;;  %v16691_v56 = vld [vmem:[#allocation7 + $0x4] ss:$8 sps:$4 sm:$0xff]  }
 0x7b4   :  { %v8652_v40 = vpack.c.bf16 %v8618_v48, %v8618_v48  ;;  %v8866_v24 = vadd.f32 1e-05, %v8864_v58  ;;  %9129 = vmatprep.subr.bf16.mxu1 %v16648_v35  ;;  %9232 = vmatprep.subr.bf16.mxu0 %v16651_v31  ;;  %v16654_v48 = vld [vmem:[#allocation6 + $0xd4] ss:$8 sps:$4 sm:$0xff]   ;;  %v16704_v60 = vld [vmem:[#allocation4 + $0x450] ss:$8 sps:$4 sm:$0xff]  }
 0x7b5   :  { %v8863_v50 = vmul.f32 0.25, %v8855_v22  ;;  %v8654_v51 = vld [vmem:[#allocation13 + $0x16] ss:$8 sm:$0x3] }
 0x7b6   :  { %8789 = vmatprep.mubr.bf16.mxu0 %v8652_v40  ;;  %v16652_v40 = vld [vmem:[#allocation6 + $0xd0] ss:$8 sps:$4 sm:$0xff]   ;;  %v8659_v4 = vrot.slane %v8654_v51, %v17836_v23 }
 0x7b7   :  { %8790 = vmatmul.mubr.bf16.vlgmr.msra.gmra.mxu0 %v8651_v55  ;;  %v8865_v54 = vadd.f32 1e-05, %v8863_v50  ;;  %9130 = vmatpush2.bf16.msra.mxu1 %v16646_v59  ;;  %v16657_v55 = vld [vmem:[#allocation7 + $0x64] ss:$8 sps:$4 sm:$0xff]   ;;  %v16707_v16 = vld [vmem:[#allocation6 + $0x150] ss:$8 sps:$4 sm:$0xff]  }
 0x7b8   :  { %9233 = vmatpush1.bf16.msra.mxu0 %v16649_v14  ;;  %9131 = vmatprep.subr.bf16.mxu1 %v16654_v48  ;;  %v16731_v51 = vld [vmem:[#allocation6 + $0x110] ss:$8 sps:$4 sm:$0xff]  }
 0x7b9   :  { %17448 = vrsqrt.f32 %v8865_v54  ;;  %9234 = vmatprep.subr.bf16.mxu0 %v16657_v55  ;;  %9264 = vmatprep.mubr.bf16.mxu0 %v17679_v7  ;;  %v8798_v55 = vand.u32 127, %v551_v12 }
 0x7ba   :  { %17450 = vrsqrt.f32 %v8866_v24 }
 0x7bb   :  { %9132 = vmatpush2.bf16.msra.mxu1 %v16652_v40  ;;  %vm8799_vm13 = vcmp.ge.s32.totalorder %v8798_v55, 16  ;;  %vm8800_vm14 = vcmp.lt.s32.totalorder %v8798_v55, 32  ;;  %v16754_v55 = vld [vmem:[#allocation4 + $0x4d4] ss:$8 sps:$4 sm:$0xff]  }
 0x7bc   :  { %9235 = vmatpush1.bf16.msra.mxu0 %v16655_v57  ;;  %9133 = vmatprep.subr.bf16.mxu1 %v16660_v47  ;;  %vm8801_vm15 = vmand %vm8799_vm13, %vm8800_vm14 }
 0x7bd   :  { %9236 = vmatprep.subr.bf16.mxu0 %v16663_v6 }
 0x7bf   :  { %9134 = vmatpush2.bf16.msra.mxu1 %v16658_v25 }
 0x7c0   :  { %9237 = vmatpush1.bf16.msra.mxu0 %v16661_v36  ;;  %9135 = vmatprep.subr.bf16.mxu1 %v16666_v43  ;;  %v8813_v36 = vld [vmem:[%s18495_s2] sm:$0xf] }
 0x7c1   :  { %9238 = vmatprep.subr.bf16.mxu0 %v16669_v19 }
 0x7c3   :  { %9136 = vmatpush2.bf16.msra.mxu1 %v16664_v37 }
 0x7c4   :  { %9239 = vmatpush1.bf16.msra.mxu0 %v16667_v33  ;;  %9137 = vmatprep.subr.bf16.mxu1 %v16672_v13 }
 0x7c5   :  { %9240 = vmatprep.subr.bf16.mxu0 %v16675_v8  ;;  %v16703_v8 = vld [vmem:[#allocation6 + $0x164] ss:$8 sps:$4 sm:$0xff]  }
 0x7c6   :  { %v17449_v9 = vpop.eup %17448 }
 0x7c7   :  { %v17451_v17 = vpop.eup %17450  ;;  %9138 = vmatpush2.bf16.msra.mxu1 %v16670_v42  ;;  %v16692_v42 = vld [vmem:[#allocation4 + $0x470] ss:$8 sps:$4 sm:$0xff]  }
 0x7c8   :  { %v8871_v18 = vcombine.low %v17449_v9, %v17451_v17  ;;  %9241 = vmatpush1.bf16.msra.mxu0 %v16673_v28  ;;  %9139 = vmatprep.subr.bf16.mxu1 %v16678_v49  ;;  %v16697_v17 = vld [vmem:[#allocation6 + $0x174] ss:$8 sps:$4 sm:$0xff]   ;;  %v16712_v49 = vld [vmem:[#allocation4 + $0x444] ss:$8 sps:$4 sm:$0xff]  }
 0x7c9   :  { %9242 = vmatprep.subr.bf16.mxu0 %v16681_v20  ;;  %v16706_v28 = vld [vmem:[#allocation4 + $0x454] ss:$8 sps:$4 sm:$0xff]  }
 0x7ca   :  { %v8873_v27 = vmul.f32 %v8871_v18, %v18318_v41  ;;  %v16701_v18 = vld [vmem:[#allocation6 + $0x160] ss:$8 sps:$4 sm:$0xff]   ;;  %v16718_v20 = vld [vmem:[#allocation4 + $0x434] ss:$8 sps:$4 sm:$0xff]  }
 0x7cb   :  { %9140 = vmatpush2.bf16.msra.mxu1 %v16676_v52  ;;  %v16710_v52 = vld [vmem:[#allocation4 + $0x440] ss:$8 sps:$4 sm:$0xff]  }
 0x7cc   :  { %v8885_v38 = vmul.f32 %v8883_v39, %v8873_v27  ;;  %9243 = vmatpush1.bf16.msra.mxu0 %v16679_v62  ;;  %9141 = vmatprep.subr.bf16.mxu1 %v16684_v29  ;;  %v16709_v39 = vld [vmem:[#allocation6 + $0x154] ss:$8 sps:$4 sm:$0xff]   ;;  %v16715_v27 = vld [vmem:[#allocation6 + $0x144] ss:$8 sps:$4 sm:$0xff]   ;;  %v16716_v62 = vld [vmem:[#allocation4 + $0x430] ss:$8 sps:$4 sm:$0xff]  }
 0x7cd   :  { %9244 = vmatprep.subr.bf16.mxu0 %v16687_v15  ;;  %v16719_v29 = vld [vmem:[#allocation6 + $0x130] ss:$8 sps:$4 sm:$0xff]   ;;  %v16722_v15 = vld [vmem:[#allocation4 + $0x420] ss:$8 sps:$4 sm:$0xff]  }
 0x7ce   :  { %v8897_v53 = vadd.f32 %v8895_v2, %v8885_v38  ;;  %v16713_v2 = vld [vmem:[#allocation6 + $0x140] ss:$8 sps:$4 sm:$0xff]   ;;  %v16721_v38 = vld [vmem:[#allocation6 + $0x134] ss:$8 sps:$4 sm:$0xff]  }
 0x7cf   :  { %9142 = vmatpush2.bf16.msra.mxu1 %v16682_v10  ;;  %v16727_v10 = vld [vmem:[#allocation6 + $0x124] ss:$8 sps:$4 sm:$0xff]  }
 0x7d0   :  { %v8899_v34 = vcombine.high %v8897_v53, %v8897_v53  ;;  %v18331_v32 = vpack.c.bf16 %v8897_v53, %v8897_v53  ;;  %9245 = vmatpush1.bf16.msra.mxu0 %v16685_v3  ;;  %9897 = vmatprep.subr.bf16.mxu1 %v16697_v17  ;;  %v16724_v53 = vld [vmem:[#allocation4 + $0x424] ss:$8 sps:$4 sm:$0xff]   ;;  %v16730_v3 = vld [vmem:[#allocation4 + $0x414] ss:$8 sps:$4 sm:$0xff]   ;;  %v16767_v17 = vld [vmem:[#allocation6 + $0x1b0] ss:$8 sps:$4 sm:$0xff]  }
 0x7d1   :  { %9246 = vmatprep.subr.bf16.mxu0 %v16691_v56  ;;  %v16733_v56 = vld [vmem:[#allocation6 + $0x114] ss:$8 sps:$4 sm:$0xff]  }
 0x7d2   :  { %v18329_v41 = vpack.c.bf16 %v8899_v34, %v8899_v34  ;;  %v16725_v34 = vld [vmem:[#allocation6 + $0x120] ss:$8 sps:$4 sm:$0xff]  }
 0x7d4   :  { %9143 = vmatprep.mubr.bf16.mxu1 %v18329_v41  ;;  %9247 = vmatpush1.bf16.msra.mxu0 %v16689_v11  ;;  %v16728_v11 = vld [vmem:[#allocation4 + $0x410] ss:$8 sps:$4 sm:$0xff]  }
 0x7d5   :  { %9144 = vmatmul.mubr.bf16.vlgmr.msra.gmra.mxu1 %v18331_v32  ;;  %9574 = vmatprep.subr.bf16.mxu0 %v16694_v30  ;;  %v16764_v30 = vld [vmem:[#allocation4 + $0x4b0] ss:$8 sps:$4 sm:$0xff]  }
 0x7d6   :  { %9929 = vmatprep.mubr.bf16.mxu1 %v18329_v41  ;;  %9898 = vmatpush1.bf16.msra.mxu1 %v16695_v1  ;;  %v16775_v1 = vld [vmem:[#allocation6 + $0x1a4] ss:$8 sps:$4 sm:$0xff]  }
 0x7d7   :  { %9899 = vmatprep.subr.bf16.mxu1 %v16703_v8  ;;  %v16773_v8 = vld [vmem:[#allocation6 + $0x1a0] ss:$8 sps:$4 sm:$0xff]  }
 0x7da   :  { %9900 = vmatpush1.bf16.msra.mxu1 %v16701_v18  ;;  %v16781_v18 = vld [vmem:[#allocation6 + $0x194] ss:$8 sps:$4 sm:$0xff]  }
 0x7db   :  { %9901 = vmatprep.subr.bf16.mxu1 %v16709_v39  ;;  %v16779_v39 = vld [vmem:[#allocation6 + $0x190] ss:$8 sps:$4 sm:$0xff]  }
 0x7de   :  { %9902 = vmatpush1.bf16.msra.mxu1 %v16707_v16  ;;  %v16787_v16 = vld [vmem:[#allocation6 + $0x184] ss:$8 sps:$4 sm:$0xff]  }
 0x7df   :  { %9903 = vmatprep.subr.bf16.mxu1 %v16715_v27  ;;  %v16785_v27 = vld [vmem:[#allocation6 + $0x180] ss:$8 sps:$4 sm:$0xff]  }
 0x7e2   :  { %9904 = vmatpush1.bf16.msra.mxu1 %v16713_v2  ;;  %v16793_v2 = vld [vmem:[#allocation6 + $0x274] ss:$8 sps:$4 sm:$0xff]  }
 0x7e3   :  { %9905 = vmatprep.subr.bf16.mxu1 %v16721_v38  ;;  %v16797_v38 = vld [vmem:[#allocation6 + $0x260] ss:$8 sps:$4 sm:$0xff]  }
 0x7e6   :  { %9906 = vmatpush1.bf16.msra.mxu1 %v16719_v29  ;;  %v16803_v29 = vld [vmem:[#allocation6 + $0x250] ss:$8 sps:$4 sm:$0xff]  }
 0x7e7   :  { %9907 = vmatprep.subr.bf16.mxu1 %v16727_v10  ;;  %v16809_v10 = vld [vmem:[#allocation6 + $0x240] ss:$8 sps:$4 sm:$0xff]  }
 0x7ea   :  { %9908 = vmatpush1.bf16.msra.mxu1 %v16725_v34  ;;  %v16815_v34 = vld [vmem:[#allocation6 + $0x230] ss:$8 sps:$4 sm:$0xff]  }
 0x7eb   :  { %9909 = vmatprep.subr.bf16.mxu1 %v16733_v56  ;;  %v16821_v56 = vld [vmem:[#allocation6 + $0x220] ss:$8 sps:$4 sm:$0xff]  }
 0x7ee   :  { %9910 = vmatpush1.bf16.msra.mxu1 %v16731_v51  ;;  %v16827_v51 = vld [vmem:[#allocation6 + $0x210] ss:$8 sps:$4 sm:$0xff]  }
 0x877   :  { %v15014_v22 = vpop.f32.mrf.mxu0 }
 0x879   :  { %v15015_v50 = vpop.f32.mrf.mxu0 }
 0x87a   :  { %v15016_v58 = vadd.f32 %v15015_v50, %v15014_v22  ;;  %v16736_v22 = vld [vmem:[#allocation4 + $0x404] ss:$8 sps:$4 sm:$0xff]   ;;  %v16734_v50 = vld [vmem:[#allocation4 + $0x400] ss:$8 sps:$4 sm:$0xff]  }
 0x87b   :  { %v15017_v35 = vpop.f32.mrf.mxu0 }
 0x87c   :  { %v8792_v59 = vadd.f32 %v15016_v58, %v8659_v4  ;;  %v16739_v4 = vld [vmem:[#allocation6 + $0x104] ss:$8 sps:$4 sm:$0xff]   ;;  %v16737_v58 = vld [vmem:[#allocation6 + $0x100] ss:$8 sps:$4 sm:$0xff]   ;;  %v16742_v35 = vld [vmem:[#allocation4 + $0x4f4] ss:$8 sps:$4 sm:$0xff]  }
 0x87d   :  { %v15018_v54 = vpop.f32.mrf.mxu0  ;;  %9911 = vmatprep.subr.bf16.mxu1 %v16739_v4  ;;  %v16833_v4 = vld [vmem:[#allocation6 + $0x200] ss:$8 sps:$4 sm:$0xff]  }
 0x87e   :  { %v8803_v24 = vand.u32 2147483647, %v8792_v59  ;;  %v8802_v47 = vmax.f32 %v8792_v59, 0.0  ;;  %9912 = vmatpush1.bf16.msra.mxu1 %v16737_v58  ;;  %v16740_v54 = vld [vmem:[#allocation4 + $0x4f0] ss:$8 sps:$4 sm:$0xff]  }
 0x87f   :  { %v16838_v58 = vld [vmem:[#allocation6 + $0x2f4] ss:$8 sps:$4 sm:$0xff]  }
 0x880   :  { %v8804_v31 = vsub.f32 0.0, %v8803_v24  ;;  %v16743_v24 = vld [vmem:[#allocation6 + $0x1f0] ss:$8 sps:$4 sm:$0xff]  }
 0x882   :  { %v8805_v14 = vmul.f32 1.442695, %v8804_v31  ;;  %v16748_v31 = vld [vmem:[#allocation4 + $0x4e4] ss:$8 sps:$4 sm:$0xff]  }
 0x884   :  { %17452 = vpow2.f32 %v8805_v14  ;;  %v16751_v14 = vld [vmem:[#allocation6 + $0x1e4] ss:$8 sps:$4 sm:$0xff]  }
 0x891   :  { %v17453_v48 = vpop.eup %17452 }
 0x892   :  { %v8807_v40 = vadd.f32 1.0, %v17453_v48  ;;  %v16746_v48 = vld [vmem:[#allocation4 + $0x4e0] ss:$8 sps:$4 sm:$0xff]  }
 0x894   :  { %17454 = vlog2.f32 %v8807_v40  ;;  %v16749_v40 = vld [vmem:[#allocation6 + $0x1e0] ss:$8 sps:$4 sm:$0xff]  }
 0x895   :  { %v18348_v12 = vpop.f32.mrf.mxu1 }
 0x897   :  { %v18350_v33 = vpop.f32.mrf.mxu1 }
 0x899   :  { %v9149_v9 = vpop.f32.mrf.mxu1 }
 0x89a   :  { %v16766_v9 = vld [vmem:[#allocation4 + $0x4b4] ss:$8 sps:$4 sm:$0xff]  }
 0x89b   :  { %v9150_v13 = vpop.f32.mrf.mxu1 }
 0x89c   :  { %v16769_v13 = vld [vmem:[#allocation6 + $0x1b4] ss:$8 sps:$4 sm:$0xff]  }
 0x8a1   :  { %v17455_v57 = vpop.eup %17454 }
 0x8a2   :  { %v8809_v25 = vmul.f32 0.6931472, %v17455_v57  ;;  %v16757_v57 = vld [vmem:[#allocation6 + $0x1d4] ss:$8 sps:$4 sm:$0xff]  }
 0x8a4   :  { %v8810_v6 = vadd.f32 %v8809_v25, %v8802_v47  ;;  %v16752_v47 = vld [vmem:[#allocation4 + $0x4d0] ss:$8 sps:$4 sm:$0xff]  }
 0x8a5   :  { %v16755_v25 = vld [vmem:[#allocation6 + $0x1d0] ss:$8 sps:$4 sm:$0xff]  }
 0x8a6   :  { %v8811_v43 = vsel %vm8801_vm15, %v8810_v6, %v8792_v59  ;;  %v16745_v59 = vld [vmem:[#allocation6 + $0x1f4] ss:$8 sps:$4 sm:$0xff]   ;;  %v16760_v6 = vld [vmem:[#allocation4 + $0x4c4] ss:$8 sps:$4 sm:$0xff]  }
 0x8a7   :  { %8812 = vst [vmem:[%s18505_s12] sm:$0xf] %v8811_v43  ;;  %v8814_v37 = vmul.f32 %v8813_v36, %v8811_v43  ;;  %9913 = vmatprep.subr.bf16.mxu1 %v16745_v59  ;;  %v16763_v36 = vld [vmem:[#allocation6 + $0x1c4] ss:$8 sps:$4 sm:$0xff]   ;;  %v16758_v43 = vld [vmem:[#allocation4 + $0x4c0] ss:$8 sps:$4 sm:$0xff]  }
 0x8a8   :  { %9914 = vmatpush2.bf16.msra.mxu1 %v16743_v24  ;;  %v16842_v59 = vld [vmem:[#allocation6 + $0x2e0] ss:$8 sps:$4 sm:$0xff]   ;;  %v16848_v24 = vld [vmem:[#allocation6 + $0x2d0] ss:$8 sps:$4 sm:$0xff]  }
 0x8a9   :  { %v18345_v19 = vpack.c.bf16 %v8814_v37, %v8814_v37  ;;  %9915 = vmatprep.subr.bf16.mxu1 %v16751_v14  ;;  %v16761_v37 = vld [vmem:[#allocation6 + $0x1c0] ss:$8 sps:$4 sm:$0xff]  }
 0x8aa   :  { %v16854_v14 = vld [vmem:[#allocation6 + $0x2c0] ss:$8 sps:$4 sm:$0xff]  }
 0x8ab   :  { %9265 = vmatmul.mubr.bf16.vlgmr.msra.gmra.mxu0 %v18345_v19 }
 0x8ac   :  { %9575 = vmatpush1.bf16.msra.mxu0 %v16692_v42  ;;  %9916 = vmatpush2.bf16.msra.mxu1 %v16749_v40  ;;  %v16772_v42 = vld [vmem:[#allocation4 + $0x4a4] ss:$8 sps:$4 sm:$0xff]   ;;  %v16860_v40 = vld [vmem:[#allocation6 + $0x2b0] ss:$8 sps:$4 sm:$0xff]  }
 0x8ad   :  { %9576 = vmatprep.subr.bf16.mxu0 %v16700_v46  ;;  %9917 = vmatprep.subr.bf16.mxu1 %v16757_v57  ;;  %v16770_v46 = vld [vmem:[#allocation4 + $0x4a0] ss:$8 sps:$4 sm:$0xff]  }
 0x8ae   :  { %v16866_v57 = vld [vmem:[#allocation6 + $0x2a0] ss:$8 sps:$4 sm:$0xff]  }
 0x8b0   :  { %9577 = vmatpush1.bf16.msra.mxu0 %v16698_v63  ;;  %9918 = vmatpush2.bf16.msra.mxu1 %v16755_v25  ;;  %v16778_v63 = vld [vmem:[#allocation4 + $0x494] ss:$8 sps:$4 sm:$0xff]   ;;  %v16872_v25 = vld [vmem:[#allocation6 + $0x290] ss:$8 sps:$4 sm:$0xff]  }
 0x8b1   :  { %9578 = vmatprep.subr.bf16.mxu0 %v16706_v28  ;;  %9919 = vmatprep.subr.bf16.mxu1 %v16763_v36  ;;  %v16776_v28 = vld [vmem:[#allocation4 + $0x490] ss:$8 sps:$4 sm:$0xff]   ;;  %v9274_v36 = vld [vmem:[#allocation13 + $0x21] ss:$8 sm:$0x3] }
 0x8b4   :  { %9579 = vmatpush1.bf16.msra.mxu0 %v16704_v60  ;;  %9920 = vmatpush2.bf16.msra.mxu1 %v16761_v37  ;;  %v16784_v60 = vld [vmem:[#allocation4 + $0x484] ss:$8 sps:$4 sm:$0xff]  }
 0x8b5   :  { %9580 = vmatprep.subr.bf16.mxu0 %v16712_v49  ;;  %9921 = vmatprep.subr.bf16.mxu1 %v16769_v13  ;;  %v16782_v49 = vld [vmem:[#allocation4 + $0x480] ss:$8 sps:$4 sm:$0xff]   ;;  %v16880_v37 = vld [vmem:[#allocation6 + $0x284] ss:$8 sps:$4 sm:$0xff]  }
 0x8b8   :  { %9581 = vmatpush1.bf16.msra.mxu0 %v16710_v52  ;;  %9922 = vmatpush2.bf16.msra.mxu1 %v16767_v17  ;;  %v16790_v52 = vld [vmem:[#allocation7 + $0xf4] ss:$8 sps:$4 sm:$0xff]   ;;  %v9283_v17 = vrot.slane %v9274_v36, %v17844_v26 }
 0x8b9   :  { %9582 = vmatprep.subr.bf16.mxu0 %v16718_v20  ;;  %9923 = vmatprep.subr.bf16.mxu1 %v16775_v1  ;;  %v16791_v20 = vld [vmem:[#allocation6 + $0x270] ss:$8 sps:$4 sm:$0xff]  }
 0x8bc   :  { %9583 = vmatpush1.bf16.msra.mxu0 %v16716_v62  ;;  %9924 = vmatpush2.bf16.msra.mxu1 %v16773_v8  ;;  %v16799_v62 = vld [vmem:[#allocation6 + $0x264] ss:$8 sps:$4 sm:$0xff]  }
 0x8bd   :  { %9584 = vmatprep.subr.bf16.mxu0 %v16724_v53  ;;  %9925 = vmatprep.subr.bf16.mxu1 %v16781_v18  ;;  %v16805_v53 = vld [vmem:[#allocation6 + $0x254] ss:$8 sps:$4 sm:$0xff]  }
 0x8c0   :  { %9585 = vmatpush1.bf16.msra.mxu0 %v16722_v15  ;;  %9926 = vmatpush2.bf16.msra.mxu1 %v16779_v39  ;;  %v16811_v15 = vld [vmem:[#allocation6 + $0x244] ss:$8 sps:$4 sm:$0xff]  }
 0x8c1   :  { %9586 = vmatprep.subr.bf16.mxu0 %v16730_v3  ;;  %9927 = vmatprep.subr.bf16.mxu1 %v16787_v16  ;;  %v16817_v3 = vld [vmem:[#allocation6 + $0x234] ss:$8 sps:$4 sm:$0xff]  }
 0x8c4   :  { %9587 = vmatpush1.bf16.msra.mxu0 %v16728_v11  ;;  %9928 = vmatpush2.bf16.msra.mxu1 %v16785_v27  ;;  %v16823_v11 = vld [vmem:[#allocation6 + $0x224] ss:$8 sps:$4 sm:$0xff]  }
 0x8c5   :  { %9588 = vmatprep.subr.bf16.mxu0 %v16736_v22  ;;  %10300 = vmatprep.subr.bf16.mxu1 %v16793_v2  ;;  %v16829_v22 = vld [vmem:[#allocation6 + $0x214] ss:$8 sps:$4 sm:$0xff]  }
 0x8c7   :  { %9930 = vmatmul.mubr.bf16.vlgmr.msra.gmra.mxu1 %v18331_v32 }
 0x8c8   :  { %9589 = vmatpush1.bf16.msra.mxu0 %v16734_v50  ;;  %10301 = vmatpush1.bf16.msra.mxu1 %v16791_v20  ;;  %v16835_v50 = vld [vmem:[#allocation6 + $0x204] ss:$8 sps:$4 sm:$0xff]  }
 0x8c9   :  { %9590 = vmatprep.subr.bf16.mxu0 %v16742_v35  ;;  %10332 = vmatprep.mubr.bf16.mxu1 %v18329_v41  ;;  %v16836_v35 = vld [vmem:[#allocation6 + $0x2f0] ss:$8 sps:$4 sm:$0xff]  }
 0x8ca   :  { %10302 = vmatprep.subr.bf16.mxu1 %v16799_v62 }
 0x8cc   :  { %9591 = vmatpush2.bf16.msra.mxu0 %v16740_v54  ;;  %10303 = vmatpush1.bf16.msra.mxu1 %v16797_v38  ;;  %v16844_v54 = vld [vmem:[#allocation6 + $0x2e4] ss:$8 sps:$4 sm:$0xff]  }
 0x8cd   :  { %9592 = vmatprep.subr.bf16.mxu0 %v16748_v31  ;;  %10304 = vmatprep.subr.bf16.mxu1 %v16805_v53  ;;  %v16850_v31 = vld [vmem:[#allocation6 + $0x2d4] ss:$8 sps:$4 sm:$0xff]  }
 0x8d0   :  { %9593 = vmatpush2.bf16.msra.mxu0 %v16746_v48  ;;  %10305 = vmatpush1.bf16.msra.mxu1 %v16803_v29  ;;  %v16856_v48 = vld [vmem:[#allocation6 + $0x2c4] ss:$8 sps:$4 sm:$0xff]  }
 0x8d1   :  { %9594 = vmatprep.subr.bf16.mxu0 %v16754_v55  ;;  %10306 = vmatprep.subr.bf16.mxu1 %v16811_v15  ;;  %v16862_v55 = vld [vmem:[#allocation6 + $0x2b4] ss:$8 sps:$4 sm:$0xff]  }
 0x8d4   :  { %9595 = vmatpush2.bf16.msra.mxu0 %v16752_v47  ;;  %10307 = vmatpush1.bf16.msra.mxu1 %v16809_v10  ;;  %v16868_v47 = vld [vmem:[#allocation6 + $0x2a4] ss:$8 sps:$4 sm:$0xff]  }
 0x8d5   :  { %9596 = vmatprep.subr.bf16.mxu0 %v16760_v6  ;;  %10308 = vmatprep.subr.bf16.mxu1 %v16817_v3  ;;  %v16874_v6 = vld [vmem:[#allocation6 + $0x294] ss:$8 sps:$4 sm:$0xff]  }
 0x8d8   :  { %9597 = vmatpush2.bf16.msra.mxu0 %v16758_v43  ;;  %10309 = vmatpush1.bf16.msra.mxu1 %v16815_v34  ;;  %v16878_v43 = vld [vmem:[#allocation6 + $0x280] ss:$8 sps:$4 sm:$0xff]  }
 0x8d9   :  { %9598 = vmatprep.subr.bf16.mxu0 %v16766_v9  ;;  %10310 = vmatprep.subr.bf16.mxu1 %v16823_v11  ;;  %v9279_v9 = vrot.slane %v9274_v36, %v17836_v23  ;;  %v9291_v36 = vld [vmem:[#allocation13 + $0x23] ss:$8 sm:$0x3] }
 0x8dc   :  { %9599 = vmatpush2.bf16.msra.mxu0 %v16764_v30  ;;  %10311 = vmatpush1.bf16.msra.mxu1 %v16821_v56 }
 0x8dd   :  { %9600 = vmatprep.subr.bf16.mxu0 %v16772_v42  ;;  %10312 = vmatprep.subr.bf16.mxu1 %v16829_v22 }
 0x8e0   :  { %9601 = vmatpush2.bf16.msra.mxu0 %v16770_v46  ;;  %10313 = vmatpush1.bf16.msra.mxu1 %v16827_v51 }
 0x8e1   :  { %9602 = vmatprep.subr.bf16.mxu0 %v16778_v63  ;;  %10314 = vmatprep.subr.bf16.mxu1 %v16835_v50 }
 0x8e4   :  { %9603 = vmatpush2.bf16.msra.mxu0 %v16776_v28  ;;  %10315 = vmatpush1.bf16.msra.mxu1 %v16833_v4 }
 0x8e5   :  { %9604 = vmatprep.subr.bf16.mxu0 %v16784_v60  ;;  %10316 = vmatprep.subr.bf16.mxu1 %v16838_v58 }
 0x8e8   :  { %9605 = vmatpush2.bf16.msra.mxu0 %v16782_v49  ;;  %10317 = vmatpush2.bf16.msra.mxu1 %v16836_v35 }
 0x8e9   :  { %10018 = vmatprep.subr.bf16.mxu0 %v16790_v52  ;;  %10318 = vmatprep.subr.bf16.mxu1 %v16844_v54 }
 0x8ec   :  { %10319 = vmatpush2.bf16.msra.mxu1 %v16842_v59 }
 0x8ed   :  { %10320 = vmatprep.subr.bf16.mxu1 %v16850_v31 }
 0x8f0   :  { %10321 = vmatpush2.bf16.msra.mxu1 %v16848_v24 }
 0x8f1   :  { %10322 = vmatprep.subr.bf16.mxu1 %v16856_v48 }
 0x8f4   :  { %10323 = vmatpush2.bf16.msra.mxu1 %v16854_v14 }
 0x8f5   :  { %10324 = vmatprep.subr.bf16.mxu1 %v16862_v55 }
 0x8f8   :  { %10325 = vmatpush2.bf16.msra.mxu1 %v16860_v40 }
 0x8f9   :  { %10326 = vmatprep.subr.bf16.mxu1 %v16868_v47 }
 0x8fc   :  { %10327 = vmatpush2.bf16.msra.mxu1 %v16866_v57 }
 0x8fd   :  { %10328 = vmatprep.subr.bf16.mxu1 %v16874_v6  ;;  %v9289_v6 = vld [vmem:[#allocation13 + $0x22] ss:$8 sm:$0x3] }
 0x900   :  { %10329 = vmatpush2.bf16.msra.mxu1 %v16872_v25 }
 0x901   :  { %10330 = vmatprep.subr.bf16.mxu1 %v16880_v37 }
 0x904   :  { %10331 = vmatpush2.bf16.msra.mxu1 %v16878_v43  ;;  %v9338_v43 = vrot.slane %v9289_v6, %v17836_v23 }
 0x907   :  { %10333 = vmatmul.mubr.bf16.vlgmr.msra.gmra.mxu1 %v18331_v32 }
 0x96b   :  { %v9266_v13 = vpop.f32.mrf.mxu0 }
 0x96c   :  { %v9267_v30 = vadd.f32 %v9266_v13, %v18348_v12  ;;  %v9351_v13 = vrot.slane %v9291_v36, %v17836_v23 }
 0x96d   :  { %v9268_v42 = vpop.f32.mrf.mxu0 }
 0x96e   :  { %v9286_v1 = vadd.f32 %v9279_v9, %v9267_v30  ;;  %v9269_v46 = vadd.f32 %v9268_v42, %v18350_v33  ;;  %v9342_v30 = vrot.slane %v9289_v6, %v17844_v26  ;;  %v16884_v6 = vld [vmem:[#allocation4 + $0x570] ss:$8 sps:$4 sm:$0xff]  }
 0x96f   :  { %v9270_v8 = vpop.f32.mrf.mxu0 }
 0x970   :  { %v9292_v63 = vsel %vm197_vm0, %v9286_v1, 0.0  ;;  %v9287_v18 = vadd.f32 %v9283_v17, %v9269_v46  ;;  %v9355_v46 = vrot.slane %v9291_v36, %v17844_v26  ;;  %v16889_v36 = vld [vmem:[#allocation4 + $0x564] ss:$8 sps:$4 sm:$0xff]  }
 0x971   :  { %v9293_v28 = vrot.slane %v9292_v63, 4  ;;  %v9271_v39 = vpop.f32.mrf.mxu0 }
 0x972   :  { %v9299_v60 = vsel %vm197_vm0, %v9287_v18, 0.0 }
 0x973   :  { %v9294_v16 = vadd.f32 %v9293_v28, %v9292_v63  ;;  %v9300_v49 = vrot.slane %v9299_v60, 4 }
 0x975   :  { %v9295_v12 = vrot.slane %v9294_v16, 2  ;;  %v9301_v27 = vadd.f32 %v9300_v49, %v9299_v60 }
 0x977   :  { %v9296_v52 = vadd.f32 %v9295_v12, %v9294_v16  ;;  %v9302_v2 = vrot.slane %v9301_v27, 2  ;;  %v16788_v12 = vld [vmem:[#allocation7 + $0xf0] ss:$8 sps:$4 sm:$0xff]  }
 0x979   :  { %v9297_v20 = vrot.slane %v9296_v52, 1  ;;  %v9303_v38 = vadd.f32 %v9302_v2, %v9301_v27  ;;  %v16794_v2 = vld [vmem:[#allocation7 + $0xe0] ss:$8 sps:$4 sm:$0xff]  }
 0x97b   :  { %v9298_v62 = vadd.f32 %v9297_v20, %v9296_v52  ;;  %v9304_v33 = vrot.slane %v9303_v38, 1  ;;  %v16796_v52 = vld [vmem:[#allocation7 + $0xe4] ss:$8 sps:$4 sm:$0xff]   ;;  %v16802_v20 = vld [vmem:[#allocation7 + $0xd4] ss:$8 sps:$4 sm:$0xff]  }
 0x97d   :  { %v9306_v29 = vmul.f32 0.25, %v9298_v62  ;;  %v9305_v53 = vadd.f32 %v9304_v33, %v9303_v38  ;;  %v16800_v38 = vld [vmem:[#allocation7 + $0xd0] ss:$8 sps:$4 sm:$0xff]   ;;  %v16808_v62 = vld [vmem:[#allocation7 + $0xc4] ss:$8 sps:$4 sm:$0xff]  }
 0x97e   :  { %v16806_v33 = vld [vmem:[#allocation7 + $0xc0] ss:$8 sps:$4 sm:$0xff]  }
 0x97f   :  { %v9308_v10 = vsub.f32 %v9286_v1, %v9306_v29  ;;  %v9307_v15 = vmul.f32 0.25, %v9305_v53  ;;  %v16814_v29 = vld [vmem:[#allocation7 + $0xb4] ss:$8 sps:$4 sm:$0xff]   ;;  %v16812_v53 = vld [vmem:[#allocation7 + $0xb0] ss:$8 sps:$4 sm:$0xff]  }
 0x981   :  { %v9310_v34 = vmul.f32 %v9308_v10, %v9308_v10  ;;  %v9309_v3 = vsub.f32 %v9287_v18, %v9307_v15  ;;  %v16818_v15 = vld [vmem:[#allocation7 + $0xa0] ss:$8 sps:$4 sm:$0xff]  }
 0x983   :  { %v9312_v56 = vsel %vm197_vm0, %v9310_v34, 0.0  ;;  %v9311_v11 = vmul.f32 %v9309_v3, %v9309_v3  ;;  %v16826_v34 = vld [vmem:[#allocation7 + $0x94] ss:$8 sps:$4 sm:$0xff]  }
 0x984   :  { %v9313_v51 = vrot.slane %v9312_v56, 4 }
 0x985   :  { %v9319_v22 = vsel %vm197_vm0, %v9311_v11, 0.0  ;;  %v16830_v11 = vld [vmem:[#allocation7 + $0x80] ss:$8 sps:$4 sm:$0xff]  }
 0x986   :  { %v9314_v4 = vadd.f32 %v9313_v51, %v9312_v56  ;;  %v9320_v50 = vrot.slane %v9319_v22, 4  ;;  %v16832_v56 = vld [vmem:[#allocation7 + $0x84] ss:$8 sps:$4 sm:$0xff]   ;;  %v16841_v51 = vld [vmem:[#allocation7 + $0x174] ss:$8 sps:$4 sm:$0xff]  }
 0x988   :  { %v9315_v58 = vrot.slane %v9314_v4, 2  ;;  %v9321_v35 = vadd.f32 %v9320_v50, %v9319_v22  ;;  %v16839_v22 = vld [vmem:[#allocation7 + $0x170] ss:$8 sps:$4 sm:$0xff]   ;;  %v16845_v50 = vld [vmem:[#allocation7 + $0x160] ss:$8 sps:$4 sm:$0xff]  }
 0x98a   :  { %v9316_v59 = vadd.f32 %v9315_v58, %v9314_v4  ;;  %v9322_v54 = vrot.slane %v9321_v35, 2  ;;  %v16847_v4 = vld [vmem:[#allocation7 + $0x164] ss:$8 sps:$4 sm:$0xff]   ;;  %v16853_v58 = vld [vmem:[#allocation7 + $0x154] ss:$8 sps:$4 sm:$0xff]  }
 0x98c   :  { %v9317_v24 = vrot.slane %v9316_v59, 1  ;;  %v9323_v31 = vadd.f32 %v9322_v54, %v9321_v35  ;;  %v16851_v35 = vld [vmem:[#allocation7 + $0x150] ss:$8 sps:$4 sm:$0xff]   ;;  %v16857_v54 = vld [vmem:[#allocation7 + $0x140] ss:$8 sps:$4 sm:$0xff]  }
 0x98e   :  { %v9318_v14 = vadd.f32 %v9317_v24, %v9316_v59  ;;  %v9324_v48 = vrot.slane %v9323_v31, 1  ;;  %v16859_v59 = vld [vmem:[#allocation7 + $0x144] ss:$8 sps:$4 sm:$0xff]   ;;  %v16865_v24 = vld [vmem:[#allocation7 + $0x134] ss:$8 sps:$4 sm:$0xff]  }
 0x990   :  { %v9326_v40 = vmul.f32 0.25, %v9318_v14  ;;  %v9325_v55 = vadd.f32 %v9324_v48, %v9323_v31  ;;  %v16863_v31 = vld [vmem:[#allocation7 + $0x130] ss:$8 sps:$4 sm:$0xff]   ;;  %v16871_v14 = vld [vmem:[#allocation7 + $0x124] ss:$8 sps:$4 sm:$0xff]  }
 0x991   :  { %v16869_v48 = vld [vmem:[#allocation7 + $0x120] ss:$8 sps:$4 sm:$0xff]  }
 0x992   :  { %v9328_v57 = vadd.f32 1e-05, %v9326_v40  ;;  %v9327_v47 = vmul.f32 0.25, %v9325_v55  ;;  %v16877_v40 = vld [vmem:[#allocation7 + $0x114] ss:$8 sps:$4 sm:$0xff]  }
 0x993   :  { %v16875_v55 = vld [vmem:[#allocation7 + $0x110] ss:$8 sps:$4 sm:$0xff]  }
 0x994   :  { %17456 = vrsqrt.f32 %v9328_v57  ;;  %v9329_v25 = vadd.f32 1e-05, %v9327_v47  ;;  %v16883_v57 = vld [vmem:[#allocation7 + $0x104] ss:$8 sps:$4 sm:$0xff]   ;;  %v16881_v47 = vld [vmem:[#allocation7 + $0x100] ss:$8 sps:$4 sm:$0xff]  }
 0x996   :  { %17458 = vrsqrt.f32 %v9329_v25  ;;  %v16886_v25 = vld [vmem:[#allocation4 + $0x574] ss:$8 sps:$4 sm:$0xff]  }
 0x9a1   :  { %v17457_v37 = vpop.eup %17456 }
 0x9a2   :  { %v9332_v9 = vmul.f32 %v17457_v37, %v9308_v10  ;;  %v16820_v10 = vld [vmem:[#allocation7 + $0xa4] ss:$8 sps:$4 sm:$0xff]   ;;  %v16892_v37 = vld [vmem:[#allocation4 + $0x554] ss:$8 sps:$4 sm:$0xff]  }
 0x9a3   :  { %v17459_v17 = vpop.eup %17458 }
 0x9a4   :  { %v9345_v42 = vmul.f32 %v9338_v43, %v9332_v9  ;;  %v9333_v1 = vmul.f32 %v17459_v17, %v9309_v3  ;;  %v16824_v3 = vld [vmem:[#allocation7 + $0x90] ss:$8 sps:$4 sm:$0xff]   ;;  %v16887_v43 = vld [vmem:[#allocation4 + $0x560] ss:$8 sps:$4 sm:$0xff]   ;;  %v16898_v17 = vld [vmem:[#allocation4 + $0x534] ss:$8 sps:$4 sm:$0xff]  }
 0x9a5   :  { %v16890_v9 = vld [vmem:[#allocation4 + $0x550] ss:$8 sps:$4 sm:$0xff]  }
 0x9a6   :  { %v9358_v8 = vadd.f32 %v9351_v13, %v9345_v42  ;;  %v9346_v63 = vmul.f32 %v9342_v30, %v9333_v1  ;;  %v16895_v13 = vld [vmem:[#allocation4 + $0x544] ss:$8 sps:$4 sm:$0xff]   ;;  %v16893_v30 = vld [vmem:[#allocation4 + $0x540] ss:$8 sps:$4 sm:$0xff]   ;;  %v16896_v42 = vld [vmem:[#allocation4 + $0x530] ss:$8 sps:$4 sm:$0xff]  }
 0x9a7   :  { %v16901_v1 = vld [vmem:[#allocation4 + $0x524] ss:$8 sps:$4 sm:$0xff]  }
 0x9a8   :  { %v9359_v18 = vadd.f32 %v9355_v46, %v9346_v63  ;;  %vm9360_vm1 = vcmp.ge.f32.partialorder %v9358_v8, 0.0  ;;  %v9362_v28 = vmul.f32 0.2, %v9358_v8  ;;  %v16899_v46 = vld [vmem:[#allocation4 + $0x520] ss:$8 sps:$4 sm:$0xff]  }
 0x9a9   :  { %v16902_v63 = vld [vmem:[#allocation4 + $0x510] ss:$8 sps:$4 sm:$0xff]  }
 0x9aa   :  { %vm9361_vm2 = vcmp.ge.f32.partialorder %v9359_v18, 0.0  ;;  %v9363_v39 = vmul.f32 0.2, %v9359_v18  ;;  %v9364_v60 = vsel %vm9360_vm1, %v9358_v8, %v9362_v28  ;;  %v16904_v8 = vld [vmem:[#allocation4 + $0x514] ss:$8 sps:$4 sm:$0xff]  }
 0x9ab   :  { %v9399_v27 = vpack.c.bf16 %v9364_v60, %v9364_v60  ;;  %v16907_v28 = vld [vmem:[#allocation4 + $0x504] ss:$8 sps:$4 sm:$0xff]   ;;  %v16905_v60 = vld [vmem:[#allocation4 + $0x500] ss:$8 sps:$4 sm:$0xff]  }
 0x9ac   :  { %v9365_v16 = vsel %vm9361_vm2, %v9359_v18, %v9363_v39  ;;  %v18371_v18 = vpop.f32.mrf.mxu1 }
 0x9ad   :  { %v9400_v49 = vpack.c.bf16 %v9365_v16, %v9365_v16 }
 0x9ae   :  { %v18373_v39 = vpop.f32.mrf.mxu1 }
 0x9af   :  { %9606 = vmatprep.mubr.bf16.mxu0 %v9400_v49  ;;  %v16910_v49 = vld [vmem:[#allocation4 + $0x5f4] ss:$8 sps:$4 sm:$0xff]  }
 0x9b0   :  { %9607 = vmatmul.mubr.bf16.vlgmr.msra.gmra.mxu0 %v9399_v27  ;;  %v9935_v16 = vpop.f32.mrf.mxu1 }
 0x9b1   :  { %10019 = vmatpush1.bf16.msra.mxu0 %v16788_v12  ;;  %10050 = vmatprep.mubr.bf16.mxu0 %v17679_v7  ;;  %v16908_v12 = vld [vmem:[#allocation4 + $0x5f0] ss:$8 sps:$4 sm:$0xff]  }
 0x9b2   :  { %10020 = vmatprep.subr.bf16.mxu0 %v16796_v52  ;;  %v9936_v27 = vpop.f32.mrf.mxu1  ;;  %v16913_v52 = vld [vmem:[#allocation4 + $0x5e4] ss:$8 sps:$4 sm:$0xff]  }
 0x9b5   :  { %10021 = vmatpush1.bf16.msra.mxu0 %v16794_v2  ;;  %v16911_v2 = vld [vmem:[#allocation4 + $0x5e0] ss:$8 sps:$4 sm:$0xff]  }
 0x9b6   :  { %10022 = vmatprep.subr.bf16.mxu0 %v16802_v20  ;;  %v16916_v20 = vld [vmem:[#allocation4 + $0x5d4] ss:$8 sps:$4 sm:$0xff]  }
 0x9b9   :  { %10023 = vmatpush1.bf16.msra.mxu0 %v16800_v38  ;;  %v16914_v38 = vld [vmem:[#allocation4 + $0x5d0] ss:$8 sps:$4 sm:$0xff]  }
 0x9ba   :  { %10024 = vmatprep.subr.bf16.mxu0 %v16808_v62  ;;  %v16919_v62 = vld [vmem:[#allocation4 + $0x5c4] ss:$8 sps:$4 sm:$0xff]  }
 0x9bd   :  { %10025 = vmatpush1.bf16.msra.mxu0 %v16806_v33  ;;  %v16917_v33 = vld [vmem:[#allocation4 + $0x5c0] ss:$8 sps:$4 sm:$0xff]  }
 0x9be   :  { %10026 = vmatprep.subr.bf16.mxu0 %v16814_v29  ;;  %v16922_v29 = vld [vmem:[#allocation4 + $0x5b4] ss:$8 sps:$4 sm:$0xff]  }
 0x9c1   :  { %10027 = vmatpush1.bf16.msra.mxu0 %v16812_v53  ;;  %v16920_v53 = vld [vmem:[#allocation4 + $0x5b0] ss:$8 sps:$4 sm:$0xff]  }
 0x9c2   :  { %10028 = vmatprep.subr.bf16.mxu0 %v16820_v10  ;;  %v16925_v10 = vld [vmem:[#allocation4 + $0x5a4] ss:$8 sps:$4 sm:$0xff]  }
 0x9c5   :  { %10029 = vmatpush1.bf16.msra.mxu0 %v16818_v15  ;;  %v16923_v15 = vld [vmem:[#allocation4 + $0x5a0] ss:$8 sps:$4 sm:$0xff]  }
 0x9c6   :  { %10030 = vmatprep.subr.bf16.mxu0 %v16826_v34  ;;  %v16926_v34 = vld [vmem:[#allocation4 + $0x590] ss:$8 sps:$4 sm:$0xff]  }
 0x9c9   :  { %10031 = vmatpush1.bf16.msra.mxu0 %v16824_v3  ;;  %v16928_v3 = vld [vmem:[#allocation4 + $0x594] ss:$8 sps:$4 sm:$0xff]  }
 0x9ca   :  { %10032 = vmatprep.subr.bf16.mxu0 %v16832_v56  ;;  %v18375_v56 = vpop.f32.mrf.mxu1 }
 0x9cd   :  { %10033 = vmatpush1.bf16.msra.mxu0 %v16830_v11  ;;  %v16931_v11 = vld [vmem:[#allocation4 + $0x584] ss:$8 sps:$4 sm:$0xff]  }
 0x9ce   :  { %10421 = vmatprep.subr.bf16.mxu0 %v16841_v51  ;;  %v18377_v51 = vpop.f32.mrf.mxu1 }
 0x9d0   :  { %10051 = vmatmul.mubr.bf16.vlgmr.msra.gmra.mxu0 %v18345_v19 }
 0x9d1   :  { %10422 = vmatpush1.bf16.msra.mxu0 %v16839_v22  ;;  %10453 = vmatprep.mubr.bf16.mxu0 %v17679_v7  ;;  %v16929_v22 = vld [vmem:[#allocation4 + $0x580] ss:$8 sps:$4 sm:$0xff]  }
 0x9d2   :  { %10423 = vmatprep.subr.bf16.mxu0 %v16847_v4  ;;  %v10338_v4 = vpop.f32.mrf.mxu1 }
 0x9d5   :  { %10424 = vmatpush1.bf16.msra.mxu0 %v16845_v50  ;;  %v10339_v50 = vpop.f32.mrf.mxu1 }
 0x9d6   :  { %10425 = vmatprep.subr.bf16.mxu0 %v16853_v58  ;;  %v9402_v58 = vld [vmem:[#allocation13 + $0x24] ss:$8 sm:$0x3] }
 0x9d9   :  { %10426 = vmatpush1.bf16.msra.mxu0 %v16851_v35  ;;  %v9407_v35 = vrot.slane %v9402_v58, %v17836_v23 }
 0x9da   :  { %10427 = vmatprep.subr.bf16.mxu0 %v16859_v59  ;;  %v9411_v59 = vrot.slane %v9402_v58, %v17844_v26 }
 0x9dd   :  { %10428 = vmatpush1.bf16.msra.mxu0 %v16857_v54 }
 0x9de   :  { %10429 = vmatprep.subr.bf16.mxu0 %v16865_v24 }
 0x9e1   :  { %10430 = vmatpush1.bf16.msra.mxu0 %v16863_v31 }
 0x9e2   :  { %10431 = vmatprep.subr.bf16.mxu0 %v16871_v14 }
 0x9e5   :  { %10432 = vmatpush1.bf16.msra.mxu0 %v16869_v48 }
 0x9e6   :  { %10433 = vmatprep.subr.bf16.mxu0 %v16877_v40 }
 0x9e9   :  { %10434 = vmatpush1.bf16.msra.mxu0 %v16875_v55 }
 0x9ea   :  { %10435 = vmatprep.subr.bf16.mxu0 %v16883_v57 }
 0x9ed   :  { %10436 = vmatpush1.bf16.msra.mxu0 %v16881_v47 }
 0x9ee   :  { %10655 = vmatprep.subr.bf16.mxu0 %v16886_v25 }
 0x9f0   :  { %10454 = vmatmul.mubr.bf16.vlgmr.msra.gmra.mxu0 %v18345_v19 }
 0x9f1   :  { %10656 = vmatpush1.bf16.msra.mxu0 %v16884_v6 }
 0x9f2   :  { %10657 = vmatprep.subr.bf16.mxu0 %v16889_v36 }
 0x9f5   :  { %10658 = vmatpush1.bf16.msra.mxu0 %v16887_v43 }
 0x9f6   :  { %10659 = vmatprep.subr.bf16.mxu0 %v16892_v37 }
 0x9f9   :  { %10660 = vmatpush1.bf16.msra.mxu0 %v16890_v9 }
 0x9fa   :  { %10661 = vmatprep.subr.bf16.mxu0 %v16895_v13 }
 0x9fd   :  { %10662 = vmatpush1.bf16.msra.mxu0 %v16893_v30 }
 0x9fe   :  { %10663 = vmatprep.subr.bf16.mxu0 %v16898_v17 }
 0xa01   :  { %10664 = vmatpush1.bf16.msra.mxu0 %v16896_v42 }
 0xa02   :  { %10665 = vmatprep.subr.bf16.mxu0 %v16901_v1 }
 0xa05   :  { %10666 = vmatpush1.bf16.msra.mxu0 %v16899_v46 }
 0xa06   :  { %10667 = vmatprep.subr.bf16.mxu0 %v16904_v8 }
 0xa09   :  { %10668 = vmatpush1.bf16.msra.mxu0 %v16902_v63 }
 0xa0a   :  { %10669 = vmatprep.subr.bf16.mxu0 %v16907_v28 }
 0xa0d   :  { %10670 = vmatpush1.bf16.msra.mxu0 %v16905_v60 }
 0xa0e   :  { %10671 = vmatprep.subr.bf16.mxu0 %v16910_v49 }
 0xa11   :  { %10672 = vmatpush2.bf16.msra.mxu0 %v16908_v12 }
 0xa12   :  { %10673 = vmatprep.subr.bf16.mxu0 %v16913_v52 }
 0xa15   :  { %10674 = vmatpush2.bf16.msra.mxu0 %v16911_v2 }
 0xa16   :  { %10675 = vmatprep.subr.bf16.mxu0 %v16916_v20 }
 0xa19   :  { %10676 = vmatpush2.bf16.msra.mxu0 %v16914_v38 }
 0xa1a   :  { %10677 = vmatprep.subr.bf16.mxu0 %v16919_v62 }
 0xa1d   :  { %10678 = vmatpush2.bf16.msra.mxu0 %v16917_v33 }
 0xa1e   :  { %10679 = vmatprep.subr.bf16.mxu0 %v16922_v29 }
 0xa21   :  { %10680 = vmatpush2.bf16.msra.mxu0 %v16920_v53 }
 0xa22   :  { %10681 = vmatprep.subr.bf16.mxu0 %v16925_v10 }
 0xa25   :  { %10682 = vmatpush2.bf16.msra.mxu0 %v16923_v15 }
 0xa26   :  { %10683 = vmatprep.subr.bf16.mxu0 %v16928_v3 }
 0xa29   :  { %10684 = vmatpush2.bf16.msra.mxu0 %v16926_v34 }
 0xa2a   :  { %10685 = vmatprep.subr.bf16.mxu0 %v16931_v11 }
 0xa2d   :  { %10686 = vmatpush2.bf16.msra.mxu0 %v16929_v22 }
 0xa70   :  { %v9608_v54 = vpop.f32.mrf.mxu0 }
 0xa71   :  { %v9609_v24 = vadd.f32 %v9608_v54, %v9407_v35  ;;  %v10060_v54 = vld [vmem:[#allocation13 + $0x27] ss:$8 sm:$0x3] }
 0xa72   :  { %v9610_v31 = vpop.f32.mrf.mxu0 }
 0xa73   :  { %v9619_v14 = vsel %vm197_vm0, %v9609_v24, 0.0  ;;  %v9611_v48 = vadd.f32 %v9610_v31, %v9411_v59  ;;  %v10065_v31 = vrot.slane %v10060_v54, %v17836_v23 }
 0xa74   :  { %v9620_v40 = vrot.slane %v9619_v14, 4  ;;  %v9612_v55 = vpop.f32.mrf.mxu0 }
 0xa75   :  { %v9626_v57 = vsel %vm197_vm0, %v9611_v48, 0.0  ;;  %v9618_v55 = vld [vmem:[#allocation13 + $0x26] ss:$8 sm:$0x3] }
 0xa76   :  { %v9621_v47 = vadd.f32 %v9620_v40, %v9619_v14  ;;  %v9627_v25 = vrot.slane %v9626_v57, 4  ;;  %v9613_v6 = vpop.f32.mrf.mxu0  ;;  %v9616_v14 = vld [vmem:[#allocation13 + $0x25] ss:$8 sm:$0x3]  ;;  %v10069_v40 = vrot.slane %v10060_v54, %v17844_v26  ;;  %v16955_v54 = vld [vmem:[#allocation4 + $0x604] ss:$8 sps:$4 sm:$0xff]  }
 0xa78   :  { %v9622_v36 = vrot.slane %v9621_v47, 2  ;;  %v9628_v43 = vadd.f32 %v9627_v25, %v9626_v57 }
 0xa7a   :  { %v9623_v37 = vadd.f32 %v9622_v36, %v9621_v47  ;;  %v9629_v9 = vrot.slane %v9628_v43, 2  ;;  %v9665_v47 = vrot.slane %v9616_v14, %v17836_v23 }
 0xa7c   :  { %v9624_v13 = vrot.slane %v9623_v37, 1  ;;  %v9630_v30 = vadd.f32 %v9629_v9, %v9628_v43  ;;  %v9678_v43 = vrot.slane %v9618_v55, %v17836_v23 }
 0xa7e   :  { %v9625_v17 = vadd.f32 %v9624_v13, %v9623_v37  ;;  %v9631_v42 = vrot.slane %v9630_v30, 1  ;;  %v9669_v37 = vrot.slane %v9616_v14, %v17844_v26  ;;  %v16961_v14 = vld [vmem:[#allocation6 + $0x374] ss:$8 sps:$4 sm:$0xff]  }
 0xa7f   :  { %11322 = vmatprep.subr.bf16.mxu0 %v16961_v14  ;;  %v17046_v14 = vld [vmem:[#allocation6 + $0x380] ss:$8 sps:$4 sm:$0xff]  }
 0xa80   :  { %v9633_v1 = vmul.f32 0.25, %v9625_v17  ;;  %v9632_v46 = vadd.f32 %v9631_v42, %v9630_v30  ;;  %v9682_v17 = vrot.slane %v9618_v55, %v17844_v26  ;;  %v16964_v55 = vld [vmem:[#allocation4 + $0x6e4] ss:$8 sps:$4 sm:$0xff]  }
 0xa82   :  { %v9635_v8 = vsub.f32 %v9609_v24, %v9633_v1  ;;  %v9634_v63 = vmul.f32 0.25, %v9632_v46 }
 0xa84   :  { %v9637_v28 = vmul.f32 %v9635_v8, %v9635_v8  ;;  %v9636_v60 = vsub.f32 %v9611_v48, %v9634_v63 }
 0xa86   :  { %v9639_v16 = vsel %vm197_vm0, %v9637_v28, 0.0  ;;  %v9638_v49 = vmul.f32 %v9636_v60, %v9636_v60 }
 0xa87   :  { %v9640_v12 = vrot.slane %v9639_v16, 4 }
 0xa88   :  { %v9646_v27 = vsel %vm197_vm0, %v9638_v49, 0.0 }
 0xa89   :  { %v9641_v52 = vadd.f32 %v9640_v12, %v9639_v16  ;;  %v9647_v2 = vrot.slane %v9646_v27, 4 }
 0xa8b   :  { %v9642_v20 = vrot.slane %v9641_v52, 2  ;;  %v9648_v38 = vadd.f32 %v9647_v2, %v9646_v27 }
 0xa8d   :  { %v9643_v62 = vadd.f32 %v9642_v20, %v9641_v52  ;;  %v9649_v33 = vrot.slane %v9648_v38, 2 }
 0xa8f   :  { %v9644_v29 = vrot.slane %v9643_v62, 1  ;;  %v9650_v53 = vadd.f32 %v9649_v33, %v9648_v38 }
 0xa90   :  { %v10052_v10 = vpop.f32.mrf.mxu0 }
 0xa91   :  { %v9645_v15 = vadd.f32 %v9644_v29, %v9643_v62  ;;  %v9651_v34 = vrot.slane %v9650_v53, 1  ;;  %v10053_v24 = vadd.f32 %v10052_v10, %v18371_v18  ;;  %v16934_v29 = vld [vmem:[#allocation4 + $0x674] ss:$8 sps:$4 sm:$0xff]   ;;  %v16937_v10 = vld [vmem:[#allocation4 + $0x664] ss:$8 sps:$4 sm:$0xff]  }
 0xa92   :  { %v10054_v3 = vpop.f32.mrf.mxu0  ;;  %10999 = vmatprep.subr.bf16.mxu1 %v16934_v29  ;;  %v17001_v29 = vld [vmem:[#allocation6 + $0x300] ss:$8 sps:$4 sm:$0xff]  }
 0xa93   :  { %v9653_v11 = vmul.f32 0.25, %v9645_v15  ;;  %v9652_v22 = vadd.f32 %v9651_v34, %v9650_v53  ;;  %v10055_v48 = vadd.f32 %v10054_v3, %v18373_v39  ;;  %v10072_v57 = vadd.f32 %v10065_v31, %v10053_v24  ;;  %v16932_v53 = vld [vmem:[#allocation4 + $0x670] ss:$8 sps:$4 sm:$0xff]   ;;  %v16935_v15 = vld [vmem:[#allocation4 + $0x660] ss:$8 sps:$4 sm:$0xff]  }
 0xa94   :  { %v10056_v4 = vpop.f32.mrf.mxu0  ;;  %11000 = vmatpush1.bf16.msra.mxu1 %v16932_v53  ;;  %v16940_v34 = vld [vmem:[#allocation4 + $0x654] ss:$8 sps:$4 sm:$0xff]   ;;  %v16938_v3 = vld [vmem:[#allocation4 + $0x650] ss:$8 sps:$4 sm:$0xff]   ;;  %v16953_v24 = vld [vmem:[#allocation4 + $0x600] ss:$8 sps:$4 sm:$0xff]  }
 0xa95   :  { %v9655_v50 = vadd.f32 1e-05, %v9653_v11  ;;  %v9654_v58 = vmul.f32 0.25, %v9652_v22  ;;  %v10073_v6 = vadd.f32 %v10069_v40, %v10055_v48  ;;  %v10076_v18 = vmul.f32 0.2, %v10072_v57  ;;  %11001 = vmatprep.subr.bf16.mxu1 %v16937_v10 }
 0xa96   :  { %v10057_v35 = vpop.f32.mrf.mxu0  ;;  %vm10074_vm3 = vcmp.ge.f32.partialorder %v10072_v57, 0.0  ;;  %v16943_v11 = vld [vmem:[#allocation4 + $0x644] ss:$8 sps:$4 sm:$0xff]   ;;  %v16941_v22 = vld [vmem:[#allocation4 + $0x640] ss:$8 sps:$4 sm:$0xff]  }
 0xa97   :  { %17460 = vrsqrt.f32 %v9655_v50  ;;  %v9656_v59 = vadd.f32 1e-05, %v9654_v58  ;;  %v10077_v39 = vmul.f32 0.2, %v10073_v6  ;;  %vm10075_vm4 = vcmp.ge.f32.partialorder %v10073_v6, 0.0 }
 0xa98   :  { %v10078_v46 = vsel %vm10074_vm3, %v10072_v57, %v10076_v18  ;;  %11002 = vmatpush1.bf16.msra.mxu1 %v16935_v15  ;;  %v16946_v4 = vld [vmem:[#allocation4 + $0x634] ss:$8 sps:$4 sm:$0xff]   ;;  %v16944_v50 = vld [vmem:[#allocation4 + $0x630] ss:$8 sps:$4 sm:$0xff]   ;;  %v16947_v58 = vld [vmem:[#allocation4 + $0x620] ss:$8 sps:$4 sm:$0xff]  }
 0xa99   :  { %17462 = vrsqrt.f32 %v9656_v59  ;;  %v10079_v16 = vsel %vm10075_vm4, %v10073_v6, %v10077_v39  ;;  %11003 = vmatprep.subr.bf16.mxu1 %v16940_v34  ;;  %v16952_v35 = vld [vmem:[#allocation4 + $0x614] ss:$8 sps:$4 sm:$0xff]   ;;  %v16950_v59 = vld [vmem:[#allocation4 + $0x610] ss:$8 sps:$4 sm:$0xff]   ;;  %v16967_v57 = vld [vmem:[#allocation6 + $0x364] ss:$8 sps:$4 sm:$0xff]  }
 0xa9a   :  { %v16958_v31 = vld [vmem:[#allocation4 + $0x6f4] ss:$8 sps:$4 sm:$0xff]   ;;  %v16956_v48 = vld [vmem:[#allocation4 + $0x6f0] ss:$8 sps:$4 sm:$0xff]   ;;  %v16979_v18 = vld [vmem:[#allocation6 + $0x344] ss:$8 sps:$4 sm:$0xff]  }
 0xa9b   :  { %v16959_v40 = vld [vmem:[#allocation6 + $0x370] ss:$8 sps:$4 sm:$0xff]   ;;  %v16970_v6 = vld [vmem:[#allocation4 + $0x6d4] ss:$8 sps:$4 sm:$0xff]   ;;  %v17012_v34 = vld [vmem:[#allocation6 + $0x3e4] ss:$8 sps:$4 sm:$0xff]  }
 0xa9c   :  { %11004 = vmatpush1.bf16.msra.mxu1 %v16938_v3  ;;  %v16985_v39 = vld [vmem:[#allocation6 + $0x334] ss:$8 sps:$4 sm:$0xff]   ;;  %v17004_v53 = vld [vmem:[#allocation6 + $0x3f0] ss:$8 sps:$4 sm:$0xff]   ;;  %v17010_v3 = vld [vmem:[#allocation6 + $0x3e0] ss:$8 sps:$4 sm:$0xff]  }
 0xa9d   :  { %11005 = vmatprep.subr.bf16.mxu1 %v16943_v11  ;;  %v17006_v10 = vld [vmem:[#allocation6 + $0x3f4] ss:$8 sps:$4 sm:$0xff]  }
 0xa9e   :  { %v17009_v15 = vld [vmem:[#allocation7 + $0x1f4] ss:$8 sps:$4 sm:$0xff]  }
 0xa9f   :  { %v17018_v11 = vld [vmem:[#allocation6 + $0x3d4] ss:$8 sps:$4 sm:$0xff]  }
 0xaa0   :  { %11006 = vmatpush1.bf16.msra.mxu1 %v16941_v22  ;;  %v17016_v22 = vld [vmem:[#allocation6 + $0x3d0] ss:$8 sps:$4 sm:$0xff]  }
 0xaa1   :  { %11007 = vmatprep.subr.bf16.mxu1 %v16946_v4  ;;  %v17024_v4 = vld [vmem:[#allocation6 + $0x3c4] ss:$8 sps:$4 sm:$0xff]  }
 0xaa4   :  { %v17461_v25 = vpop.eup %17460  ;;  %11008 = vmatpush1.bf16.msra.mxu1 %v16944_v50  ;;  %v17022_v50 = vld [vmem:[#allocation6 + $0x3c0] ss:$8 sps:$4 sm:$0xff]  }
 0xaa5   :  { %v9659_v36 = vmul.f32 %v17461_v25, %v9635_v8  ;;  %v16965_v25 = vld [vmem:[#allocation6 + $0x360] ss:$8 sps:$4 sm:$0xff]  }
 0xaa6   :  { %v17463_v9 = vpop.eup %17462 }
 0xaa7   :  { %v9672_v13 = vmul.f32 %v9665_v47, %v9659_v36  ;;  %v9660_v30 = vmul.f32 %v17463_v9, %v9636_v60  ;;  %v16962_v47 = vld [vmem:[#allocation4 + $0x6e0] ss:$8 sps:$4 sm:$0xff]   ;;  %v16973_v36 = vld [vmem:[#allocation6 + $0x354] ss:$8 sps:$4 sm:$0xff]   ;;  %v16976_v9 = vld [vmem:[#allocation4 + $0x6c4] ss:$8 sps:$4 sm:$0xff]  }
 0xaa9   :  { %v9685_v42 = vadd.f32 %v9678_v43, %v9672_v13  ;;  %v9673_v1 = vmul.f32 %v9669_v37, %v9660_v30  ;;  %v16968_v43 = vld [vmem:[#allocation4 + $0x6d0] ss:$8 sps:$4 sm:$0xff]   ;;  %v16974_v13 = vld [vmem:[#allocation4 + $0x6c0] ss:$8 sps:$4 sm:$0xff]  }
 0xaaa   :  { %v16971_v37 = vld [vmem:[#allocation6 + $0x350] ss:$8 sps:$4 sm:$0xff]   ;;  %v16977_v30 = vld [vmem:[#allocation6 + $0x340] ss:$8 sps:$4 sm:$0xff]  }
 0xaab   :  { %v9686_v63 = vadd.f32 %v9682_v17, %v9673_v1  ;;  %v10080_v28 = vadd.f32 %v10078_v46, %v9685_v42  ;;  %v16982_v17 = vld [vmem:[#allocation4 + $0x6b4] ss:$8 sps:$4 sm:$0xff]   ;;  %v16980_v42 = vld [vmem:[#allocation4 + $0x6b0] ss:$8 sps:$4 sm:$0xff]   ;;  %v16988_v46 = vld [vmem:[#allocation4 + $0x6a4] ss:$8 sps:$4 sm:$0xff]  }
 0xaac   :  { %v16983_v1 = vld [vmem:[#allocation6 + $0x330] ss:$8 sps:$4 sm:$0xff]  }
 0xaad   :  { %v10081_v8 = vadd.f32 %v10079_v16, %v9686_v63  ;;  %vm10082_vm5 = vcmp.ge.f32.partialorder %v10080_v28, 0.0  ;;  %v10084_v49 = vmul.f32 0.2, %v10080_v28  ;;  %v16991_v63 = vld [vmem:[#allocation6 + $0x324] ss:$8 sps:$4 sm:$0xff]  }
 0xaae   :  { %v16989_v16 = vld [vmem:[#allocation6 + $0x320] ss:$8 sps:$4 sm:$0xff]  }
 0xaaf   :  { %vm10083_vm6 = vcmp.ge.f32.partialorder %v10081_v8, 0.0  ;;  %v10085_v12 = vmul.f32 0.2, %v10081_v8  ;;  %v10086_v52 = vsel %vm10082_vm5, %v10080_v28, %v10084_v49  ;;  %v16986_v28 = vld [vmem:[#allocation4 + $0x6a0] ss:$8 sps:$4 sm:$0xff]  }
 0xab0   :  { %v18393_v27 = vpop.f32.mrf.mxu0  ;;  %v18399_v38 = vpack.c.bf16 %v10086_v52, %v10086_v52  ;;  %v16994_v49 = vld [vmem:[#allocation4 + $0x694] ss:$8 sps:$4 sm:$0xff]  }
 0xab1   :  { %v10087_v60 = vsel %vm10083_vm6, %v10081_v8, %v10085_v12  ;;  %v16992_v8 = vld [vmem:[#allocation4 + $0x690] ss:$8 sps:$4 sm:$0xff]   ;;  %v16997_v52 = vld [vmem:[#allocation6 + $0x314] ss:$8 sps:$4 sm:$0xff]  }
 0xab2   :  { %v18395_v2 = vpop.f32.mrf.mxu0  ;;  %v18397_v20 = vpack.c.bf16 %v10087_v60, %v10087_v60  ;;  %v16995_v12 = vld [vmem:[#allocation6 + $0x310] ss:$8 sps:$4 sm:$0xff]   ;;  %v17000_v60 = vld [vmem:[#allocation4 + $0x684] ss:$8 sps:$4 sm:$0xff]  }
 0xab4   :  { %v10459_v62 = vpop.f32.mrf.mxu0  ;;  %10687 = vmatprep.mubr.bf16.mxu0 %v18397_v20 }
 0xab5   :  { %10688 = vmatmul.mubr.bf16.vlgmr.msra.gmra.mxu0 %v18399_v38  ;;  %v17003_v62 = vld [vmem:[#allocation6 + $0x304] ss:$8 sps:$4 sm:$0xff]  }
 0xab6   :  { %v10460_v33 = vpop.f32.mrf.mxu0  ;;  %11354 = vmatprep.mubr.bf16.mxu0 %v18329_v41  ;;  %v16949_v41 = vld [vmem:[#allocation4 + $0x624] ss:$8 sps:$4 sm:$0xff]   ;;  %11323 = vmatpush1.bf16.msra.mxu0 %v16959_v40  ;;  %v10456_v40 = vadd.f32 %v18393_v27, %v18375_v56 }
 0xab7   :  { %11009 = vmatprep.subr.bf16.mxu1 %v16949_v41  ;;  %11324 = vmatprep.subr.bf16.mxu0 %v16967_v57  ;;  %v16998_v33 = vld [vmem:[#allocation4 + $0x680] ss:$8 sps:$4 sm:$0xff]   ;;  %v17030_v41 = vld [vmem:[#allocation6 + $0x3b4] ss:$8 sps:$4 sm:$0xff]  }
 0xab8   :  { %11010 = vmatpush1.bf16.msra.mxu1 %v16947_v58  ;;  %v17028_v58 = vld [vmem:[#allocation6 + $0x3b0] ss:$8 sps:$4 sm:$0xff]  }
 0xab9   :  { %11011 = vmatprep.subr.bf16.mxu1 %v16952_v35  ;;  %v17036_v35 = vld [vmem:[#allocation6 + $0x3a4] ss:$8 sps:$4 sm:$0xff]  }
 0xaba   :  { %11325 = vmatpush1.bf16.msra.mxu0 %v16965_v25 }
 0xabb   :  { %11326 = vmatprep.subr.bf16.mxu0 %v16973_v36 }
 0xabc   :  { %11012 = vmatpush1.bf16.msra.mxu1 %v16950_v59  ;;  %v17034_v59 = vld [vmem:[#allocation6 + $0x3a0] ss:$8 sps:$4 sm:$0xff]  }
 0xabd   :  { %11013 = vmatprep.subr.bf16.mxu1 %v16955_v54  ;;  %v17042_v54 = vld [vmem:[#allocation6 + $0x394] ss:$8 sps:$4 sm:$0xff]  }
 0xabe   :  { %11327 = vmatpush1.bf16.msra.mxu0 %v16971_v37 }
 0xabf   :  { %11328 = vmatprep.subr.bf16.mxu0 %v16979_v18 }
 0xac0   :  { %11014 = vmatpush1.bf16.msra.mxu1 %v16953_v24  ;;  %v17040_v24 = vld [vmem:[#allocation6 + $0x390] ss:$8 sps:$4 sm:$0xff]  }
 0xac1   :  { %11015 = vmatprep.subr.bf16.mxu1 %v16958_v31  ;;  %v17048_v31 = vld [vmem:[#allocation6 + $0x384] ss:$8 sps:$4 sm:$0xff]  }
 0xac2   :  { %11329 = vmatpush1.bf16.msra.mxu0 %v16977_v30 }
 0xac3   :  { %11330 = vmatprep.subr.bf16.mxu0 %v16985_v39 }
 0xac4   :  { %11016 = vmatpush2.bf16.msra.mxu1 %v16956_v48  ;;  %v10699_v48 = vld [vmem:[#allocation13 + $0x30] ss:$8 sm:$0x3] }
 0xac5   :  { %11017 = vmatprep.subr.bf16.mxu1 %v16964_v55  ;;  %v10704_v55 = vrot.slane %v10699_v48, %v17836_v23 }
 0xac6   :  { %11331 = vmatpush1.bf16.msra.mxu0 %v16983_v1 }
 0xac7   :  { %11332 = vmatprep.subr.bf16.mxu0 %v16991_v63 }
 0xac8   :  { %11018 = vmatpush2.bf16.msra.mxu1 %v16962_v47  ;;  %v10458_v47 = vadd.f32 %v18395_v2, %v18377_v51 }
 0xac9   :  { %11019 = vmatprep.subr.bf16.mxu1 %v16970_v6  ;;  %v10708_v6 = vrot.slane %v10699_v48, %v17844_v26  ;;  %v10716_v48 = vld [vmem:[#allocation13 + $0x32] ss:$8 sm:$0x3] }
 0xaca   :  { %11333 = vmatpush1.bf16.msra.mxu0 %v16989_v16 }
 0xacb   :  { %11334 = vmatprep.subr.bf16.mxu0 %v16997_v52 }
 0xacc   :  { %11020 = vmatpush2.bf16.msra.mxu1 %v16968_v43 }
 0xacd   :  { %11021 = vmatprep.subr.bf16.mxu1 %v16976_v9 }
 0xace   :  { %11335 = vmatpush1.bf16.msra.mxu0 %v16995_v12 }
 0xacf   :  { %11336 = vmatprep.subr.bf16.mxu0 %v17003_v62 }
 0xad0   :  { %11022 = vmatpush2.bf16.msra.mxu1 %v16974_v13 }
 0xad1   :  { %11023 = vmatprep.subr.bf16.mxu1 %v16982_v17 }
 0xad2   :  { %11337 = vmatpush1.bf16.msra.mxu0 %v17001_v29 }
 0xad3   :  { %11338 = vmatprep.subr.bf16.mxu0 %v17006_v10 }
 0xad4   :  { %11024 = vmatpush2.bf16.msra.mxu1 %v16980_v42 }
 0xad5   :  { %11025 = vmatprep.subr.bf16.mxu1 %v16988_v46 }
 0xad6   :  { %11339 = vmatpush2.bf16.msra.mxu0 %v17004_v53 }
 0xad7   :  { %11340 = vmatprep.subr.bf16.mxu0 %v17012_v34 }
 0xad8   :  { %11026 = vmatpush2.bf16.msra.mxu1 %v16986_v28 }
 0xad9   :  { %11027 = vmatprep.subr.bf16.mxu1 %v16994_v49 }
 0xada   :  { %11341 = vmatpush2.bf16.msra.mxu0 %v17010_v3 }
 0xadb   :  { %11342 = vmatprep.subr.bf16.mxu0 %v17018_v11 }
 0xadc   :  { %11028 = vmatpush2.bf16.msra.mxu1 %v16992_v8 }
 0xadd   :  { %11029 = vmatprep.subr.bf16.mxu1 %v17000_v60 }
 0xade   :  { %11343 = vmatpush2.bf16.msra.mxu0 %v17016_v22 }
 0xadf   :  { %11344 = vmatprep.subr.bf16.mxu0 %v17024_v4 }
 0xae0   :  { %11030 = vmatpush2.bf16.msra.mxu1 %v16998_v33 }
 0xae1   :  { %11443 = vmatprep.subr.bf16.mxu1 %v17009_v15 }
 0xae2   :  { %11345 = vmatpush2.bf16.msra.mxu0 %v17022_v50 }
 0xae3   :  { %11346 = vmatprep.subr.bf16.mxu0 %v17030_v41 }
 0xae6   :  { %11347 = vmatpush2.bf16.msra.mxu0 %v17028_v58 }
 0xae7   :  { %11348 = vmatprep.subr.bf16.mxu0 %v17036_v35 }
 0xaea   :  { %11349 = vmatpush2.bf16.msra.mxu0 %v17034_v59 }
 0xaeb   :  { %11350 = vmatprep.subr.bf16.mxu0 %v17042_v54 }
 0xaee   :  { %11351 = vmatpush2.bf16.msra.mxu0 %v17040_v24 }
 0xaef   :  { %11352 = vmatprep.subr.bf16.mxu0 %v17048_v31 }
 0xaf2   :  { %11353 = vmatpush2.bf16.msra.mxu0 %v17046_v14  ;;  %v10714_v14 = vld [vmem:[#allocation13 + $0x31] ss:$8 sm:$0x3] }
 0xaf5   :  { %11355 = vmatmul.mubr.bf16.vlgmr.msra.gmra.mxu0 %v18331_v32 }
 0xb75   :  { %v10689_v57 = vpop.f32.mrf.mxu0 }
 0xb76   :  { %v10696_v25 = vadd.f32 %v10689_v57, %v10456_v40  ;;  %v10763_v40 = vrot.slane %v10714_v14, %v17836_v23 }
 0xb77   :  { %v10691_v36 = vpop.f32.mrf.mxu0 }
 0xb78   :  { %v10711_v43 = vadd.f32 %v10704_v55, %v10696_v25  ;;  %v10697_v37 = vadd.f32 %v10691_v36, %v10458_v47  ;;  %v10776_v47 = vrot.slane %v10716_v48, %v17836_v23  ;;  %v10767_v25 = vrot.slane %v10714_v14, %v17844_v26  ;;  %v17084_v14 = vld [vmem:[#allocation4 + $0x7d4] ss:$8 sps:$4 sm:$0xff]  }
 0xb79   :  { %v10693_v9 = vpop.f32.mrf.mxu0 }
 0xb7a   :  { %v10717_v18 = vsel %vm197_vm0, %v10711_v43, 0.0  ;;  %v10712_v32 = vadd.f32 %v10708_v6, %v10697_v37  ;;  %v10780_v37 = vrot.slane %v10716_v48, %v17844_v26  ;;  %v17082_v48 = vld [vmem:[#allocation4 + $0x7d0] ss:$8 sps:$4 sm:$0xff]  }
 0xb7b   :  { %v10718_v13 = vrot.slane %v10717_v18, 4  ;;  %v10694_v30 = vpop.f32.mrf.mxu0 }
 0xb7c   :  { %v10724_v56 = vsel %vm197_vm0, %v10712_v32, 0.0 }
 0xb7d   :  { %v10719_v27 = vadd.f32 %v10718_v13, %v10717_v18  ;;  %v10725_v17 = vrot.slane %v10724_v56, 4 }
 0xb7f   :  { %v10720_v39 = vrot.slane %v10719_v27, 2  ;;  %v10726_v42 = vadd.f32 %v10725_v17, %v10724_v56 }
 0xb81   :  { %v10721_v1 = vadd.f32 %v10720_v39, %v10719_v27  ;;  %v10727_v51 = vrot.slane %v10726_v42, 2  ;;  %v17007_v39 = vld [vmem:[#allocation7 + $0x1f0] ss:$8 sps:$4 sm:$0xff]  }
 0xb83   :  { %v10722_v2 = vrot.slane %v10721_v1, 1  ;;  %v10728_v46 = vadd.f32 %v10727_v51, %v10726_v42  ;;  %v17013_v51 = vld [vmem:[#allocation7 + $0x1e0] ss:$8 sps:$4 sm:$0xff]  }
 0xb85   :  { %v10723_v63 = vadd.f32 %v10722_v2, %v10721_v1  ;;  %v10729_v28 = vrot.slane %v10728_v46, 1  ;;  %v17015_v1 = vld [vmem:[#allocation7 + $0x1e4] ss:$8 sps:$4 sm:$0xff]   ;;  %v17021_v2 = vld [vmem:[#allocation7 + $0x1d4] ss:$8 sps:$4 sm:$0xff]  }
 0xb87   :  { %v10731_v16 = vmul.f32 0.25, %v10723_v63  ;;  %v10730_v8 = vadd.f32 %v10729_v28, %v10728_v46  ;;  %v17019_v46 = vld [vmem:[#allocation7 + $0x1d0] ss:$8 sps:$4 sm:$0xff]   ;;  %v17027_v63 = vld [vmem:[#allocation7 + $0x1c4] ss:$8 sps:$4 sm:$0xff]  }
 0xb88   :  { %v17025_v28 = vld [vmem:[#allocation7 + $0x1c0] ss:$8 sps:$4 sm:$0xff]  }
 0xb89   :  { %v10733_v49 = vsub.f32 %v10711_v43, %v10731_v16  ;;  %v10732_v12 = vmul.f32 0.25, %v10730_v8  ;;  %v17033_v16 = vld [vmem:[#allocation7 + $0x1b4] ss:$8 sps:$4 sm:$0xff]   ;;  %v17031_v8 = vld [vmem:[#allocation7 + $0x1b0] ss:$8 sps:$4 sm:$0xff]  }
 0xb8b   :  { %v10735_v52 = vmul.f32 %v10733_v49, %v10733_v49  ;;  %v10734_v60 = vsub.f32 %v10712_v32, %v10732_v12  ;;  %v17037_v12 = vld [vmem:[#allocation7 + $0x1a0] ss:$8 sps:$4 sm:$0xff]  }
 0xb8d   :  { %v10737_v62 = vsel %vm197_vm0, %v10735_v52, 0.0  ;;  %v10736_v33 = vmul.f32 %v10734_v60, %v10734_v60  ;;  %v17045_v52 = vld [vmem:[#allocation7 + $0x194] ss:$8 sps:$4 sm:$0xff]  }
 0xb8e   :  { %v10738_v29 = vrot.slane %v10737_v62, 4 }
 0xb8f   :  { %v10744_v53 = vsel %vm197_vm0, %v10736_v33, 0.0  ;;  %v17054_v33 = vld [vmem:[#allocation4 + $0x774] ss:$8 sps:$4 sm:$0xff]  }
 0xb90   :  { %v10739_v10 = vadd.f32 %v10738_v29, %v10737_v62  ;;  %v10745_v15 = vrot.slane %v10744_v53, 4  ;;  %v17049_v62 = vld [vmem:[#allocation7 + $0x180] ss:$8 sps:$4 sm:$0xff]   ;;  %v17052_v29 = vld [vmem:[#allocation4 + $0x770] ss:$8 sps:$4 sm:$0xff]  }
 0xb92   :  { %v10740_v34 = vrot.slane %v10739_v10, 2  ;;  %v10746_v3 = vadd.f32 %v10745_v15, %v10744_v53  ;;  %v17057_v53 = vld [vmem:[#allocation4 + $0x764] ss:$8 sps:$4 sm:$0xff]   ;;  %v17060_v15 = vld [vmem:[#allocation4 + $0x754] ss:$8 sps:$4 sm:$0xff]  }
 0xb94   :  { %v10741_v11 = vadd.f32 %v10740_v34, %v10739_v10  ;;  %v10747_v22 = vrot.slane %v10746_v3, 2  ;;  %v17055_v10 = vld [vmem:[#allocation4 + $0x760] ss:$8 sps:$4 sm:$0xff]   ;;  %v17058_v34 = vld [vmem:[#allocation4 + $0x750] ss:$8 sps:$4 sm:$0xff]  }
 0xb96   :  { %v10742_v4 = vrot.slane %v10741_v11, 1  ;;  %v10748_v50 = vadd.f32 %v10747_v22, %v10746_v3  ;;  %v17063_v3 = vld [vmem:[#allocation4 + $0x744] ss:$8 sps:$4 sm:$0xff]   ;;  %v17066_v22 = vld [vmem:[#allocation4 + $0x734] ss:$8 sps:$4 sm:$0xff]  }
 0xb98   :  { %v10743_v41 = vadd.f32 %v10742_v4, %v10741_v11  ;;  %v10749_v58 = vrot.slane %v10748_v50, 1  ;;  %v17061_v11 = vld [vmem:[#allocation4 + $0x740] ss:$8 sps:$4 sm:$0xff]   ;;  %v17064_v4 = vld [vmem:[#allocation4 + $0x730] ss:$8 sps:$4 sm:$0xff]  }
 0xb9a   :  { %v10751_v35 = vmul.f32 0.25, %v10743_v41  ;;  %v10750_v59 = vadd.f32 %v10749_v58, %v10748_v50  ;;  %v17069_v50 = vld [vmem:[#allocation4 + $0x724] ss:$8 sps:$4 sm:$0xff]   ;;  %v17072_v41 = vld [vmem:[#allocation4 + $0x714] ss:$8 sps:$4 sm:$0xff]  }
 0xb9b   :  { %v17075_v58 = vld [vmem:[#allocation4 + $0x704] ss:$8 sps:$4 sm:$0xff]  }
 0xb9c   :  { %v10753_v54 = vadd.f32 1e-05, %v10751_v35  ;;  %v10752_v24 = vmul.f32 0.25, %v10750_v59  ;;  %v17073_v35 = vld [vmem:[#allocation4 + $0x700] ss:$8 sps:$4 sm:$0xff]  }
 0xb9d   :  { %v17078_v59 = vld [vmem:[#allocation4 + $0x7f4] ss:$8 sps:$4 sm:$0xff]  }
 0xb9e   :  { %17464 = vrsqrt.f32 %v10753_v54  ;;  %v10754_v31 = vadd.f32 1e-05, %v10752_v24  ;;  %v17076_v54 = vld [vmem:[#allocation4 + $0x7f0] ss:$8 sps:$4 sm:$0xff]   ;;  %v17081_v24 = vld [vmem:[#allocation4 + $0x7e4] ss:$8 sps:$4 sm:$0xff]  }
 0xba0   :  { %17466 = vrsqrt.f32 %v10754_v31  ;;  %v17079_v31 = vld [vmem:[#allocation4 + $0x7e0] ss:$8 sps:$4 sm:$0xff]  }
 0xbab   :  { %v17465_v55 = vpop.eup %17464 }
 0xbac   :  { %v10757_v57 = vmul.f32 %v17465_v55, %v10733_v49  ;;  %v17039_v49 = vld [vmem:[#allocation7 + $0x1a4] ss:$8 sps:$4 sm:$0xff]   ;;  %v17085_v55 = vld [vmem:[#allocation4 + $0x7c0] ss:$8 sps:$4 sm:$0xff]  }
 0xbad   :  { %v17467_v6 = vpop.eup %17466 }
 0xbae   :  { %v10770_v36 = vmul.f32 %v10763_v40, %v10757_v57  ;;  %v10758_v43 = vmul.f32 %v17467_v6, %v10734_v60  ;;  %v17051_v60 = vld [vmem:[#allocation7 + $0x184] ss:$8 sps:$4 sm:$0xff]   ;;  %v17090_v57 = vld [vmem:[#allocation4 + $0x7b4] ss:$8 sps:$4 sm:$0xff]   ;;  %v17091_v6 = vld [vmem:[#allocation4 + $0x7a0] ss:$8 sps:$4 sm:$0xff]  }
 0xbaf   :  { %v17087_v40 = vld [vmem:[#allocation4 + $0x7c4] ss:$8 sps:$4 sm:$0xff]  }
 0xbb0   :  { %v10783_v9 = vadd.f32 %v10776_v47, %v10770_v36  ;;  %v10771_v18 = vmul.f32 %v10767_v25, %v10758_v43  ;;  %v17088_v47 = vld [vmem:[#allocation4 + $0x7b0] ss:$8 sps:$4 sm:$0xff]   ;;  %v17093_v25 = vld [vmem:[#allocation4 + $0x7a4] ss:$8 sps:$4 sm:$0xff]   ;;  %v17096_v36 = vld [vmem:[#allocation4 + $0x794] ss:$8 sps:$4 sm:$0xff]  }
 0xbb1   :  { %v17094_v43 = vld [vmem:[#allocation4 + $0x790] ss:$8 sps:$4 sm:$0xff]  }
 0xbb2   :  { %v10784_v32 = vadd.f32 %v10780_v37, %v10771_v18  ;;  %vm10785_vm7 = vcmp.ge.f32.partialorder %v10783_v9, 0.0  ;;  %v10787_v13 = vmul.f32 0.2, %v10783_v9  ;;  %v17099_v37 = vld [vmem:[#allocation4 + $0x784] ss:$8 sps:$4 sm:$0xff]  }
 0xbb4   :  { %vm10786_vm8 = vcmp.ge.f32.partialorder %v10784_v32, 0.0  ;;  %v10788_v30 = vmul.f32 0.2, %v10784_v32  ;;  %v10789_v56 = vsel %vm10785_vm7, %v10783_v9, %v10787_v13  ;;  %v17097_v9 = vld [vmem:[#allocation4 + $0x780] ss:$8 sps:$4 sm:$0xff]  }
 0xbb5   :  { %v10824_v42 = vpack.c.bf16 %v10789_v56, %v10789_v56  ;;  %v18423_v18 = vpop.f32.mrf.mxu0  ;;  %v17102_v56 = vld [vmem:[#allocation10 + $0x2dc] ss:$52 sps:$4 sm:$0xff]  }
 0xbb6   :  { %v10790_v27 = vsel %vm10786_vm8, %v10784_v32, %v10788_v30  ;;  %13100 = vmatprep.subr.bf16.mxu0 %v17102_v56  ;;  %v17178_v56 = vld [vmem:[#allocation10 + $0x410] ss:$52 sps:$4 sm:$0xff]  }
 0xbb7   :  { %v10825_v17 = vpack.c.bf16 %v10790_v27, %v10790_v27  ;;  %v18425_v32 = vpop.f32.mrf.mxu0  ;;  %v17105_v27 = vld [vmem:[#allocation10 + $0x2e4] ss:$52 sps:$4 sm:$0xff]  }
 0xbb9   :  { %11031 = vmatprep.mubr.bf16.mxu1 %v10825_v17  ;;  %v11360_v13 = vpop.f32.mrf.mxu0  ;;  %v17100_v17 = vld [vmem:[#allocation10 + $0x2d8] ss:$52 sps:$4 sm:$0xff]  }
 0xbba   :  { %11032 = vmatmul.mubr.bf16.vlgmr.msra.gmra.mxu1 %v10824_v42  ;;  %13101 = vmatpush1.bf16.msra.mxu0 %v17100_v17  ;;  %v17108_v42 = vld [vmem:[#allocation10 + $0x274] ss:$52 sps:$4 sm:$0xff]   ;;  %v17186_v17 = vld [vmem:[#allocation10 + $0x3ac] ss:$52 sps:$4 sm:$0xff]  }
 0xbbb   :  { %11444 = vmatpush1.bf16.msra.mxu1 %v17007_v39  ;;  %11475 = vmatprep.mubr.bf16.mxu1 %v17679_v7  ;;  %v17043_v7 = vld [vmem:[#allocation7 + $0x190] ss:$8 sps:$4 sm:$0xff]   ;;  %v11361_v30 = vpop.f32.mrf.mxu0  ;;  %v17103_v39 = vld [vmem:[#allocation10 + $0x2e0] ss:$52 sps:$4 sm:$0xff]  }
 0xbbc   :  { %11445 = vmatprep.subr.bf16.mxu1 %v17015_v1  ;;  %v17111_v1 = vld [vmem:[#allocation10 + $0x27c] ss:$52 sps:$4 sm:$0xff]   ;;  %13102 = vmatprep.subr.bf16.mxu0 %v17108_v42  ;;  %v17180_v13 = vld [vmem:[#allocation10 + $0x414] ss:$52 sps:$4 sm:$0xff]  }
 0xbbd   :  { %v17183_v30 = vld [vmem:[#allocation10 + $0x41c] ss:$52 sps:$4 sm:$0xff]  }
 0xbbe   :  { %v17184_v42 = vld [vmem:[#allocation10 + $0x3a8] ss:$52 sps:$4 sm:$0xff]  }
 0xbbf   :  { %11446 = vmatpush1.bf16.msra.mxu1 %v17013_v51  ;;  %v17106_v51 = vld [vmem:[#allocation10 + $0x270] ss:$52 sps:$4 sm:$0xff]  }
 0xbc0   :  { %11447 = vmatprep.subr.bf16.mxu1 %v17021_v2  ;;  %v17109_v2 = vld [vmem:[#allocation10 + $0x278] ss:$52 sps:$4 sm:$0xff]   ;;  %13103 = vmatpush1.bf16.msra.mxu0 %v17106_v51 }
 0xbc1   :  { %v17192_v51 = vld [vmem:[#allocation10 + $0x344] ss:$52 sps:$4 sm:$0xff]  }
 0xbc3   :  { %11448 = vmatpush1.bf16.msra.mxu1 %v17019_v46  ;;  %v17117_v46 = vld [vmem:[#allocation10 + $0x214] ss:$52 sps:$4 sm:$0xff]  }
 0xbc4   :  { %11449 = vmatprep.subr.bf16.mxu1 %v17027_v63  ;;  %v17112_v63 = vld [vmem:[#allocation10 + $0x208] ss:$52 sps:$4 sm:$0xff]  }
 0xbc7   :  { %11450 = vmatpush1.bf16.msra.mxu1 %v17025_v28  ;;  %v17115_v28 = vld [vmem:[#allocation10 + $0x210] ss:$52 sps:$4 sm:$0xff]  }
 0xbc8   :  { %11451 = vmatprep.subr.bf16.mxu1 %v17033_v16  ;;  %v17118_v16 = vld [vmem:[#allocation10 + $0x1a0] ss:$52 sps:$4 sm:$0xff]  }
 0xbcb   :  { %11452 = vmatpush1.bf16.msra.mxu1 %v17031_v8  ;;  %v17120_v8 = vld [vmem:[#allocation10 + $0x1a4] ss:$52 sps:$4 sm:$0xff]  }
 0xbcc   :  { %11453 = vmatprep.subr.bf16.mxu1 %v17039_v49  ;;  %v17121_v49 = vld [vmem:[#allocation10 + $0x1a8] ss:$52 sps:$4 sm:$0xff]  }
 0xbcf   :  { %11454 = vmatpush1.bf16.msra.mxu1 %v17037_v12  ;;  %v17123_v12 = vld [vmem:[#allocation10 + $0x1ac] ss:$52 sps:$4 sm:$0xff]  }
 0xbd0   :  { %11455 = vmatprep.subr.bf16.mxu1 %v17045_v52  ;;  %v17126_v52 = vld [vmem:[#allocation10 + $0x13c] ss:$52 sps:$4 sm:$0xff]  }
 0xbd3   :  { %11456 = vmatpush1.bf16.msra.mxu1 %v17043_v7  ;;  %v17129_v7 = vld [vmem:[#allocation10 + $0x144] ss:$52 sps:$4 sm:$0xff]  }
 0xbd4   :  { %11457 = vmatprep.subr.bf16.mxu1 %v17051_v60  ;;  %v17124_v60 = vld [vmem:[#allocation10 + $0x138] ss:$52 sps:$4 sm:$0xff]  }
 0xbd7   :  { %11458 = vmatpush1.bf16.msra.mxu1 %v17049_v62  ;;  %v17127_v62 = vld [vmem:[#allocation10 + $0x140] ss:$52 sps:$4 sm:$0xff]  }
 0xbd8   :  { %11677 = vmatprep.subr.bf16.mxu1 %v17054_v33  ;;  %v17132_v33 = vld [vmem:[#allocation10 + $0xd4] ss:$52 sps:$4 sm:$0xff]  }
 0xbda   :  { %11476 = vmatmul.mubr.bf16.vlgmr.msra.gmra.mxu1 %v18345_v19  ;;  %v17067_v19 = vld [vmem:[#allocation4 + $0x720] ss:$8 sps:$4 sm:$0xff]  }
 0xbdb   :  { %11678 = vmatpush1.bf16.msra.mxu1 %v17052_v29  ;;  %11709 = vmatprep.mubr.bf16.mxu1 %v18397_v20  ;;  %v17070_v20 = vld [vmem:[#allocation4 + $0x710] ss:$8 sps:$4 sm:$0xff]  }
 0xbdc   :  { %11679 = vmatprep.subr.bf16.mxu1 %v17057_v53  ;;  %v17135_v29 = vld [vmem:[#allocation10 + $0xdc] ss:$52 sps:$4 sm:$0xff]  }
 0xbdd   :  { %v17130_v53 = vld [vmem:[#allocation10 + $0xd0] ss:$52 sps:$4 sm:$0xff]  }
 0xbdf   :  { %11680 = vmatpush1.bf16.msra.mxu1 %v17055_v10  ;;  %v17133_v10 = vld [vmem:[#allocation10 + $0xd8] ss:$52 sps:$4 sm:$0xff]  }
 0xbe0   :  { %11681 = vmatprep.subr.bf16.mxu1 %v17060_v15  ;;  %v17138_v15 = vld [vmem:[#allocation10 + $0x6c] ss:$52 sps:$4 sm:$0xff]  }
 0xbe3   :  { %11682 = vmatpush1.bf16.msra.mxu1 %v17058_v34  ;;  %v17141_v34 = vld [vmem:[#allocation10 + $0x74] ss:$52 sps:$4 sm:$0xff]  }
 0xbe4   :  { %11683 = vmatprep.subr.bf16.mxu1 %v17063_v3  ;;  %v17136_v3 = vld [vmem:[#allocation10 + $0x68] ss:$52 sps:$4 sm:$0xff]  }
 0xbe7   :  { %11684 = vmatpush1.bf16.msra.mxu1 %v17061_v11  ;;  %v17139_v11 = vld [vmem:[#allocation10 + $0x70] ss:$52 sps:$4 sm:$0xff]  }
 0xbe8   :  { %11685 = vmatprep.subr.bf16.mxu1 %v17066_v22  ;;  %v17144_v22 = vld [vmem:[#allocation10 + $0x4] ss:$52 sps:$4 sm:$0xff]  }
 0xbeb   :  { %11686 = vmatpush1.bf16.msra.mxu1 %v17064_v4  ;;  %v17147_v4 = vld [vmem:[#allocation10 + $0xc] ss:$52 sps:$4 sm:$0xff]  }
 0xbec   :  { %11687 = vmatprep.subr.bf16.mxu1 %v17069_v50  ;;  %v17142_v50 = vld [vmem:[#allocation10] ss:$52 sps:$4 sm:$0xff]  }
 0xbef   :  { %11688 = vmatpush1.bf16.msra.mxu1 %v17067_v19  ;;  %v17145_v19 = vld [vmem:[#allocation10 + $0x8] ss:$52 sps:$4 sm:$0xff]  }
 0xbf0   :  { %11689 = vmatprep.subr.bf16.mxu1 %v17072_v41  ;;  %v17150_v41 = vld [vmem:[#allocation10 + $0x61c] ss:$52 sps:$4 sm:$0xff]  }
 0xbf3   :  { %11690 = vmatpush1.bf16.msra.mxu1 %v17070_v20  ;;  %v17153_v20 = vld [vmem:[#allocation10 + $0x624] ss:$52 sps:$4 sm:$0xff]  }
 0xbf4   :  { %11691 = vmatprep.subr.bf16.mxu1 %v17075_v58  ;;  %v17148_v58 = vld [vmem:[#allocation10 + $0x618] ss:$52 sps:$4 sm:$0xff]  }
 0xbf7   :  { %11692 = vmatpush1.bf16.msra.mxu1 %v17073_v35  ;;  %v17151_v35 = vld [vmem:[#allocation10 + $0x620] ss:$52 sps:$4 sm:$0xff]  }
 0xbf8   :  { %11693 = vmatprep.subr.bf16.mxu1 %v17078_v59  ;;  %v17156_v59 = vld [vmem:[#allocation10 + $0x5b4] ss:$52 sps:$4 sm:$0xff]  }
 0xbfb   :  { %11694 = vmatpush2.bf16.msra.mxu1 %v17076_v54  ;;  %v17159_v54 = vld [vmem:[#allocation10 + $0x5bc] ss:$52 sps:$4 sm:$0xff]  }
 0xbfc   :  { %11695 = vmatprep.subr.bf16.mxu1 %v17081_v24  ;;  %v17154_v24 = vld [vmem:[#allocation10 + $0x5b0] ss:$52 sps:$4 sm:$0xff]  }
 0xbff   :  { %11696 = vmatpush2.bf16.msra.mxu1 %v17079_v31  ;;  %v17157_v31 = vld [vmem:[#allocation10 + $0x5b8] ss:$52 sps:$4 sm:$0xff]  }
 0xc00   :  { %11697 = vmatprep.subr.bf16.mxu1 %v17084_v14  ;;  %v17162_v14 = vld [vmem:[#allocation10 + $0x54c] ss:$52 sps:$4 sm:$0xff]  }
 0xc03   :  { %11698 = vmatpush2.bf16.msra.mxu1 %v17082_v48  ;;  %v17165_v48 = vld [vmem:[#allocation10 + $0x554] ss:$52 sps:$4 sm:$0xff]  }
 0xc04   :  { %11699 = vmatprep.subr.bf16.mxu1 %v17087_v40  ;;  %v17160_v40 = vld [vmem:[#allocation10 + $0x548] ss:$52 sps:$4 sm:$0xff]  }
 0xc07   :  { %11700 = vmatpush2.bf16.msra.mxu1 %v17085_v55  ;;  %v17163_v55 = vld [vmem:[#allocation10 + $0x550] ss:$52 sps:$4 sm:$0xff]  }
 0xc08   :  { %11701 = vmatprep.subr.bf16.mxu1 %v17090_v57  ;;  %v17168_v57 = vld [vmem:[#allocation10 + $0x4e4] ss:$52 sps:$4 sm:$0xff]  }
 0xc0b   :  { %11702 = vmatpush2.bf16.msra.mxu1 %v17088_v47  ;;  %v17171_v47 = vld [vmem:[#allocation10 + $0x4ec] ss:$52 sps:$4 sm:$0xff]  }
 0xc0c   :  { %11703 = vmatprep.subr.bf16.mxu1 %v17093_v25  ;;  %v17166_v25 = vld [vmem:[#allocation10 + $0x4e0] ss:$52 sps:$4 sm:$0xff]  }
 0xc0f   :  { %11704 = vmatpush2.bf16.msra.mxu1 %v17091_v6  ;;  %v17169_v6 = vld [vmem:[#allocation10 + $0x4e8] ss:$52 sps:$4 sm:$0xff]  }
 0xc10   :  { %11705 = vmatprep.subr.bf16.mxu1 %v17096_v36  ;;  %v17174_v36 = vld [vmem:[#allocation10 + $0x47c] ss:$52 sps:$4 sm:$0xff]  }
 0xc13   :  { %11706 = vmatpush2.bf16.msra.mxu1 %v17094_v43  ;;  %v17177_v43 = vld [vmem:[#allocation10 + $0x484] ss:$52 sps:$4 sm:$0xff]  }
 0xc14   :  { %11707 = vmatprep.subr.bf16.mxu1 %v17099_v37  ;;  %v17172_v37 = vld [vmem:[#allocation10 + $0x478] ss:$52 sps:$4 sm:$0xff]  }
 0xc17   :  { %11708 = vmatpush2.bf16.msra.mxu1 %v17097_v9  ;;  %v17175_v9 = vld [vmem:[#allocation10 + $0x480] ss:$52 sps:$4 sm:$0xff]  }
 0xc18   :  { %13141 = vmatprep.subr.bf16.mxu1 %v17105_v27  ;;  %v17181_v27 = vld [vmem:[#allocation10 + $0x418] ss:$52 sps:$4 sm:$0xff]  }
 0xc1a   :  { %11710 = vmatmul.mubr.bf16.vlgmr.msra.gmra.mxu1 %v18399_v38  ;;  %v17114_v38 = vld [vmem:[#allocation10 + $0x20c] ss:$52 sps:$4 sm:$0xff]  }
 0xc1b   :  { %13142 = vmatpush1.bf16.msra.mxu1 %v17103_v39  ;;  %13104 = vmatprep.subr.bf16.mxu0 %v17114_v38  ;;  %v17189_v39 = vld [vmem:[#allocation10 + $0x3b4] ss:$52 sps:$4 sm:$0xff]  }
 0xc1c   :  { %13143 = vmatprep.subr.bf16.mxu1 %v17111_v1  ;;  %13105 = vmatpush1.bf16.msra.mxu0 %v17112_v63  ;;  %v17187_v1 = vld [vmem:[#allocation10 + $0x3b0] ss:$52 sps:$4 sm:$0xff]   ;;  %v17190_v38 = vld [vmem:[#allocation10 + $0x340] ss:$52 sps:$4 sm:$0xff]  }
 0xc1d   :  { %13106 = vmatprep.subr.bf16.mxu0 %v17120_v8  ;;  %v17198_v63 = vld [vmem:[#allocation10 + $0x2ec] ss:$52 sps:$4 sm:$0xff]  }
 0xc1f   :  { %13144 = vmatpush1.bf16.msra.mxu1 %v17109_v2  ;;  %v17195_v2 = vld [vmem:[#allocation10 + $0x34c] ss:$52 sps:$4 sm:$0xff]  }
 0xc20   :  { %13145 = vmatprep.subr.bf16.mxu1 %v17117_v46  ;;  %13107 = vmatpush1.bf16.msra.mxu0 %v17118_v16  ;;  %v17193_v46 = vld [vmem:[#allocation10 + $0x348] ss:$52 sps:$4 sm:$0xff]   ;;  %v10827_v16 = vld [vmem:[#allocation13 + $0x33] ss:$8 sm:$0x3] }
 0xc21   :  { %13108 = vmatprep.subr.bf16.mxu0 %v17126_v52  ;;  %v10832_v8 = vrot.slane %v10827_v16, %v17836_v23 }
 0xc23   :  { %13146 = vmatpush1.bf16.msra.mxu1 %v17115_v28  ;;  %v17201_v28 = vld [vmem:[#allocation10 + $0x2f4] ss:$52 sps:$4 sm:$0xff]  }
 0xc24   :  { %13147 = vmatprep.subr.bf16.mxu1 %v17123_v12  ;;  %13109 = vmatpush1.bf16.msra.mxu0 %v17124_v60 }
 0xc25   :  { %13110 = vmatprep.subr.bf16.mxu0 %v17132_v33 }
 0xc27   :  { %13148 = vmatpush1.bf16.msra.mxu1 %v17121_v49  ;;  %v10836_v49 = vrot.slane %v10827_v16, %v17844_v26 }
 0xc28   :  { %13149 = vmatprep.subr.bf16.mxu1 %v17129_v7  ;;  %13111 = vmatpush1.bf16.msra.mxu0 %v17130_v53 }
 0xc29   :  { %13112 = vmatprep.subr.bf16.mxu0 %v17138_v15 }
 0xc2b   :  { %13150 = vmatpush1.bf16.msra.mxu1 %v17127_v62 }
 0xc2c   :  { %13151 = vmatprep.subr.bf16.mxu1 %v17135_v29  ;;  %13113 = vmatpush1.bf16.msra.mxu0 %v17136_v3 }
 0xc2d   :  { %13114 = vmatprep.subr.bf16.mxu0 %v17144_v22 }
 0xc2f   :  { %13152 = vmatpush1.bf16.msra.mxu1 %v17133_v10 }
 0xc30   :  { %13153 = vmatprep.subr.bf16.mxu1 %v17141_v34  ;;  %13115 = vmatpush1.bf16.msra.mxu0 %v17142_v50 }
 0xc31   :  { %13116 = vmatprep.subr.bf16.mxu0 %v17150_v41 }
 0xc33   :  { %13154 = vmatpush1.bf16.msra.mxu1 %v17139_v11 }
 0xc34   :  { %13155 = vmatprep.subr.bf16.mxu1 %v17147_v4  ;;  %13117 = vmatpush2.bf16.msra.mxu0 %v17148_v58 }
 0xc35   :  { %13118 = vmatprep.subr.bf16.mxu0 %v17156_v59 }
 0xc37   :  { %13156 = vmatpush1.bf16.msra.mxu1 %v17145_v19 }
 0xc38   :  { %13157 = vmatprep.subr.bf16.mxu1 %v17153_v20  ;;  %13119 = vmatpush2.bf16.msra.mxu0 %v17154_v24 }
 0xc39   :  { %13120 = vmatprep.subr.bf16.mxu0 %v17162_v14 }
 0xc3b   :  { %13158 = vmatpush2.bf16.msra.mxu1 %v17151_v35 }
 0xc3c   :  { %13159 = vmatprep.subr.bf16.mxu1 %v17159_v54  ;;  %13121 = vmatpush2.bf16.msra.mxu0 %v17160_v40 }
 0xc3d   :  { %13122 = vmatprep.subr.bf16.mxu0 %v17168_v57 }
 0xc3f   :  { %13160 = vmatpush2.bf16.msra.mxu1 %v17157_v31 }
 0xc40   :  { %13161 = vmatprep.subr.bf16.mxu1 %v17165_v48  ;;  %13123 = vmatpush2.bf16.msra.mxu0 %v17166_v25 }
 0xc41   :  { %13124 = vmatprep.subr.bf16.mxu0 %v17174_v36 }
 0xc43   :  { %13162 = vmatpush2.bf16.msra.mxu1 %v17163_v55 }
 0xc44   :  { %13163 = vmatprep.subr.bf16.mxu1 %v17171_v47  ;;  %13125 = vmatpush2.bf16.msra.mxu0 %v17172_v37 }
 0xc45   :  { %13126 = vmatprep.subr.bf16.mxu0 %v17180_v13 }
 0xc47   :  { %13164 = vmatpush2.bf16.msra.mxu1 %v17169_v6 }
 0xc48   :  { %13165 = vmatprep.subr.bf16.mxu1 %v17177_v43  ;;  %13127 = vmatpush2.bf16.msra.mxu0 %v17178_v56 }
 0xc49   :  { %13128 = vmatprep.subr.bf16.mxu0 %v17186_v17 }
 0xc4b   :  { %13166 = vmatpush2.bf16.msra.mxu1 %v17175_v9 }
 0xc4c   :  { %13167 = vmatprep.subr.bf16.mxu1 %v17183_v30  ;;  %13129 = vmatpush2.bf16.msra.mxu0 %v17184_v42 }
 0xc4d   :  { %13130 = vmatprep.subr.bf16.mxu0 %v17192_v51 }
 0xc4f   :  { %13168 = vmatpush2.bf16.msra.mxu1 %v17181_v27 }
 0xc50   :  { %13169 = vmatprep.subr.bf16.mxu1 %v17189_v39  ;;  %13131 = vmatpush2.bf16.msra.mxu0 %v17190_v38 }
 0xc51   :  { %13182 = vmatprep.subr.bf16.mxu0 %v17198_v63  ;;  %v11041_v63 = vld [vmem:[#allocation13 + $0x34] ss:$8 sm:$0x3] }
 0xc53   :  { %13170 = vmatpush2.bf16.msra.mxu1 %v17187_v1 }
 0xc54   :  { %13171 = vmatprep.subr.bf16.mxu1 %v17195_v2 }
 0xc57   :  { %13172 = vmatpush2.bf16.msra.mxu1 %v17193_v46 }
 0xc58   :  { %13223 = vmatprep.subr.bf16.mxu1 %v17201_v28  ;;  %v11721_v28 = vld [vmem:[#allocation13 + $0x36] ss:$8 sm:$0x3] }
 0xc7a   :  { %v11033_v12 = vpop.f32.mrf.mxu1 }
 0xc7b   :  { %v11034_v52 = vadd.f32 %v11033_v12, %v10832_v8  ;;  %v11043_v12 = vld [vmem:[#allocation13 + $0x35] ss:$8 sm:$0x3] }
 0xc7c   :  { %v11035_v7 = vpop.f32.mrf.mxu1 }
 0xc7d   :  { %v11036_v60 = vadd.f32 %v11035_v7, %v10836_v49  ;;  %v11044_v62 = vsel %vm197_vm0, %v11034_v52, 0.0  ;;  %v11090_v49 = vrot.slane %v11041_v63, %v17836_v23  ;;  %v11726_v7 = vrot.slane %v11721_v28, %v17836_v23 }
 0xc7e   :  { %v11037_v33 = vpop.f32.mrf.mxu1  ;;  %v11045_v10 = vrot.slane %v11044_v62, 4 }
 0xc7f   :  { %v11051_v29 = vsel %vm197_vm0, %v11036_v60, 0.0 }
 0xc80   :  { %v11038_v53 = vpop.f32.mrf.mxu1  ;;  %v11052_v15 = vrot.slane %v11051_v29, 4  ;;  %v11046_v34 = vadd.f32 %v11045_v10, %v11044_v62  ;;  %v11094_v62 = vrot.slane %v11041_v63, %v17844_v26  ;;  %v11730_v10 = vrot.slane %v11721_v28, %v17844_v26  ;;  %v17228_v63 = vld [vmem:[#allocation10 + $0xe4] ss:$52 sps:$4 sm:$0xff]   ;;  %v17231_v28 = vld [vmem:[#allocation10 + $0xec] ss:$52 sps:$4 sm:$0xff]  }
 0xc82   :  { %v11053_v3 = vadd.f32 %v11052_v15, %v11051_v29  ;;  %v11047_v11 = vrot.slane %v11046_v34, 2 }
 0xc84   :  { %v11054_v22 = vrot.slane %v11053_v3, 2  ;;  %v11048_v4 = vadd.f32 %v11047_v11, %v11046_v34  ;;  %v11103_v34 = vrot.slane %v11043_v12, %v17836_v23 }
 0xc86   :  { %v11055_v50 = vadd.f32 %v11054_v22, %v11053_v3  ;;  %v11049_v19 = vrot.slane %v11048_v4, 1 }
 0xc88   :  { %v11056_v41 = vrot.slane %v11055_v50, 1  ;;  %v11050_v20 = vadd.f32 %v11049_v19, %v11048_v4 }
 0xc8a   :  { %v11057_v58 = vadd.f32 %v11056_v41, %v11055_v50  ;;  %v11058_v35 = vmul.f32 0.25, %v11050_v20 }
 0xc8c   :  { %v11059_v54 = vmul.f32 0.25, %v11057_v58  ;;  %v11060_v31 = vsub.f32 %v11034_v52, %v11058_v35 }
 0xc8e   :  { %v11061_v48 = vsub.f32 %v11036_v60, %v11059_v54  ;;  %v11062_v55 = vmul.f32 %v11060_v31, %v11060_v31 }
 0xc90   :  { %v11063_v57 = vmul.f32 %v11061_v48, %v11061_v48  ;;  %v11064_v47 = vsel %vm197_vm0, %v11062_v55, 0.0 }
 0xc91   :  { %v11065_v6 = vrot.slane %v11064_v47, 4 }
 0xc92   :  { %v11071_v25 = vsel %vm197_vm0, %v11063_v57, 0.0 }
 0xc93   :  { %v11072_v36 = vrot.slane %v11071_v25, 4  ;;  %v11066_v43 = vadd.f32 %v11065_v6, %v11064_v47  ;;  %v17196_v47 = vld [vmem:[#allocation10 + $0x2e8] ss:$52 sps:$4 sm:$0xff]  }
 0xc95   :  { %v11073_v37 = vadd.f32 %v11072_v36, %v11071_v25  ;;  %v11067_v9 = vrot.slane %v11066_v43, 2  ;;  %v17199_v25 = vld [vmem:[#allocation10 + $0x2f0] ss:$52 sps:$4 sm:$0xff]  }
 0xc96   :  { %v17204_v36 = vld [vmem:[#allocation10 + $0x284] ss:$52 sps:$4 sm:$0xff]  }
 0xc97   :  { %v11074_v13 = vrot.slane %v11073_v37, 2  ;;  %v11068_v30 = vadd.f32 %v11067_v9, %v11066_v43  ;;  %v17207_v43 = vld [vmem:[#allocation10 + $0x28c] ss:$52 sps:$4 sm:$0xff]   ;;  %v17205_v9 = vld [vmem:[#allocation10 + $0x288] ss:$52 sps:$4 sm:$0xff]  }
 0xc99   :  { %v11075_v56 = vadd.f32 %v11074_v13, %v11073_v37  ;;  %v11069_v27 = vrot.slane %v11068_v30, 1  ;;  %v17202_v37 = vld [vmem:[#allocation10 + $0x280] ss:$52 sps:$4 sm:$0xff]   ;;  %v17210_v13 = vld [vmem:[#allocation10 + $0x21c] ss:$52 sps:$4 sm:$0xff]  }
 0xc9a   :  { %v11477_v59 = vpop.f32.mrf.mxu1 }
 0xc9b   :  { %v11076_v17 = vrot.slane %v11075_v56, 1  ;;  %v11070_v39 = vadd.f32 %v11069_v27, %v11068_v30  ;;  %v11478_v52 = vadd.f32 %v11477_v59, %v18423_v18  ;;  %v11107_v18 = vrot.slane %v11043_v12, %v17844_v26  ;;  %v17213_v30 = vld [vmem:[#allocation10 + $0x224] ss:$52 sps:$4 sm:$0xff]   ;;  %v17211_v27 = vld [vmem:[#allocation10 + $0x220] ss:$52 sps:$4 sm:$0xff]  }
 0xc9c   :  { %v11479_v24 = vpop.f32.mrf.mxu1  ;;  %v17237_v12 = vld [vmem:[#allocation10 + $0x84] ss:$52 sps:$4 sm:$0xff]  }
 0xc9d   :  { %v11077_v42 = vadd.f32 %v11076_v17, %v11075_v56  ;;  %v11078_v1 = vmul.f32 0.25, %v11070_v39  ;;  %v11480_v29 = vadd.f32 %v11479_v24, %v18425_v32  ;;  %v17208_v56 = vld [vmem:[#allocation10 + $0x218] ss:$52 sps:$4 sm:$0xff]   ;;  %v17216_v17 = vld [vmem:[#allocation10 + $0x1b4] ss:$52 sps:$4 sm:$0xff]  }
 0xc9e   :  { %v11481_v14 = vpop.f32.mrf.mxu1  ;;  %v17219_v39 = vld [vmem:[#allocation10 + $0x1bc] ss:$52 sps:$4 sm:$0xff]  }
 0xc9f   :  { %v11079_v51 = vmul.f32 0.25, %v11077_v42  ;;  %v11080_v2 = vadd.f32 1e-05, %v11078_v1  ;;  %v17214_v42 = vld [vmem:[#allocation10 + $0x1b0] ss:$52 sps:$4 sm:$0xff]  }
 0xca0   :  { %v11482_v40 = vpop.f32.mrf.mxu1  ;;  %v17217_v1 = vld [vmem:[#allocation10 + $0x1b8] ss:$52 sps:$4 sm:$0xff]  }
 0xca1   :  { %v11081_v38 = vadd.f32 1e-05, %v11079_v51  ;;  %17468 = vrsqrt.f32 %v11080_v2  ;;  %v17222_v51 = vld [vmem:[#allocation10 + $0x14c] ss:$52 sps:$4 sm:$0xff]   ;;  %v17225_v2 = vld [vmem:[#allocation10 + $0x154] ss:$52 sps:$4 sm:$0xff]  }
 0xca3   :  { %17470 = vrsqrt.f32 %v11081_v38  ;;  %v17220_v38 = vld [vmem:[#allocation10 + $0x148] ss:$52 sps:$4 sm:$0xff]  }
 0xcae   :  { %v17469_v46 = vpop.eup %17468 }
 0xcaf   :  { %v11084_v8 = vmul.f32 %v17469_v46, %v11060_v31  ;;  %v17223_v46 = vld [vmem:[#allocation10 + $0x150] ss:$52 sps:$4 sm:$0xff]  }
 0xcb0   :  { %v17471_v16 = vpop.eup %17470 }
 0xcb1   :  { %v11085_v60 = vmul.f32 %v17471_v16, %v11061_v48  ;;  %v11097_v15 = vmul.f32 %v11090_v49, %v11084_v8  ;;  %v17226_v16 = vld [vmem:[#allocation10 + $0xe0] ss:$52 sps:$4 sm:$0xff]   ;;  %v17229_v8 = vld [vmem:[#allocation10 + $0xe8] ss:$52 sps:$4 sm:$0xff]  }
 0xcb2   :  { %v17234_v49 = vld [vmem:[#allocation10 + $0x7c] ss:$52 sps:$4 sm:$0xff]  }
 0xcb3   :  { %v11098_v4 = vmul.f32 %v11094_v62, %v11085_v60  ;;  %v11110_v20 = vadd.f32 %v11103_v34, %v11097_v15  ;;  %v17240_v60 = vld [vmem:[#allocation10 + $0x14] ss:$52 sps:$4 sm:$0xff]   ;;  %v17243_v62 = vld [vmem:[#allocation10 + $0x1c] ss:$52 sps:$4 sm:$0xff]  }
 0xcb4   :  { %v17244_v15 = vld [vmem:[#allocation10 + $0x628] ss:$52 sps:$4 sm:$0xff]   ;;  %v17247_v34 = vld [vmem:[#allocation10 + $0x630] ss:$52 sps:$4 sm:$0xff]  }
 0xcb5   :  { %v11111_v59 = vadd.f32 %v11107_v18, %v11098_v4  ;;  %v17253_v4 = vld [vmem:[#allocation10 + $0x5c8] ss:$52 sps:$4 sm:$0xff]  }
 0xcb6   :  { %v17258_v18 = vld [vmem:[#allocation10 + $0x55c] ss:$52 sps:$4 sm:$0xff]  }
 0xcda   :  { %v11711_v33 = vpop.f32.mrf.mxu1 }
 0xcdb   :  { %v11718_v53 = vadd.f32 %v11711_v33, %v11478_v52  ;;  %v17232_v52 = vld [vmem:[#allocation10 + $0x78] ss:$52 sps:$4 sm:$0xff]   ;;  %v17238_v33 = vld [vmem:[#allocation10 + $0x10] ss:$52 sps:$4 sm:$0xff]  }
 0xcdc   :  { %v11713_v3 = vpop.f32.mrf.mxu1 }
 0xcdd   :  { %v11733_v11 = vadd.f32 %v11726_v7, %v11718_v53  ;;  %v11719_v22 = vadd.f32 %v11713_v3, %v11480_v29  ;;  %v17235_v7 = vld [vmem:[#allocation10 + $0x80] ss:$52 sps:$4 sm:$0xff]   ;;  %v17241_v29 = vld [vmem:[#allocation10 + $0x18] ss:$52 sps:$4 sm:$0xff]  }
 0xcde   :  { %v11715_v50 = vpop.f32.mrf.mxu1  ;;  %v17246_v53 = vld [vmem:[#allocation10 + $0x62c] ss:$52 sps:$4 sm:$0xff]   ;;  %v17252_v3 = vld [vmem:[#allocation10 + $0x5c4] ss:$52 sps:$4 sm:$0xff]  }
 0xcdf   :  { %vm11735_vm0 = vcmp.ge.f32.partialorder %v11733_v11, 0.0  ;;  %v11737_v19 = vmul.f32 0.2, %v11733_v11  ;;  %v11734_v41 = vadd.f32 %v11730_v10, %v11719_v22  ;;  %v17249_v10 = vld [vmem:[#allocation10 + $0x634] ss:$52 sps:$4 sm:$0xff]  }
 0xce0   :  { %v11716_v58 = vpop.f32.mrf.mxu1  ;;  %v17250_v22 = vld [vmem:[#allocation10 + $0x5c0] ss:$52 sps:$4 sm:$0xff]   ;;  %v17261_v50 = vld [vmem:[#allocation10 + $0x564] ss:$52 sps:$4 sm:$0xff]  }
 0xce1   :  { %v11739_v35 = vsel %vm11735_vm0, %v11733_v11, %v11737_v19  ;;  %vm11736_vm9 = vcmp.ge.f32.partialorder %v11734_v41, 0.0  ;;  %v11738_v32 = vmul.f32 0.2, %v11734_v41  ;;  %v17255_v11 = vld [vmem:[#allocation10 + $0x5cc] ss:$52 sps:$4 sm:$0xff]  }
 0xce2   :  { %v11741_v54 = vadd.f32 %v11739_v35, %v11110_v20  ;;  %v17256_v19 = vld [vmem:[#allocation10 + $0x558] ss:$52 sps:$4 sm:$0xff]   ;;  %v17264_v20 = vld [vmem:[#allocation10 + $0x4f4] ss:$52 sps:$4 sm:$0xff]   ;;  %v17267_v58 = vld [vmem:[#allocation10 + $0x4fc] ss:$52 sps:$4 sm:$0xff]  }
 0xce3   :  { %v11740_v24 = vsel %vm11736_vm9, %v11734_v41, %v11738_v32  ;;  %v17259_v41 = vld [vmem:[#allocation10 + $0x560] ss:$52 sps:$4 sm:$0xff]   ;;  %v17262_v35 = vld [vmem:[#allocation10 + $0x4f0] ss:$52 sps:$4 sm:$0xff]   ;;  %v17265_v32 = vld [vmem:[#allocation10 + $0x4f8] ss:$52 sps:$4 sm:$0xff]  }
 0xce4   :  { %vm11743_vm10 = vcmp.ge.f32.partialorder %v11741_v54, 0.0  ;;  %v11745_v31 = vmul.f32 0.2, %v11741_v54  ;;  %v11742_v14 = vadd.f32 %v11740_v24, %v11111_v59  ;;  %v17270_v59 = vld [vmem:[#allocation10 + $0x48c] ss:$52 sps:$4 sm:$0xff]  }
 0xce5   :  { %v17268_v24 = vld [vmem:[#allocation10 + $0x488] ss:$52 sps:$4 sm:$0xff]  }
 0xce6   :  { %vm11744_vm11 = vcmp.ge.f32.partialorder %v11742_v14, 0.0  ;;  %v11746_v48 = vmul.f32 0.2, %v11742_v14  ;;  %v11747_v40 = vsel %vm11743_vm10, %v11741_v54, %v11745_v31  ;;  %v17273_v54 = vld [vmem:[#allocation10 + $0x494] ss:$52 sps:$4 sm:$0xff]  }
 0xce7   :  { %v18443_v6 = vpack.c.bf16 %v11747_v40, %v11747_v40  ;;  %v17271_v31 = vld [vmem:[#allocation10 + $0x490] ss:$52 sps:$4 sm:$0xff]   ;;  %v17274_v40 = vld [vmem:[#allocation10 + $0x420] ss:$52 sps:$4 sm:$0xff]  }
 0xce8   :  { %v11748_v55 = vsel %vm11744_vm11, %v11742_v14, %v11746_v48  ;;  %v17276_v14 = vld [vmem:[#allocation10 + $0x424] ss:$52 sps:$4 sm:$0xff]   ;;  %v17279_v48 = vld [vmem:[#allocation10 + $0x42c] ss:$52 sps:$4 sm:$0xff]  }
 0xce9   :  { %v18441_v57 = vpack.c.bf16 %v11748_v55, %v11748_v55  ;;  %v17277_v55 = vld [vmem:[#allocation10 + $0x428] ss:$52 sps:$4 sm:$0xff]  }
 0xceb   :  { %13132 = vmatprep.mubr.bf16.mxu0 %v18441_v57  ;;  %13173 = vmatprep.mubr.bf16.mxu1 %v18441_v57 }
 0xcec   :  { %13133 = vmatmul.mubr.bf16.vlgmr.msra.gmra.mxu0 %v18443_v6  ;;  %13174 = vmatmul.mubr.bf16.vlgmr.msra.gmra.mxu1 %v18443_v6 }
 0xced   :  { %13183 = vmatpush1.bf16.msra.mxu0 %v17196_v47  ;;  %13224 = vmatpush1.bf16.msra.mxu1 %v17199_v25  ;;  %v17282_v47 = vld [vmem:[#allocation10 + $0x3bc] ss:$52 sps:$4 sm:$0xff]   ;;  %v17285_v25 = vld [vmem:[#allocation10 + $0x3c4] ss:$52 sps:$4 sm:$0xff]  }
 0xcee   :  { %13214 = vmatprep.mubr.bf16.mxu0 %v18441_v57  ;;  %13255 = vmatprep.mubr.bf16.mxu1 %v18441_v57 }
 0xcef   :  { %13184 = vmatprep.subr.bf16.mxu0 %v17204_v36  ;;  %13225 = vmatprep.subr.bf16.mxu1 %v17207_v43  ;;  %v17280_v36 = vld [vmem:[#allocation10 + $0x3b8] ss:$52 sps:$4 sm:$0xff]   ;;  %v17283_v43 = vld [vmem:[#allocation10 + $0x3c0] ss:$52 sps:$4 sm:$0xff]  }
 0xcf1   :  { %13185 = vmatpush1.bf16.msra.mxu0 %v17202_v37  ;;  %13226 = vmatpush1.bf16.msra.mxu1 %v17205_v9  ;;  %v17288_v37 = vld [vmem:[#allocation10 + $0x354] ss:$52 sps:$4 sm:$0xff]   ;;  %v17291_v9 = vld [vmem:[#allocation10 + $0x35c] ss:$52 sps:$4 sm:$0xff]  }
 0xcf2   :  { %13186 = vmatprep.subr.bf16.mxu0 %v17210_v13  ;;  %13227 = vmatprep.subr.bf16.mxu1 %v17213_v30  ;;  %v17286_v13 = vld [vmem:[#allocation10 + $0x350] ss:$52 sps:$4 sm:$0xff]   ;;  %v17289_v30 = vld [vmem:[#allocation10 + $0x358] ss:$52 sps:$4 sm:$0xff]  }
 0xcf5   :  { %13187 = vmatpush1.bf16.msra.mxu0 %v17208_v56  ;;  %13228 = vmatpush1.bf16.msra.mxu1 %v17211_v27  ;;  %v17294_v56 = vld [vmem:[#allocation10 + $0x2fc] ss:$52 sps:$4 sm:$0xff]   ;;  %v17297_v27 = vld [vmem:[#allocation10 + $0x304] ss:$52 sps:$4 sm:$0xff]  }
 0xcf6   :  { %13188 = vmatprep.subr.bf16.mxu0 %v17216_v17  ;;  %13229 = vmatprep.subr.bf16.mxu1 %v17219_v39  ;;  %v17292_v17 = vld [vmem:[#allocation10 + $0x2f8] ss:$52 sps:$4 sm:$0xff]   ;;  %v17295_v39 = vld [vmem:[#allocation10 + $0x300] ss:$52 sps:$4 sm:$0xff]  }
 0xcf9   :  { %13189 = vmatpush1.bf16.msra.mxu0 %v17214_v42  ;;  %13230 = vmatpush1.bf16.msra.mxu1 %v17217_v1  ;;  %v17300_v42 = vld [vmem:[#allocation10 + $0x294] ss:$52 sps:$4 sm:$0xff]   ;;  %v17303_v1 = vld [vmem:[#allocation10 + $0x29c] ss:$52 sps:$4 sm:$0xff]  }
 0xcfa   :  { %13190 = vmatprep.subr.bf16.mxu0 %v17222_v51  ;;  %13231 = vmatprep.subr.bf16.mxu1 %v17225_v2  ;;  %v17298_v51 = vld [vmem:[#allocation10 + $0x290] ss:$52 sps:$4 sm:$0xff]   ;;  %v17301_v2 = vld [vmem:[#allocation10 + $0x298] ss:$52 sps:$4 sm:$0xff]  }
 0xcfd   :  { %13191 = vmatpush1.bf16.msra.mxu0 %v17220_v38  ;;  %13232 = vmatpush1.bf16.msra.mxu1 %v17223_v46  ;;  %v17306_v38 = vld [vmem:[#allocation10 + $0x22c] ss:$52 sps:$4 sm:$0xff]   ;;  %v17309_v46 = vld [vmem:[#allocation10 + $0x234] ss:$52 sps:$4 sm:$0xff]  }
 0xcfe   :  { %13192 = vmatprep.subr.bf16.mxu0 %v17228_v63  ;;  %13233 = vmatprep.subr.bf16.mxu1 %v17231_v28  ;;  %v17304_v63 = vld [vmem:[#allocation10 + $0x228] ss:$52 sps:$4 sm:$0xff]   ;;  %v17307_v28 = vld [vmem:[#allocation10 + $0x230] ss:$52 sps:$4 sm:$0xff]  }
 0xd01   :  { %13193 = vmatpush1.bf16.msra.mxu0 %v17226_v16  ;;  %13234 = vmatpush1.bf16.msra.mxu1 %v17229_v8  ;;  %v17312_v16 = vld [vmem:[#allocation10 + $0x1c4] ss:$52 sps:$4 sm:$0xff]   ;;  %v17315_v8 = vld [vmem:[#allocation10 + $0x1cc] ss:$52 sps:$4 sm:$0xff]  }
 0xd02   :  { %13194 = vmatprep.subr.bf16.mxu0 %v17234_v49  ;;  %13235 = vmatprep.subr.bf16.mxu1 %v17237_v12  ;;  %v17310_v49 = vld [vmem:[#allocation10 + $0x1c0] ss:$52 sps:$4 sm:$0xff]   ;;  %v17313_v12 = vld [vmem:[#allocation10 + $0x1c8] ss:$52 sps:$4 sm:$0xff]  }
 0xd05   :  { %13195 = vmatpush1.bf16.msra.mxu0 %v17232_v52  ;;  %13236 = vmatpush1.bf16.msra.mxu1 %v17235_v7  ;;  %v17318_v52 = vld [vmem:[#allocation10 + $0x15c] ss:$52 sps:$4 sm:$0xff]   ;;  %v17321_v7 = vld [vmem:[#allocation10 + $0x164] ss:$52 sps:$4 sm:$0xff]  }
 0xd06   :  { %13196 = vmatprep.subr.bf16.mxu0 %v17240_v60  ;;  %13237 = vmatprep.subr.bf16.mxu1 %v17243_v62  ;;  %v17316_v60 = vld [vmem:[#allocation10 + $0x158] ss:$52 sps:$4 sm:$0xff]   ;;  %v17319_v62 = vld [vmem:[#allocation10 + $0x160] ss:$52 sps:$4 sm:$0xff]  }
 0xd09   :  { %13197 = vmatpush1.bf16.msra.mxu0 %v17238_v33  ;;  %13238 = vmatpush1.bf16.msra.mxu1 %v17241_v29  ;;  %v17324_v33 = vld [vmem:[#allocation10 + $0xf4] ss:$52 sps:$4 sm:$0xff]   ;;  %v17327_v29 = vld [vmem:[#allocation10 + $0xfc] ss:$52 sps:$4 sm:$0xff]  }
 0xd0a   :  { %13198 = vmatprep.subr.bf16.mxu0 %v17246_v53  ;;  %13239 = vmatprep.subr.bf16.mxu1 %v17249_v10  ;;  %v17322_v53 = vld [vmem:[#allocation10 + $0xf0] ss:$52 sps:$4 sm:$0xff]   ;;  %v17325_v10 = vld [vmem:[#allocation10 + $0xf8] ss:$52 sps:$4 sm:$0xff]  }
 0xd0d   :  { %13199 = vmatpush2.bf16.msra.mxu0 %v17244_v15  ;;  %13240 = vmatpush2.bf16.msra.mxu1 %v17247_v34  ;;  %v17330_v15 = vld [vmem:[#allocation10 + $0x8c] ss:$52 sps:$4 sm:$0xff]   ;;  %v17333_v34 = vld [vmem:[#allocation10 + $0x94] ss:$52 sps:$4 sm:$0xff]  }
 0xd0e   :  { %13200 = vmatprep.subr.bf16.mxu0 %v17252_v3  ;;  %13241 = vmatprep.subr.bf16.mxu1 %v17255_v11  ;;  %v17328_v3 = vld [vmem:[#allocation10 + $0x88] ss:$52 sps:$4 sm:$0xff]   ;;  %v17331_v11 = vld [vmem:[#allocation10 + $0x90] ss:$52 sps:$4 sm:$0xff]  }
 0xd11   :  { %13201 = vmatpush2.bf16.msra.mxu0 %v17250_v22  ;;  %13242 = vmatpush2.bf16.msra.mxu1 %v17253_v4  ;;  %v17336_v22 = vld [vmem:[#allocation10 + $0x24] ss:$52 sps:$4 sm:$0xff]   ;;  %v17339_v4 = vld [vmem:[#allocation10 + $0x2c] ss:$52 sps:$4 sm:$0xff]  }
 0xd12   :  { %13202 = vmatprep.subr.bf16.mxu0 %v17258_v18  ;;  %13243 = vmatprep.subr.bf16.mxu1 %v17261_v50  ;;  %v17334_v18 = vld [vmem:[#allocation10 + $0x20] ss:$52 sps:$4 sm:$0xff]   ;;  %v17337_v50 = vld [vmem:[#allocation10 + $0x28] ss:$52 sps:$4 sm:$0xff]  }
 0xd15   :  { %13203 = vmatpush2.bf16.msra.mxu0 %v17256_v19  ;;  %13244 = vmatpush2.bf16.msra.mxu1 %v17259_v41  ;;  %v17342_v19 = vld [vmem:[#allocation10 + $0x63c] ss:$52 sps:$4 sm:$0xff]   ;;  %v17345_v41 = vld [vmem:[#allocation10 + $0x644] ss:$52 sps:$4 sm:$0xff]  }
 0xd16   :  { %13204 = vmatprep.subr.bf16.mxu0 %v17264_v20  ;;  %13245 = vmatprep.subr.bf16.mxu1 %v17267_v58  ;;  %v17340_v20 = vld [vmem:[#allocation10 + $0x638] ss:$52 sps:$4 sm:$0xff]   ;;  %v17343_v58 = vld [vmem:[#allocation10 + $0x640] ss:$52 sps:$4 sm:$0xff]  }
 0xd19   :  { %13205 = vmatpush2.bf16.msra.mxu0 %v17262_v35  ;;  %13246 = vmatpush2.bf16.msra.mxu1 %v17265_v32  ;;  %v17348_v35 = vld [vmem:[#allocation10 + $0x5d4] ss:$52 sps:$4 sm:$0xff]   ;;  %v17351_v32 = vld [vmem:[#allocation10 + $0x5dc] ss:$52 sps:$4 sm:$0xff]  }
 0xd1a   :  { %13206 = vmatprep.subr.bf16.mxu0 %v17270_v59  ;;  %13247 = vmatprep.subr.bf16.mxu1 %v17273_v54  ;;  %v17346_v59 = vld [vmem:[#allocation10 + $0x5d0] ss:$52 sps:$4 sm:$0xff]   ;;  %v17349_v54 = vld [vmem:[#allocation10 + $0x5d8] ss:$52 sps:$4 sm:$0xff]  }
 0xd1d   :  { %13207 = vmatpush2.bf16.msra.mxu0 %v17268_v24  ;;  %13248 = vmatpush2.bf16.msra.mxu1 %v17271_v31  ;;  %v17354_v24 = vld [vmem:[#allocation10 + $0x56c] ss:$52 sps:$4 sm:$0xff]   ;;  %v17357_v31 = vld [vmem:[#allocation10 + $0x574] ss:$52 sps:$4 sm:$0xff]  }
 0xd1e   :  { %13208 = vmatprep.subr.bf16.mxu0 %v17276_v14  ;;  %13249 = vmatprep.subr.bf16.mxu1 %v17279_v48  ;;  %v17352_v14 = vld [vmem:[#allocation10 + $0x568] ss:$52 sps:$4 sm:$0xff]   ;;  %v17355_v48 = vld [vmem:[#allocation10 + $0x570] ss:$52 sps:$4 sm:$0xff]  }
 0xd21   :  { %13209 = vmatpush2.bf16.msra.mxu0 %v17274_v40  ;;  %13250 = vmatpush2.bf16.msra.mxu1 %v17277_v55  ;;  %v17360_v40 = vld [vmem:[#allocation10 + $0x504] ss:$52 sps:$4 sm:$0xff]   ;;  %v17363_v55 = vld [vmem:[#allocation10 + $0x50c] ss:$52 sps:$4 sm:$0xff]  }
 0xd22   :  { %13210 = vmatprep.subr.bf16.mxu0 %v17282_v47  ;;  %13251 = vmatprep.subr.bf16.mxu1 %v17285_v25  ;;  %v17358_v47 = vld [vmem:[#allocation10 + $0x500] ss:$52 sps:$4 sm:$0xff]   ;;  %v17361_v25 = vld [vmem:[#allocation10 + $0x508] ss:$52 sps:$4 sm:$0xff]  }
 0xd25   :  { %13211 = vmatpush2.bf16.msra.mxu0 %v17280_v36  ;;  %13252 = vmatpush2.bf16.msra.mxu1 %v17283_v43  ;;  %v17366_v36 = vld [vmem:[#allocation10 + $0x49c] ss:$52 sps:$4 sm:$0xff]   ;;  %v17369_v43 = vld [vmem:[#allocation10 + $0x4a4] ss:$52 sps:$4 sm:$0xff]  }
 0xd26   :  { %13212 = vmatprep.subr.bf16.mxu0 %v17288_v37  ;;  %13253 = vmatprep.subr.bf16.mxu1 %v17291_v9  ;;  %v17364_v37 = vld [vmem:[#allocation10 + $0x498] ss:$52 sps:$4 sm:$0xff]   ;;  %v17367_v9 = vld [vmem:[#allocation10 + $0x4a0] ss:$52 sps:$4 sm:$0xff]  }
 0xd29   :  { %13213 = vmatpush2.bf16.msra.mxu0 %v17286_v13  ;;  %13254 = vmatpush2.bf16.msra.mxu1 %v17289_v30  ;;  %v17372_v13 = vld [vmem:[#allocation10 + $0x434] ss:$52 sps:$4 sm:$0xff]   ;;  %v17375_v30 = vld [vmem:[#allocation10 + $0x43c] ss:$52 sps:$4 sm:$0xff]  }
 0xd2a   :  { %13264 = vmatprep.subr.bf16.mxu0 %v17294_v56  ;;  %13305 = vmatprep.subr.bf16.mxu1 %v17297_v27  ;;  %v17370_v56 = vld [vmem:[#allocation10 + $0x430] ss:$52 sps:$4 sm:$0xff]   ;;  %v17373_v27 = vld [vmem:[#allocation10 + $0x438] ss:$52 sps:$4 sm:$0xff]  }
 0xd2c   :  { %13215 = vmatmul.mubr.bf16.vlgmr.msra.gmra.mxu0 %v18443_v6  ;;  %13256 = vmatmul.mubr.bf16.vlgmr.msra.gmra.mxu1 %v18443_v6 }
 0xd2d   :  { %13265 = vmatpush1.bf16.msra.mxu0 %v17292_v17  ;;  %13296 = vmatprep.mubr.bf16.mxu0 %v18441_v57  ;;  %v17378_v17 = vld [vmem:[#allocation10 + $0x3cc] ss:$52 sps:$4 sm:$0xff]  }
 0xd2e   :  { %13306 = vmatpush1.bf16.msra.mxu1 %v17295_v39  ;;  %13337 = vmatprep.mubr.bf16.mxu1 %v18441_v57  ;;  %v17381_v39 = vld [vmem:[#allocation10 + $0x3d4] ss:$52 sps:$4 sm:$0xff]  }
 0xd2f   :  { %13266 = vmatprep.subr.bf16.mxu0 %v17300_v42  ;;  %13307 = vmatprep.subr.bf16.mxu1 %v17303_v1  ;;  %v17376_v42 = vld [vmem:[#allocation10 + $0x3c8] ss:$52 sps:$4 sm:$0xff]   ;;  %v17379_v1 = vld [vmem:[#allocation10 + $0x3d0] ss:$52 sps:$4 sm:$0xff]  }
 0xd31   :  { %13267 = vmatpush1.bf16.msra.mxu0 %v17298_v51  ;;  %v17384_v51 = vld [vmem:[#allocation10 + $0x364] ss:$52 sps:$4 sm:$0xff]  }
 0xd32   :  { %13308 = vmatpush1.bf16.msra.mxu1 %v17301_v2  ;;  %13268 = vmatprep.subr.bf16.mxu0 %v17306_v38  ;;  %v17387_v2 = vld [vmem:[#allocation10 + $0x36c] ss:$52 sps:$4 sm:$0xff]  }
 0xd33   :  { %13309 = vmatprep.subr.bf16.mxu1 %v17309_v46  ;;  %v17382_v38 = vld [vmem:[#allocation10 + $0x360] ss:$52 sps:$4 sm:$0xff]   ;;  %v17385_v46 = vld [vmem:[#allocation10 + $0x368] ss:$52 sps:$4 sm:$0xff]  }
 0xd35   :  { %13269 = vmatpush1.bf16.msra.mxu0 %v17304_v63  ;;  %v17388_v63 = vld [vmem:[#allocation10 + $0x648] ss:$52 sps:$4 sm:$0xff]  }
 0xd36   :  { %13310 = vmatpush1.bf16.msra.mxu1 %v17307_v28  ;;  %13270 = vmatprep.subr.bf16.mxu0 %v17312_v16  ;;  %v17389_v28 = vld [vmem:[#allocation10 + $0x308] ss:$52 sps:$4 sm:$0xff]   ;;  %v17390_v16 = vld [vmem:[#allocation10 + $0x5e0] ss:$52 sps:$4 sm:$0xff]  }
 0xd37   :  { %13311 = vmatprep.subr.bf16.mxu1 %v17315_v8  ;;  %v17391_v8 = vld [vmem:[#allocation10 + $0x2a0] ss:$52 sps:$4 sm:$0xff]  }
 0xd39   :  { %13271 = vmatpush1.bf16.msra.mxu0 %v17310_v49  ;;  %v17392_v49 = vld [vmem:[#allocation10 + $0x578] ss:$52 sps:$4 sm:$0xff]  }
 0xd3a   :  { %13312 = vmatpush1.bf16.msra.mxu1 %v17313_v12  ;;  %13272 = vmatprep.subr.bf16.mxu0 %v17318_v52  ;;  %v17393_v12 = vld [vmem:[#allocation10 + $0x238] ss:$52 sps:$4 sm:$0xff]   ;;  %v17394_v52 = vld [vmem:[#allocation10 + $0x510] ss:$52 sps:$4 sm:$0xff]  }
 0xd3b   :  { %13313 = vmatprep.subr.bf16.mxu1 %v17321_v7  ;;  %v17395_v7 = vld [vmem:[#allocation10 + $0x1d0] ss:$52 sps:$4 sm:$0xff]  }
 0xd3d   :  { %13273 = vmatpush1.bf16.msra.mxu0 %v17316_v60  ;;  %v17396_v60 = vld [vmem:[#allocation10 + $0x4a8] ss:$52 sps:$4 sm:$0xff]  }
 0xd3e   :  { %13314 = vmatpush1.bf16.msra.mxu1 %v17319_v62  ;;  %13274 = vmatprep.subr.bf16.mxu0 %v17324_v33  ;;  %v17397_v62 = vld [vmem:[#allocation10 + $0x168] ss:$52 sps:$4 sm:$0xff]   ;;  %v17398_v33 = vld [vmem:[#allocation10 + $0x440] ss:$52 sps:$4 sm:$0xff]  }
 0xd3f   :  { %13315 = vmatprep.subr.bf16.mxu1 %v17327_v29  ;;  %v17399_v29 = vld [vmem:[#allocation10 + $0x100] ss:$52 sps:$4 sm:$0xff]  }
 0xd41   :  { %13275 = vmatpush1.bf16.msra.mxu0 %v17322_v53  ;;  %v17400_v53 = vld [vmem:[#allocation10 + $0x3d8] ss:$52 sps:$4 sm:$0xff]  }
 0xd42   :  { %13316 = vmatpush1.bf16.msra.mxu1 %v17325_v10  ;;  %13276 = vmatprep.subr.bf16.mxu0 %v17330_v15  ;;  %v17402_v10 = vld [vmem:[#allocation10 + $0x370] ss:$52 sps:$4 sm:$0xff]  }
 0xd43   :  { %13317 = vmatprep.subr.bf16.mxu1 %v17333_v34  ;;  %v17403_v15 = vld [vmem:[#allocation10 + $0x30] ss:$52 sps:$4 sm:$0xff]   ;;  %v11975_v34 = vld [vmem:[#allocation15] sm:$0xff] }
 0xd45   :  { %13277 = vmatpush1.bf16.msra.mxu0 %v17328_v3  ;;  %v11982_v3 = vrot.slane %v11975_v34, %v17836_v23 }
 0xd46   :  { %13318 = vmatpush1.bf16.msra.mxu1 %v17331_v11  ;;  %13278 = vmatprep.subr.bf16.mxu0 %v17336_v22  ;;  %v11990_v11 = vrot.slane %v11975_v34, %v17861_v44  ;;  %v11986_v22 = vrot.slane %v11975_v34, %v17844_v26 }
 0xd47   :  { %13319 = vmatprep.subr.bf16.mxu1 %v17339_v4  ;;  %v11994_v4 = vrot.slane %v11975_v34, %v17864_v45 }
 0xd49   :  { %13279 = vmatpush1.bf16.msra.mxu0 %v17334_v18 }
 0xd4a   :  { %13320 = vmatpush1.bf16.msra.mxu1 %v17337_v50  ;;  %13280 = vmatprep.subr.bf16.mxu0 %v17342_v19 }
 0xd4b   :  { %13321 = vmatprep.subr.bf16.mxu1 %v17345_v41 }
 0xd4d   :  { %13281 = vmatpush2.bf16.msra.mxu0 %v17340_v20 }
 0xd4e   :  { %13322 = vmatpush2.bf16.msra.mxu1 %v17343_v58  ;;  %13282 = vmatprep.subr.bf16.mxu0 %v17348_v35 }
 0xd4f   :  { %13323 = vmatprep.subr.bf16.mxu1 %v17351_v32 }
 0xd51   :  { %13283 = vmatpush2.bf16.msra.mxu0 %v17346_v59 }
 0xd52   :  { %13324 = vmatpush2.bf16.msra.mxu1 %v17349_v54  ;;  %13284 = vmatprep.subr.bf16.mxu0 %v17354_v24 }
 0xd53   :  { %13325 = vmatprep.subr.bf16.mxu1 %v17357_v31 }
 0xd55   :  { %13285 = vmatpush2.bf16.msra.mxu0 %v17352_v14 }
 0xd56   :  { %13326 = vmatpush2.bf16.msra.mxu1 %v17355_v48  ;;  %13286 = vmatprep.subr.bf16.mxu0 %v17360_v40  ;;  %v11998_v48 = vrot.slane %v11975_v34, %v17916_v61  ;;  %v12006_v40 = vrot.slane %v11975_v34, %v17932_v5 }
 0xd57   :  { %13327 = vmatprep.subr.bf16.mxu1 %v17363_v55  ;;  %v12002_v55 = vrot.slane %v11975_v34, %v17924_v0  ;;  %v11976_v0 = vld [vmem:[#allocation15 + $0x8] sm:$0x1f] }
 0xd58   :  { %v12014_v5 = vrot.slane %v11976_v0, %v17836_v23 }
 0xd59   :  { %13287 = vmatpush2.bf16.msra.mxu0 %v17358_v47  ;;  %v12010_v47 = vrot.slane %v11975_v34, %v17940_v21  ;;  %v12018_v21 = vrot.slane %v11976_v0, %v17844_v26 }
 0xd5a   :  { %13328 = vmatpush2.bf16.msra.mxu1 %v17361_v25  ;;  %13288 = vmatprep.subr.bf16.mxu0 %v17366_v36 }
 0xd5b   :  { %13329 = vmatprep.subr.bf16.mxu1 %v17369_v43 }
 0xd5d   :  { %13289 = vmatpush2.bf16.msra.mxu0 %v17364_v37 }
 0xd5e   :  { %13330 = vmatpush2.bf16.msra.mxu1 %v17367_v9  ;;  %13290 = vmatprep.subr.bf16.mxu0 %v17372_v13 }
 0xd5f   :  { %13331 = vmatprep.subr.bf16.mxu1 %v17375_v30 }
 0xd61   :  { %13291 = vmatpush2.bf16.msra.mxu0 %v17370_v56 }
 0xd62   :  { %13332 = vmatpush2.bf16.msra.mxu1 %v17373_v27  ;;  %13292 = vmatprep.subr.bf16.mxu0 %v17378_v17 }
 0xd63   :  { %13333 = vmatprep.subr.bf16.mxu1 %v17381_v39 }
 0xd65   :  { %13293 = vmatpush2.bf16.msra.mxu0 %v17376_v42 }
 0xd66   :  { %13334 = vmatpush2.bf16.msra.mxu1 %v17379_v1  ;;  %13294 = vmatprep.subr.bf16.mxu0 %v17384_v51 }
 0xd67   :  { %13335 = vmatprep.subr.bf16.mxu1 %v17387_v2 }
 0xd69   :  { %13295 = vmatpush2.bf16.msra.mxu0 %v17382_v38  ;;  %v12022_v38 = vrot.slane %v11976_v0, %v17861_v44  ;;  %v12030_v44 = vrot.slane %v11976_v0, %v17916_v61 }
 0xd6a   :  { %13336 = vmatpush2.bf16.msra.mxu1 %v17385_v46  ;;  %15020 = vmatprep.subr.bf16.mxu0 %v17388_v63  ;;  %v12026_v46 = vrot.slane %v11976_v0, %v17864_v45 }
 0xd6c   :  { %13297 = vmatmul.mubr.bf16.vlgmr.msra.gmra.mxu0 %v18443_v6 }
 0xd6d   :  { %13338 = vmatmul.mubr.bf16.vlgmr.msra.gmra.mxu1 %v18443_v6  ;;  %15021 = vmatpush3.bf16.msra.mxu0 %v17389_v28 }
 0xd6e   :  { %13378 = vmatprep.mubr.bf16.mxu0 %v18441_v57  ;;  %15022 = vmatprep.subr.bf16.mxu0 %v17390_v16  ;;  %v17401_v57 = vld [vmem:[#allocation10 + $0x98] ss:$52 sps:$4 sm:$0xff]  }
 0xd71   :  { %15023 = vmatpush3.bf16.msra.mxu0 %v17391_v8 }
 0xd72   :  { %15024 = vmatprep.subr.bf16.mxu0 %v17392_v49 }
 0xd75   :  { %15025 = vmatpush3.bf16.msra.mxu0 %v17393_v12 }
 0xd76   :  { %15026 = vmatprep.subr.bf16.mxu0 %v17394_v52 }
 0xd79   :  { %15027 = vmatpush3.bf16.msra.mxu0 %v17395_v7 }
 0xd7a   :  { %15028 = vmatprep.subr.bf16.mxu0 %v17396_v60 }
 0xd7d   :  { %15029 = vmatpush3.bf16.msra.mxu0 %v17397_v62 }
 0xd7e   :  { %15030 = vmatprep.subr.bf16.mxu0 %v17398_v33 }
 0xd81   :  { %15031 = vmatpush3.bf16.msra.mxu0 %v17399_v29 }
 0xd82   :  { %15032 = vmatprep.subr.bf16.mxu0 %v17400_v53 }
 0xd85   :  { %15033 = vmatpush3.bf16.msra.mxu0 %v17401_v57 }
 0xd86   :  { %15034 = vmatprep.subr.bf16.mxu0 %v17402_v10 }
 0xd89   :  { %15035 = vmatpush3.bf16.msra.mxu0 %v17403_v15 }
 0xd8c   :  { %13379 = vmatmul.mubr.bf16.vlgmr.msra.gmra.mxu0 %v18443_v6 }
 0xdac   :  { %v13134_v18 = vpop.f32.mrf.mxu0  ;;  %v13175_v50 = vpop.f32.mrf.mxu1 }
 0xdad   :  { %v13135_v20 = vadd.f32 %v13134_v18, %v11982_v3  ;;  %v13176_v58 = vadd.f32 %v13175_v50, %v11990_v11 }
 0xdae   :  { %v13136_v19 = vpop.f32.mrf.mxu0  ;;  %v13177_v41 = vpop.f32.mrf.mxu1 }
 0xdaf   :  { %v13137_v35 = vadd.f32 %v13136_v19, %v11986_v22  ;;  %v13178_v32 = vadd.f32 %v13177_v41, %v11994_v4 }
 0xdb0   :  { %v13138_v59 = vpop.f32.mrf.mxu0  ;;  %v13179_v54 = vpop.f32.mrf.mxu1 }
 0xdb1   :  { %v13398_v6 = vcombine.low %v13135_v20, %v13137_v35  ;;  %v13399_v24 = vcombine.low %v13176_v58, %v13178_v32 }
 0xdb2   :  { %v13139_v31 = vpop.f32.mrf.mxu0  ;;  %v13180_v14 = vpop.f32.mrf.mxu1 }
 0xdb3   :  { %13410 = vst [vmem:[%s18506_s13] sm:$0xff] %v13398_v6  ;;  %13411 = vst [vmem:[%s18506_s13 + $0x8] sm:$0xff] %v13399_v24 }
 0xdec   :  { %v13216_v25 = vpop.f32.mrf.mxu0  ;;  %v13257_v36 = vpop.f32.mrf.mxu1 }
 0xded   :  { %v13217_v9 = vadd.f32 %v13216_v25, %v11998_v48  ;;  %v13258_v13 = vadd.f32 %v13257_v36, %v12006_v40 }
 0xdee   :  { %v13218_v43 = vpop.f32.mrf.mxu0  ;;  %v13259_v37 = vpop.f32.mrf.mxu1 }
 0xdef   :  { %v13219_v30 = vadd.f32 %v13218_v43, %v12002_v55  ;;  %v13260_v56 = vadd.f32 %v13259_v37, %v12010_v47 }
 0xdf0   :  { %v13220_v27 = vpop.f32.mrf.mxu0  ;;  %v13261_v17 = vpop.f32.mrf.mxu1 }
 0xdf1   :  { %v13400_v39 = vcombine.low %v13217_v9, %v13219_v30  ;;  %v13401_v42 = vcombine.low %v13258_v13, %v13260_v56 }
 0xdf2   :  { %v13221_v1 = vpop.f32.mrf.mxu0  ;;  %v13262_v51 = vpop.f32.mrf.mxu1 }
 0xdf3   :  { %13412 = vst [vmem:[%s18506_s13 + $0x10] sm:$0xff] %v13400_v39  ;;  %13413 = vst [vmem:[%s18506_s13 + $0x18] sm:$0xff] %v13401_v42 }
 0xe2c   :  { %v13298_v2 = vpop.f32.mrf.mxu0 }
 0xe2d   :  { %v13339_v63 = vpop.f32.mrf.mxu1  ;;  %v13299_v16 = vadd.f32 %v13298_v2, %v12014_v5 }
 0xe2e   :  { %v13300_v28 = vpop.f32.mrf.mxu0  ;;  %v13340_v12 = vadd.f32 %v13339_v63, %v12022_v38 }
 0xe2f   :  { %v13301_v8 = vadd.f32 %v13300_v28, %v12018_v21  ;;  %v13341_v49 = vpop.f32.mrf.mxu1 }
 0xe30   :  { %v13342_v52 = vadd.f32 %v13341_v49, %v12026_v46  ;;  %v13302_v7 = vpop.f32.mrf.mxu0 }
 0xe31   :  { %v13402_v60 = vcombine.low %v13299_v16, %v13301_v8  ;;  %v13343_v62 = vpop.f32.mrf.mxu1 }
 0xe32   :  { %v13403_v33 = vcombine.low %v13340_v12, %v13342_v52  ;;  %v13303_v29 = vpop.f32.mrf.mxu0 }
 0xe33   :  { %13414 = vst [vmem:[%s18506_s13 + $0x20] sm:$0xff] %v13402_v60  ;;  %v13344_v23 = vpop.f32.mrf.mxu1 }
 0xe34   :  { %13415 = vst [vmem:[%s18506_s13 + $0x28] sm:$0xff] %v13403_v33 }
 0xe4c   :  { %v15036_v26 = vpop.f32.mrf.mxu0 }
 0xe4e   :  { %v15037_v45 = vpop.f32.mrf.mxu0 }
 0xe4f   :  { %v15038_v53 = vadd.f32 %v15037_v45, %v15036_v26 }
 0xe50   :  { %v15039_v57 = vpop.f32.mrf.mxu0 }
 0xe51   :  { %v13381_v10 = vadd.f32 %v15038_v53, %v12030_v44 }
 0xe52   :  { %v15040_v15 = vpop.f32.mrf.mxu0 }
 0xe53   :  { %13416 = vst [vmem:[%s18506_s13 + $0x30] sm:$0xf] %v13381_v10 }
 0xe54   :  { %13425 = vsyncpa [#allocation3], 1 }
 0xe55   :  { %13426 = vsyncpa [#allocation5], 1 }
 0xe56   :  { %13427 = vsyncpa [#allocation8], 1 }
 0xe57   :  { %13428 = vsyncpa [#allocation11], 1 }
 0xe58   :  { %13429 = vsyncpa [#allocation14], 1 }

</bundles_post_ra>
